<compile_context>
chip_gen: v7x
topology: tpu7x:2x2x1
jax: 0.10.0
libtpu: 0.0.40
codegen_flags: <defaults>
</compile_context>

<pallas_src>
import functools

import jax
import jax.numpy as jnp
from jax.experimental import pallas as pl
from jax.experimental.pallas import tpu as pltpu

# ---- module hyper-parameters (globals `nc`, `ndf`, `n_class` in the source) ----
NC = 3
NDF = 4          # small for the demo; architecture identical to the module
N_CLASS = 5
LRELU_SLOPE = 0.2
BN_EPS = 1e-5
NOISE_SIGMA = 0.1

VMEM_LIMIT = 32 * 1024 * 1024       # scoped-VMEM request (fits v5e/v6e/v7x)
ACT_TILE_BYTES = 2 * 1024 * 1024    # per-buffer activation budget for conv tiles (bf16)
NOISE_TILE_BYTES = 4 * 1024 * 1024  # per-step budget for the noise kernel (~8 B/elem)


def _round_up(x, m):
    return (x + m - 1) // m * m


# --------------------------- GaussianNoise kernel ------------------------------
def _gaussian_noise_kernel(x_ref, z_ref, o_ref, *, sigma):
    # y = x + sigma * x.detach() * N(0,1); f32 math, store in o_ref.dtype (bf16 in the
    # training path so no separate convert pass is needed afterwards).
    x = x_ref[...].astype(jnp.float32)
    z = z_ref[...].astype(jnp.float32)
    o_ref[...] = (x + sigma * x * z).astype(o_ref.dtype)


def _noise_plan(total):
    """Find (rows, cols, row_tile): rows*cols == total, cols lane-dense, zero padding."""
    for cols in (1024, 512, 256, 128):
        if total % cols == 0:
            rows = total // cols
            if rows % 8 == 0:
                cap = max(8, (NOISE_TILE_BYTES // (8 * cols)) // 8 * 8)
                tr = 8
                for cand in range(8, min(rows, cap) + 1, 8):
                    if rows % cand == 0 and rows // cand >= 2:
                        tr = cand                      # biggest divisor, >=2 grid steps
                if rows // tr < 2 and rows <= cap:
                    tr = rows                          # tiny tensor: single step
                return rows, cols, tr
    return None


def _noise_pallas(x2, z2, tr, sigma, out_dtype):
    rows, cols = x2.shape
    cost = pl.CostEstimate(
        flops=3 * rows * cols, transcendentals=0,
        bytes_accessed=int(rows * cols * (4 + 2 + jnp.dtype(out_dtype).itemsize)))
    return pl.pallas_call(
        functools.partial(_gaussian_noise_kernel, sigma=float(sigma)),
        out_shape=jax.ShapeDtypeStruct((rows, cols), out_dtype),
        grid_spec=pltpu.PrefetchScalarGridSpec(
            num_scalar_prefetch=0,
            grid=(rows // tr,),
            in_specs=[pl.BlockSpec((tr, cols), lambda i: (i, 0)),
                      pl.BlockSpec((tr, cols), lambda i: (i, 0))],
            out_specs=pl.BlockSpec((tr, cols), lambda i: (i, 0)),
        ),
        compiler_params=pltpu.CompilerParams(
            dimension_semantics=("parallel",), vmem_limit_bytes=VMEM_LIMIT),
        cost_estimate=cost,
    )(x2, z2)


def gaussian_noise(x, seed, sigma=NOISE_SIGMA, out_dtype=None):
    """GaussianNoise module, training mode: y = x + sigma * x.detach() * N(0,1)."""
    out_dtype = x.dtype if out_dtype is None else out_dtype
    if sigma == 0.0:
        return x.astype(out_dtype)
    orig_shape = x.shape
    total = x.size
    key = jax.random.PRNGKey(seed)
    plan = _noise_plan(total)
    if plan is not None:
        rows, cols, tr = plan
        x2 = x.reshape(rows, cols).astype(jnp.float32)
        z2 = jax.random.normal(key, (rows, cols), dtype=jnp.bfloat16)   # N(0,1), bf16 read
        out = _noise_pallas(x2, z2, tr, sigma, out_dtype)
        return out.reshape(orig_shape)
    # Fallback for shapes that do not factor into a lane-dense 2-D tile: pad + slice.
    cols = 512
    rows = -(-total // cols)
    tr = min(_round_up(rows, 8), 256)
    rows_p = _round_up(rows, tr)
    flat = jnp.pad(x.reshape(-1).astype(jnp.float32), (0, rows_p * cols - total))
    z2 = jax.random.normal(key, (rows_p, cols), dtype=jnp.bfloat16)
    out = _noise_pallas(flat.reshape(rows_p, cols), z2, tr, sigma, out_dtype)
    return out.reshape(-1)[:total].reshape(orig_shape)


# ------------------------ fused conv matmul (feature-major) --------------------
def _conv_matmul_kernel(w_ref, x_ref, scale_ref, bias_ref, o_ref, *, slope):
    # (cout, K) @ (K, TM): the big flattened N*H*W axis sits on lanes -> unmasked,
    # lane-dense stores even though cout is only 4..64.
    acc = jnp.dot(w_ref[...], x_ref[...], preferred_element_type=jnp.float32)
    acc = acc * scale_ref[...] + bias_ref[...]        # folded BN affine, f32
    acc = jnp.where(acc >= 0, acc, slope * acc)       # LeakyReLU, f32
    o_ref[...] = acc.astype(o_ref.dtype)


def _choose_m_tiles(M, K):
    """VMEM-budget-aware M tiling: whole layer in 1-2 grid steps whenever possible."""
    Mr = _round_up(M, 128)
    if Mr <= 512:
        return Mr, 1                                   # tiny layer: single step
    cap = max(128, (ACT_TILE_BYTES // (2 * K)) // 128 * 128)   # bf16 activation budget
    tm = min(_round_up(-(-M // 2), 128), cap)          # >=2 tiles -> both v7x TCs busy
    return tm, -(-M // tm)


def conv_matmul(w_mat, patches, scale, bias, *, slope=LRELU_SLOPE,
                out_dtype=jnp.bfloat16):
    """out = leaky_relu((w_mat @ patches) * scale + bias);  w:(cout,K) bf16, patches:(K,M)."""
    cout, K = w_mat.shape
    _, M = patches.shape
    tm, ntiles = _choose_m_tiles(M, K)
    Mp = tm * ntiles
    p = patches.astype(jnp.bfloat16)
    if Mp != M:
        p = jnp.pad(p, ((0, 0), (0, Mp - M)))
    cost = pl.CostEstimate(
        flops=2 * cout * K * Mp, transcendentals=0,
        bytes_accessed=int((w_mat.size + p.size) * 2 + (scale.size + bias.size) * 4
                           + cout * Mp * jnp.dtype(out_dtype).itemsize))
    out = pl.pallas_call(
        functools.partial(_conv_matmul_kernel, slope=slope),
        out_shape=jax.ShapeDtypeStruct((cout, Mp), out_dtype),
        grid_spec=pltpu.PrefetchScalarGridSpec(
            num_scalar_prefetch=0,
            grid=(ntiles,),
            in_specs=[
                pl.BlockSpec((cout, K), lambda i: (0, 0)),   # resident weight (bf16)
                pl.BlockSpec((K, tm), lambda i: (0, i)),     # activation tile (bf16)
                pl.BlockSpec((cout, 1), lambda i: (0, 0)),   # folded BN scale (f32)
                pl.BlockSpec((cout, 1), lambda i: (0, 0)),   # folded BN shift (f32)
            ],
            out_specs=pl.BlockSpec((cout, tm), lambda i: (0, i)),
        ),
        compiler_params=pltpu.CompilerParams(
            dimension_semantics=("parallel",), vmem_limit_bytes=VMEM_LIMIT),
        cost_estimate=cost,
    )(w_mat, p, scale, bias)
    return out if Mp == M else out[:, :M]


# --------------------- fused heads: disc + cls1 + cls2 + cls3 ------------------
def _heads_kernel(x_ref, w1_ref, b1_ref, s1_ref, w2_ref, b2_ref, w3_ref, b3_ref,
                  d_ref, c_ref, *, cls_cols, slope):
    # All three bf16 weight matrices (~2.3 MB) are resident in VMEM; intermediates
    # never leave the kernel.  Head1 = [cls1 | disc | pad] with per-column LeakyReLU
    # slope (slope=1.0 == identity for the discriminate column).
    h1 = jnp.dot(x_ref[...], w1_ref[...], preferred_element_type=jnp.float32)
    h1 = h1 + b1_ref[...]
    h1 = jnp.where(h1 >= 0, h1, s1_ref[...] * h1)
    d_ref[...] = h1[:, cls_cols:].astype(d_ref.dtype)          # discriminate (+ padding)
    h2 = jnp.dot(h1[:, :cls_cols].astype(jnp.bfloat16), w2_ref[...],
                 preferred_element_type=jnp.float32) + b2_ref[...]
    h2 = jnp.where(h2 >= 0, h2, slope * h2)
    h3 = jnp.dot(h2.astype(jnp.bfloat16), w3_ref[...],
                 preferred_element_type=jnp.float32) + b3_ref[...]
    c_ref[...] = h3.astype(c_ref.dtype)


def fused_heads(feat, prep):
    N, F = feat.shape
    Mp = max(8, _round_up(N, 8))
    xp = jnp.pad(feat.astype(jnp.bfloat16), ((0, Mp - N), (0, 0)))
    w1, b1, s1 = prep['head1_w'], prep['head1_b'], prep['head1_s']
    w2, b2 = prep['head2_w'], prep['head2_b']
    w3, b3 = prep['head3_w'], prep['head3_b']
    n1, n2, n3 = w1.shape[1], w2.shape[1], w3.shape[1]
    cls_cols = w2.shape[0]                                     # 1024
    cost = pl.CostEstimate(
        flops=2 * Mp * (F * n1 + cls_cols * n2 + n2 * n3), transcendentals=0,
        bytes_accessed=int(2 * (xp.size + w1.size + w2.size + w3.size)
                           + 4 * (b1.size + s1.size + b2.size + b3.size)
                           + 4 * Mp * (n1 - cls_cols + n3)))
    d, c = pl.pallas_call(
        functools.partial(_heads_kernel, cls_cols=cls_cols, slope=LRELU_SLOPE),
        out_shape=(jax.ShapeDtypeStruct((Mp, n1 - cls_cols), jnp.float32),
                   jax.ShapeDtypeStruct((Mp, n3), jnp.float32)),
        grid_spec=pltpu.PrefetchScalarGridSpec(
            num_scalar_prefetch=0,
            grid=(1,),
            in_specs=[
                pl.BlockSpec((Mp, F), lambda i: (0, 0)),
                pl.BlockSpec(w1.shape, lambda i: (0, 0)),
                pl.BlockSpec(b1.shape, lambda i: (0, 0)),
                pl.BlockSpec(s1.shape, lambda i: (0, 0)),
                pl.BlockSpec(w2.shape, lambda i: (0, 0)),
                pl.BlockSpec(b2.shape, lambda i: (0, 0)),
                pl.BlockSpec(w3.shape, lambda i: (0, 0)),
                pl.BlockSpec(b3.shape, lambda i: (0, 0)),
            ],
            out_specs=[pl.BlockSpec((Mp, n1 - cls_cols), lambda i: (0, 0)),
                       pl.BlockSpec((Mp, n3), lambda i: (0, 0))],
        ),
        compiler_params=pltpu.CompilerParams(
            dimension_semantics=("arbitrary",), vmem_limit_bytes=VMEM_LIMIT),
        cost_estimate=cost,
    )(xp, w1, b1, s1, w2, b2, w3, b3)
    return d[:N], c[:N]


# ------------------------------- JAX glue --------------------------------------
def extract_patches_cm(x, k=4, s=2, p=1):
    """x: (C, N, H, W) -> im2col patches (k*k*C, N*Ho*Wo); feature order ((kh,kw),cin)."""
    C, N, H, W = x.shape
    xp = jnp.pad(x, ((0, 0), (0, 0), (p, p), (p, p)))
    Ho = (H + 2 * p - k) // s + 1
    Wo = (W + 2 * p - k) // s + 1
    taps = []
    for i in range(k):
        for j in range(k):
            taps.append(xp[:, :, i:i + s * Ho:s, j:j + s * Wo:s])
    pat = jnp.concatenate(taps, axis=0)               # (k*k*C, N, Ho, Wo)
    return pat.reshape(k * k * C, N * Ho * Wo), Ho, Wo


def conv_block(x_cnhw, w_mat, scale, bias, k=4):
    """Conv2d(k=4,s=2,p=1,bias=False) [+ folded BN] + LeakyReLU(0.2), feature-major."""
    _, N0, _, _ = x_cnhw.shape
    cout, _ = w_mat.shape
    patches, ho, wo = extract_patches_cm(x_cnhw, k=k, s=2, p=1)
    y = conv_matmul(w_mat, patches, scale, bias)      # (cout, N*Ho*Wo)
    return y.reshape(cout, N0, ho, wo)


def bn_fold(gamma, beta, mean, var):
    s = gamma / jnp.sqrt(var + BN_EPS)                # f32 fold (accuracy)
    return s, beta - mean * s


def init_params(key):
    p = {}
    chans = [NC, NDF, NDF * 2, NDF * 4, NDF * 8, NDF * 16, NDF * 16]
    keys = jax.random.split(key, 32)
    ki = 0
    for li in range(1, 7):
        cin, cout = chans[li - 1], chans[li]
        p[f'conv{li}_w'] = 0.02 * jax.random.normal(keys[ki], (cout, cin, 4, 4), jnp.float32); ki += 1
        if li >= 2:  # conv1 has no BatchNorm
            p[f'bn{li}_gamma'] = 1.0 + 0.02 * jax.random.normal(keys[ki], (cout,), jnp.float32); ki += 1
            p[f'bn{li}_beta'] = 0.02 * jax.random.normal(keys[ki], (cout,), jnp.float32); ki += 1
            p[f'bn{li}_mean'] = 0.01 * jax.random.normal(keys[ki], (cout,), jnp.float32); ki += 1
            p[f'bn{li}_var'] = 1.0 + 0.1 * jnp.abs(jax.random.normal(keys[ki], (cout,), jnp.float32)); ki += 1
    feat = NDF * 16 * 4 * 2
    p['disc_w'] = 0.02 * jax.random.normal(keys[ki], (1, feat), jnp.float32); ki += 1
    p['disc_b'] = jnp.zeros((1,), jnp.float32)
    p['cls1_w'] = 0.02 * jax.random.normal(keys[ki], (1024, feat), jnp.float32); ki += 1
    p['cls1_b'] = 0.01 * jax.random.normal(keys[ki], (1024,), jnp.float32); ki += 1
    p['cls2_w'] = 0.02 * jax.random.normal(keys[ki], (512, 1024), jnp.float32); ki += 1
    p['cls2_b'] = 0.01 * jax.random.normal(keys[ki], (512,), jnp.float32); ki += 1
    p['cls3_w'] = 0.02 * jax.random.normal(keys[ki], (N_CLASS, 512), jnp.float32); ki += 1
    p['cls3_b'] = 0.01 * jax.random.normal(keys[ki], (N_CLASS,), jnp.float32); ki += 1
    return p


def prepare_params(params):
    """One-time weight preprocessing (transpose / fold / pad / bf16), hoisted out of jit."""
    prep = {}
    for li in range(1, 7):
        w = params[f'conv{li}_w']
        cout, cin, k, _ = w.shape
        # weight feature order ((kh,kw),cin) to match extract_patches_cm
        prep[f'conv{li}_wmat'] = (jnp.transpose(w, (0, 2, 3, 1))
                                  .reshape(cout, k * k * cin).astype(jnp.bfloat16))
        if li == 1:                                   # conv1: no BatchNorm
            s = jnp.ones((cout,), jnp.float32)
            b = jnp.zeros((cout,), jnp.float32)
        else:
            s, b = bn_fold(params[f'bn{li}_gamma'], params[f'bn{li}_beta'],
                           params[f'bn{li}_mean'], params[f'bn{li}_var'])
        prep[f'conv{li}_scale'] = s.reshape(cout, 1).astype(jnp.float32)
        prep[f'conv{li}_bias'] = b.reshape(cout, 1).astype(jnp.float32)

    # Fused head1 = [cls1 (LeakyReLU) | discriminate (identity) | pad to 128-multiple]
    n_cls1 = params['cls1_w'].shape[0]
    w1 = jnp.concatenate([params['cls1_w'].T, params['disc_w'].T], axis=1)
    b1 = jnp.concatenate([params['cls1_b'], params['disc_b']])
    s1 = jnp.concatenate([jnp.full((n_cls1,), LRELU_SLOPE, jnp.float32),
                          jnp.ones((1,), jnp.float32)])
    n1 = _round_up(w1.shape[1], 128)
    pad = n1 - w1.shape[1]
    prep['head1_w'] = jnp.pad(w1, ((0, 0), (0, pad))).astype(jnp.bfloat16)
    prep['head1_b'] = jnp.pad(b1, (0, pad)).reshape(1, n1).astype(jnp.float32)
    prep['head1_s'] = jnp.pad(s1, (0, pad), constant_values=1.0).reshape(1, n1).astype(jnp.float32)
    prep['head2_w'] = params['cls2_w'].T.astype(jnp.bfloat16)
    prep['head2_b'] = params['cls2_b'].reshape(1, -1).astype(jnp.float32)
    n3 = _round_up(N_CLASS, 128)
    prep['head3_w'] = jnp.pad(params['cls3_w'].T, ((0, 0), (0, n3 - N_CLASS))).astype(jnp.bfloat16)
    prep['head3_b'] = jnp.pad(params['cls3_b'], (0, n3 - N_CLASS)).reshape(1, n3).astype(jnp.float32)
    return prep


def discriminator_forward(x_nchw, prep, *, training=False, noise_seed=0):
    x = x_nchw.astype(jnp.float32)
    if training:
        # GaussianNoise module (spec): fused Pallas kernel, writes bf16 directly.
        x = gaussian_noise(x, noise_seed, sigma=NOISE_SIGMA, out_dtype=jnp.bfloat16)
    else:
        x = x.astype(jnp.bfloat16)
    # TODO(synk): training-mode Dropout after conv1 is not modeled (eval identity).
    x = jnp.transpose(x, (1, 0, 2, 3))                # NCHW -> channels-major (C,N,H,W)
    for li in range(1, 7):                            # conv1 (no BN), conv2..conv6 + BN
        x = conv_block(x, prep[f'conv{li}_wmat'],
                       prep[f'conv{li}_scale'], prep[f'conv{li}_bias'])
    C, N, H, W = x.shape
    feat = jnp.transpose(x, (1, 0, 2, 3)).reshape(N, C * H * W)   # nn.Flatten (NCHW order)
    d, c = fused_heads(feat, prep)
    return d[:, :1], c[:, :N_CLASS]


if __name__ == "__main__":
    key = jax.random.PRNGKey(0)
    k_in, k_par = jax.random.split(key)
    # Input spatial size must reduce to 4x2 after six stride-2 convs (16:9 image).
    x = jax.random.normal(k_in, (2, NC, 256, 144), jnp.float32)
    params = init_params(k_par)
    prep = prepare_params(params)     # one-time weight prep, outside the jitted forward

    # Eval-mode forward (GaussianNoise / Dropout are identities).
    fwd_eval = jax.jit(functools.partial(discriminator_forward, training=False))
    d_out, c_out = fwd_eval(x, prep)
    jax.block_until_ready((d_out, c_out))
    assert d_out.shape == (2, 1) and c_out.shape == (2, N_CLASS)
    assert bool(jnp.all(jnp.isfinite(d_out))) and bool(jnp.all(jnp.isfinite(c_out)))

    # Standalone check of the GaussianNoise Pallas kernel (training-mode semantics).
    y = jax.jit(functools.partial(gaussian_noise, sigma=0.1))(x, 123)
    jax.block_until_ready(y)
    assert y.shape == x.shape and bool(jnp.all(jnp.isfinite(y)))
    rel = float(jnp.std(y - x) / (0.1 * jnp.std(x) + 1e-12))
    assert 0.5 < rel < 2.0, rel

    # Training-mode forward (noise active) also runs.
    fwd_train = jax.jit(functools.partial(discriminator_forward,
                                          training=True, noise_seed=7))
    d_t, c_t = fwd_train(x, prep)
    jax.block_until_ready((d_t, c_t))
    assert bool(jnp.all(jnp.isfinite(d_t))) and bool(jnp.all(jnp.isfinite(c_t)))

    print("KERNEL_OK")
</pallas_src>

<mosaic_0001>
module attributes {stable_mosaic.version = 11 : i64} {
  func.func @_conv_matmul_kernel(%arg0: i32, %arg1: memref<4x48xbf16, #tpu.memory_space<vmem>>, %arg2: memref<48x9216xbf16, #tpu.memory_space<vmem>>, %arg3: memref<4x1xf32, #tpu.memory_space<vmem>>, %arg4: memref<4x1xf32, #tpu.memory_space<vmem>>, %arg5: memref<4x9216xbf16, #tpu.memory_space<vmem>>) attributes {dimension_semantics = [#tpu.dimension_semantics<parallel>], iteration_bounds = array<i64: 2>, scalar_prefetch = 0 : i64, scratch_operands = 0 : i64, tpu.core_type = #tpu.core_type<tc>, window_params = [{pipeline_mode = #tpu.pipeline_mode<synchronous>, transform_indices = @transform_0, window_bounds = array<i64: 4, 48>}, {transform_indices = @transform_1, window_bounds = array<i64: 48, 9216>}, {pipeline_mode = #tpu.pipeline_mode<synchronous>, transform_indices = @transform_2, window_bounds = array<i64: 4, 1>}, {pipeline_mode = #tpu.pipeline_mode<synchronous>, transform_indices = @transform_3, window_bounds = array<i64: 4, 1>}, {transform_indices = @transform_4, window_bounds = array<i64: 4, 9216>}]} {
    %c0 = arith.constant 0 : index
    %c0_0 = arith.constant 0 : index
    %0 = vector.load %arg1[%c0, %c0_0] : memref<4x48xbf16, #tpu.memory_space<vmem>>, vector<4x48xbf16>
    %c0_1 = arith.constant 0 : index
    %c0_2 = arith.constant 0 : index
    %1 = vector.load %arg2[%c0_1, %c0_2] : memref<48x9216xbf16, #tpu.memory_space<vmem>>, vector<48x9216xbf16>
    %cst = arith.constant dense<0.000000e+00> : vector<4x9216xf32>
    %2 = tpu.matmul %0, %1, %cst {dimension_numbers = #tpu.dot_dimension_numbers<[1], [0], [0], [1], [0, 0, 1, 1], [], []>} : vector<4x48xbf16>, vector<48x9216xbf16>, vector<4x9216xf32> -> vector<4x9216xf32>
    %c0_3 = arith.constant 0 : index
    %c0_4 = arith.constant 0 : index
    %3 = vector.load %arg3[%c0_3, %c0_4] : memref<4x1xf32, #tpu.memory_space<vmem>>, vector<4x1xf32>
    %4 = vector.broadcast %3 : vector<4x1xf32> to vector<4x9216xf32>
    %5 = arith.mulf %2, %4 : vector<4x9216xf32>
    %c0_5 = arith.constant 0 : index
    %c0_6 = arith.constant 0 : index
    %6 = vector.load %arg4[%c0_5, %c0_6] : memref<4x1xf32, #tpu.memory_space<vmem>>, vector<4x1xf32>
    %7 = vector.broadcast %6 : vector<4x1xf32> to vector<4x9216xf32>
    %8 = arith.addf %5, %7 : vector<4x9216xf32>
    %cst_7 = arith.constant 0.000000e+00 : f32
    %9 = vector.broadcast %cst_7 : f32 to vector<4x9216xf32>
    %10 = arith.cmpf oge, %8, %9 : vector<4x9216xf32>
    %cst_8 = arith.constant 2.000000e-01 : f32
    %11 = vector.broadcast %cst_8 : f32 to vector<4x9216xf32>
    %12 = arith.mulf %11, %8 : vector<4x9216xf32>
    %13 = arith.select %10, %8, %12 : vector<4x9216xi1>, vector<4x9216xf32>
    %14 = arith.truncf %13 : vector<4x9216xf32> to vector<4x9216xbf16>
    %c0_9 = arith.constant 0 : index
    %c0_10 = arith.constant 0 : index
    %15 = vector.load %arg5[%c0_9, %c0_10] : memref<4x9216xbf16, #tpu.memory_space<vmem>>, vector<4x9216xbf16>
    tpu.vector_store %arg5[%c0_9, %c0_10], %14 {strides = array<i32>} : memref<4x9216xbf16, #tpu.memory_space<vmem>>, vector<4x9216xbf16>,
    return
  }
  func.func @transform_0(%arg0: i32) -> (i32, i32) {
    %c0_i32 = arith.constant 0 : i32
    %c0_i32_0 = arith.constant 0 : i32
    %c0_i32_1 = arith.constant 0 : i32
    return %c0_i32, %c0_i32_0 : i32, i32
  }
  func.func @transform_1(%arg0: i32) -> (i32, i32) {
    %c0_i32 = arith.constant 0 : i32
    %c0_i32_0 = arith.constant 0 : i32
    return %c0_i32, %arg0 : i32, i32
  }
  func.func @transform_2(%arg0: i32) -> (i32, i32) {
    %c0_i32 = arith.constant 0 : i32
    %c0_i32_0 = arith.constant 0 : i32
    %c0_i32_1 = arith.constant 0 : i32
    return %c0_i32, %c0_i32_0 : i32, i32
  }
  func.func @transform_3(%arg0: i32) -> (i32, i32) {
    %c0_i32 = arith.constant 0 : i32
    %c0_i32_0 = arith.constant 0 : i32
    %c0_i32_1 = arith.constant 0 : i32
    return %c0_i32, %c0_i32_0 : i32, i32
  }
  func.func @transform_4(%arg0: i32) -> (i32, i32) {
    %c0_i32 = arith.constant 0 : i32
    %c0_i32_0 = arith.constant 0 : i32
    return %c0_i32, %arg0 : i32, i32
  }
}

module attributes {stable_mosaic.version = 11 : i64} {
  func.func @_conv_matmul_kernel(%arg0: i32, %arg1: memref<8x64xbf16, #tpu.memory_space<vmem>>, %arg2: memref<64x2304xbf16, #tpu.memory_space<vmem>>, %arg3: memref<8x1xf32, #tpu.memory_space<vmem>>, %arg4: memref<8x1xf32, #tpu.memory_space<vmem>>, %arg5: memref<8x2304xbf16, #tpu.memory_space<vmem>>) attributes {dimension_semantics = [#tpu.dimension_semantics<parallel>], iteration_bounds = array<i64: 2>, scalar_prefetch = 0 : i64, scratch_operands = 0 : i64, tpu.core_type = #tpu.core_type<tc>, window_params = [{pipeline_mode = #tpu.pipeline_mode<synchronous>, transform_indices = @transform_0, window_bounds = array<i64: 8, 64>}, {transform_indices = @transform_1, window_bounds = array<i64: 64, 2304>}, {pipeline_mode = #tpu.pipeline_mode<synchronous>, transform_indices = @transform_2, window_bounds = array<i64: 8, 1>}, {pipeline_mode = #tpu.pipeline_mode<synchronous>, transform_indices = @transform_3, window_bounds = array<i64: 8, 1>}, {transform_indices = @transform_4, window_bounds = array<i64: 8, 2304>}]} {
    %c0 = arith.constant 0 : index
    %c0_0 = arith.constant 0 : index
    %0 = vector.load %arg1[%c0, %c0_0] : memref<8x64xbf16, #tpu.memory_space<vmem>>, vector<8x64xbf16>
    %c0_1 = arith.constant 0 : index
    %c0_2 = arith.constant 0 : index
    %1 = vector.load %arg2[%c0_1, %c0_2] : memref<64x2304xbf16, #tpu.memory_space<vmem>>, vector<64x2304xbf16>
    %cst = arith.constant dense<0.000000e+00> : vector<8x2304xf32>
    %2 = tpu.matmul %0, %1, %cst {dimension_numbers = #tpu.dot_dimension_numbers<[1], [0], [0], [1], [0, 0, 1, 1], [], []>} : vector<8x64xbf16>, vector<64x2304xbf16>, vector<8x2304xf32> -> vector<8x2304xf32>
    %c0_3 = arith.constant 0 : index
    %c0_4 = arith.constant 0 : index
    %3 = vector.load %arg3[%c0_3, %c0_4] : memref<8x1xf32, #tpu.memory_space<vmem>>, vector<8x1xf32>
    %4 = vector.broadcast %3 : vector<8x1xf32> to vector<8x2304xf32>
    %5 = arith.mulf %2, %4 : vector<8x2304xf32>
    %c0_5 = arith.constant 0 : index
    %c0_6 = arith.constant 0 : index
    %6 = vector.load %arg4[%c0_5, %c0_6] : memref<8x1xf32, #tpu.memory_space<vmem>>, vector<8x1xf32>
    %7 = vector.broadcast %6 : vector<8x1xf32> to vector<8x2304xf32>
    %8 = arith.addf %5, %7 : vector<8x2304xf32>
    %cst_7 = arith.constant 0.000000e+00 : f32
    %9 = vector.broadcast %cst_7 : f32 to vector<8x2304xf32>
    %10 = arith.cmpf oge, %8, %9 : vector<8x2304xf32>
    %cst_8 = arith.constant 2.000000e-01 : f32
    %11 = vector.broadcast %cst_8 : f32 to vector<8x2304xf32>
    %12 = arith.mulf %11, %8 : vector<8x2304xf32>
    %13 = arith.select %10, %8, %12 : vector<8x2304xi1>, vector<8x2304xf32>
    %14 = arith.truncf %13 : vector<8x2304xf32> to vector<8x2304xbf16>
    %c0_9 = arith.constant 0 : index
    %c0_10 = arith.constant 0 : index
    %15 = vector.load %arg5[%c0_9, %c0_10] : memref<8x2304xbf16, #tpu.memory_space<vmem>>, vector<8x2304xbf16>
    tpu.vector_store %arg5[%c0_9, %c0_10], %14 {strides = array<i32>} : memref<8x2304xbf16, #tpu.memory_space<vmem>>, vector<8x2304xbf16>,
    return
  }
  func.func @transform_0(%arg0: i32) -> (i32, i32) {
    %c0_i32 = arith.constant 0 : i32
    %c0_i32_0 = arith.constant 0 : i32
    %c0_i32_1 = arith.constant 0 : i32
    return %c0_i32, %c0_i32_0 : i32, i32
  }
  func.func @transform_1(%arg0: i32) -> (i32, i32) {
    %c0_i32 = arith.constant 0 : i32
    %c0_i32_0 = arith.constant 0 : i32
    return %c0_i32, %arg0 : i32, i32
  }
  func.func @transform_2(%arg0: i32) -> (i32, i32) {
    %c0_i32 = arith.constant 0 : i32
    %c0_i32_0 = arith.constant 0 : i32
    %c0_i32_1 = arith.constant 0 : i32
    return %c0_i32, %c0_i32_0 : i32, i32
  }
  func.func @transform_3(%arg0: i32) -> (i32, i32) {
    %c0_i32 = arith.constant 0 : i32
    %c0_i32_0 = arith.constant 0 : i32
    %c0_i32_1 = arith.constant 0 : i32
    return %c0_i32, %c0_i32_0 : i32, i32
  }
  func.func @transform_4(%arg0: i32) -> (i32, i32) {
    %c0_i32 = arith.constant 0 : i32
    %c0_i32_0 = arith.constant 0 : i32
    return %c0_i32, %arg0 : i32, i32
  }
}

module attributes {stable_mosaic.version = 11 : i64} {
  func.func @_conv_matmul_kernel(%arg0: i32, %arg1: memref<16x128xbf16, #tpu.memory_space<vmem>>, %arg2: memref<128x640xbf16, #tpu.memory_space<vmem>>, %arg3: memref<16x1xf32, #tpu.memory_space<vmem>>, %arg4: memref<16x1xf32, #tpu.memory_space<vmem>>, %arg5: memref<16x640xbf16, #tpu.memory_space<vmem>>) attributes {dimension_semantics = [#tpu.dimension_semantics<parallel>], iteration_bounds = array<i64: 2>, scalar_prefetch = 0 : i64, scratch_operands = 0 : i64, tpu.core_type = #tpu.core_type<tc>, window_params = [{pipeline_mode = #tpu.pipeline_mode<synchronous>, transform_indices = @transform_0, window_bounds = array<i64: 16, 128>}, {transform_indices = @transform_1, window_bounds = array<i64: 128, 640>}, {pipeline_mode = #tpu.pipeline_mode<synchronous>, transform_indices = @transform_2, window_bounds = array<i64: 16, 1>}, {pipeline_mode = #tpu.pipeline_mode<synchronous>, transform_indices = @transform_3, window_bounds = array<i64: 16, 1>}, {transform_indices = @transform_4, window_bounds = array<i64: 16, 640>}]} {
    %c0 = arith.constant 0 : index
    %c0_0 = arith.constant 0 : index
    %0 = vector.load %arg1[%c0, %c0_0] : memref<16x128xbf16, #tpu.memory_space<vmem>>, vector<16x128xbf16>
    %c0_1 = arith.constant 0 : index
    %c0_2 = arith.constant 0 : index
    %1 = vector.load %arg2[%c0_1, %c0_2] : memref<128x640xbf16, #tpu.memory_space<vmem>>, vector<128x640xbf16>
    %cst = arith.constant dense<0.000000e+00> : vector<16x640xf32>
    %2 = tpu.matmul %0, %1, %cst {dimension_numbers = #tpu.dot_dimension_numbers<[1], [0], [0], [1], [0, 0, 1, 1], [], []>} : vector<16x128xbf16>, vector<128x640xbf16>, vector<16x640xf32> -> vector<16x640xf32>
    %c0_3 = arith.constant 0 : index
    %c0_4 = arith.constant 0 : index
    %3 = vector.load %arg3[%c0_3, %c0_4] : memref<16x1xf32, #tpu.memory_space<vmem>>, vector<16x1xf32>
    %4 = vector.broadcast %3 : vector<16x1xf32> to vector<16x640xf32>
    %5 = arith.mulf %2, %4 : vector<16x640xf32>
    %c0_5 = arith.constant 0 : index
    %c0_6 = arith.constant 0 : index
    %6 = vector.load %arg4[%c0_5, %c0_6] : memref<16x1xf32, #tpu.memory_space<vmem>>, vector<16x1xf32>
    %7 = vector.broadcast %6 : vector<16x1xf32> to vector<16x640xf32>
    %8 = arith.addf %5, %7 : vector<16x640xf32>
    %cst_7 = arith.constant 0.000000e+00 : f32
    %9 = vector.broadcast %cst_7 : f32 to vector<16x640xf32>
    %10 = arith.cmpf oge, %8, %9 : vector<16x640xf32>
    %cst_8 = arith.constant 2.000000e-01 : f32
    %11 = vector.broadcast %cst_8 : f32 to vector<16x640xf32>
    %12 = arith.mulf %11, %8 : vector<16x640xf32>
    %13 = arith.select %10, %8, %12 : vector<16x640xi1>, vector<16x640xf32>
    %14 = arith.truncf %13 : vector<16x640xf32> to vector<16x640xbf16>
    %c0_9 = arith.constant 0 : index
    %c0_10 = arith.constant 0 : index
    %15 = vector.load %arg5[%c0_9, %c0_10] : memref<16x640xbf16, #tpu.memory_space<vmem>>, vector<16x640xbf16>
    tpu.vector_store %arg5[%c0_9, %c0_10], %14 {strides = array<i32>} : memref<16x640xbf16, #tpu.memory_space<vmem>>, vector<16x640xbf16>,
    return
  }
  func.func @transform_0(%arg0: i32) -> (i32, i32) {
    %c0_i32 = arith.constant 0 : i32
    %c0_i32_0 = arith.constant 0 : i32
    %c0_i32_1 = arith.constant 0 : i32
    return %c0_i32, %c0_i32_0 : i32, i32
  }
  func.func @transform_1(%arg0: i32) -> (i32, i32) {
    %c0_i32 = arith.constant 0 : i32
    %c0_i32_0 = arith.constant 0 : i32
    return %c0_i32, %arg0 : i32, i32
  }
  func.func @transform_2(%arg0: i32) -> (i32, i32) {
    %c0_i32 = arith.constant 0 : i32
    %c0_i32_0 = arith.constant 0 : i32
    %c0_i32_1 = arith.constant 0 : i32
    return %c0_i32, %c0_i32_0 : i32, i32
  }
  func.func @transform_3(%arg0: i32) -> (i32, i32) {
    %c0_i32 = arith.constant 0 : i32
    %c0_i32_0 = arith.constant 0 : i32
    %c0_i32_1 = arith.constant 0 : i32
    return %c0_i32, %c0_i32_0 : i32, i32
  }
  func.func @transform_4(%arg0: i32) -> (i32, i32) {
    %c0_i32 = arith.constant 0 : i32
    %c0_i32_0 = arith.constant 0 : i32
    return %c0_i32, %arg0 : i32, i32
  }
}

module attributes {stable_mosaic.version = 11 : i64} {
  func.func @_conv_matmul_kernel(%arg0: i32, %arg1: memref<32x256xbf16, #tpu.memory_space<vmem>>, %arg2: memref<256x384xbf16, #tpu.memory_space<vmem>>, %arg3: memref<32x1xf32, #tpu.memory_space<vmem>>, %arg4: memref<32x1xf32, #tpu.memory_space<vmem>>, %arg5: memref<32x384xbf16, #tpu.memory_space<vmem>>) attributes {dimension_semantics = [#tpu.dimension_semantics<parallel>], iteration_bounds = array<i64: 1>, scalar_prefetch = 0 : i64, scratch_operands = 0 : i64, tpu.core_type = #tpu.core_type<tc>, window_params = [{pipeline_mode = #tpu.pipeline_mode<synchronous>, transform_indices = @transform_0, window_bounds = array<i64: 32, 256>}, {transform_indices = @transform_1, window_bounds = array<i64: 256, 384>}, {pipeline_mode = #tpu.pipeline_mode<synchronous>, transform_indices = @transform_2, window_bounds = array<i64: 32, 1>}, {pipeline_mode = #tpu.pipeline_mode<synchronous>, transform_indices = @transform_3, window_bounds = array<i64: 32, 1>}, {transform_indices = @transform_4, window_bounds = array<i64: 32, 384>}]} {
    %c0 = arith.constant 0 : index
    %c0_0 = arith.constant 0 : index
    %0 = vector.load %arg1[%c0, %c0_0] : memref<32x256xbf16, #tpu.memory_space<vmem>>, vector<32x256xbf16>
    %c0_1 = arith.constant 0 : index
    %c0_2 = arith.constant 0 : index
    %1 = vector.load %arg2[%c0_1, %c0_2] : memref<256x384xbf16, #tpu.memory_space<vmem>>, vector<256x384xbf16>
    %cst = arith.constant dense<0.000000e+00> : vector<32x384xf32>
    %2 = tpu.matmul %0, %1, %cst {dimension_numbers = #tpu.dot_dimension_numbers<[1], [0], [0], [1], [0, 0, 1, 1], [], []>} : vector<32x256xbf16>, vector<256x384xbf16>, vector<32x384xf32> -> vector<32x384xf32>
    %c0_3 = arith.constant 0 : index
    %c0_4 = arith.constant 0 : index
    %3 = vector.load %arg3[%c0_3, %c0_4] : memref<32x1xf32, #tpu.memory_space<vmem>>, vector<32x1xf32>
    %4 = vector.broadcast %3 : vector<32x1xf32> to vector<32x384xf32>
    %5 = arith.mulf %2, %4 : vector<32x384xf32>
    %c0_5 = arith.constant 0 : index
    %c0_6 = arith.constant 0 : index
    %6 = vector.load %arg4[%c0_5, %c0_6] : memref<32x1xf32, #tpu.memory_space<vmem>>, vector<32x1xf32>
    %7 = vector.broadcast %6 : vector<32x1xf32> to vector<32x384xf32>
    %8 = arith.addf %5, %7 : vector<32x384xf32>
    %cst_7 = arith.constant 0.000000e+00 : f32
    %9 = vector.broadcast %cst_7 : f32 to vector<32x384xf32>
    %10 = arith.cmpf oge, %8, %9 : vector<32x384xf32>
    %cst_8 = arith.constant 2.000000e-01 : f32
    %11 = vector.broadcast %cst_8 : f32 to vector<32x384xf32>
    %12 = arith.mulf %11, %8 : vector<32x384xf32>
    %13 = arith.select %10, %8, %12 : vector<32x384xi1>, vector<32x384xf32>
    %14 = arith.truncf %13 : vector<32x384xf32> to vector<32x384xbf16>
    %c0_9 = arith.constant 0 : index
    %c0_10 = arith.constant 0 : index
    %15 = vector.load %arg5[%c0_9, %c0_10] : memref<32x384xbf16, #tpu.memory_space<vmem>>, vector<32x384xbf16>
    tpu.vector_store %arg5[%c0_9, %c0_10], %14 {strides = array<i32>} : memref<32x384xbf16, #tpu.memory_space<vmem>>, vector<32x384xbf16>,
    return
  }
  func.func @transform_0(%arg0: i32) -> (i32, i32) {
    %c0_i32 = arith.constant 0 : i32
    %c0_i32_0 = arith.constant 0 : i32
    %c0_i32_1 = arith.constant 0 : i32
    return %c0_i32, %c0_i32_0 : i32, i32
  }
  func.func @transform_1(%arg0: i32) -> (i32, i32) {
    %c0_i32 = arith.constant 0 : i32
    %c0_i32_0 = arith.constant 0 : i32
    return %c0_i32, %arg0 : i32, i32
  }
  func.func @transform_2(%arg0: i32) -> (i32, i32) {
    %c0_i32 = arith.constant 0 : i32
    %c0_i32_0 = arith.constant 0 : i32
    %c0_i32_1 = arith.constant 0 : i32
    return %c0_i32, %c0_i32_0 : i32, i32
  }
  func.func @transform_3(%arg0: i32) -> (i32, i32) {
    %c0_i32 = arith.constant 0 : i32
    %c0_i32_0 = arith.constant 0 : i32
    %c0_i32_1 = arith.constant 0 : i32
    return %c0_i32, %c0_i32_0 : i32, i32
  }
  func.func @transform_4(%arg0: i32) -> (i32, i32) {
    %c0_i32 = arith.constant 0 : i32
    %c0_i32_0 = arith.constant 0 : i32
    return %c0_i32, %arg0 : i32, i32
  }
}

module attributes {stable_mosaic.version = 11 : i64} {
  func.func @_conv_matmul_kernel(%arg0: i32, %arg1: memref<64x512xbf16, #tpu.memory_space<vmem>>, %arg2: memref<512x128xbf16, #tpu.memory_space<vmem>>, %arg3: memref<64x1xf32, #tpu.memory_space<vmem>>, %arg4: memref<64x1xf32, #tpu.memory_space<vmem>>, %arg5: memref<64x128xbf16, #tpu.memory_space<vmem>>) attributes {dimension_semantics = [#tpu.dimension_semantics<parallel>], iteration_bounds = array<i64: 1>, scalar_prefetch = 0 : i64, scratch_operands = 0 : i64, tpu.core_type = #tpu.core_type<tc>, window_params = [{pipeline_mode = #tpu.pipeline_mode<synchronous>, transform_indices = @transform_0, window_bounds = array<i64: 64, 512>}, {transform_indices = @transform_1, window_bounds = array<i64: 512, 128>}, {pipeline_mode = #tpu.pipeline_mode<synchronous>, transform_indices = @transform_2, window_bounds = array<i64: 64, 1>}, {pipeline_mode = #tpu.pipeline_mode<synchronous>, transform_indices = @transform_3, window_bounds = array<i64: 64, 1>}, {transform_indices = @transform_4, window_bounds = array<i64: 64, 128>}]} {
    %c0 = arith.constant 0 : index
    %c0_0 = arith.constant 0 : index
    %0 = vector.load %arg1[%c0, %c0_0] : memref<64x512xbf16, #tpu.memory_space<vmem>>, vector<64x512xbf16>
    %c0_1 = arith.constant 0 : index
    %c0_2 = arith.constant 0 : index
    %1 = vector.load %arg2[%c0_1, %c0_2] : memref<512x128xbf16, #tpu.memory_space<vmem>>, vector<512x128xbf16>
    %cst = arith.constant dense<0.000000e+00> : vector<64x128xf32>
    %2 = tpu.matmul %0, %1, %cst {dimension_numbers = #tpu.dot_dimension_numbers<[1], [0], [0], [1], [0, 0, 1, 1], [], []>} : vector<64x512xbf16>, vector<512x128xbf16>, vector<64x128xf32> -> vector<64x128xf32>
    %c0_3 = arith.constant 0 : index
    %c0_4 = arith.constant 0 : index
    %3 = vector.load %arg3[%c0_3, %c0_4] : memref<64x1xf32, #tpu.memory_space<vmem>>, vector<64x1xf32>
    %4 = vector.broadcast %3 : vector<64x1xf32> to vector<64x128xf32>
    %5 = arith.mulf %2, %4 : vector<64x128xf32>
    %c0_5 = arith.constant 0 : index
    %c0_6 = arith.constant 0 : index
    %6 = vector.load %arg4[%c0_5, %c0_6] : memref<64x1xf32, #tpu.memory_space<vmem>>, vector<64x1xf32>
    %7 = vector.broadcast %6 : vector<64x1xf32> to vector<64x128xf32>
    %8 = arith.addf %5, %7 : vector<64x128xf32>
    %cst_7 = arith.constant 0.000000e+00 : f32
    %9 = vector.broadcast %cst_7 : f32 to vector<64x128xf32>
    %10 = arith.cmpf oge, %8, %9 : vector<64x128xf32>
    %cst_8 = arith.constant 2.000000e-01 : f32
    %11 = vector.broadcast %cst_8 : f32 to vector<64x128xf32>
    %12 = arith.mulf %11, %8 : vector<64x128xf32>
    %13 = arith.select %10, %8, %12 : vector<64x128xi1>, vector<64x128xf32>
    %14 = arith.truncf %13 : vector<64x128xf32> to vector<64x128xbf16>
    %c0_9 = arith.constant 0 : index
    %c0_10 = arith.constant 0 : index
    %15 = vector.load %arg5[%c0_9, %c0_10] : memref<64x128xbf16, #tpu.memory_space<vmem>>, vector<64x128xbf16>
    tpu.vector_store %arg5[%c0_9, %c0_10], %14 {strides = array<i32>} : memref<64x128xbf16, #tpu.memory_space<vmem>>, vector<64x128xbf16>,
    return
  }
  func.func @transform_0(%arg0: i32) -> (i32, i32) {
    %c0_i32 = arith.constant 0 : i32
    %c0_i32_0 = arith.constant 0 : i32
    %c0_i32_1 = arith.constant 0 : i32
    return %c0_i32, %c0_i32_0 : i32, i32
  }
  func.func @transform_1(%arg0: i32) -> (i32, i32) {
    %c0_i32 = arith.constant 0 : i32
    %c0_i32_0 = arith.constant 0 : i32
    return %c0_i32, %arg0 : i32, i32
  }
  func.func @transform_2(%arg0: i32) -> (i32, i32) {
    %c0_i32 = arith.constant 0 : i32
    %c0_i32_0 = arith.constant 0 : i32
    %c0_i32_1 = arith.constant 0 : i32
    return %c0_i32, %c0_i32_0 : i32, i32
  }
  func.func @transform_3(%arg0: i32) -> (i32, i32) {
    %c0_i32 = arith.constant 0 : i32
    %c0_i32_0 = arith.constant 0 : i32
    %c0_i32_1 = arith.constant 0 : i32
    return %c0_i32, %c0_i32_0 : i32, i32
  }
  func.func @transform_4(%arg0: i32) -> (i32, i32) {
    %c0_i32 = arith.constant 0 : i32
    %c0_i32_0 = arith.constant 0 : i32
    return %c0_i32, %arg0 : i32, i32
  }
}

module attributes {stable_mosaic.version = 11 : i64} {
  func.func @_conv_matmul_kernel(%arg0: i32, %arg1: memref<64x1024xbf16, #tpu.memory_space<vmem>>, %arg2: memref<1024x128xbf16, #tpu.memory_space<vmem>>, %arg3: memref<64x1xf32, #tpu.memory_space<vmem>>, %arg4: memref<64x1xf32, #tpu.memory_space<vmem>>, %arg5: memref<64x128xbf16, #tpu.memory_space<vmem>>) attributes {dimension_semantics = [#tpu.dimension_semantics<parallel>], iteration_bounds = array<i64: 1>, scalar_prefetch = 0 : i64, scratch_operands = 0 : i64, tpu.core_type = #tpu.core_type<tc>, window_params = [{pipeline_mode = #tpu.pipeline_mode<synchronous>, transform_indices = @transform_0, window_bounds = array<i64: 64, 1024>}, {transform_indices = @transform_1, window_bounds = array<i64: 1024, 128>}, {pipeline_mode = #tpu.pipeline_mode<synchronous>, transform_indices = @transform_2, window_bounds = array<i64: 64, 1>}, {pipeline_mode = #tpu.pipeline_mode<synchronous>, transform_indices = @transform_3, window_bounds = array<i64: 64, 1>}, {transform_indices = @transform_4, window_bounds = array<i64: 64, 128>}]} {
    %c0 = arith.constant 0 : index
    %c0_0 = arith.constant 0 : index
    %0 = vector.load %arg1[%c0, %c0_0] : memref<64x1024xbf16, #tpu.memory_space<vmem>>, vector<64x1024xbf16>
    %c0_1 = arith.constant 0 : index
    %c0_2 = arith.constant 0 : index
    %1 = vector.load %arg2[%c0_1, %c0_2] : memref<1024x128xbf16, #tpu.memory_space<vmem>>, vector<1024x128xbf16>
    %cst = arith.constant dense<0.000000e+00> : vector<64x128xf32>
    %2 = tpu.matmul %0, %1, %cst {dimension_numbers = #tpu.dot_dimension_numbers<[1], [0], [0], [1], [0, 0, 1, 1], [], []>} : vector<64x1024xbf16>, vector<1024x128xbf16>, vector<64x128xf32> -> vector<64x128xf32>
    %c0_3 = arith.constant 0 : index
    %c0_4 = arith.constant 0 : index
    %3 = vector.load %arg3[%c0_3, %c0_4] : memref<64x1xf32, #tpu.memory_space<vmem>>, vector<64x1xf32>
    %4 = vector.broadcast %3 : vector<64x1xf32> to vector<64x128xf32>
    %5 = arith.mulf %2, %4 : vector<64x128xf32>
    %c0_5 = arith.constant 0 : index
    %c0_6 = arith.constant 0 : index
    %6 = vector.load %arg4[%c0_5, %c0_6] : memref<64x1xf32, #tpu.memory_space<vmem>>, vector<64x1xf32>
    %7 = vector.broadcast %6 : vector<64x1xf32> to vector<64x128xf32>
    %8 = arith.addf %5, %7 : vector<64x128xf32>
    %cst_7 = arith.constant 0.000000e+00 : f32
    %9 = vector.broadcast %cst_7 : f32 to vector<64x128xf32>
    %10 = arith.cmpf oge, %8, %9 : vector<64x128xf32>
    %cst_8 = arith.constant 2.000000e-01 : f32
    %11 = vector.broadcast %cst_8 : f32 to vector<64x128xf32>
    %12 = arith.mulf %11, %8 : vector<64x128xf32>
    %13 = arith.select %10, %8, %12 : vector<64x128xi1>, vector<64x128xf32>
    %14 = arith.truncf %13 : vector<64x128xf32> to vector<64x128xbf16>
    %c0_9 = arith.constant 0 : index
    %c0_10 = arith.constant 0 : index
    %15 = vector.load %arg5[%c0_9, %c0_10] : memref<64x128xbf16, #tpu.memory_space<vmem>>, vector<64x128xbf16>
    tpu.vector_store %arg5[%c0_9, %c0_10], %14 {strides = array<i32>} : memref<64x128xbf16, #tpu.memory_space<vmem>>, vector<64x128xbf16>,
    return
  }
  func.func @transform_0(%arg0: i32) -> (i32, i32) {
    %c0_i32 = arith.constant 0 : i32
    %c0_i32_0 = arith.constant 0 : i32
    %c0_i32_1 = arith.constant 0 : i32
    return %c0_i32, %c0_i32_0 : i32, i32
  }
  func.func @transform_1(%arg0: i32) -> (i32, i32) {
    %c0_i32 = arith.constant 0 : i32
    %c0_i32_0 = arith.constant 0 : i32
    return %c0_i32, %arg0 : i32, i32
  }
  func.func @transform_2(%arg0: i32) -> (i32, i32) {
    %c0_i32 = arith.constant 0 : i32
    %c0_i32_0 = arith.constant 0 : i32
    %c0_i32_1 = arith.constant 0 : i32
    return %c0_i32, %c0_i32_0 : i32, i32
  }
  func.func @transform_3(%arg0: i32) -> (i32, i32) {
    %c0_i32 = arith.constant 0 : i32
    %c0_i32_0 = arith.constant 0 : i32
    %c0_i32_1 = arith.constant 0 : i32
    return %c0_i32, %c0_i32_0 : i32, i32
  }
  func.func @transform_4(%arg0: i32) -> (i32, i32) {
    %c0_i32 = arith.constant 0 : i32
    %c0_i32_0 = arith.constant 0 : i32
    return %c0_i32, %arg0 : i32, i32
  }
}

module attributes {stable_mosaic.version = 11 : i64} {
  func.func @_heads_kernel(%arg0: i32, %arg1: memref<8x512xbf16, #tpu.memory_space<vmem>>, %arg2: memref<512x1152xbf16, #tpu.memory_space<vmem>>, %arg3: memref<1x1152xf32, #tpu.memory_space<vmem>>, %arg4: memref<1x1152xf32, #tpu.memory_space<vmem>>, %arg5: memref<1024x512xbf16, #tpu.memory_space<vmem>>, %arg6: memref<1x512xf32, #tpu.memory_space<vmem>>, %arg7: memref<512x128xbf16, #tpu.memory_space<vmem>>, %arg8: memref<1x128xf32, #tpu.memory_space<vmem>>, %arg9: memref<8x128xf32, #tpu.memory_space<vmem>>, %arg10: memref<8x128xf32, #tpu.memory_space<vmem>>) attributes {dimension_semantics = [#tpu.dimension_semantics<arbitrary>], iteration_bounds = array<i64: 1>, scalar_prefetch = 0 : i64, scratch_operands = 0 : i64, tpu.core_type = #tpu.core_type<tc>, window_params = [{pipeline_mode = #tpu.pipeline_mode<synchronous>, transform_indices = @transform_0, window_bounds = array<i64: 8, 512>}, {pipeline_mode = #tpu.pipeline_mode<synchronous>, transform_indices = @transform_1, window_bounds = array<i64: 512, 1152>}, {pipeline_mode = #tpu.pipeline_mode<synchronous>, transform_indices = @transform_2, window_bounds = array<i64: 1, 1152>}, {pipeline_mode = #tpu.pipeline_mode<synchronous>, transform_indices = @transform_3, window_bounds = array<i64: 1, 1152>}, {pipeline_mode = #tpu.pipeline_mode<synchronous>, transform_indices = @transform_4, window_bounds = array<i64: 1024, 512>}, {pipeline_mode = #tpu.pipeline_mode<synchronous>, transform_indices = @transform_5, window_bounds = array<i64: 1, 512>}, {pipeline_mode = #tpu.pipeline_mode<synchronous>, transform_indices = @transform_6, window_bounds = array<i64: 512, 128>}, {pipeline_mode = #tpu.pipeline_mode<synchronous>, transform_indices = @transform_7, window_bounds = array<i64: 1, 128>}, {pipeline_mode = #tpu.pipeline_mode<synchronous>, transform_indices = @transform_8, window_bounds = array<i64: 8, 128>}, {pipeline_mode = #tpu.pipeline_mode<synchronous>, transform_indices = @transform_9, window_bounds = array<i64: 8, 128>}]} {
    %c0 = arith.constant 0 : index
    %c0_0 = arith.constant 0 : index
    %0 = vector.load %arg1[%c0, %c0_0] : memref<8x512xbf16, #tpu.memory_space<vmem>>, vector<8x512xbf16>
    %c0_1 = arith.constant 0 : index
    %c0_2 = arith.constant 0 : index
    %1 = vector.load %arg2[%c0_1, %c0_2] : memref<512x1152xbf16, #tpu.memory_space<vmem>>, vector<512x1152xbf16>
    %cst = arith.constant dense<0.000000e+00> : vector<8x1152xf32>
    %2 = tpu.matmul %0, %1, %cst {dimension_numbers = #tpu.dot_dimension_numbers<[1], [0], [0], [1], [0, 0, 1, 1], [], []>} : vector<8x512xbf16>, vector<512x1152xbf16>, vector<8x1152xf32> -> vector<8x1152xf32>
    %c0_3 = arith.constant 0 : index
    %c0_4 = arith.constant 0 : index
    %3 = vector.load %arg3[%c0_3, %c0_4] : memref<1x1152xf32, #tpu.memory_space<vmem>>, vector<1x1152xf32>
    %4 = vector.broadcast %3 : vector<1x1152xf32> to vector<8x1152xf32>
    %5 = arith.addf %2, %4 : vector<8x1152xf32>
    %cst_5 = arith.constant 0.000000e+00 : f32
    %6 = vector.broadcast %cst_5 : f32 to vector<8x1152xf32>
    %7 = arith.cmpf oge, %5, %6 : vector<8x1152xf32>
    %c0_6 = arith.constant 0 : index
    %c0_7 = arith.constant 0 : index
    %8 = vector.load %arg4[%c0_6, %c0_7] : memref<1x1152xf32, #tpu.memory_space<vmem>>, vector<1x1152xf32>
    %9 = vector.broadcast %8 : vector<1x1152xf32> to vector<8x1152xf32>
    %10 = arith.mulf %9, %5 : vector<8x1152xf32>
    %11 = arith.select %7, %5, %10 : vector<8x1152xi1>, vector<8x1152xf32>
    %12 = vector.extract_strided_slice %11 {offsets = [0, 1024], sizes = [8, 128], strides = [1, 1]} : vector<8x1152xf32> to vector<8x128xf32>
    %c0_8 = arith.constant 0 : index
    %c0_9 = arith.constant 0 : index
    %13 = vector.load %arg9[%c0_8, %c0_9] : memref<8x128xf32, #tpu.memory_space<vmem>>, vector<8x128xf32>
    tpu.vector_store %arg9[%c0_8, %c0_9], %12 {strides = array<i32>} : memref<8x128xf32, #tpu.memory_space<vmem>>, vector<8x128xf32>,
    %14 = vector.extract_strided_slice %11 {offsets = [0, 0], sizes = [8, 1024], strides = [1, 1]} : vector<8x1152xf32> to vector<8x1024xf32>
    %15 = arith.truncf %14 : vector<8x1024xf32> to vector<8x1024xbf16>
    %c0_10 = arith.constant 0 : index
    %c0_11 = arith.constant 0 : index
    %16 = vector.load %arg5[%c0_10, %c0_11] : memref<1024x512xbf16, #tpu.memory_space<vmem>>, vector<1024x512xbf16>
    %cst_12 = arith.constant dense<0.000000e+00> : vector<8x512xf32>
    %17 = tpu.matmul %15, %16, %cst_12 {dimension_numbers = #tpu.dot_dimension_numbers<[1], [0], [0], [1], [0, 0, 1, 1], [], []>} : vector<8x1024xbf16>, vector<1024x512xbf16>, vector<8x512xf32> -> vector<8x512xf32>
    %c0_13 = arith.constant 0 : index
    %c0_14 = arith.constant 0 : index
    %18 = vector.load %arg6[%c0_13, %c0_14] : memref<1x512xf32, #tpu.memory_space<vmem>>, vector<1x512xf32>
    %19 = vector.broadcast %18 : vector<1x512xf32> to vector<8x512xf32>
    %20 = arith.addf %17, %19 : vector<8x512xf32>
    %cst_15 = arith.constant 0.000000e+00 : f32
    %21 = vector.broadcast %cst_15 : f32 to vector<8x512xf32>
    %22 = arith.cmpf oge, %20, %21 : vector<8x512xf32>
    %cst_16 = arith.constant 2.000000e-01 : f32
    %23 = vector.broadcast %cst_16 : f32 to vector<8x512xf32>
    %24 = arith.mulf %23, %20 : vector<8x512xf32>
    %25 = arith.select %22, %20, %24 : vector<8x512xi1>, vector<8x512xf32>
    %26 = arith.truncf %25 : vector<8x512xf32> to vector<8x512xbf16>
    %c0_17 = arith.constant 0 : index
    %c0_18 = arith.constant 0 : index
    %27 = vector.load %arg7[%c0_17, %c0_18] : memref<512x128xbf16, #tpu.memory_space<vmem>>, vector<512x128xbf16>
    %cst_19 = arith.constant dense<0.000000e+00> : vector<8x128xf32>
    %28 = tpu.matmul %26, %27, %cst_19 {dimension_numbers = #tpu.dot_dimension_numbers<[1], [0], [0], [1], [0, 0, 1, 1], [], []>} : vector<8x512xbf16>, vector<512x128xbf16>, vector<8x128xf32> -> vector<8x128xf32>
    %c0_20 = arith.constant 0 : index
    %c0_21 = arith.constant 0 : index
    %29 = vector.load %arg8[%c0_20, %c0_21] : memref<1x128xf32, #tpu.memory_space<vmem>>, vector<1x128xf32>
    %30 = vector.broadcast %29 : vector<1x128xf32> to vector<8x128xf32>
    %31 = arith.addf %28, %30 : vector<8x128xf32>
    %c0_22 = arith.constant 0 : index
    %c0_23 = arith.constant 0 : index
    %32 = vector.load %arg10[%c0_22, %c0_23] : memref<8x128xf32, #tpu.memory_space<vmem>>, vector<8x128xf32>
    tpu.vector_store %arg10[%c0_22, %c0_23], %31 {strides = array<i32>} : memref<8x128xf32, #tpu.memory_space<vmem>>, vector<8x128xf32>,
    return
  }
  func.func @transform_0(%arg0: i32) -> (i32, i32) {
    %c0_i32 = arith.constant 0 : i32
    %c0_i32_0 = arith.constant 0 : i32
    %c0_i32_1 = arith.constant 0 : i32
    return %c0_i32, %c0_i32_0 : i32, i32
  }
  func.func @transform_1(%arg0: i32) -> (i32, i32) {
    %c0_i32 = arith.constant 0 : i32
    %c0_i32_0 = arith.constant 0 : i32
    %c0_i32_1 = arith.constant 0 : i32
    return %c0_i32, %c0_i32_0 : i32, i32
  }
  func.func @transform_2(%arg0: i32) -> (i32, i32) {
    %c0_i32 = arith.constant 0 : i32
    %c0_i32_0 = arith.constant 0 : i32
    %c0_i32_1 = arith.constant 0 : i32
    return %c0_i32, %c0_i32_0 : i32, i32
  }
  func.func @transform_3(%arg0: i32) -> (i32, i32) {
    %c0_i32 = arith.constant 0 : i32
    %c0_i32_0 = arith.constant 0 : i32
    %c0_i32_1 = arith.constant 0 : i32
    return %c0_i32, %c0_i32_0 : i32, i32
  }
  func.func @transform_4(%arg0: i32) -> (i32, i32) {
    %c0_i32 = arith.constant 0 : i32
    %c0_i32_0 = arith.constant 0 : i32
    %c0_i32_1 = arith.constant 0 : i32
    return %c0_i32, %c0_i32_0 : i32, i32
  }
  func.func @transform_5(%arg0: i32) -> (i32, i32) {
    %c0_i32 = arith.constant 0 : i32
    %c0_i32_0 = arith.constant 0 : i32
    %c0_i32_1 = arith.constant 0 : i32
    return %c0_i32, %c0_i32_0 : i32, i32
  }
  func.func @transform_6(%arg0: i32) -> (i32, i32) {
    %c0_i32 = arith.constant 0 : i32
    %c0_i32_0 = arith.constant 0 : i32
    %c0_i32_1 = arith.constant 0 : i32
    return %c0_i32, %c0_i32_0 : i32, i32
  }
  func.func @transform_7(%arg0: i32) -> (i32, i32) {
    %c0_i32 = arith.constant 0 : i32
    %c0_i32_0 = arith.constant 0 : i32
    %c0_i32_1 = arith.constant 0 : i32
    return %c0_i32, %c0_i32_0 : i32, i32
  }
  func.func @transform_8(%arg0: i32) -> (i32, i32) {
    %c0_i32 = arith.constant 0 : i32
    %c0_i32_0 = arith.constant 0 : i32
    %c0_i32_1 = arith.constant 0 : i32
    return %c0_i32, %c0_i32_0 : i32, i32
  }
  func.func @transform_9(%arg0: i32) -> (i32, i32) {
    %c0_i32 = arith.constant 0 : i32
    %c0_i32_0 = arith.constant 0 : i32
    %c0_i32_1 = arith.constant 0 : i32
    return %c0_i32, %c0_i32_0 : i32, i32
  }
}

</mosaic_0001>

<bundles_post_ra>
// kernel: discriminator_forward.7
= control target key start
LH: loop header
LB: loop body
LE: loop exit
PB: predicated region body
PF: predicated region fallthrough
CT: control target
= control target key end

     0   :  { %s4727_s15 = smov 0   ;;  %s4729_s16 = smov 0   ;;  %s5765_s0 = inlined_call_operand.vmem [shape: bf16[4,48], index: 0, kind: input, shape index: {}]   ;;  %s5766_s1 = inlined_call_operand.vmem [shape: bf16[48,18432], index: 1, kind: input, shape index: {}]   ;;  %s5767_s2 = inlined_call_operand.vmem [shape: f32[4,1], index: 2, kind: input, shape index: {}]   ;;  %s5768_s3 = inlined_call_operand.vmem [shape: f32[4,1], index: 3, kind: input, shape index: {}]   ;;  %s5769_s4 = inlined_call_operand.vmem [shape: bf16[4,18432], index: 4, kind: output, shape index: {}]  }
   0x1   :  { %s4731_s17 = smov 0  }
   0x2 LB: > { %s4348_s18 = sadd.s32 4294967295, %s4698_s17   ;;  %s4744_s19 = sadd.s32 1, %s4698_s17   ;;  %s4698_s17 = sphi %s4731_s17, %s5772_s17   ;;  %s4694_s16 = sphi %s4729_s16, %s5771_s16   ;;  %s4690_s15 = sphi %s4727_s15, %s5770_s15  }
   0x3   : > { %s39_s20 = ssub.s32 %s4698_s17, %s4744_s19  ;;  %s42_s21 = sadd.s32 1, %s4694_s16 }
   0x4   : > { %p40_p0 = scmp.eq.s32.totalorder %s39_s20, 0  ;;  %p49_p1 = scmp.ne.s32.totalorder %s4694_s16, %s4690_s15 }
   0x5   : > { %p50_p2 = scmp.eq.s32.totalorder %s4698_s17, 0  ;;  %p4351_p4 = scmp.ge.s32.totalorder %s4698_s17, 2 }
   0x6   : > { %s4753_s22 = scalar_select %p40_p0, %s4694_s16, %s42_s21  }
   0x7   : > { %p51_p3 = por %p50_p2, %p49_p1  ;;  %152 = sbr.rel (%p4351_p4) target bundleno = 127 (0x7f), region = 28 }
   0xe   : > { %155 = sbr.rel (!%p51_p3) target bundleno = 127 (0x7f), region = 32  ;;  %s157_s23 = sand.u32 (%p51_p3), 1, %s4694_s16  }
   0xf   : > { %s4645_s24 = smul.u32 (%p51_p3), 288, %s4698_s17 }
  0x10   : > { %s4646_s25 = smul.u32 (%p51_p3), 1728, %s157_s23 }
  0x11   : > { %s4761_s28 = scalar_lea.vmem (%p51_p3), %s5766_s1, %s4645_s24 }
  0x12   : > { %v175_v0 = vld [vmem:[%s4761_s28] sm:$0xff] (%p51_p3)  ;;  %v177_v1 = vld [vmem:[%s4761_s28 + $0x8] sm:$0xff] (%p51_p3)  ;;  %v179_v2 = vld [vmem:[%s4761_s28 + $0x10] sm:$0xff] (%p51_p3)  ;;  %s4766_s29 = scalar_lea.vmem (%p51_p3), [#allocation2], %s4646_s25 }
  0x13   : > { %176 = vst [vmem:[%s4766_s29] sm:$0xff] (%p51_p3), %v175_v0  ;;  %178 = vst [vmem:[%s4766_s29 + $0x8] sm:$0xff] (%p51_p3), %v177_v1  ;;  %v181_v3 = vld [vmem:[%s4761_s28 + $0x18] sm:$0xff] (%p51_p3)  ;;  %v183_v4 = vld [vmem:[%s4761_s28 + $0x20] sm:$0xff] (%p51_p3) }
  0x14   : > { %180 = vst [vmem:[%s4766_s29 + $0x10] sm:$0xff] (%p51_p3), %v179_v2  ;;  %v185_v5 = vld [vmem:[%s4761_s28 + $0x28] sm:$0xff] (%p51_p3)  ;;  %182 = vst [vmem:[%s4766_s29 + $0x18] sm:$0xff] (%p51_p3), %v181_v3  ;;  %v187_v6 = vld [vmem:[%s4761_s28 + $0x30] sm:$0xff] (%p51_p3) }
  0x15   : > { %184 = vst [vmem:[%s4766_s29 + $0x20] sm:$0xff] %v183_v4  ;;  %186 = vst [vmem:[%s4766_s29 + $0x28] sm:$0xff] %v185_v5  ;;  %v189_v7 = vld [vmem:[%s4761_s28 + $0x38] sm:$0xff]  ;;  %v191_v8 = vld [vmem:[%s4761_s28 + $0x40] sm:$0xff] }
  0x16   : > { %188 = vst [vmem:[%s4766_s29 + $0x30] sm:$0xff] %v187_v6  ;;  %190 = vst [vmem:[%s4766_s29 + $0x38] sm:$0xff] %v189_v7  ;;  %v193_v9 = vld [vmem:[%s4761_s28 + $0x48] sm:$0xff]  ;;  %v195_v10 = vld [vmem:[%s4761_s28 + $0x50] sm:$0xff] }
  0x17   : > { %192 = vst [vmem:[%s4766_s29 + $0x40] sm:$0xff] %v191_v8  ;;  %v197_v11 = vld [vmem:[%s4761_s28 + $0x58] sm:$0xff]  ;;  %194 = vst [vmem:[%s4766_s29 + $0x48] sm:$0xff] %v193_v9  ;;  %v199_v12 = vld [vmem:[%s4761_s28 + $0x60] sm:$0xff] }
  0x18   : > { %196 = vst [vmem:[%s4766_s29 + $0x50] sm:$0xff] %v195_v10  ;;  %198 = vst [vmem:[%s4766_s29 + $0x58] sm:$0xff] %v197_v11  ;;  %v201_v13 = vld [vmem:[%s4761_s28 + $0x68] sm:$0xff]  ;;  %v203_v14 = vld [vmem:[%s4761_s28 + $0x70] sm:$0xff] }
  0x19   : > { %200 = vst [vmem:[%s4766_s29 + $0x60] sm:$0xff] %v199_v12  ;;  %202 = vst [vmem:[%s4766_s29 + $0x68] sm:$0xff] %v201_v13  ;;  %v205_v15 = vld [vmem:[%s4761_s28 + $0x78] sm:$0xff]  ;;  %v207_v16 = vld [vmem:[%s4761_s28 + $0x80] sm:$0xff] }
  0x1a   : > { %204 = vst [vmem:[%s4766_s29 + $0x70] sm:$0xff] %v203_v14  ;;  %v209_v17 = vld [vmem:[%s4761_s28 + $0x88] sm:$0xff]  ;;  %206 = vst [vmem:[%s4766_s29 + $0x78] sm:$0xff] %v205_v15  ;;  %v211_v18 = vld [vmem:[%s4761_s28 + $0x90] sm:$0xff] }
  0x1b   : > { %208 = vst [vmem:[%s4766_s29 + $0x80] sm:$0xff] %v207_v16  ;;  %210 = vst [vmem:[%s4766_s29 + $0x88] sm:$0xff] %v209_v17  ;;  %v213_v19 = vld [vmem:[%s4761_s28 + $0x98] sm:$0xff]  ;;  %v215_v20 = vld [vmem:[%s4761_s28 + $0xa0] sm:$0xff] }
  0x1c   : > { %212 = vst [vmem:[%s4766_s29 + $0x90] sm:$0xff] %v211_v18  ;;  %214 = vst [vmem:[%s4766_s29 + $0x98] sm:$0xff] %v213_v19  ;;  %v217_v21 = vld [vmem:[%s4761_s28 + $0xa8] sm:$0xff]  ;;  %v219_v22 = vld [vmem:[%s4761_s28 + $0xb0] sm:$0xff] }
  0x1d   : > { %216 = vst [vmem:[%s4766_s29 + $0xa0] sm:$0xff] %v215_v20  ;;  %v221_v23 = vld [vmem:[%s4761_s28 + $0xb8] sm:$0xff]  ;;  %218 = vst [vmem:[%s4766_s29 + $0xa8] sm:$0xff] %v217_v21  ;;  %v223_v24 = vld [vmem:[%s4761_s28 + $0xc0] sm:$0xff] }
  0x1e   : > { %220 = vst [vmem:[%s4766_s29 + $0xb0] sm:$0xff] %v219_v22  ;;  %222 = vst [vmem:[%s4766_s29 + $0xb8] sm:$0xff] %v221_v23  ;;  %v225_v25 = vld [vmem:[%s4761_s28 + $0xc8] sm:$0xff]  ;;  %v227_v26 = vld [vmem:[%s4761_s28 + $0xd0] sm:$0xff] }
  0x1f   : > { %224 = vst [vmem:[%s4766_s29 + $0xc0] sm:$0xff] %v223_v24  ;;  %226 = vst [vmem:[%s4766_s29 + $0xc8] sm:$0xff] %v225_v25  ;;  %v229_v27 = vld [vmem:[%s4761_s28 + $0xd8] sm:$0xff]  ;;  %v231_v28 = vld [vmem:[%s4761_s28 + $0xe0] sm:$0xff] }
  0x20   : > { %228 = vst [vmem:[%s4766_s29 + $0xd0] sm:$0xff] %v227_v26  ;;  %v233_v29 = vld [vmem:[%s4761_s28 + $0xe8] sm:$0xff]  ;;  %230 = vst [vmem:[%s4766_s29 + $0xd8] sm:$0xff] %v229_v27  ;;  %v235_v30 = vld [vmem:[%s4761_s28 + $0xf0] sm:$0xff] }
  0x21   : > { %232 = vst [vmem:[%s4766_s29 + $0xe0] sm:$0xff] %v231_v28  ;;  %234 = vst [vmem:[%s4766_s29 + $0xe8] sm:$0xff] %v233_v29  ;;  %v237_v31 = vld [vmem:[%s4761_s28 + $0xf8] sm:$0xff]  ;;  %v239_v32 = vld [vmem:[%s4761_s28 + $0x100] sm:$0xff] }
  0x22   : > { %236 = vst [vmem:[%s4766_s29 + $0xf0] sm:$0xff] %v235_v30  ;;  %238 = vst [vmem:[%s4766_s29 + $0xf8] sm:$0xff] %v237_v31  ;;  %v241_v33 = vld [vmem:[%s4761_s28 + $0x108] sm:$0xff]  ;;  %v243_v34 = vld [vmem:[%s4761_s28 + $0x110] sm:$0xff] }
  0x23   : > { %240 = vst [vmem:[%s4766_s29 + $0x100] sm:$0xff] %v239_v32  ;;  %v245_v35 = vld [vmem:[%s4761_s28 + $0x118] sm:$0xff]  ;;  %242 = vst [vmem:[%s4766_s29 + $0x108] sm:$0xff] %v241_v33  ;;  %v247_v36 = vld [vmem:[%s4761_s28 + $0x240] sm:$0xff] }
  0x24   : > { %244 = vst [vmem:[%s4766_s29 + $0x110] sm:$0xff] %v243_v34  ;;  %246 = vst [vmem:[%s4766_s29 + $0x118] sm:$0xff] %v245_v35  ;;  %v249_v37 = vld [vmem:[%s4761_s28 + $0x248] sm:$0xff]  ;;  %v251_v38 = vld [vmem:[%s4761_s28 + $0x250] sm:$0xff] }
  0x25   : > { %248 = vst [vmem:[%s4766_s29 + $0x120] sm:$0xff] %v247_v36  ;;  %250 = vst [vmem:[%s4766_s29 + $0x128] sm:$0xff] %v249_v37  ;;  %v253_v39 = vld [vmem:[%s4761_s28 + $0x258] sm:$0xff]  ;;  %v255_v40 = vld [vmem:[%s4761_s28 + $0x260] sm:$0xff] }
  0x26   : > { %252 = vst [vmem:[%s4766_s29 + $0x130] sm:$0xff] %v251_v38  ;;  %v257_v41 = vld [vmem:[%s4761_s28 + $0x268] sm:$0xff]  ;;  %254 = vst [vmem:[%s4766_s29 + $0x138] sm:$0xff] %v253_v39  ;;  %v259_v42 = vld [vmem:[%s4761_s28 + $0x270] sm:$0xff] }
  0x27   : > { %256 = vst [vmem:[%s4766_s29 + $0x140] sm:$0xff] %v255_v40  ;;  %258 = vst [vmem:[%s4766_s29 + $0x148] sm:$0xff] %v257_v41  ;;  %v261_v43 = vld [vmem:[%s4761_s28 + $0x278] sm:$0xff]  ;;  %v263_v44 = vld [vmem:[%s4761_s28 + $0x280] sm:$0xff] }
  0x28   : > { %260 = vst [vmem:[%s4766_s29 + $0x150] sm:$0xff] %v259_v42  ;;  %262 = vst [vmem:[%s4766_s29 + $0x158] sm:$0xff] %v261_v43  ;;  %v265_v45 = vld [vmem:[%s4761_s28 + $0x288] sm:$0xff]  ;;  %v267_v46 = vld [vmem:[%s4761_s28 + $0x290] sm:$0xff] }
  0x29   : > { %264 = vst [vmem:[%s4766_s29 + $0x160] sm:$0xff] %v263_v44  ;;  %v269_v47 = vld [vmem:[%s4761_s28 + $0x298] sm:$0xff]  ;;  %266 = vst [vmem:[%s4766_s29 + $0x168] sm:$0xff] %v265_v45  ;;  %v271_v48 = vld [vmem:[%s4761_s28 + $0x2a0] sm:$0xff] }
  0x2a   : > { %268 = vst [vmem:[%s4766_s29 + $0x170] sm:$0xff] %v267_v46  ;;  %270 = vst [vmem:[%s4766_s29 + $0x178] sm:$0xff] %v269_v47  ;;  %v273_v49 = vld [vmem:[%s4761_s28 + $0x2a8] sm:$0xff]  ;;  %v275_v50 = vld [vmem:[%s4761_s28 + $0x2b0] sm:$0xff] }
  0x2b   : > { %272 = vst [vmem:[%s4766_s29 + $0x180] sm:$0xff] %v271_v48  ;;  %274 = vst [vmem:[%s4766_s29 + $0x188] sm:$0xff] %v273_v49  ;;  %v277_v51 = vld [vmem:[%s4761_s28 + $0x2b8] sm:$0xff]  ;;  %v279_v52 = vld [vmem:[%s4761_s28 + $0x2c0] sm:$0xff] }
  0x2c   : > { %276 = vst [vmem:[%s4766_s29 + $0x190] sm:$0xff] %v275_v50  ;;  %v281_v53 = vld [vmem:[%s4761_s28 + $0x2c8] sm:$0xff]  ;;  %278 = vst [vmem:[%s4766_s29 + $0x198] sm:$0xff] %v277_v51  ;;  %v283_v54 = vld [vmem:[%s4761_s28 + $0x2d0] sm:$0xff] }
  0x2d   : > { %280 = vst [vmem:[%s4766_s29 + $0x1a0] sm:$0xff] %v279_v52  ;;  %282 = vst [vmem:[%s4766_s29 + $0x1a8] sm:$0xff] %v281_v53  ;;  %v285_v55 = vld [vmem:[%s4761_s28 + $0x2d8] sm:$0xff]  ;;  %v287_v56 = vld [vmem:[%s4761_s28 + $0x2e0] sm:$0xff] }
  0x2e   : > { %284 = vst [vmem:[%s4766_s29 + $0x1b0] sm:$0xff] %v283_v54  ;;  %286 = vst [vmem:[%s4766_s29 + $0x1b8] sm:$0xff] %v285_v55  ;;  %v289_v57 = vld [vmem:[%s4761_s28 + $0x2e8] sm:$0xff]  ;;  %v291_v58 = vld [vmem:[%s4761_s28 + $0x2f0] sm:$0xff] }
  0x2f   : > { %288 = vst [vmem:[%s4766_s29 + $0x1c0] sm:$0xff] %v287_v56  ;;  %v293_v59 = vld [vmem:[%s4761_s28 + $0x2f8] sm:$0xff]  ;;  %290 = vst [vmem:[%s4766_s29 + $0x1c8] sm:$0xff] %v289_v57  ;;  %v295_v60 = vld [vmem:[%s4761_s28 + $0x300] sm:$0xff] }
  0x30   : > { %292 = vst [vmem:[%s4766_s29 + $0x1d0] sm:$0xff] %v291_v58  ;;  %294 = vst [vmem:[%s4766_s29 + $0x1d8] sm:$0xff] %v293_v59  ;;  %v297_v61 = vld [vmem:[%s4761_s28 + $0x308] sm:$0xff]  ;;  %v299_v62 = vld [vmem:[%s4761_s28 + $0x310] sm:$0xff] }
  0x31   : > { %296 = vst [vmem:[%s4766_s29 + $0x1e0] sm:$0xff] %v295_v60  ;;  %298 = vst [vmem:[%s4766_s29 + $0x1e8] sm:$0xff] %v297_v61  ;;  %v301_v63 = vld [vmem:[%s4761_s28 + $0x318] sm:$0xff]  ;;  %v303_v0 = vld [vmem:[%s4761_s28 + $0x320] sm:$0xff] }
  0x32   : > { %300 = vst [vmem:[%s4766_s29 + $0x1f0] sm:$0xff] %v299_v62  ;;  %v305_v1 = vld [vmem:[%s4761_s28 + $0x328] sm:$0xff]  ;;  %302 = vst [vmem:[%s4766_s29 + $0x1f8] sm:$0xff] %v301_v63  ;;  %v307_v2 = vld [vmem:[%s4761_s28 + $0x330] sm:$0xff] }
  0x33   : > { %304 = vst [vmem:[%s4766_s29 + $0x200] sm:$0xff] %v303_v0  ;;  %306 = vst [vmem:[%s4766_s29 + $0x208] sm:$0xff] %v305_v1  ;;  %v309_v3 = vld [vmem:[%s4761_s28 + $0x338] sm:$0xff]  ;;  %v311_v4 = vld [vmem:[%s4761_s28 + $0x340] sm:$0xff] }
  0x34   : > { %308 = vst [vmem:[%s4766_s29 + $0x210] sm:$0xff] %v307_v2  ;;  %310 = vst [vmem:[%s4766_s29 + $0x218] sm:$0xff] %v309_v3  ;;  %v313_v5 = vld [vmem:[%s4761_s28 + $0x348] sm:$0xff]  ;;  %v315_v6 = vld [vmem:[%s4761_s28 + $0x350] sm:$0xff] }
  0x35   : > { %312 = vst [vmem:[%s4766_s29 + $0x220] sm:$0xff] %v311_v4  ;;  %v317_v7 = vld [vmem:[%s4761_s28 + $0x358] sm:$0xff]  ;;  %314 = vst [vmem:[%s4766_s29 + $0x228] sm:$0xff] %v313_v5  ;;  %v319_v8 = vld [vmem:[%s4761_s28 + $0x480] sm:$0xff] }
  0x36   : > { %316 = vst [vmem:[%s4766_s29 + $0x230] sm:$0xff] %v315_v6  ;;  %318 = vst [vmem:[%s4766_s29 + $0x238] sm:$0xff] %v317_v7  ;;  %v321_v9 = vld [vmem:[%s4761_s28 + $0x488] sm:$0xff]  ;;  %v323_v10 = vld [vmem:[%s4761_s28 + $0x490] sm:$0xff] }
  0x37   : > { %320 = vst [vmem:[%s4766_s29 + $0x240] sm:$0xff] %v319_v8  ;;  %322 = vst [vmem:[%s4766_s29 + $0x248] sm:$0xff] %v321_v9  ;;  %v325_v11 = vld [vmem:[%s4761_s28 + $0x498] sm:$0xff]  ;;  %v327_v12 = vld [vmem:[%s4761_s28 + $0x4a0] sm:$0xff] }
  0x38   : > { %324 = vst [vmem:[%s4766_s29 + $0x250] sm:$0xff] %v323_v10  ;;  %v329_v13 = vld [vmem:[%s4761_s28 + $0x4a8] sm:$0xff]  ;;  %326 = vst [vmem:[%s4766_s29 + $0x258] sm:$0xff] %v325_v11  ;;  %v331_v14 = vld [vmem:[%s4761_s28 + $0x4b0] sm:$0xff] }
  0x39   : > { %328 = vst [vmem:[%s4766_s29 + $0x260] sm:$0xff] %v327_v12  ;;  %330 = vst [vmem:[%s4766_s29 + $0x268] sm:$0xff] %v329_v13  ;;  %v333_v15 = vld [vmem:[%s4761_s28 + $0x4b8] sm:$0xff]  ;;  %v335_v16 = vld [vmem:[%s4761_s28 + $0x4c0] sm:$0xff] }
  0x3a   : > { %332 = vst [vmem:[%s4766_s29 + $0x270] sm:$0xff] %v331_v14  ;;  %334 = vst [vmem:[%s4766_s29 + $0x278] sm:$0xff] %v333_v15  ;;  %v337_v17 = vld [vmem:[%s4761_s28 + $0x4c8] sm:$0xff]  ;;  %v339_v18 = vld [vmem:[%s4761_s28 + $0x4d0] sm:$0xff] }
  0x3b   : > { %336 = vst [vmem:[%s4766_s29 + $0x280] sm:$0xff] %v335_v16  ;;  %v341_v19 = vld [vmem:[%s4761_s28 + $0x4d8] sm:$0xff]  ;;  %338 = vst [vmem:[%s4766_s29 + $0x288] sm:$0xff] %v337_v17  ;;  %v343_v20 = vld [vmem:[%s4761_s28 + $0x4e0] sm:$0xff] }
  0x3c   : > { %340 = vst [vmem:[%s4766_s29 + $0x290] sm:$0xff] %v339_v18  ;;  %342 = vst [vmem:[%s4766_s29 + $0x298] sm:$0xff] %v341_v19  ;;  %v345_v21 = vld [vmem:[%s4761_s28 + $0x4e8] sm:$0xff]  ;;  %v347_v22 = vld [vmem:[%s4761_s28 + $0x4f0] sm:$0xff] }
  0x3d   : > { %344 = vst [vmem:[%s4766_s29 + $0x2a0] sm:$0xff] %v343_v20  ;;  %346 = vst [vmem:[%s4766_s29 + $0x2a8] sm:$0xff] %v345_v21  ;;  %v349_v23 = vld [vmem:[%s4761_s28 + $0x4f8] sm:$0xff]  ;;  %v351_v24 = vld [vmem:[%s4761_s28 + $0x500] sm:$0xff] }
  0x3e   : > { %348 = vst [vmem:[%s4766_s29 + $0x2b0] sm:$0xff] %v347_v22  ;;  %v353_v25 = vld [vmem:[%s4761_s28 + $0x508] sm:$0xff]  ;;  %350 = vst [vmem:[%s4766_s29 + $0x2b8] sm:$0xff] %v349_v23  ;;  %v355_v26 = vld [vmem:[%s4761_s28 + $0x510] sm:$0xff] }
  0x3f   : > { %352 = vst [vmem:[%s4766_s29 + $0x2c0] sm:$0xff] %v351_v24  ;;  %354 = vst [vmem:[%s4766_s29 + $0x2c8] sm:$0xff] %v353_v25  ;;  %v357_v27 = vld [vmem:[%s4761_s28 + $0x518] sm:$0xff]  ;;  %v359_v28 = vld [vmem:[%s4761_s28 + $0x520] sm:$0xff] }
  0x40   : > { %356 = vst [vmem:[%s4766_s29 + $0x2d0] sm:$0xff] %v355_v26  ;;  %358 = vst [vmem:[%s4766_s29 + $0x2d8] sm:$0xff] %v357_v27  ;;  %v361_v29 = vld [vmem:[%s4761_s28 + $0x528] sm:$0xff]  ;;  %v363_v30 = vld [vmem:[%s4761_s28 + $0x530] sm:$0xff] }
  0x41   : > { %360 = vst [vmem:[%s4766_s29 + $0x2e0] sm:$0xff] %v359_v28  ;;  %v365_v31 = vld [vmem:[%s4761_s28 + $0x538] sm:$0xff]  ;;  %362 = vst [vmem:[%s4766_s29 + $0x2e8] sm:$0xff] %v361_v29  ;;  %v367_v32 = vld [vmem:[%s4761_s28 + $0x540] sm:$0xff] }
  0x42   : > { %364 = vst [vmem:[%s4766_s29 + $0x2f0] sm:$0xff] %v363_v30  ;;  %366 = vst [vmem:[%s4766_s29 + $0x2f8] sm:$0xff] %v365_v31  ;;  %v369_v33 = vld [vmem:[%s4761_s28 + $0x548] sm:$0xff]  ;;  %v371_v34 = vld [vmem:[%s4761_s28 + $0x550] sm:$0xff] }
  0x43   : > { %368 = vst [vmem:[%s4766_s29 + $0x300] sm:$0xff] %v367_v32  ;;  %370 = vst [vmem:[%s4766_s29 + $0x308] sm:$0xff] %v369_v33  ;;  %v373_v35 = vld [vmem:[%s4761_s28 + $0x558] sm:$0xff]  ;;  %v375_v36 = vld [vmem:[%s4761_s28 + $0x560] sm:$0xff] }
  0x44   : > { %372 = vst [vmem:[%s4766_s29 + $0x310] sm:$0xff] %v371_v34  ;;  %v377_v37 = vld [vmem:[%s4761_s28 + $0x568] sm:$0xff]  ;;  %374 = vst [vmem:[%s4766_s29 + $0x318] sm:$0xff] %v373_v35  ;;  %v379_v38 = vld [vmem:[%s4761_s28 + $0x570] sm:$0xff] }
  0x45   : > { %376 = vst [vmem:[%s4766_s29 + $0x320] sm:$0xff] %v375_v36  ;;  %378 = vst [vmem:[%s4766_s29 + $0x328] sm:$0xff] %v377_v37  ;;  %v381_v39 = vld [vmem:[%s4761_s28 + $0x578] sm:$0xff]  ;;  %v383_v40 = vld [vmem:[%s4761_s28 + $0x580] sm:$0xff] }
  0x46   : > { %380 = vst [vmem:[%s4766_s29 + $0x330] sm:$0xff] %v379_v38  ;;  %382 = vst [vmem:[%s4766_s29 + $0x338] sm:$0xff] %v381_v39  ;;  %v385_v41 = vld [vmem:[%s4761_s28 + $0x588] sm:$0xff]  ;;  %v387_v42 = vld [vmem:[%s4761_s28 + $0x590] sm:$0xff] }
  0x47   : > { %384 = vst [vmem:[%s4766_s29 + $0x340] sm:$0xff] %v383_v40  ;;  %v389_v43 = vld [vmem:[%s4761_s28 + $0x598] sm:$0xff]  ;;  %386 = vst [vmem:[%s4766_s29 + $0x348] sm:$0xff] %v385_v41  ;;  %v391_v44 = vld [vmem:[%s4761_s28 + $0x6c0] sm:$0xff] }
  0x48   : > { %388 = vst [vmem:[%s4766_s29 + $0x350] sm:$0xff] %v387_v42  ;;  %390 = vst [vmem:[%s4766_s29 + $0x358] sm:$0xff] %v389_v43  ;;  %v393_v45 = vld [vmem:[%s4761_s28 + $0x6c8] sm:$0xff]  ;;  %v395_v46 = vld [vmem:[%s4761_s28 + $0x6d0] sm:$0xff] }
  0x49   : > { %392 = vst [vmem:[%s4766_s29 + $0x360] sm:$0xff] %v391_v44  ;;  %394 = vst [vmem:[%s4766_s29 + $0x368] sm:$0xff] %v393_v45  ;;  %v397_v47 = vld [vmem:[%s4761_s28 + $0x6d8] sm:$0xff]  ;;  %v399_v48 = vld [vmem:[%s4761_s28 + $0x6e0] sm:$0xff] }
  0x4a   : > { %396 = vst [vmem:[%s4766_s29 + $0x370] sm:$0xff] %v395_v46  ;;  %v401_v49 = vld [vmem:[%s4761_s28 + $0x6e8] sm:$0xff]  ;;  %398 = vst [vmem:[%s4766_s29 + $0x378] sm:$0xff] %v397_v47  ;;  %v403_v50 = vld [vmem:[%s4761_s28 + $0x6f0] sm:$0xff] }
  0x4b   : > { %400 = vst [vmem:[%s4766_s29 + $0x380] sm:$0xff] %v399_v48  ;;  %402 = vst [vmem:[%s4766_s29 + $0x388] sm:$0xff] %v401_v49  ;;  %v405_v51 = vld [vmem:[%s4761_s28 + $0x6f8] sm:$0xff]  ;;  %v407_v52 = vld [vmem:[%s4761_s28 + $0x700] sm:$0xff] }
  0x4c   : > { %404 = vst [vmem:[%s4766_s29 + $0x390] sm:$0xff] %v403_v50  ;;  %406 = vst [vmem:[%s4766_s29 + $0x398] sm:$0xff] %v405_v51  ;;  %v409_v53 = vld [vmem:[%s4761_s28 + $0x708] sm:$0xff]  ;;  %v411_v54 = vld [vmem:[%s4761_s28 + $0x710] sm:$0xff] }
  0x4d   : > { %408 = vst [vmem:[%s4766_s29 + $0x3a0] sm:$0xff] %v407_v52  ;;  %v413_v55 = vld [vmem:[%s4761_s28 + $0x718] sm:$0xff]  ;;  %410 = vst [vmem:[%s4766_s29 + $0x3a8] sm:$0xff] %v409_v53  ;;  %v415_v56 = vld [vmem:[%s4761_s28 + $0x720] sm:$0xff] }
  0x4e   : > { %412 = vst [vmem:[%s4766_s29 + $0x3b0] sm:$0xff] %v411_v54  ;;  %414 = vst [vmem:[%s4766_s29 + $0x3b8] sm:$0xff] %v413_v55  ;;  %v417_v57 = vld [vmem:[%s4761_s28 + $0x728] sm:$0xff]  ;;  %v419_v58 = vld [vmem:[%s4761_s28 + $0x730] sm:$0xff] }
  0x4f   : > { %416 = vst [vmem:[%s4766_s29 + $0x3c0] sm:$0xff] %v415_v56  ;;  %418 = vst [vmem:[%s4766_s29 + $0x3c8] sm:$0xff] %v417_v57  ;;  %v421_v59 = vld [vmem:[%s4761_s28 + $0x738] sm:$0xff]  ;;  %v423_v60 = vld [vmem:[%s4761_s28 + $0x740] sm:$0xff] }
  0x50   : > { %420 = vst [vmem:[%s4766_s29 + $0x3d0] sm:$0xff] %v419_v58  ;;  %v425_v61 = vld [vmem:[%s4761_s28 + $0x748] sm:$0xff]  ;;  %422 = vst [vmem:[%s4766_s29 + $0x3d8] sm:$0xff] %v421_v59  ;;  %v427_v62 = vld [vmem:[%s4761_s28 + $0x750] sm:$0xff] }
  0x51   : > { %424 = vst [vmem:[%s4766_s29 + $0x3e0] sm:$0xff] %v423_v60  ;;  %426 = vst [vmem:[%s4766_s29 + $0x3e8] sm:$0xff] %v425_v61  ;;  %v429_v63 = vld [vmem:[%s4761_s28 + $0x758] sm:$0xff]  ;;  %v431_v0 = vld [vmem:[%s4761_s28 + $0x760] sm:$0xff] }
  0x52   : > { %428 = vst [vmem:[%s4766_s29 + $0x3f0] sm:$0xff] %v427_v62  ;;  %430 = vst [vmem:[%s4766_s29 + $0x3f8] sm:$0xff] %v429_v63  ;;  %v433_v1 = vld [vmem:[%s4761_s28 + $0x768] sm:$0xff]  ;;  %v435_v2 = vld [vmem:[%s4761_s28 + $0x770] sm:$0xff] }
  0x53   : > { %432 = vst [vmem:[%s4766_s29 + $0x400] sm:$0xff] %v431_v0  ;;  %v437_v3 = vld [vmem:[%s4761_s28 + $0x778] sm:$0xff]  ;;  %434 = vst [vmem:[%s4766_s29 + $0x408] sm:$0xff] %v433_v1  ;;  %v439_v4 = vld [vmem:[%s4761_s28 + $0x780] sm:$0xff] }
  0x54   : > { %436 = vst [vmem:[%s4766_s29 + $0x410] sm:$0xff] %v435_v2  ;;  %438 = vst [vmem:[%s4766_s29 + $0x418] sm:$0xff] %v437_v3  ;;  %v441_v5 = vld [vmem:[%s4761_s28 + $0x788] sm:$0xff]  ;;  %v443_v6 = vld [vmem:[%s4761_s28 + $0x790] sm:$0xff] }
  0x55   : > { %440 = vst [vmem:[%s4766_s29 + $0x420] sm:$0xff] %v439_v4  ;;  %442 = vst [vmem:[%s4766_s29 + $0x428] sm:$0xff] %v441_v5  ;;  %v445_v7 = vld [vmem:[%s4761_s28 + $0x798] sm:$0xff]  ;;  %v447_v8 = vld [vmem:[%s4761_s28 + $0x7a0] sm:$0xff] }
  0x56   : > { %444 = vst [vmem:[%s4766_s29 + $0x430] sm:$0xff] %v443_v6  ;;  %v449_v9 = vld [vmem:[%s4761_s28 + $0x7a8] sm:$0xff]  ;;  %446 = vst [vmem:[%s4766_s29 + $0x438] sm:$0xff] %v445_v7  ;;  %v451_v10 = vld [vmem:[%s4761_s28 + $0x7b0] sm:$0xff] }
  0x57   : > { %448 = vst [vmem:[%s4766_s29 + $0x440] sm:$0xff] %v447_v8  ;;  %450 = vst [vmem:[%s4766_s29 + $0x448] sm:$0xff] %v449_v9  ;;  %v453_v11 = vld [vmem:[%s4761_s28 + $0x7b8] sm:$0xff]  ;;  %v455_v12 = vld [vmem:[%s4761_s28 + $0x7c0] sm:$0xff] }
  0x58   : > { %452 = vst [vmem:[%s4766_s29 + $0x450] sm:$0xff] %v451_v10  ;;  %454 = vst [vmem:[%s4766_s29 + $0x458] sm:$0xff] %v453_v11  ;;  %v457_v13 = vld [vmem:[%s4761_s28 + $0x7c8] sm:$0xff]  ;;  %v459_v14 = vld [vmem:[%s4761_s28 + $0x7d0] sm:$0xff] }
  0x59   : > { %456 = vst [vmem:[%s4766_s29 + $0x460] sm:$0xff] %v455_v12  ;;  %v461_v15 = vld [vmem:[%s4761_s28 + $0x7d8] sm:$0xff]  ;;  %458 = vst [vmem:[%s4766_s29 + $0x468] sm:$0xff] %v457_v13  ;;  %v463_v16 = vld [vmem:[%s4761_s28 + $0x900] sm:$0xff] }
  0x5a   : > { %460 = vst [vmem:[%s4766_s29 + $0x470] sm:$0xff] %v459_v14  ;;  %462 = vst [vmem:[%s4766_s29 + $0x478] sm:$0xff] %v461_v15  ;;  %v465_v17 = vld [vmem:[%s4761_s28 + $0x908] sm:$0xff]  ;;  %v467_v18 = vld [vmem:[%s4761_s28 + $0x910] sm:$0xff] }
  0x5b   : > { %464 = vst [vmem:[%s4766_s29 + $0x480] sm:$0xff] %v463_v16  ;;  %466 = vst [vmem:[%s4766_s29 + $0x488] sm:$0xff] %v465_v17  ;;  %v469_v19 = vld [vmem:[%s4761_s28 + $0x918] sm:$0xff]  ;;  %v471_v20 = vld [vmem:[%s4761_s28 + $0x920] sm:$0xff] }
  0x5c   : > { %468 = vst [vmem:[%s4766_s29 + $0x490] sm:$0xff] %v467_v18  ;;  %v473_v21 = vld [vmem:[%s4761_s28 + $0x928] sm:$0xff]  ;;  %470 = vst [vmem:[%s4766_s29 + $0x498] sm:$0xff] %v469_v19  ;;  %v475_v22 = vld [vmem:[%s4761_s28 + $0x930] sm:$0xff] }
  0x5d   : > { %472 = vst [vmem:[%s4766_s29 + $0x4a0] sm:$0xff] %v471_v20  ;;  %474 = vst [vmem:[%s4766_s29 + $0x4a8] sm:$0xff] %v473_v21  ;;  %v477_v23 = vld [vmem:[%s4761_s28 + $0x938] sm:$0xff]  ;;  %v479_v24 = vld [vmem:[%s4761_s28 + $0x940] sm:$0xff] }
  0x5e   : > { %476 = vst [vmem:[%s4766_s29 + $0x4b0] sm:$0xff] %v475_v22  ;;  %478 = vst [vmem:[%s4766_s29 + $0x4b8] sm:$0xff] %v477_v23  ;;  %v481_v25 = vld [vmem:[%s4761_s28 + $0x948] sm:$0xff]  ;;  %v483_v26 = vld [vmem:[%s4761_s28 + $0x950] sm:$0xff] }
  0x5f   : > { %480 = vst [vmem:[%s4766_s29 + $0x4c0] sm:$0xff] %v479_v24  ;;  %v485_v27 = vld [vmem:[%s4761_s28 + $0x958] sm:$0xff]  ;;  %482 = vst [vmem:[%s4766_s29 + $0x4c8] sm:$0xff] %v481_v25  ;;  %v487_v28 = vld [vmem:[%s4761_s28 + $0x960] sm:$0xff] }
  0x60   : > { %484 = vst [vmem:[%s4766_s29 + $0x4d0] sm:$0xff] %v483_v26  ;;  %486 = vst [vmem:[%s4766_s29 + $0x4d8] sm:$0xff] %v485_v27  ;;  %v489_v29 = vld [vmem:[%s4761_s28 + $0x968] sm:$0xff]  ;;  %v491_v30 = vld [vmem:[%s4761_s28 + $0x970] sm:$0xff] }
  0x61   : > { %488 = vst [vmem:[%s4766_s29 + $0x4e0] sm:$0xff] %v487_v28  ;;  %490 = vst [vmem:[%s4766_s29 + $0x4e8] sm:$0xff] %v489_v29  ;;  %v493_v31 = vld [vmem:[%s4761_s28 + $0x978] sm:$0xff]  ;;  %v495_v32 = vld [vmem:[%s4761_s28 + $0x980] sm:$0xff] }
  0x62   : > { %492 = vst [vmem:[%s4766_s29 + $0x4f0] sm:$0xff] %v491_v30  ;;  %v497_v33 = vld [vmem:[%s4761_s28 + $0x988] sm:$0xff]  ;;  %494 = vst [vmem:[%s4766_s29 + $0x4f8] sm:$0xff] %v493_v31  ;;  %v499_v34 = vld [vmem:[%s4761_s28 + $0x990] sm:$0xff] }
  0x63   : > { %496 = vst [vmem:[%s4766_s29 + $0x500] sm:$0xff] %v495_v32  ;;  %498 = vst [vmem:[%s4766_s29 + $0x508] sm:$0xff] %v497_v33  ;;  %v501_v35 = vld [vmem:[%s4761_s28 + $0x998] sm:$0xff]  ;;  %v503_v36 = vld [vmem:[%s4761_s28 + $0x9a0] sm:$0xff] }
  0x64   : > { %500 = vst [vmem:[%s4766_s29 + $0x510] sm:$0xff] %v499_v34  ;;  %502 = vst [vmem:[%s4766_s29 + $0x518] sm:$0xff] %v501_v35  ;;  %v505_v37 = vld [vmem:[%s4761_s28 + $0x9a8] sm:$0xff]  ;;  %v507_v38 = vld [vmem:[%s4761_s28 + $0x9b0] sm:$0xff] }
  0x65   : > { %504 = vst [vmem:[%s4766_s29 + $0x520] sm:$0xff] %v503_v36  ;;  %v509_v39 = vld [vmem:[%s4761_s28 + $0x9b8] sm:$0xff]  ;;  %506 = vst [vmem:[%s4766_s29 + $0x528] sm:$0xff] %v505_v37  ;;  %v511_v40 = vld [vmem:[%s4761_s28 + $0x9c0] sm:$0xff] }
  0x66   : > { %508 = vst [vmem:[%s4766_s29 + $0x530] sm:$0xff] %v507_v38  ;;  %510 = vst [vmem:[%s4766_s29 + $0x538] sm:$0xff] %v509_v39  ;;  %v513_v41 = vld [vmem:[%s4761_s28 + $0x9c8] sm:$0xff]  ;;  %v515_v42 = vld [vmem:[%s4761_s28 + $0x9d0] sm:$0xff] }
  0x67   : > { %512 = vst [vmem:[%s4766_s29 + $0x540] sm:$0xff] %v511_v40  ;;  %514 = vst [vmem:[%s4766_s29 + $0x548] sm:$0xff] %v513_v41  ;;  %v517_v43 = vld [vmem:[%s4761_s28 + $0x9d8] sm:$0xff]  ;;  %v519_v44 = vld [vmem:[%s4761_s28 + $0x9e0] sm:$0xff] }
  0x68   : > { %516 = vst [vmem:[%s4766_s29 + $0x550] sm:$0xff] %v515_v42  ;;  %v521_v45 = vld [vmem:[%s4761_s28 + $0x9e8] sm:$0xff]  ;;  %518 = vst [vmem:[%s4766_s29 + $0x558] sm:$0xff] %v517_v43  ;;  %v523_v46 = vld [vmem:[%s4761_s28 + $0x9f0] sm:$0xff] }
  0x69   : > { %520 = vst [vmem:[%s4766_s29 + $0x560] sm:$0xff] %v519_v44  ;;  %522 = vst [vmem:[%s4766_s29 + $0x568] sm:$0xff] %v521_v45  ;;  %v525_v47 = vld [vmem:[%s4761_s28 + $0x9f8] sm:$0xff]  ;;  %v527_v48 = vld [vmem:[%s4761_s28 + $0xa00] sm:$0xff] }
  0x6a   : > { %524 = vst [vmem:[%s4766_s29 + $0x570] sm:$0xff] %v523_v46  ;;  %526 = vst [vmem:[%s4766_s29 + $0x578] sm:$0xff] %v525_v47  ;;  %v529_v49 = vld [vmem:[%s4761_s28 + $0xa08] sm:$0xff]  ;;  %v531_v50 = vld [vmem:[%s4761_s28 + $0xa10] sm:$0xff] }
  0x6b   : > { %528 = vst [vmem:[%s4766_s29 + $0x580] sm:$0xff] %v527_v48  ;;  %v533_v51 = vld [vmem:[%s4761_s28 + $0xa18] sm:$0xff]  ;;  %530 = vst [vmem:[%s4766_s29 + $0x588] sm:$0xff] %v529_v49  ;;  %v535_v52 = vld [vmem:[%s4761_s28 + $0xb40] sm:$0xff] }
  0x6c   : > { %532 = vst [vmem:[%s4766_s29 + $0x590] sm:$0xff] %v531_v50  ;;  %534 = vst [vmem:[%s4766_s29 + $0x598] sm:$0xff] %v533_v51  ;;  %v537_v53 = vld [vmem:[%s4761_s28 + $0xb48] sm:$0xff]  ;;  %v539_v54 = vld [vmem:[%s4761_s28 + $0xb50] sm:$0xff] }
  0x6d   : > { %536 = vst [vmem:[%s4766_s29 + $0x5a0] sm:$0xff] %v535_v52  ;;  %538 = vst [vmem:[%s4766_s29 + $0x5a8] sm:$0xff] %v537_v53  ;;  %v541_v55 = vld [vmem:[%s4761_s28 + $0xb58] sm:$0xff]  ;;  %v543_v56 = vld [vmem:[%s4761_s28 + $0xb60] sm:$0xff] }
  0x6e   : > { %540 = vst [vmem:[%s4766_s29 + $0x5b0] sm:$0xff] %v539_v54  ;;  %v545_v57 = vld [vmem:[%s4761_s28 + $0xb68] sm:$0xff]  ;;  %542 = vst [vmem:[%s4766_s29 + $0x5b8] sm:$0xff] %v541_v55  ;;  %v547_v58 = vld [vmem:[%s4761_s28 + $0xb70] sm:$0xff] }
  0x6f   : > { %544 = vst [vmem:[%s4766_s29 + $0x5c0] sm:$0xff] %v543_v56  ;;  %546 = vst [vmem:[%s4766_s29 + $0x5c8] sm:$0xff] %v545_v57  ;;  %v549_v59 = vld [vmem:[%s4761_s28 + $0xb78] sm:$0xff]  ;;  %v551_v60 = vld [vmem:[%s4761_s28 + $0xb80] sm:$0xff] }
  0x70   : > { %548 = vst [vmem:[%s4766_s29 + $0x5d0] sm:$0xff] %v547_v58  ;;  %550 = vst [vmem:[%s4766_s29 + $0x5d8] sm:$0xff] %v549_v59  ;;  %v553_v61 = vld [vmem:[%s4761_s28 + $0xb88] sm:$0xff]  ;;  %v555_v62 = vld [vmem:[%s4761_s28 + $0xb90] sm:$0xff] }
  0x71   : > { %552 = vst [vmem:[%s4766_s29 + $0x5e0] sm:$0xff] %v551_v60  ;;  %v557_v63 = vld [vmem:[%s4761_s28 + $0xb98] sm:$0xff]  ;;  %554 = vst [vmem:[%s4766_s29 + $0x5e8] sm:$0xff] %v553_v61  ;;  %v559_v0 = vld [vmem:[%s4761_s28 + $0xba0] sm:$0xff] }
  0x72   : > { %556 = vst [vmem:[%s4766_s29 + $0x5f0] sm:$0xff] %v555_v62  ;;  %558 = vst [vmem:[%s4766_s29 + $0x5f8] sm:$0xff] %v557_v63  ;;  %v561_v1 = vld [vmem:[%s4761_s28 + $0xba8] sm:$0xff]  ;;  %v563_v2 = vld [vmem:[%s4761_s28 + $0xbb0] sm:$0xff] }
  0x73   : > { %560 = vst [vmem:[%s4766_s29 + $0x600] sm:$0xff] %v559_v0  ;;  %562 = vst [vmem:[%s4766_s29 + $0x608] sm:$0xff] %v561_v1  ;;  %v565_v3 = vld [vmem:[%s4761_s28 + $0xbb8] sm:$0xff]  ;;  %v567_v4 = vld [vmem:[%s4761_s28 + $0xbc0] sm:$0xff] }
  0x74   : > { %564 = vst [vmem:[%s4766_s29 + $0x610] sm:$0xff] %v563_v2  ;;  %v569_v5 = vld [vmem:[%s4761_s28 + $0xbc8] sm:$0xff]  ;;  %566 = vst [vmem:[%s4766_s29 + $0x618] sm:$0xff] %v565_v3  ;;  %v571_v6 = vld [vmem:[%s4761_s28 + $0xbd0] sm:$0xff] }
  0x75   : > { %568 = vst [vmem:[%s4766_s29 + $0x620] sm:$0xff] %v567_v4  ;;  %570 = vst [vmem:[%s4766_s29 + $0x628] sm:$0xff] %v569_v5  ;;  %v573_v7 = vld [vmem:[%s4761_s28 + $0xbd8] sm:$0xff]  ;;  %v575_v8 = vld [vmem:[%s4761_s28 + $0xbe0] sm:$0xff] }
  0x76   : > { %572 = vst [vmem:[%s4766_s29 + $0x630] sm:$0xff] %v571_v6  ;;  %574 = vst [vmem:[%s4766_s29 + $0x638] sm:$0xff] %v573_v7  ;;  %v577_v9 = vld [vmem:[%s4761_s28 + $0xbe8] sm:$0xff]  ;;  %v579_v10 = vld [vmem:[%s4761_s28 + $0xbf0] sm:$0xff] }
  0x77   : > { %576 = vst [vmem:[%s4766_s29 + $0x640] sm:$0xff] %v575_v8  ;;  %v581_v11 = vld [vmem:[%s4761_s28 + $0xbf8] sm:$0xff]  ;;  %578 = vst [vmem:[%s4766_s29 + $0x648] sm:$0xff] %v577_v9  ;;  %v583_v12 = vld [vmem:[%s4761_s28 + $0xc00] sm:$0xff] }
  0x78   : > { %580 = vst [vmem:[%s4766_s29 + $0x650] sm:$0xff] %v579_v10  ;;  %582 = vst [vmem:[%s4766_s29 + $0x658] sm:$0xff] %v581_v11  ;;  %v585_v13 = vld [vmem:[%s4761_s28 + $0xc08] sm:$0xff]  ;;  %v587_v14 = vld [vmem:[%s4761_s28 + $0xc10] sm:$0xff] }
  0x79   : > { %584 = vst [vmem:[%s4766_s29 + $0x660] sm:$0xff] %v583_v12  ;;  %586 = vst [vmem:[%s4766_s29 + $0x668] sm:$0xff] %v585_v13  ;;  %v589_v15 = vld [vmem:[%s4761_s28 + $0xc18] sm:$0xff]  ;;  %v591_v16 = vld [vmem:[%s4761_s28 + $0xc20] sm:$0xff] }
  0x7a   : > { %588 = vst [vmem:[%s4766_s29 + $0x670] sm:$0xff] %v587_v14  ;;  %v593_v17 = vld [vmem:[%s4761_s28 + $0xc28] sm:$0xff]  ;;  %590 = vst [vmem:[%s4766_s29 + $0x678] sm:$0xff] %v589_v15  ;;  %v595_v18 = vld [vmem:[%s4761_s28 + $0xc30] sm:$0xff] }
  0x7b   : > { %592 = vst [vmem:[%s4766_s29 + $0x680] sm:$0xff] %v591_v16  ;;  %594 = vst [vmem:[%s4766_s29 + $0x688] sm:$0xff] %v593_v17  ;;  %v597_v19 = vld [vmem:[%s4761_s28 + $0xc38] sm:$0xff]  ;;  %v599_v20 = vld [vmem:[%s4761_s28 + $0xc40] sm:$0xff] }
  0x7c   : > { %596 = vst [vmem:[%s4766_s29 + $0x690] sm:$0xff] %v595_v18  ;;  %598 = vst [vmem:[%s4766_s29 + $0x698] sm:$0xff] %v597_v19  ;;  %v601_v21 = vld [vmem:[%s4761_s28 + $0xc48] sm:$0xff]  ;;  %v603_v22 = vld [vmem:[%s4761_s28 + $0xc50] sm:$0xff] }
  0x7d   : > { %600 = vst [vmem:[%s4766_s29 + $0x6a0] sm:$0xff] %v599_v20  ;;  %v605_v23 = vld [vmem:[%s4761_s28 + $0xc58] sm:$0xff]  ;;  %602 = vst [vmem:[%s4766_s29 + $0x6a8] sm:$0xff] %v601_v21 }
  0x7e   : > { %604 = vst [vmem:[%s4766_s29 + $0x6b0] sm:$0xff] %v603_v22  ;;  %606 = vst [vmem:[%s4766_s29 + $0x6b8] sm:$0xff] %v605_v23 }
  0x7f PF: > { %p4353_p5 = scmp.ge.s32.totalorder %s4698_s17, 1  ;;  %p611_p6 = scmp.lt.s32.totalorder %s4698_s17, 3 }
  0x81   : > { %p612_p7 = pnand %p4353_p5, %p611_p6 }
  0x82   : > { %s618_s30 = sand.u32 (!%p612_p7), 1, %s4690_s15   ;;  %v4700_v24 = vmov (!%p612_p7), 0   ;;  %v3428_v25 = vld [vmem:[%s5767_s2] sm:$0xf] (!%p612_p7)  ;;  %vm1948_vm0 = vcmask (!%p612_p7), 392192   ;;  %s644_s15 = smul.u32 (!%p612_p7), 72, %s4348_s18 }
  0x83   : > { %615 = sbr.rel (%p612_p7) target bundleno = 582 (0x246), region = 55  ;;  %1984 = vmatprep.mubr.bf16.mxu0 (!%p612_p7), %v4700_v24  ;;  %2025 = vmatprep.mubr.bf16.mxu1 (!%p612_p7), %v4700_v24  ;;  %v3506_v26 = vld [vmem:[%s5768_s3] sm:$0xf] (!%p612_p7) }
  0x84   : > { %s4647_s5 = smul.u32 (!%p612_p7), 1728, %s618_s30  ;;  %4674 = vset.pattern.permute.xlu0 (!%p612_p7), %v4700_v24  ;;  %v5234_v61 = vld [vmem:[%s5765_s0] sm:$0x3] (!%p612_p7)  ;;  %p645_p8 = scmp.lt.s32.totalorder (!%p612_p7), %s644_s15, 143 }
  0x85   : > { %3431 = vperm.xlu0 (!%p612_p7), %4674, %v3428_v25  }
  0x86   : > { %s5209_s10 = scalar_lea.vmem (!%p612_p7), [#allocation2], %s4647_s5 }
  0x87   : > { %v652_v27 = vld [vmem:[%s5209_s10] sm:$0xff] (!%p612_p7)  ;;  %v653_v29 = vld [vmem:[%s5209_s10 + $0x8] sm:$0xff] (!%p612_p7)  ;;  %v654_v49 = vld [vmem:[%s5209_s10 + $0x10] sm:$0xff] (!%p612_p7) }
  0x88   : > { %v688_v28 = vld [vmem:[%s5209_s10 + $0x120] sm:$0xff] (!%p612_p7)  ;;  %v689_v31 = vld [vmem:[%s5209_s10 + $0x128] sm:$0xff] (!%p612_p7)  ;;  %v690_v50 = vld [vmem:[%s5209_s10 + $0x130] sm:$0xff] (!%p612_p7) }
  0x89   : > { %v4356_v30 = vcombine.high (!%p612_p7), %v652_v27, %v688_v28  ;;  %v4355_v32 = vcombine.low (!%p612_p7), %v652_v27, %v688_v28  ;;  %v724_v33 = vld [vmem:[%s5209_s10 + $0x240] sm:$0xff] (!%p612_p7)  ;;  %v4358_v35 = vcombine.high (!%p612_p7), %v653_v29, %v689_v31  ;;  %v4357_v36 = vcombine.low (!%p612_p7), %v653_v29, %v689_v31  ;;  %v725_v38 = vld [vmem:[%s5209_s10 + $0x248] sm:$0xff] (!%p612_p7)  ;;  %3509 = vperm.xlu0 (!%p612_p7), %4674, %v3506_v26   ;;  %v655_v51 = vld [vmem:[%s5209_s10 + $0x18] sm:$0xff] (!%p612_p7) }
  0x8a   : > { %v760_v34 = vld [vmem:[%s5209_s10 + $0x360] sm:$0xff]  ;;  %v761_v39 = vld [vmem:[%s5209_s10 + $0x368] sm:$0xff]  ;;  %v691_v52 = vld [vmem:[%s5209_s10 + $0x138] sm:$0xff]  ;;  %v4360_v55 = vcombine.high %v654_v49, %v690_v50  ;;  %v4359_v62 = vcombine.low %v654_v49, %v690_v50  ;;  %s5774_s15 = smov (!%p645_p8, %s644_s15), 143 }
  0x8b   : > { %v4428_v37 = vcombine.high %v724_v33, %v760_v34  ;;  %v796_v40 = vld [vmem:[%s5209_s10 + $0x480] sm:$0xff]  ;;  %1952 = vmatprep.subr.bf16.mxu0 %v4356_v30  ;;  %v4430_v41 = vcombine.high %v725_v38, %v761_v39  ;;  %v797_v43 = vld [vmem:[%s5209_s10 + $0x488] sm:$0xff]  ;;  %1993 = vmatprep.subr.bf16.mxu1 %v4358_v35  ;;  %v4427_v45 = vcombine.low %v724_v33, %v760_v34  ;;  %v726_v57 = vld [vmem:[%s5209_s10 + $0x250] sm:$0xff]  ;;  %s4354_s17 = sshll.u32 %s5774_s15, 1 }
  0x8c   : > { %v832_v42 = vld [vmem:[%s5209_s10 + $0x5a0] sm:$0xff]  ;;  %v833_v44 = vld [vmem:[%s5209_s10 + $0x5a8] sm:$0xff]  ;;  %1953 = vmatpush1.bf16.msra.mxu0 %v4355_v32  ;;  %1994 = vmatpush1.bf16.msra.mxu1 %v4357_v36  ;;  %v4429_v46 = vcombine.low %v725_v38, %v761_v39  ;;  %v4362_v56 = vcombine.high %v655_v51, %v691_v52  ;;  %v762_v58 = vld [vmem:[%s5209_s10 + $0x370] sm:$0xff]  ;;  %v4361_v63 = vcombine.low %v655_v51, %v691_v52  ;;  %s5566_s21 = scalar_lea.vmem %s5769_s4, %s4354_s17 }
  0x8d   : > { %1954 = vmatprep.subr.bf16.mxu0 %v4428_v37  ;;  %v4500_v47 = vcombine.high %v796_v40, %v832_v42  ;;  %1995 = vmatprep.subr.bf16.mxu1 %v4430_v41  ;;  %v4502_v48 = vcombine.high %v797_v43, %v833_v44  ;;  %v4499_v53 = vcombine.low %v796_v40, %v832_v42  ;;  %v727_v59 = vld [vmem:[%s5209_s10 + $0x258] sm:$0xff]  ;;  %v798_v2 = vld [vmem:[%s5209_s10 + $0x490] sm:$0xff]  ;;  %v656_v10 = vld [vmem:[%s5209_s10 + $0x20] sm:$0xff] }
  0x8e   : > { %v4501_v54 = vcombine.low %v797_v43, %v833_v44  ;;  %v763_v60 = vld [vmem:[%s5209_s10 + $0x378] sm:$0xff]  ;;  %v4432_v0 = vcombine.high %v726_v57, %v762_v58  ;;  %v834_v3 = vld [vmem:[%s5209_s10 + $0x5b0] sm:$0xff]  ;;  %v4431_v6 = vcombine.low %v726_v57, %v762_v58  ;;  %v692_v11 = vld [vmem:[%s5209_s10 + $0x140] sm:$0xff] }
  0x8f   : > { %v4434_v1 = vcombine.high %v727_v59, %v763_v60  ;;  %v799_v4 = vld [vmem:[%s5209_s10 + $0x498] sm:$0xff]  ;;  %v4433_v7 = vcombine.low %v727_v59, %v763_v60  ;;  %v4504_v8 = vcombine.high %v798_v2, %v834_v3  ;;  %v657_v12 = vld [vmem:[%s5209_s10 + $0x28] sm:$0xff]  ;;  %v4503_v14 = vcombine.low %v798_v2, %v834_v3  ;;  %v728_v18 = vld [vmem:[%s5209_s10 + $0x260] sm:$0xff] }
  0x90   : > { %1955 = vmatpush1.bf16.msra.mxu0 %v4427_v45  ;;  %1996 = vmatpush1.bf16.msra.mxu1 %v4429_v46  ;;  %v835_v5 = vld [vmem:[%s5209_s10 + $0x5b8] sm:$0xff]  ;;  %v693_v13 = vld [vmem:[%s5209_s10 + $0x148] sm:$0xff]  ;;  %v4364_v16 = vcombine.high %v656_v10, %v692_v11  ;;  %v764_v19 = vld [vmem:[%s5209_s10 + $0x380] sm:$0xff]  ;;  %v4363_v22 = vcombine.low %v656_v10, %v692_v11 }
  0x91   : > { %1956 = vmatprep.subr.bf16.mxu0 %v4500_v47  ;;  %1997 = vmatprep.subr.bf16.mxu1 %v4502_v48  ;;  %v4506_v9 = vcombine.high %v799_v4, %v835_v5  ;;  %v4505_v15 = vcombine.low %v799_v4, %v835_v5  ;;  %v4366_v17 = vcombine.high %v657_v12, %v693_v13  ;;  %v729_v20 = vld [vmem:[%s5209_s10 + $0x268] sm:$0xff]  ;;  %v800_v27 = vld [vmem:[%s5209_s10 + $0x4a0] sm:$0xff]  ;;  %v658_v35 = vld [vmem:[%s5209_s10 + $0x30] sm:$0xff] }
  0x92   : > { %v765_v21 = vld [vmem:[%s5209_s10 + $0x388] sm:$0xff]  ;;  %v4365_v23 = vcombine.low %v657_v12, %v693_v13  ;;  %v4436_v25 = vcombine.high %v728_v18, %v764_v19  ;;  %v836_v28 = vld [vmem:[%s5209_s10 + $0x5c0] sm:$0xff]  ;;  %v4435_v31 = vcombine.low %v728_v18, %v764_v19  ;;  %v694_v36 = vld [vmem:[%s5209_s10 + $0x150] sm:$0xff] }
  0x93   : > { %v4438_v26 = vcombine.high %v729_v20, %v765_v21  ;;  %v801_v29 = vld [vmem:[%s5209_s10 + $0x4a8] sm:$0xff]  ;;  %v4437_v32 = vcombine.low %v729_v20, %v765_v21  ;;  %v4508_v33 = vcombine.high %v800_v27, %v836_v28  ;;  %v659_v37 = vld [vmem:[%s5209_s10 + $0x38] sm:$0xff]  ;;  %v4507_v39 = vcombine.low %v800_v27, %v836_v28  ;;  %v730_v43 = vld [vmem:[%s5209_s10 + $0x270] sm:$0xff] }
  0x94   : > { %1957 = vmatpush1.bf16.msra.mxu0 %v4499_v53  ;;  %1998 = vmatpush1.bf16.msra.mxu1 %v4501_v54  ;;  %v837_v30 = vld [vmem:[%s5209_s10 + $0x5c8] sm:$0xff]  ;;  %v695_v38 = vld [vmem:[%s5209_s10 + $0x158] sm:$0xff]  ;;  %v4368_v41 = vcombine.high %v658_v35, %v694_v36  ;;  %v766_v44 = vld [vmem:[%s5209_s10 + $0x390] sm:$0xff]  ;;  %v4367_v47 = vcombine.low %v658_v35, %v694_v36 }
  0x95   : > { %2034 = vmatprep.subr.bf16.mxu0 %v4360_v55  ;;  %2075 = vmatprep.subr.bf16.mxu1 %v4362_v56  ;;  %v4510_v34 = vcombine.high %v801_v29, %v837_v30  ;;  %v4509_v40 = vcombine.low %v801_v29, %v837_v30  ;;  %v4370_v42 = vcombine.high %v659_v37, %v695_v38  ;;  %v731_v45 = vld [vmem:[%s5209_s10 + $0x278] sm:$0xff]  ;;  %v802_v51 = vld [vmem:[%s5209_s10 + $0x4b0] sm:$0xff]  ;;  %v660_v59 = vld [vmem:[%s5209_s10 + $0x40] sm:$0xff] }
  0x96   : > { %v767_v46 = vld [vmem:[%s5209_s10 + $0x398] sm:$0xff]  ;;  %v4369_v48 = vcombine.low %v659_v37, %v695_v38  ;;  %v4440_v49 = vcombine.high %v730_v43, %v766_v44  ;;  %v838_v52 = vld [vmem:[%s5209_s10 + $0x5d0] sm:$0xff]  ;;  %v4439_v55 = vcombine.low %v730_v43, %v766_v44  ;;  %v696_v60 = vld [vmem:[%s5209_s10 + $0x160] sm:$0xff] }
  0x97   : > { %4571 = vmatmul.mubr.msk.bf16.vlgmr.msra.gmra.mrb[0].mxu0 %vm1948_vm0, %v5234_v61  ;;  %4572 = vmatmul.mubr.msk.bf16.vlgmr.msra.gmra.mrb[0].mxu1 %vm1948_vm0, %v5234_v61  ;;  %v4442_v50 = vcombine.high %v731_v45, %v767_v46  ;;  %v803_v53 = vld [vmem:[%s5209_s10 + $0x4b8] sm:$0xff]  ;;  %v4441_v56 = vcombine.low %v731_v45, %v767_v46  ;;  %v4512_v57 = vcombine.high %v802_v51, %v838_v52  ;;  %v732_v4 = vld [vmem:[%s5209_s10 + $0x280] sm:$0xff]  ;;  %v662_v20 = vld [vmem:[%s5209_s10 + $0x50] sm:$0xff] }
  0x98   : > { %2035 = vmatpush1.bf16.msra.mxu0 %v4359_v62  ;;  %2076 = vmatpush1.bf16.msra.mxu1 %v4361_v63  ;;  %v839_v54 = vld [vmem:[%s5209_s10 + $0x5d8] sm:$0xff]  ;;  %v661_v62 = vld [vmem:[%s5209_s10 + $0x48] sm:$0xff]  ;;  %v4372_v2 = vcombine.high %v660_v59, %v696_v60  ;;  %v768_v5 = vld [vmem:[%s5209_s10 + $0x3a0] sm:$0xff] }
  0x99   : > { %2036 = vmatprep.subr.bf16.mxu0 %v4432_v0  ;;  %2077 = vmatprep.subr.bf16.mxu1 %v4434_v1  ;;  %v4514_v58 = vcombine.high %v803_v53, %v839_v54  ;;  %v697_v63 = vld [vmem:[%s5209_s10 + $0x168] sm:$0xff]  ;;  %v4511_v0 = vcombine.low %v802_v51, %v838_v52  ;;  %v4513_v1 = vcombine.low %v803_v53, %v839_v54  ;;  %v804_v12 = vld [vmem:[%s5209_s10 + $0x4c0] sm:$0xff]  ;;  %v698_v21 = vld [vmem:[%s5209_s10 + $0x170] sm:$0xff] }
  0x9a   : > { %2066 = vmatprep.mubr.bf16.mxu0 %v4700_v24  ;;  %2107 = vmatprep.mubr.bf16.mxu1 %v4700_v24  ;;  %v4374_v3 = vcombine.high %v661_v62, %v697_v63  ;;  %v4444_v10 = vcombine.high %v732_v4, %v768_v5  ;;  %v840_v13 = vld [vmem:[%s5209_s10 + $0x5e0] sm:$0xff]  ;;  %v4376_v27 = vcombine.high %v662_v20, %v698_v21  ;;  %v734_v29 = vld [vmem:[%s5209_s10 + $0x290] sm:$0xff] }
  0x9b   : > { %v4516_v18 = vcombine.high %v804_v12, %v840_v13  ;;  %v770_v30 = vld [vmem:[%s5209_s10 + $0x3b0] sm:$0xff]  ;;  %v664_v45 = vld [vmem:[%s5209_s10 + $0x60] sm:$0xff] }
  0x9c   : > { %2037 = vmatpush1.bf16.msra.mxu0 %v4431_v6  ;;  %2078 = vmatpush1.bf16.msra.mxu1 %v4433_v7  ;;  %v733_v6 = vld [vmem:[%s5209_s10 + $0x288] sm:$0xff]  ;;  %v4448_v35 = vcombine.high %v734_v29, %v770_v30  ;;  %v806_v37 = vld [vmem:[%s5209_s10 + $0x4d0] sm:$0xff]  ;;  %v700_v46 = vld [vmem:[%s5209_s10 + $0x180] sm:$0xff] }
  0x9d   : > { %2038 = vmatprep.subr.bf16.mxu0 %v4504_v8  ;;  %2079 = vmatprep.subr.bf16.mxu1 %v4506_v9  ;;  %v769_v7 = vld [vmem:[%s5209_s10 + $0x3a8] sm:$0xff]  ;;  %v4371_v8 = vcombine.low %v660_v59, %v696_v60  ;;  %v4373_v9 = vcombine.low %v661_v62, %v697_v63  ;;  %v842_v38 = vld [vmem:[%s5209_s10 + $0x5f0] sm:$0xff]  ;;  %v4380_v51 = vcombine.high %v664_v45, %v700_v46  ;;  %v736_v53 = vld [vmem:[%s5209_s10 + $0x2a0] sm:$0xff] }
  0x9e   : > { %v4446_v11 = vcombine.high %v733_v6, %v769_v7  ;;  %v4520_v43 = vcombine.high %v806_v37, %v842_v38  ;;  %v772_v54 = vld [vmem:[%s5209_s10 + $0x3c0] sm:$0xff] }
  0x9f   : > { %v4452_v59 = vcombine.high %v736_v53, %v772_v54  ;;  %v808_v62 = vld [vmem:[%s5209_s10 + $0x4e0] sm:$0xff] }
  0xa0   : > { %2039 = vmatpush1.bf16.msra.mxu0 %v4503_v14  ;;  %2080 = vmatpush1.bf16.msra.mxu1 %v4505_v15  ;;  %v805_v14 = vld [vmem:[%s5209_s10 + $0x4c8] sm:$0xff]  ;;  %v844_v63 = vld [vmem:[%s5209_s10 + $0x600] sm:$0xff] }
  0xa1   : > { %2116 = vmatprep.subr.bf16.mxu0 %v4364_v16  ;;  %2157 = vmatprep.subr.bf16.mxu1 %v4366_v17  ;;  %v841_v15 = vld [vmem:[%s5209_s10 + $0x5e8] sm:$0xff]  ;;  %v4443_v16 = vcombine.low %v732_v4, %v768_v5  ;;  %v4445_v17 = vcombine.low %v733_v6, %v769_v7  ;;  %v4524_v4 = vcombine.high %v808_v62, %v844_v63  ;;  %v666_v6 = vld [vmem:[%s5209_s10 + $0x70] sm:$0xff] }
  0xa2   : > { %v4518_v19 = vcombine.high %v805_v14, %v841_v15  ;;  %v702_v7 = vld [vmem:[%s5209_s10 + $0x190] sm:$0xff] }
  0xa3   : > { %4573 = vmatmul.mubr.msk.bf16.vlgmr.msra.gmra.mrb[4].mxu0 %vm1948_vm0, %v5234_v61  ;;  %4574 = vmatmul.mubr.msk.bf16.vlgmr.msra.gmra.mrb[4].mxu1 %vm1948_vm0, %v5234_v61 }
  0xa4   : > { %2117 = vmatpush1.bf16.msra.mxu0 %v4363_v22  ;;  %2158 = vmatpush1.bf16.msra.mxu1 %v4365_v23  ;;  %v663_v22 = vld [vmem:[%s5209_s10 + $0x58] sm:$0xff] }
  0xa5   : > { %2118 = vmatprep.subr.bf16.mxu0 %v4436_v25  ;;  %2159 = vmatprep.subr.bf16.mxu1 %v4438_v26  ;;  %v699_v23 = vld [vmem:[%s5209_s10 + $0x178] sm:$0xff]  ;;  %v4515_v25 = vcombine.low %v804_v12, %v840_v13  ;;  %v4517_v26 = vcombine.low %v805_v14, %v841_v15  ;;  %v4384_v12 = vcombine.high %v666_v6, %v702_v7  ;;  %v738_v14 = vld [vmem:[%s5209_s10 + $0x2b0] sm:$0xff] }
  0xa6   : > { %2148 = vmatprep.mubr.bf16.mxu0 %v4700_v24  ;;  %2189 = vmatprep.mubr.bf16.mxu1 %v4700_v24  ;;  %v4378_v28 = vcombine.high %v663_v22, %v699_v23  ;;  %v774_v15 = vld [vmem:[%s5209_s10 + $0x3d0] sm:$0xff] }
  0xa8   : > { %2119 = vmatpush1.bf16.msra.mxu0 %v4435_v31  ;;  %2160 = vmatpush1.bf16.msra.mxu1 %v4437_v32  ;;  %v735_v31 = vld [vmem:[%s5209_s10 + $0x298] sm:$0xff] }
  0xa9   : > { %2120 = vmatprep.subr.bf16.mxu0 %v4508_v33  ;;  %2161 = vmatprep.subr.bf16.mxu1 %v4510_v34  ;;  %v771_v32 = vld [vmem:[%s5209_s10 + $0x3b8] sm:$0xff]  ;;  %v4375_v33 = vcombine.low %v662_v20, %v698_v21  ;;  %v4377_v34 = vcombine.low %v663_v22, %v699_v23  ;;  %v4456_v20 = vcombine.high %v738_v14, %v774_v15  ;;  %v810_v22 = vld [vmem:[%s5209_s10 + $0x4f0] sm:$0xff] }
  0xaa   : > { %v4450_v36 = vcombine.high %v735_v31, %v771_v32  ;;  %v846_v23 = vld [vmem:[%s5209_s10 + $0x610] sm:$0xff] }
  0xac   : > { %2121 = vmatpush1.bf16.msra.mxu0 %v4507_v39  ;;  %2162 = vmatpush1.bf16.msra.mxu1 %v4509_v40  ;;  %v807_v39 = vld [vmem:[%s5209_s10 + $0x4d8] sm:$0xff] }
  0xad   : > { %2198 = vmatprep.subr.bf16.mxu0 %v4368_v41  ;;  %2239 = vmatprep.subr.bf16.mxu1 %v4370_v42  ;;  %v843_v40 = vld [vmem:[%s5209_s10 + $0x5f8] sm:$0xff]  ;;  %v4447_v41 = vcombine.low %v734_v29, %v770_v30  ;;  %v4449_v42 = vcombine.low %v735_v31, %v771_v32  ;;  %v4528_v29 = vcombine.high %v810_v22, %v846_v23  ;;  %v668_v31 = vld [vmem:[%s5209_s10 + $0x80] sm:$0xff] }
  0xae   : > { %v4522_v44 = vcombine.high %v807_v39, %v843_v40  ;;  %v704_v32 = vld [vmem:[%s5209_s10 + $0x1a0] sm:$0xff] }
  0xaf   : > { %4575 = vmatmul.mubr.msk.bf16.vlgmr.msra.gmra.mrb[8].mxu0 %vm1948_vm0, %v5234_v61  ;;  %4576 = vmatmul.mubr.msk.bf16.vlgmr.msra.gmra.mrb[8].mxu1 %vm1948_vm0, %v5234_v61 }
  0xb0   : > { %2199 = vmatpush1.bf16.msra.mxu0 %v4367_v47  ;;  %2240 = vmatpush1.bf16.msra.mxu1 %v4369_v48  ;;  %v665_v47 = vld [vmem:[%s5209_s10 + $0x68] sm:$0xff] }
  0xb1   : > { %2200 = vmatprep.subr.bf16.mxu0 %v4440_v49  ;;  %2241 = vmatprep.subr.bf16.mxu1 %v4442_v50  ;;  %v701_v48 = vld [vmem:[%s5209_s10 + $0x188] sm:$0xff]  ;;  %v4519_v49 = vcombine.low %v806_v37, %v842_v38  ;;  %v4521_v50 = vcombine.low %v807_v39, %v843_v40  ;;  %v4388_v37 = vcombine.high %v668_v31, %v704_v32  ;;  %v740_v39 = vld [vmem:[%s5209_s10 + $0x2c0] sm:$0xff] }
  0xb2   : > { %2230 = vmatprep.mubr.bf16.mxu0 %v4700_v24  ;;  %2271 = vmatprep.mubr.bf16.mxu1 %v4700_v24  ;;  %v4382_v52 = vcombine.high %v665_v47, %v701_v48  ;;  %v776_v40 = vld [vmem:[%s5209_s10 + $0x3e0] sm:$0xff] }
  0xb4   : > { %2201 = vmatpush1.bf16.msra.mxu0 %v4439_v55  ;;  %2242 = vmatpush1.bf16.msra.mxu1 %v4441_v56  ;;  %v737_v55 = vld [vmem:[%s5209_s10 + $0x2a8] sm:$0xff] }
  0xb5   : > { %2202 = vmatprep.subr.bf16.mxu0 %v4512_v57  ;;  %2243 = vmatprep.subr.bf16.mxu1 %v4514_v58  ;;  %v773_v56 = vld [vmem:[%s5209_s10 + $0x3c8] sm:$0xff]  ;;  %v4379_v57 = vcombine.low %v664_v45, %v700_v46  ;;  %v4381_v58 = vcombine.low %v665_v47, %v701_v48  ;;  %v4460_v45 = vcombine.high %v740_v39, %v776_v40  ;;  %v812_v47 = vld [vmem:[%s5209_s10 + $0x500] sm:$0xff] }
  0xb6   : > { %v4454_v60 = vcombine.high %v737_v55, %v773_v56  ;;  %v848_v48 = vld [vmem:[%s5209_s10 + $0x620] sm:$0xff] }
  0xb8   : > { %2203 = vmatpush1.bf16.msra.mxu0 %v4511_v0  ;;  %2244 = vmatpush1.bf16.msra.mxu1 %v4513_v1  ;;  %v809_v0 = vld [vmem:[%s5209_s10 + $0x4e8] sm:$0xff] }
  0xb9   : > { %2280 = vmatprep.subr.bf16.mxu0 %v4372_v2  ;;  %2321 = vmatprep.subr.bf16.mxu1 %v4374_v3  ;;  %v845_v1 = vld [vmem:[%s5209_s10 + $0x608] sm:$0xff]  ;;  %v4451_v2 = vcombine.low %v736_v53, %v772_v54  ;;  %v4453_v3 = vcombine.low %v737_v55, %v773_v56  ;;  %v4532_v53 = vcombine.high %v812_v47, %v848_v48  ;;  %v670_v55 = vld [vmem:[%s5209_s10 + $0x90] sm:$0xff] }
  0xba   : > { %v4526_v5 = vcombine.high %v809_v0, %v845_v1  ;;  %v706_v56 = vld [vmem:[%s5209_s10 + $0x1b0] sm:$0xff] }
  0xbb   : > { %4577 = vmatmul.mubr.msk.bf16.vlgmr.msra.gmra.mrb[12].mxu0 %vm1948_vm0, %v5234_v61  ;;  %4578 = vmatmul.mubr.msk.bf16.vlgmr.msra.gmra.mrb[12].mxu1 %vm1948_vm0, %v5234_v61 }
  0xbc   : > { %2281 = vmatpush1.bf16.msra.mxu0 %v4371_v8  ;;  %2322 = vmatpush1.bf16.msra.mxu1 %v4373_v9  ;;  %v667_v8 = vld [vmem:[%s5209_s10 + $0x78] sm:$0xff] }
  0xbd   : > { %2282 = vmatprep.subr.bf16.mxu0 %v4444_v10  ;;  %2323 = vmatprep.subr.bf16.mxu1 %v4446_v11  ;;  %v703_v9 = vld [vmem:[%s5209_s10 + $0x198] sm:$0xff]  ;;  %v4523_v10 = vcombine.low %v808_v62, %v844_v63  ;;  %v4525_v11 = vcombine.low %v809_v0, %v845_v1  ;;  %v4392_v62 = vcombine.high %v670_v55, %v706_v56  ;;  %v742_v0 = vld [vmem:[%s5209_s10 + $0x2d0] sm:$0xff] }
  0xbe   : > { %2312 = vmatprep.mubr.bf16.mxu0 %v4700_v24  ;;  %2353 = vmatprep.mubr.bf16.mxu1 %v4700_v24  ;;  %v4386_v13 = vcombine.high %v667_v8, %v703_v9  ;;  %v778_v1 = vld [vmem:[%s5209_s10 + $0x3f0] sm:$0xff] }
  0xc0   : > { %2283 = vmatpush1.bf16.msra.mxu0 %v4443_v16  ;;  %2324 = vmatpush1.bf16.msra.mxu1 %v4445_v17  ;;  %v739_v16 = vld [vmem:[%s5209_s10 + $0x2b8] sm:$0xff] }
  0xc1   : > { %2284 = vmatprep.subr.bf16.mxu0 %v4516_v18  ;;  %2325 = vmatprep.subr.bf16.mxu1 %v4518_v19  ;;  %v775_v17 = vld [vmem:[%s5209_s10 + $0x3d8] sm:$0xff]  ;;  %v4383_v18 = vcombine.low %v666_v6, %v702_v7  ;;  %v4385_v19 = vcombine.low %v667_v8, %v703_v9  ;;  %v4464_v6 = vcombine.high %v742_v0, %v778_v1  ;;  %v814_v8 = vld [vmem:[%s5209_s10 + $0x510] sm:$0xff] }
  0xc2   : > { %v4458_v21 = vcombine.high %v739_v16, %v775_v17  ;;  %v850_v9 = vld [vmem:[%s5209_s10 + $0x630] sm:$0xff] }
  0xc4   : > { %2285 = vmatpush1.bf16.msra.mxu0 %v4515_v25  ;;  %2326 = vmatpush1.bf16.msra.mxu1 %v4517_v26  ;;  %v811_v25 = vld [vmem:[%s5209_s10 + $0x4f8] sm:$0xff] }
  0xc5   : > { %2362 = vmatprep.subr.bf16.mxu0 %v4376_v27  ;;  %2403 = vmatprep.subr.bf16.mxu1 %v4378_v28  ;;  %v847_v26 = vld [vmem:[%s5209_s10 + $0x618] sm:$0xff]  ;;  %v4455_v27 = vcombine.low %v738_v14, %v774_v15  ;;  %v4457_v28 = vcombine.low %v739_v16, %v775_v17  ;;  %v4536_v14 = vcombine.high %v814_v8, %v850_v9  ;;  %v672_v16 = vld [vmem:[%s5209_s10 + $0xa0] sm:$0xff] }
  0xc6   : > { %v4530_v30 = vcombine.high %v811_v25, %v847_v26  ;;  %v708_v17 = vld [vmem:[%s5209_s10 + $0x1c0] sm:$0xff] }
  0xc7   : > { %4579 = vmatmul.mubr.msk.bf16.vlgmr.msra.gmra.mrb[16].mxu0 %vm1948_vm0, %v5234_v61  ;;  %4580 = vmatmul.mubr.msk.bf16.vlgmr.msra.gmra.mrb[16].mxu1 %vm1948_vm0, %v5234_v61 }
  0xc8   : > { %2363 = vmatpush1.bf16.msra.mxu0 %v4375_v33  ;;  %2404 = vmatpush1.bf16.msra.mxu1 %v4377_v34  ;;  %v669_v33 = vld [vmem:[%s5209_s10 + $0x88] sm:$0xff] }
  0xc9   : > { %2364 = vmatprep.subr.bf16.mxu0 %v4448_v35  ;;  %2405 = vmatprep.subr.bf16.mxu1 %v4450_v36  ;;  %v705_v34 = vld [vmem:[%s5209_s10 + $0x1a8] sm:$0xff]  ;;  %v4527_v35 = vcombine.low %v810_v22, %v846_v23  ;;  %v4529_v36 = vcombine.low %v811_v25, %v847_v26  ;;  %v4396_v22 = vcombine.high %v672_v16, %v708_v17  ;;  %v744_v25 = vld [vmem:[%s5209_s10 + $0x2e0] sm:$0xff] }
  0xca   : > { %2394 = vmatprep.mubr.bf16.mxu0 %v4700_v24  ;;  %2435 = vmatprep.mubr.bf16.mxu1 %v4700_v24  ;;  %v4390_v38 = vcombine.high %v669_v33, %v705_v34  ;;  %v780_v26 = vld [vmem:[%s5209_s10 + $0x400] sm:$0xff] }
  0xcc   : > { %2365 = vmatpush1.bf16.msra.mxu0 %v4447_v41  ;;  %2406 = vmatpush1.bf16.msra.mxu1 %v4449_v42  ;;  %v741_v41 = vld [vmem:[%s5209_s10 + $0x2c8] sm:$0xff] }
  0xcd   : > { %2366 = vmatprep.subr.bf16.mxu0 %v4520_v43  ;;  %2407 = vmatprep.subr.bf16.mxu1 %v4522_v44  ;;  %v777_v42 = vld [vmem:[%s5209_s10 + $0x3e8] sm:$0xff]  ;;  %v4387_v43 = vcombine.low %v668_v31, %v704_v32  ;;  %v4389_v44 = vcombine.low %v669_v33, %v705_v34  ;;  %v4468_v31 = vcombine.high %v744_v25, %v780_v26  ;;  %v816_v33 = vld [vmem:[%s5209_s10 + $0x520] sm:$0xff] }
  0xce   : > { %v4462_v46 = vcombine.high %v741_v41, %v777_v42  ;;  %v852_v34 = vld [vmem:[%s5209_s10 + $0x640] sm:$0xff] }
  0xd0   : > { %2367 = vmatpush1.bf16.msra.mxu0 %v4519_v49  ;;  %2408 = vmatpush1.bf16.msra.mxu1 %v4521_v50  ;;  %v813_v49 = vld [vmem:[%s5209_s10 + $0x508] sm:$0xff] }
  0xd1   : > { %2444 = vmatprep.subr.bf16.mxu0 %v4380_v51  ;;  %2485 = vmatprep.subr.bf16.mxu1 %v4382_v52  ;;  %v849_v50 = vld [vmem:[%s5209_s10 + $0x628] sm:$0xff]  ;;  %v4459_v51 = vcombine.low %v740_v39, %v776_v40  ;;  %v4461_v52 = vcombine.low %v741_v41, %v777_v42  ;;  %v4540_v39 = vcombine.high %v816_v33, %v852_v34  ;;  %v674_v41 = vld [vmem:[%s5209_s10 + $0xb0] sm:$0xff] }
  0xd2   : > { %v4534_v54 = vcombine.high %v813_v49, %v849_v50  ;;  %v710_v42 = vld [vmem:[%s5209_s10 + $0x1d0] sm:$0xff] }
  0xd3   : > { %4581 = vmatmul.mubr.msk.bf16.vlgmr.msra.gmra.mrb[20].mxu0 %vm1948_vm0, %v5234_v61  ;;  %4582 = vmatmul.mubr.msk.bf16.vlgmr.msra.gmra.mrb[20].mxu1 %vm1948_vm0, %v5234_v61 }
  0xd4   : > { %2445 = vmatpush1.bf16.msra.mxu0 %v4379_v57  ;;  %2486 = vmatpush1.bf16.msra.mxu1 %v4381_v58  ;;  %v671_v57 = vld [vmem:[%s5209_s10 + $0x98] sm:$0xff] }
  0xd5   : > { %2446 = vmatprep.subr.bf16.mxu0 %v4452_v59  ;;  %2487 = vmatprep.subr.bf16.mxu1 %v4454_v60  ;;  %v707_v58 = vld [vmem:[%s5209_s10 + $0x1b8] sm:$0xff]  ;;  %v4531_v59 = vcombine.low %v812_v47, %v848_v48  ;;  %v4533_v60 = vcombine.low %v813_v49, %v849_v50  ;;  %v4400_v47 = vcombine.high %v674_v41, %v710_v42  ;;  %v746_v49 = vld [vmem:[%s5209_s10 + $0x2f0] sm:$0xff] }
  0xd6   : > { %2476 = vmatprep.mubr.bf16.mxu0 %v4700_v24  ;;  %2517 = vmatprep.mubr.bf16.mxu1 %v4700_v24  ;;  %v4394_v63 = vcombine.high %v671_v57, %v707_v58  ;;  %v782_v50 = vld [vmem:[%s5209_s10 + $0x410] sm:$0xff] }
  0xd8   : > { %2447 = vmatpush1.bf16.msra.mxu0 %v4451_v2  ;;  %2488 = vmatpush1.bf16.msra.mxu1 %v4453_v3  ;;  %v743_v2 = vld [vmem:[%s5209_s10 + $0x2d8] sm:$0xff] }
  0xd9   : > { %2448 = vmatprep.subr.bf16.mxu0 %v4524_v4  ;;  %2489 = vmatprep.subr.bf16.mxu1 %v4526_v5  ;;  %v779_v3 = vld [vmem:[%s5209_s10 + $0x3f8] sm:$0xff]  ;;  %v4391_v4 = vcombine.low %v670_v55, %v706_v56  ;;  %v4393_v5 = vcombine.low %v671_v57, %v707_v58  ;;  %v4472_v55 = vcombine.high %v746_v49, %v782_v50  ;;  %v818_v57 = vld [vmem:[%s5209_s10 + $0x530] sm:$0xff] }
  0xda   : > { %v4466_v7 = vcombine.high %v743_v2, %v779_v3  ;;  %v854_v58 = vld [vmem:[%s5209_s10 + $0x650] sm:$0xff] }
  0xdc   : > { %2449 = vmatpush1.bf16.msra.mxu0 %v4523_v10  ;;  %2490 = vmatpush1.bf16.msra.mxu1 %v4525_v11  ;;  %v815_v10 = vld [vmem:[%s5209_s10 + $0x518] sm:$0xff] }
  0xdd   : > { %2526 = vmatprep.subr.bf16.mxu0 %v4384_v12  ;;  %2567 = vmatprep.subr.bf16.mxu1 %v4386_v13  ;;  %v851_v11 = vld [vmem:[%s5209_s10 + $0x638] sm:$0xff]  ;;  %v4463_v12 = vcombine.low %v742_v0, %v778_v1  ;;  %v4465_v13 = vcombine.low %v743_v2, %v779_v3  ;;  %v4544_v0 = vcombine.high %v818_v57, %v854_v58  ;;  %v676_v2 = vld [vmem:[%s5209_s10 + $0xc0] sm:$0xff] }
  0xde   : > { %v4538_v15 = vcombine.high %v815_v10, %v851_v11  ;;  %v712_v3 = vld [vmem:[%s5209_s10 + $0x1e0] sm:$0xff] }
  0xdf   : > { %4583 = vmatmul.mubr.msk.bf16.vlgmr.msra.gmra.mrb[24].mxu0 %vm1948_vm0, %v5234_v61  ;;  %4584 = vmatmul.mubr.msk.bf16.vlgmr.msra.gmra.mrb[24].mxu1 %vm1948_vm0, %v5234_v61 }
  0xe0   : > { %2527 = vmatpush1.bf16.msra.mxu0 %v4383_v18  ;;  %2568 = vmatpush1.bf16.msra.mxu1 %v4385_v19  ;;  %v673_v18 = vld [vmem:[%s5209_s10 + $0xa8] sm:$0xff] }
  0xe1   : > { %2528 = vmatprep.subr.bf16.mxu0 %v4456_v20  ;;  %2569 = vmatprep.subr.bf16.mxu1 %v4458_v21  ;;  %v709_v19 = vld [vmem:[%s5209_s10 + $0x1c8] sm:$0xff]  ;;  %v4535_v20 = vcombine.low %v814_v8, %v850_v9  ;;  %v4537_v21 = vcombine.low %v815_v10, %v851_v11  ;;  %v4404_v8 = vcombine.high %v676_v2, %v712_v3  ;;  %v748_v10 = vld [vmem:[%s5209_s10 + $0x300] sm:$0xff] }
  0xe2   : > { %2558 = vmatprep.mubr.bf16.mxu0 %v4700_v24  ;;  %2599 = vmatprep.mubr.bf16.mxu1 %v4700_v24  ;;  %v4398_v23 = vcombine.high %v673_v18, %v709_v19  ;;  %v784_v11 = vld [vmem:[%s5209_s10 + $0x420] sm:$0xff] }
  0xe4   : > { %2529 = vmatpush1.bf16.msra.mxu0 %v4455_v27  ;;  %2570 = vmatpush1.bf16.msra.mxu1 %v4457_v28  ;;  %v745_v27 = vld [vmem:[%s5209_s10 + $0x2e8] sm:$0xff] }
  0xe5   : > { %2530 = vmatprep.subr.bf16.mxu0 %v4528_v29  ;;  %2571 = vmatprep.subr.bf16.mxu1 %v4530_v30  ;;  %v781_v28 = vld [vmem:[%s5209_s10 + $0x408] sm:$0xff]  ;;  %v4395_v29 = vcombine.low %v672_v16, %v708_v17  ;;  %v4397_v30 = vcombine.low %v673_v18, %v709_v19  ;;  %v4476_v16 = vcombine.high %v748_v10, %v784_v11  ;;  %v820_v18 = vld [vmem:[%s5209_s10 + $0x540] sm:$0xff] }
  0xe6   : > { %v4470_v32 = vcombine.high %v745_v27, %v781_v28  ;;  %v856_v19 = vld [vmem:[%s5209_s10 + $0x660] sm:$0xff] }
  0xe8   : > { %2531 = vmatpush1.bf16.msra.mxu0 %v4527_v35  ;;  %2572 = vmatpush1.bf16.msra.mxu1 %v4529_v36  ;;  %v817_v35 = vld [vmem:[%s5209_s10 + $0x528] sm:$0xff] }
  0xe9   : > { %2608 = vmatprep.subr.bf16.mxu0 %v4388_v37  ;;  %2649 = vmatprep.subr.bf16.mxu1 %v4390_v38  ;;  %v853_v36 = vld [vmem:[%s5209_s10 + $0x648] sm:$0xff]  ;;  %v4467_v37 = vcombine.low %v744_v25, %v780_v26  ;;  %v4469_v38 = vcombine.low %v745_v27, %v781_v28  ;;  %v4548_v25 = vcombine.high %v820_v18, %v856_v19  ;;  %v678_v27 = vld [vmem:[%s5209_s10 + $0xd0] sm:$0xff] }
  0xea   : > { %v4542_v40 = vcombine.high %v817_v35, %v853_v36  ;;  %v714_v28 = vld [vmem:[%s5209_s10 + $0x1f0] sm:$0xff] }
  0xeb   : > { %4585 = vmatmul.mubr.msk.bf16.vlgmr.msra.gmra.mrb[28].mxu0 %vm1948_vm0, %v5234_v61  ;;  %4586 = vmatmul.mubr.msk.bf16.vlgmr.msra.gmra.mrb[28].mxu1 %vm1948_vm0, %v5234_v61 }
  0xec   : > { %2609 = vmatpush1.bf16.msra.mxu0 %v4387_v43  ;;  %2650 = vmatpush1.bf16.msra.mxu1 %v4389_v44  ;;  %v675_v43 = vld [vmem:[%s5209_s10 + $0xb8] sm:$0xff] }
  0xed   : > { %2610 = vmatprep.subr.bf16.mxu0 %v4460_v45  ;;  %2651 = vmatprep.subr.bf16.mxu1 %v4462_v46  ;;  %v711_v44 = vld [vmem:[%s5209_s10 + $0x1d8] sm:$0xff]  ;;  %v4539_v45 = vcombine.low %v816_v33, %v852_v34  ;;  %v4541_v46 = vcombine.low %v817_v35, %v853_v36  ;;  %v4408_v33 = vcombine.high %v678_v27, %v714_v28  ;;  %v750_v35 = vld [vmem:[%s5209_s10 + $0x310] sm:$0xff] }
  0xee   : > { %2640 = vmatprep.mubr.bf16.mxu0 %v4700_v24  ;;  %2681 = vmatprep.mubr.bf16.mxu1 %v4700_v24  ;;  %v4402_v48 = vcombine.high %v675_v43, %v711_v44  ;;  %v786_v36 = vld [vmem:[%s5209_s10 + $0x430] sm:$0xff] }
  0xf0   : > { %2611 = vmatpush1.bf16.msra.mxu0 %v4459_v51  ;;  %2652 = vmatpush1.bf16.msra.mxu1 %v4461_v52  ;;  %v747_v51 = vld [vmem:[%s5209_s10 + $0x2f8] sm:$0xff] }
  0xf1   : > { %2612 = vmatprep.subr.bf16.mxu0 %v4532_v53  ;;  %2653 = vmatprep.subr.bf16.mxu1 %v4534_v54  ;;  %v783_v52 = vld [vmem:[%s5209_s10 + $0x418] sm:$0xff]  ;;  %v4399_v53 = vcombine.low %v674_v41, %v710_v42  ;;  %v4401_v54 = vcombine.low %v675_v43, %v711_v44  ;;  %v4480_v41 = vcombine.high %v750_v35, %v786_v36  ;;  %v822_v43 = vld [vmem:[%s5209_s10 + $0x550] sm:$0xff] }
  0xf2   : > { %v4474_v56 = vcombine.high %v747_v51, %v783_v52  ;;  %v858_v44 = vld [vmem:[%s5209_s10 + $0x670] sm:$0xff] }
  0xf4   : > { %2613 = vmatpush1.bf16.msra.mxu0 %v4531_v59  ;;  %2654 = vmatpush1.bf16.msra.mxu1 %v4533_v60  ;;  %v819_v59 = vld [vmem:[%s5209_s10 + $0x538] sm:$0xff] }
  0xf5   : > { %2690 = vmatprep.subr.bf16.mxu0 %v4392_v62  ;;  %2731 = vmatprep.subr.bf16.mxu1 %v4394_v63  ;;  %v855_v60 = vld [vmem:[%s5209_s10 + $0x658] sm:$0xff]  ;;  %v4471_v62 = vcombine.low %v746_v49, %v782_v50  ;;  %v4473_v63 = vcombine.low %v747_v51, %v783_v52  ;;  %v4552_v49 = vcombine.high %v822_v43, %v858_v44  ;;  %v680_v51 = vld [vmem:[%s5209_s10 + $0xe0] sm:$0xff] }
  0xf6   : > { %v4546_v1 = vcombine.high %v819_v59, %v855_v60  ;;  %v716_v52 = vld [vmem:[%s5209_s10 + $0x200] sm:$0xff] }
  0xf7   : > { %4587 = vmatmul.mubr.msk.bf16.vlgmr.msra.gmra.mrb[32].mxu0 %vm1948_vm0, %v5234_v61  ;;  %4588 = vmatmul.mubr.msk.bf16.vlgmr.msra.gmra.mrb[32].mxu1 %vm1948_vm0, %v5234_v61 }
  0xf8   : > { %2691 = vmatpush1.bf16.msra.mxu0 %v4391_v4  ;;  %2732 = vmatpush1.bf16.msra.mxu1 %v4393_v5  ;;  %v677_v4 = vld [vmem:[%s5209_s10 + $0xc8] sm:$0xff] }
  0xf9   : > { %2692 = vmatprep.subr.bf16.mxu0 %v4464_v6  ;;  %2733 = vmatprep.subr.bf16.mxu1 %v4466_v7  ;;  %v713_v5 = vld [vmem:[%s5209_s10 + $0x1e8] sm:$0xff]  ;;  %v4543_v6 = vcombine.low %v818_v57, %v854_v58  ;;  %v4545_v7 = vcombine.low %v819_v59, %v855_v60  ;;  %v752_v58 = vld [vmem:[%s5209_s10 + $0x320] sm:$0xff] }
  0xfa   : > { %2722 = vmatprep.mubr.bf16.mxu0 %v4700_v24  ;;  %2763 = vmatprep.mubr.bf16.mxu1 %v4700_v24  ;;  %v4406_v9 = vcombine.high %v677_v4, %v713_v5  ;;  %v788_v59 = vld [vmem:[%s5209_s10 + $0x440] sm:$0xff]  ;;  %v753_v60 = vld [vmem:[%s5209_s10 + $0x328] sm:$0xff] }
  0xfc   : > { %2693 = vmatpush1.bf16.msra.mxu0 %v4463_v12  ;;  %2734 = vmatpush1.bf16.msra.mxu1 %v4465_v13  ;;  %v749_v12 = vld [vmem:[%s5209_s10 + $0x308] sm:$0xff] }
  0xfd   : > { %2694 = vmatprep.subr.bf16.mxu0 %v4536_v14  ;;  %2735 = vmatprep.subr.bf16.mxu1 %v4538_v15  ;;  %v785_v13 = vld [vmem:[%s5209_s10 + $0x428] sm:$0xff]  ;;  %v4403_v14 = vcombine.low %v676_v2, %v712_v3  ;;  %v4405_v15 = vcombine.low %v677_v4, %v713_v5  ;;  %v824_v3 = vld [vmem:[%s5209_s10 + $0x560] sm:$0xff] }
  0xfe   : > { %v4478_v17 = vcombine.high %v749_v12, %v785_v13  ;;  %v860_v4 = vld [vmem:[%s5209_s10 + $0x680] sm:$0xff] }
  0xff   : > { %v5475_v5 = vld [vmem:[%s5765_s0] sm:$0x3] }
 0x100   : > { %2695 = vmatpush1.bf16.msra.mxu0 %v4535_v20  ;;  %2736 = vmatpush1.bf16.msra.mxu1 %v4537_v21  ;;  %v821_v20 = vld [vmem:[%s5209_s10 + $0x548] sm:$0xff] }
 0x101   : > { %2772 = vmatprep.subr.bf16.mxu0 %v4396_v22  ;;  %2813 = vmatprep.subr.bf16.mxu1 %v4398_v23  ;;  %v857_v21 = vld [vmem:[%s5209_s10 + $0x668] sm:$0xff]  ;;  %v4475_v22 = vcombine.low %v748_v10, %v784_v11  ;;  %v4477_v23 = vcombine.low %v749_v12, %v785_v13  ;;  %v4556_v10 = vcombine.high %v824_v3, %v860_v4  ;;  %v682_v12 = vld [vmem:[%s5209_s10 + $0xf0] sm:$0xff] }
 0x102   : > { %v4550_v26 = vcombine.high %v821_v20, %v857_v21  ;;  %v718_v13 = vld [vmem:[%s5209_s10 + $0x210] sm:$0xff] }
 0x103   : > { %4589 = vmatmul.mubr.msk.bf16.vlgmr.msra.gmra.mrb[36].mxu0 %vm1948_vm0, %v5234_v61  ;;  %4590 = vmatmul.mubr.msk.bf16.vlgmr.msra.gmra.mrb[36].mxu1 %vm1948_vm0, %v5234_v61 }
 0x104   : > { %2773 = vmatpush1.bf16.msra.mxu0 %v4395_v29  ;;  %2814 = vmatpush1.bf16.msra.mxu1 %v4397_v30  ;;  %v679_v29 = vld [vmem:[%s5209_s10 + $0xd8] sm:$0xff] }
 0x105   : > { %2774 = vmatprep.subr.bf16.mxu0 %v4468_v31  ;;  %2815 = vmatprep.subr.bf16.mxu1 %v4470_v32  ;;  %v715_v30 = vld [vmem:[%s5209_s10 + $0x1f8] sm:$0xff]  ;;  %v4547_v31 = vcombine.low %v820_v18, %v856_v19  ;;  %v4549_v32 = vcombine.low %v821_v20, %v857_v21  ;;  %v4416_v18 = vcombine.high %v682_v12, %v718_v13  ;;  %v754_v20 = vld [vmem:[%s5209_s10 + $0x330] sm:$0xff] }
 0x106   : > { %2804 = vmatprep.mubr.bf16.mxu0 %v4700_v24  ;;  %2845 = vmatprep.mubr.bf16.mxu1 %v4700_v24  ;;  %v4410_v34 = vcombine.high %v679_v29, %v715_v30  ;;  %v790_v21 = vld [vmem:[%s5209_s10 + $0x450] sm:$0xff] }
 0x108   : > { %2775 = vmatpush1.bf16.msra.mxu0 %v4467_v37  ;;  %2816 = vmatpush1.bf16.msra.mxu1 %v4469_v38  ;;  %v751_v37 = vld [vmem:[%s5209_s10 + $0x318] sm:$0xff] }
 0x109   : > { %2776 = vmatprep.subr.bf16.mxu0 %v4540_v39  ;;  %2817 = vmatprep.subr.bf16.mxu1 %v4542_v40  ;;  %v787_v38 = vld [vmem:[%s5209_s10 + $0x438] sm:$0xff]  ;;  %v4407_v39 = vcombine.low %v678_v27, %v714_v28  ;;  %v4409_v40 = vcombine.low %v679_v29, %v715_v30  ;;  %v4488_v27 = vcombine.high %v754_v20, %v790_v21  ;;  %v826_v29 = vld [vmem:[%s5209_s10 + $0x570] sm:$0xff] }
 0x10a   : > { %v4482_v42 = vcombine.high %v751_v37, %v787_v38  ;;  %v862_v30 = vld [vmem:[%s5209_s10 + $0x690] sm:$0xff] }
 0x10c   : > { %2777 = vmatpush1.bf16.msra.mxu0 %v4539_v45  ;;  %2818 = vmatpush1.bf16.msra.mxu1 %v4541_v46  ;;  %v823_v45 = vld [vmem:[%s5209_s10 + $0x558] sm:$0xff] }
 0x10d   : > { %2854 = vmatprep.subr.bf16.mxu0 %v4400_v47  ;;  %2895 = vmatprep.subr.bf16.mxu1 %v4402_v48  ;;  %v859_v46 = vld [vmem:[%s5209_s10 + $0x678] sm:$0xff]  ;;  %v4479_v47 = vcombine.low %v750_v35, %v786_v36  ;;  %v4481_v48 = vcombine.low %v751_v37, %v787_v38  ;;  %v4560_v35 = vcombine.high %v826_v29, %v862_v30  ;;  %v684_v37 = vld [vmem:[%s5209_s10 + $0x100] sm:$0xff] }
 0x10e   : > { %v4554_v50 = vcombine.high %v823_v45, %v859_v46  ;;  %v720_v38 = vld [vmem:[%s5209_s10 + $0x220] sm:$0xff] }
 0x10f   : > { %4591 = vmatmul.mubr.msk.bf16.vlgmr.msra.gmra.mrb[40].mxu0 %vm1948_vm0, %v5234_v61  ;;  %4592 = vmatmul.mubr.msk.bf16.vlgmr.msra.gmra.mrb[40].mxu1 %vm1948_vm0, %v5234_v61 }
 0x110   : > { %2855 = vmatpush1.bf16.msra.mxu0 %v4399_v53  ;;  %2896 = vmatpush1.bf16.msra.mxu1 %v4401_v54  ;;  %v681_v53 = vld [vmem:[%s5209_s10 + $0xe8] sm:$0xff]  ;;  %v4551_v54 = vcombine.low %v822_v43, %v858_v44  ;;  %v4420_v43 = vcombine.high %v684_v37, %v720_v38 }
 0x111   : > { %2856 = vmatprep.subr.bf16.mxu0 %v4472_v55  ;;  %2897 = vmatprep.subr.bf16.mxu1 %v4474_v56  ;;  %v4553_v55 = vcombine.low %v823_v45, %v859_v46  ;;  %v4412_v56 = vcombine.high %v680_v51, %v716_v52  ;;  %v756_v45 = vld [vmem:[%s5209_s10 + $0x340] sm:$0xff] }
 0x112   : > { %2886 = vmatprep.mubr.bf16.mxu0 %v4700_v24  ;;  %2927 = vmatprep.mubr.bf16.mxu1 %v4700_v24  ;;  %v792_v46 = vld [vmem:[%s5209_s10 + $0x460] sm:$0xff] }
 0x114   : > { %2857 = vmatpush1.bf16.msra.mxu0 %v4471_v62  ;;  %2898 = vmatpush1.bf16.msra.mxu1 %v4473_v63  ;;  %v789_v62 = vld [vmem:[%s5209_s10 + $0x448] sm:$0xff]  ;;  %v4411_v63 = vcombine.low %v680_v51, %v716_v52  ;;  %v4492_v51 = vcombine.high %v756_v45, %v792_v46 }
 0x115   : > { %2858 = vmatprep.subr.bf16.mxu0 %v4544_v0  ;;  %2899 = vmatprep.subr.bf16.mxu1 %v4546_v1  ;;  %v4484_v1 = vcombine.high %v752_v58, %v788_v59  ;;  %v4486_v2 = vcombine.high %v753_v60, %v789_v62 }
 0x118   : > { %2859 = vmatpush1.bf16.msra.mxu0 %v4543_v6  ;;  %2900 = vmatpush1.bf16.msra.mxu1 %v4545_v7  ;;  %v825_v6 = vld [vmem:[%s5209_s10 + $0x568] sm:$0xff] }
 0x119   : > { %2936 = vmatprep.subr.bf16.mxu0 %v4404_v8  ;;  %2977 = vmatprep.subr.bf16.mxu1 %v4406_v9  ;;  %v861_v7 = vld [vmem:[%s5209_s10 + $0x688] sm:$0xff]  ;;  %v4483_v8 = vcombine.low %v752_v58, %v788_v59  ;;  %v4485_v9 = vcombine.low %v753_v60, %v789_v62  ;;  %v686_v60 = vld [vmem:[%s5209_s10 + $0x110] sm:$0xff] }
 0x11a   : > { %v4558_v11 = vcombine.high %v825_v6, %v861_v7  ;;  %v722_v62 = vld [vmem:[%s5209_s10 + $0x230] sm:$0xff] }
 0x11b   : > { %4593 = vmatmul.mubr.msk.bf16.vlgmr.msra.gmra.mrb[44].mxu0 %vm1948_vm0, %v5234_v61  ;;  %4594 = vmatmul.mubr.msk.bf16.vlgmr.msra.gmra.mrb[44].mxu1 %vm1948_vm0, %v5234_v61 }
 0x11c   : > { %2937 = vmatpush1.bf16.msra.mxu0 %v4403_v14  ;;  %2978 = vmatpush1.bf16.msra.mxu1 %v4405_v15  ;;  %v683_v14 = vld [vmem:[%s5209_s10 + $0xf8] sm:$0xff] }
 0x11d   : > { %2938 = vmatprep.subr.bf16.mxu0 %v4476_v16  ;;  %2979 = vmatprep.subr.bf16.mxu1 %v4478_v17  ;;  %v719_v15 = vld [vmem:[%s5209_s10 + $0x218] sm:$0xff]  ;;  %v4555_v16 = vcombine.low %v824_v3, %v860_v4  ;;  %v4557_v17 = vcombine.low %v825_v6, %v861_v7  ;;  %v4424_v3 = vcombine.high %v686_v60, %v722_v62  ;;  %v758_v6 = vld [vmem:[%s5209_s10 + $0x350] sm:$0xff] }
 0x11e   : > { %2968 = vmatprep.mubr.bf16.mxu0 %v4700_v24  ;;  %3009 = vmatprep.mubr.bf16.mxu1 %v4700_v24  ;;  %v4418_v19 = vcombine.high %v683_v14, %v719_v15  ;;  %v794_v7 = vld [vmem:[%s5209_s10 + $0x470] sm:$0xff] }
 0x120   : > { %2939 = vmatpush1.bf16.msra.mxu0 %v4475_v22  ;;  %2980 = vmatpush1.bf16.msra.mxu1 %v4477_v23  ;;  %v755_v22 = vld [vmem:[%s5209_s10 + $0x338] sm:$0xff] }
 0x121   : > { %2940 = vmatprep.subr.bf16.mxu0 %v4548_v25  ;;  %2981 = vmatprep.subr.bf16.mxu1 %v4550_v26  ;;  %v791_v23 = vld [vmem:[%s5209_s10 + $0x458] sm:$0xff]  ;;  %v4415_v25 = vcombine.low %v682_v12, %v718_v13  ;;  %v4417_v26 = vcombine.low %v683_v14, %v719_v15  ;;  %v4496_v12 = vcombine.high %v758_v6, %v794_v7  ;;  %v830_v14 = vld [vmem:[%s5209_s10 + $0x590] sm:$0xff] }
 0x122   : > { %v4490_v28 = vcombine.high %v755_v22, %v791_v23  ;;  %v866_v15 = vld [vmem:[%s5209_s10 + $0x6b0] sm:$0xff] }
 0x124   : > { %2941 = vmatpush1.bf16.msra.mxu0 %v4547_v31  ;;  %2982 = vmatpush1.bf16.msra.mxu1 %v4549_v32  ;;  %v827_v31 = vld [vmem:[%s5209_s10 + $0x578] sm:$0xff] }
 0x125   : > { %3018 = vmatprep.subr.bf16.mxu0 %v4408_v33  ;;  %3059 = vmatprep.subr.bf16.mxu1 %v4410_v34  ;;  %v863_v32 = vld [vmem:[%s5209_s10 + $0x698] sm:$0xff]  ;;  %v4487_v33 = vcombine.low %v754_v20, %v790_v21  ;;  %v4489_v34 = vcombine.low %v755_v22, %v791_v23  ;;  %v4568_v20 = vcombine.high %v830_v14, %v866_v15 }
 0x126   : > { %v4562_v36 = vcombine.high %v827_v31, %v863_v32  ;;  %v4567_v22 = vcombine.low %v830_v14, %v866_v15 }
 0x127   : > { %4595 = vmatmul.mubr.msk.bf16.vlgmr.msra.gmra.mrb[48].mxu0 %vm1948_vm0, %v5234_v61  ;;  %4596 = vmatmul.mubr.msk.bf16.vlgmr.msra.gmra.mrb[48].mxu1 %vm1948_vm0, %v5234_v61  ;;  %v717_v61 = vld [vmem:[%s5209_s10 + $0x208] sm:$0xff] }
 0x128   : > { %3019 = vmatpush1.bf16.msra.mxu0 %v4407_v39  ;;  %3060 = vmatpush1.bf16.msra.mxu1 %v4409_v40  ;;  %v4414_v57 = vcombine.high %v681_v53, %v717_v61  ;;  %v4413_v0 = vcombine.low %v681_v53, %v717_v61  ;;  %v685_v39 = vld [vmem:[%s5209_s10 + $0x108] sm:$0xff]  ;;  %v828_v53 = vld [vmem:[%s5209_s10 + $0x580] sm:$0xff] }
 0x129   : > { %3020 = vmatprep.subr.bf16.mxu0 %v4480_v41  ;;  %3061 = vmatprep.subr.bf16.mxu1 %v4482_v42  ;;  %v721_v40 = vld [vmem:[%s5209_s10 + $0x228] sm:$0xff]  ;;  %v4559_v41 = vcombine.low %v826_v29, %v862_v30  ;;  %v4561_v42 = vcombine.low %v827_v31, %v863_v32  ;;  %v864_v61 = vld [vmem:[%s5209_s10 + $0x6a0] sm:$0xff] }
 0x12a   : > { %3050 = vmatprep.mubr.bf16.mxu0 %v4700_v24  ;;  %3091 = vmatprep.mubr.bf16.mxu1 %v4700_v24  ;;  %v4422_v44 = vcombine.high %v685_v39, %v721_v40  ;;  %v4564_v58 = vcombine.high %v828_v53, %v864_v61 }
 0x12c   : > { %3021 = vmatpush1.bf16.msra.mxu0 %v4479_v47  ;;  %3062 = vmatpush1.bf16.msra.mxu1 %v4481_v48  ;;  %v757_v47 = vld [vmem:[%s5209_s10 + $0x348] sm:$0xff] }
 0x12d   : > { %3022 = vmatprep.subr.bf16.mxu0 %v4552_v49  ;;  %3063 = vmatprep.subr.bf16.mxu1 %v4554_v50  ;;  %v793_v48 = vld [vmem:[%s5209_s10 + $0x468] sm:$0xff]  ;;  %v4419_v49 = vcombine.low %v684_v37, %v720_v38  ;;  %v4421_v50 = vcombine.low %v685_v39, %v721_v40 }
 0x12e   : > { %v4494_v52 = vcombine.high %v757_v47, %v793_v48 }
 0x130   : > { %3023 = vmatpush1.bf16.msra.mxu0 %v4551_v54  ;;  %3064 = vmatpush1.bf16.msra.mxu1 %v4553_v55  ;;  %v829_v54 = vld [vmem:[%s5209_s10 + $0x588] sm:$0xff] }
 0x131   : > { %3100 = vmatprep.subr.bf16.mxu0 %v4412_v56  ;;  %3141 = vmatprep.subr.bf16.mxu1 %v4414_v57  ;;  %v865_v55 = vld [vmem:[%s5209_s10 + $0x6a8] sm:$0xff]  ;;  %v4491_v56 = vcombine.low %v756_v45, %v792_v46  ;;  %v4493_v57 = vcombine.low %v757_v47, %v793_v48 }
 0x132   : > { %v4566_v59 = vcombine.high %v829_v54, %v865_v55 }
 0x133   : > { %4597 = vmatmul.mubr.msk.bf16.vlgmr.msra.gmra.mrb[52].mxu0 %vm1948_vm0, %v5475_v5  ;;  %4598 = vmatmul.mubr.msk.bf16.vlgmr.msra.gmra.mrb[52].mxu1 %vm1948_vm0, %v5475_v5 }
 0x134   : > { %3101 = vmatpush1.bf16.msra.mxu0 %v4411_v63  ;;  %3142 = vmatpush1.bf16.msra.mxu1 %v4413_v0  ;;  %v687_v63 = vld [vmem:[%s5209_s10 + $0x118] sm:$0xff] }
 0x135   : > { %3102 = vmatprep.subr.bf16.mxu0 %v4484_v1  ;;  %3143 = vmatprep.subr.bf16.mxu1 %v4486_v2  ;;  %v723_v0 = vld [vmem:[%s5209_s10 + $0x238] sm:$0xff]  ;;  %v4563_v1 = vcombine.low %v828_v53, %v864_v61  ;;  %v4565_v2 = vcombine.low %v829_v54, %v865_v55 }
 0x136   : > { %3132 = vmatprep.mubr.bf16.mxu0 %v4700_v24  ;;  %3173 = vmatprep.mubr.bf16.mxu1 %v4700_v24  ;;  %v4426_v4 = vcombine.high %v687_v63, %v723_v0 }
 0x138   : > { %3103 = vmatpush1.bf16.msra.mxu0 %v4483_v8  ;;  %3144 = vmatpush1.bf16.msra.mxu1 %v4485_v9  ;;  %v759_v8 = vld [vmem:[%s5209_s10 + $0x358] sm:$0xff] }
 0x139   : > { %3104 = vmatprep.subr.bf16.mxu0 %v4556_v10  ;;  %3145 = vmatprep.subr.bf16.mxu1 %v4558_v11  ;;  %v795_v9 = vld [vmem:[%s5209_s10 + $0x478] sm:$0xff]  ;;  %v4423_v10 = vcombine.low %v686_v60, %v722_v62  ;;  %v4425_v11 = vcombine.low %v687_v63, %v723_v0 }
 0x13a   : > { %v4498_v13 = vcombine.high %v759_v8, %v795_v9 }
 0x13c   : > { %3105 = vmatpush1.bf16.msra.mxu0 %v4555_v16  ;;  %3146 = vmatpush1.bf16.msra.mxu1 %v4557_v17  ;;  %v831_v16 = vld [vmem:[%s5209_s10 + $0x598] sm:$0xff] }
 0x13d   : > { %3182 = vmatprep.subr.bf16.mxu0 %v4416_v18  ;;  %3223 = vmatprep.subr.bf16.mxu1 %v4418_v19  ;;  %v867_v17 = vld [vmem:[%s5209_s10 + $0x6b8] sm:$0xff]  ;;  %v4495_v18 = vcombine.low %v758_v6, %v794_v7  ;;  %v4497_v19 = vcombine.low %v759_v8, %v795_v9 }
 0x13e   : > { %v4570_v21 = vcombine.high %v831_v16, %v867_v17  ;;  %v4569_v23 = vcombine.low %v831_v16, %v867_v17 }
 0x13f   : > { %4599 = vmatmul.mubr.msk.bf16.vlgmr.msra.gmra.mrb[56].mxu0 %vm1948_vm0, %v5475_v5  ;;  %4600 = vmatmul.mubr.msk.bf16.vlgmr.msra.gmra.mrb[56].mxu1 %vm1948_vm0, %v5475_v5 }
 0x140   : > { %3183 = vmatpush1.bf16.msra.mxu0 %v4415_v25  ;;  %3224 = vmatpush1.bf16.msra.mxu1 %v4417_v26  ;;  %v5543_v25 = vpop.permute.xlu0 %3431  ;;  %v4701_v26 = vmov 1983009808  }
 0x141   : > { %3184 = vmatprep.subr.bf16.mxu0 %v4488_v27  ;;  %3225 = vmatprep.subr.bf16.mxu1 %v4490_v28  ;;  %v3949_v27 = vlaneseq }
 0x142   : > { %3214 = vmatprep.mubr.bf16.mxu0 %v4700_v24  ;;  %3255 = vmatprep.mubr.bf16.mxu1 %v4700_v24 }
 0x143   : > { %v3950_v40 = vshrl.u32 %v3949_v27, 7 }
 0x144   : > { %3185 = vmatpush1.bf16.msra.mxu0 %v4487_v33  ;;  %3226 = vmatpush1.bf16.msra.mxu1 %v4489_v34  ;;  %v5547_v29 = vpop.permute.xlu0 %3509 }
 0x145   : > { %3186 = vmatprep.subr.bf16.mxu0 %v4560_v35  ;;  %3227 = vmatprep.subr.bf16.mxu1 %v4562_v36 }
 0x148   : > { %3187 = vmatpush1.bf16.msra.mxu0 %v4559_v41  ;;  %3228 = vmatpush1.bf16.msra.mxu1 %v4561_v42 }
 0x149   : > { %3264 = vmatprep.subr.bf16.mxu0 %v4420_v43  ;;  %3305 = vmatprep.subr.bf16.mxu1 %v4422_v44 }
 0x14b   : > { %4601 = vmatmul.mubr.msk.bf16.vlgmr.msra.gmra.mrb[60].mxu0 %vm1948_vm0, %v5475_v5  ;;  %4602 = vmatmul.mubr.msk.bf16.vlgmr.msra.gmra.mrb[60].mxu1 %vm1948_vm0, %v5475_v5 }
 0x14c   : > { %3265 = vmatpush1.bf16.msra.mxu0 %v4419_v49  ;;  %3306 = vmatpush1.bf16.msra.mxu1 %v4421_v50 }
 0x14d   : > { %3266 = vmatprep.subr.bf16.mxu0 %v4492_v51  ;;  %3307 = vmatprep.subr.bf16.mxu1 %v4494_v52 }
 0x14e   : > { %3296 = vmatprep.mubr.bf16.mxu0 %v4700_v24  ;;  %3337 = vmatprep.mubr.bf16.mxu1 %v4700_v24 }
 0x150   : > { %3267 = vmatpush1.bf16.msra.mxu0 %v4491_v56  ;;  %3308 = vmatpush1.bf16.msra.mxu1 %v4493_v57 }
 0x151   : > { %3268 = vmatprep.subr.bf16.mxu0 %v4564_v58  ;;  %3309 = vmatprep.subr.bf16.mxu1 %v4566_v59 }
 0x154   : > { %3269 = vmatpush1.bf16.msra.mxu0 %v4563_v1  ;;  %3310 = vmatpush1.bf16.msra.mxu1 %v4565_v2 }
 0x155   : > { %3346 = vmatprep.subr.bf16.mxu0 %v4424_v3  ;;  %3387 = vmatprep.subr.bf16.mxu1 %v4426_v4 }
 0x157   : > { %4603 = vmatmul.mubr.msk.bf16.vlgmr.msra.gmra.mrb[64].mxu0 %vm1948_vm0, %v5475_v5  ;;  %4604 = vmatmul.mubr.msk.bf16.vlgmr.msra.gmra.mrb[64].mxu1 %vm1948_vm0, %v5475_v5 }
 0x158   : > { %3347 = vmatpush1.bf16.msra.mxu0 %v4423_v10  ;;  %3388 = vmatpush1.bf16.msra.mxu1 %v4425_v11 }
 0x159   : > { %3348 = vmatprep.subr.bf16.mxu0 %v4496_v12  ;;  %3389 = vmatprep.subr.bf16.mxu1 %v4498_v13 }
 0x15a   : > { %3378 = vmatprep.mubr.bf16.mxu0 %v4700_v24  ;;  %3419 = vmatprep.mubr.bf16.mxu1 %v4700_v24  ;;  %v3947_v24 = vunpack.c.l.s4 %v4701_v26 }
 0x15c   : > { %3349 = vmatpush1.bf16.msra.mxu0 %v4495_v18  ;;  %3390 = vmatpush1.bf16.msra.mxu1 %v4497_v19  ;;  %v3948_v39 = vunpack.c.0.s8 %v3947_v24 }
 0x15d   : > { %3350 = vmatprep.subr.bf16.mxu0 %v4568_v20  ;;  %3391 = vmatprep.subr.bf16.mxu1 %v4570_v21 }
 0x15e   : > { %v5558_v49 = vsub.s32 %v3948_v39, %v3950_v40 }
 0x160   : > { %3351 = vmatpush1.bf16.msra.mxu0 %v4567_v22  ;;  %3392 = vmatpush1.bf16.msra.mxu1 %v4569_v23 }
 0x163   : > { %4605 = vmatmul.mubr.msk.bf16.vlgmr.msra.gmra.mrb[68].mxu0 %vm1948_vm0, %v5475_v5  ;;  %4606 = vmatmul.mubr.msk.bf16.vlgmr.msra.gmra.mrb[68].mxu1 %vm1948_vm0, %v5475_v5 }
 0x16a   : > { %v1986_v28 = vpop.f32.mrb[0].mxu0  ;;  %v2027_v31 = vpop.f32.mrb[0].mxu1 }
 0x16b   : > { %v3434_v30 = vmul.f32 %v5543_v25, %v1986_v28  ;;  %v1988_v32 = vpop.f32.mrb[1].mxu0  ;;  %v3436_v33 = vmul.f32 %v5543_v25, %v2027_v31  ;;  %v2029_v5 = vpop.f32.mrb[1].mxu1 }
 0x16c   : > { %v3435_v34 = vmul.f32 %v5543_v25, %v1988_v32  ;;  %v1990_v35 = vpop.f32.mrb[2].mxu0  ;;  %v3437_v36 = vmul.f32 %v5543_v25, %v2029_v5  ;;  %v2031_v37 = vpop.f32.mrb[2].mxu1 }
 0x16d   : > { %v1991_v38 = vpop.f32.mrb[3].mxu0  ;;  %v3512_v41 = vadd.f32 %v5547_v29, %v3434_v30  ;;  %v2032_v42 = vpop.f32.mrb[3].mxu1  ;;  %v3514_v44 = vadd.f32 %v5547_v29, %v3436_v33 }
 0x16e   : > { %v3513_v43 = vadd.f32 %v5547_v29, %v3435_v34  ;;  %v3515_v45 = vadd.f32 %v5547_v29, %v3437_v36 }
 0x16f   : > { %vm3584_vm1 = vcmp.ge.f32.partialorder %v3512_v41, 0.0  ;;  %v3656_v46 = vmul.f32 0.2, %v3512_v41  ;;  %vm3586_vm3 = vcmp.ge.f32.partialorder %v3514_v44, 0.0  ;;  %v3658_v48 = vmul.f32 0.2, %v3514_v44 }
 0x170   : > { %vm3585_vm2 = vcmp.ge.f32.partialorder %v3513_v43, 0.0  ;;  %v3657_v47 = vmul.f32 0.2, %v3513_v43  ;;  %vm3587_vm4 = vcmp.ge.f32.partialorder %v3515_v45, 0.0  ;;  %v3659_v50 = vmul.f32 0.2, %v3515_v45 }
 0x171   : > { %v3728_v51 = vsel %vm3584_vm1, %v3512_v41, %v3656_v46  ;;  %v3730_v53 = vsel %vm3586_vm3, %v3514_v44, %v3658_v48 }
 0x172   : > { %v3729_v52 = vsel %vm3585_vm2, %v3513_v43, %v3657_v47  ;;  %v3731_v61 = vsel %vm3587_vm4, %v3515_v45, %v3659_v50 }
 0x173   : > { %v4607_v54 = vpack.c.bf16 %v3729_v52, %v3728_v51  ;;  %v4608_v55 = vpack.c.bf16 %v3731_v61, %v3730_v53 }
 0x175   : > { %v3952_v56 = vrot.slane %v4607_v54, %v5558_v49  ;;  %v3959_v58 = vrot.slane %v4608_v55, %v5558_v49 }
 0x176   : > { %v2068_v57 = vpop.f32.mrb[4].mxu0  ;;  %v2109_v60 = vpop.f32.mrb[4].mxu1 }
 0x177   : > { %v3438_v59 = vmul.f32 %v5543_v25, %v2068_v57  ;;  %v2070_v62 = vpop.f32.mrb[5].mxu0  ;;  %v3440_v63 = vmul.f32 %v5543_v25, %v2109_v60  ;;  %v2111_v1 = vpop.f32.mrb[5].mxu1  ;;  %v3960_v2 = vcombine.low %v3952_v56, %v3959_v58 }
 0x178   : > { %v3439_v0 = vmul.f32 %v5543_v25, %v2070_v62  ;;  %v2072_v3 = vpop.f32.mrb[6].mxu0  ;;  %v3441_v6 = vmul.f32 %v5543_v25, %v2111_v1  ;;  %v2113_v7 = vpop.f32.mrb[6].mxu1 }
 0x179   : > { %v3516_v4 = vadd.f32 %v5547_v29, %v3438_v59  ;;  %v2073_v8 = vpop.f32.mrb[7].mxu0  ;;  %v3518_v9 = vadd.f32 %v5547_v29, %v3440_v63  ;;  %4268 = vst [vmem:[%s5566_s21] sm:$0xff] %v3960_v2  ;;  %v2114_v11 = vpop.f32.mrb[7].mxu1 }
 0x17a   : > { %v3517_v10 = vadd.f32 %v5547_v29, %v3439_v0  ;;  %v3519_v13 = vadd.f32 %v5547_v29, %v3441_v6 }
 0x17b   : > { %vm3588_vm5 = vcmp.ge.f32.partialorder %v3516_v4, 0.0  ;;  %v3660_v12 = vmul.f32 0.2, %v3516_v4  ;;  %vm3590_vm6 = vcmp.ge.f32.partialorder %v3518_v9, 0.0  ;;  %v3662_v14 = vmul.f32 0.2, %v3518_v9 }
 0x17c   : > { %vm3589_vm7 = vcmp.ge.f32.partialorder %v3517_v10, 0.0  ;;  %v3661_v15 = vmul.f32 0.2, %v3517_v10  ;;  %vm3591_vm8 = vcmp.ge.f32.partialorder %v3519_v13, 0.0  ;;  %v3663_v17 = vmul.f32 0.2, %v3519_v13 }
 0x17d   : > { %v3732_v16 = vsel %vm3588_vm5, %v3516_v4, %v3660_v12  ;;  %v3734_v18 = vsel %vm3590_vm6, %v3518_v9, %v3662_v14 }
 0x17e   : > { %v3733_v19 = vsel %vm3589_vm7, %v3517_v10, %v3661_v15  ;;  %v3735_v21 = vsel %vm3591_vm8, %v3519_v13, %v3663_v17 }
 0x17f   : > { %v4609_v20 = vpack.c.bf16 %v3733_v19, %v3732_v16  ;;  %v4610_v22 = vpack.c.bf16 %v3735_v21, %v3734_v18 }
 0x181   : > { %v3969_v23 = vrot.slane %v4609_v20, %v5558_v49  ;;  %v3976_v26 = vrot.slane %v4610_v22, %v5558_v49 }
 0x182   : > { %v2150_v24 = vpop.f32.mrb[8].mxu0  ;;  %v2191_v28 = vpop.f32.mrb[8].mxu1 }
 0x183   : > { %v3442_v27 = vmul.f32 %v5543_v25, %v2150_v24  ;;  %v2152_v30 = vpop.f32.mrb[9].mxu0  ;;  %v3977_v31 = vcombine.low %v3969_v23, %v3976_v26  ;;  %v3444_v32 = vmul.f32 %v5543_v25, %v2191_v28  ;;  %v2193_v34 = vpop.f32.mrb[9].mxu1 }
 0x184   : > { %v3443_v33 = vmul.f32 %v5543_v25, %v2152_v30  ;;  %v2154_v5 = vpop.f32.mrb[10].mxu0  ;;  %v3445_v36 = vmul.f32 %v5543_v25, %v2193_v34  ;;  %v2195_v37 = vpop.f32.mrb[10].mxu1 }
 0x185   : > { %v3520_v35 = vadd.f32 %v5547_v29, %v3442_v27  ;;  %v2155_v38 = vpop.f32.mrb[11].mxu0  ;;  %4269 = vst [vmem:[%s5566_s21 + $0x8] sm:$0xff] %v3977_v31  ;;  %v3522_v39 = vadd.f32 %v5547_v29, %v3444_v32  ;;  %v2196_v41 = vpop.f32.mrb[11].mxu1 }
 0x186   : > { %v3521_v40 = vadd.f32 %v5547_v29, %v3443_v33  ;;  %v3523_v43 = vadd.f32 %v5547_v29, %v3445_v36 }
 0x187   : > { %vm3592_vm9 = vcmp.ge.f32.partialorder %v3520_v35, 0.0  ;;  %v3664_v42 = vmul.f32 0.2, %v3520_v35  ;;  %vm3594_vm10 = vcmp.ge.f32.partialorder %v3522_v39, 0.0  ;;  %v3666_v44 = vmul.f32 0.2, %v3522_v39 }
 0x188   : > { %vm3593_vm11 = vcmp.ge.f32.partialorder %v3521_v40, 0.0  ;;  %v3665_v45 = vmul.f32 0.2, %v3521_v40  ;;  %vm3595_vm12 = vcmp.ge.f32.partialorder %v3523_v43, 0.0  ;;  %v3667_v47 = vmul.f32 0.2, %v3523_v43 }
 0x189   : > { %v3736_v46 = vsel %vm3592_vm9, %v3520_v35, %v3664_v42  ;;  %v3738_v48 = vsel %vm3594_vm10, %v3522_v39, %v3666_v44 }
 0x18a   : > { %v3737_v50 = vsel %vm3593_vm11, %v3521_v40, %v3665_v45  ;;  %v3739_v52 = vsel %vm3595_vm12, %v3523_v43, %v3667_v47 }
 0x18b   : > { %v4611_v51 = vpack.c.bf16 %v3737_v50, %v3736_v46  ;;  %v4612_v53 = vpack.c.bf16 %v3739_v52, %v3738_v48 }
 0x18d   : > { %v3986_v61 = vrot.slane %v4611_v51, %v5558_v49  ;;  %v3993_v54 = vrot.slane %v4612_v53, %v5558_v49 }
 0x18e   : > { %v2232_v55 = vpop.f32.mrb[12].mxu0  ;;  %v2273_v57 = vpop.f32.mrb[12].mxu1 }
 0x18f   : > { %v3446_v56 = vmul.f32 %v5543_v25, %v2232_v55  ;;  %v2234_v58 = vpop.f32.mrb[13].mxu0  ;;  %v3994_v59 = vcombine.low %v3986_v61, %v3993_v54  ;;  %v3448_v60 = vmul.f32 %v5543_v25, %v2273_v57  ;;  %v2275_v63 = vpop.f32.mrb[13].mxu1 }
 0x190   : > { %v3447_v62 = vmul.f32 %v5543_v25, %v2234_v58  ;;  %v2236_v0 = vpop.f32.mrb[14].mxu0  ;;  %v3449_v2 = vmul.f32 %v5543_v25, %v2275_v63  ;;  %v2277_v3 = vpop.f32.mrb[14].mxu1 }
 0x191   : > { %v3524_v1 = vadd.f32 %v5547_v29, %v3446_v56  ;;  %v2237_v4 = vpop.f32.mrb[15].mxu0  ;;  %4270 = vst [vmem:[%s5566_s21 + $0x10] sm:$0xff] %v3994_v59  ;;  %v3526_v6 = vadd.f32 %v5547_v29, %v3448_v60  ;;  %v2278_v8 = vpop.f32.mrb[15].mxu1 }
 0x192   : > { %v3525_v7 = vadd.f32 %v5547_v29, %v3447_v62  ;;  %v3527_v10 = vadd.f32 %v5547_v29, %v3449_v2 }
 0x193   : > { %vm3596_vm13 = vcmp.ge.f32.partialorder %v3524_v1, 0.0  ;;  %v3668_v9 = vmul.f32 0.2, %v3524_v1  ;;  %vm3598_vm14 = vcmp.ge.f32.partialorder %v3526_v6, 0.0  ;;  %v3670_v11 = vmul.f32 0.2, %v3526_v6 }
 0x194   : > { %vm3597_vm15 = vcmp.ge.f32.partialorder %v3525_v7, 0.0  ;;  %v3669_v12 = vmul.f32 0.2, %v3525_v7  ;;  %vm3599_vm0 = vcmp.ge.f32.partialorder %v3527_v10, 0.0  ;;  %v3671_v14 = vmul.f32 0.2, %v3527_v10 }
 0x195   : > { %v3740_v13 = vsel %vm3596_vm13, %v3524_v1, %v3668_v9  ;;  %v3742_v15 = vsel %vm3598_vm14, %v3526_v6, %v3670_v11 }
 0x196   : > { %v3741_v16 = vsel %vm3597_vm15, %v3525_v7, %v3669_v12  ;;  %v3743_v18 = vsel %vm3599_vm0, %v3527_v10, %v3671_v14 }
 0x197   : > { %v4613_v17 = vpack.c.bf16 %v3741_v16, %v3740_v13  ;;  %v4614_v19 = vpack.c.bf16 %v3743_v18, %v3742_v15 }
 0x199   : > { %v4003_v20 = vrot.slane %v4613_v17, %v5558_v49  ;;  %v4010_v21 = vrot.slane %v4614_v19, %v5558_v49 }
 0x19a   : > { %v2314_v22 = vpop.f32.mrb[16].mxu0  ;;  %v2355_v26 = vpop.f32.mrb[16].mxu1 }
 0x19b   : > { %v3450_v23 = vmul.f32 %v5543_v25, %v2314_v22  ;;  %v2316_v24 = vpop.f32.mrb[17].mxu0  ;;  %v4011_v27 = vcombine.low %v4003_v20, %v4010_v21  ;;  %v3452_v28 = vmul.f32 %v5543_v25, %v2355_v26  ;;  %v2357_v31 = vpop.f32.mrb[17].mxu1 }
 0x19c   : > { %v3451_v30 = vmul.f32 %v5543_v25, %v2316_v24  ;;  %v2318_v32 = vpop.f32.mrb[18].mxu0  ;;  %v3453_v34 = vmul.f32 %v5543_v25, %v2357_v31  ;;  %v2359_v5 = vpop.f32.mrb[18].mxu1 }
 0x19d   : > { %v3528_v33 = vadd.f32 %v5547_v29, %v3450_v23  ;;  %v2319_v35 = vpop.f32.mrb[19].mxu0  ;;  %4271 = vst [vmem:[%s5566_s21 + $0x18] sm:$0xff] %v4011_v27  ;;  %v3530_v36 = vadd.f32 %v5547_v29, %v3452_v28  ;;  %v2360_v38 = vpop.f32.mrb[19].mxu1 }
 0x19e   : > { %v3529_v37 = vadd.f32 %v5547_v29, %v3451_v30  ;;  %v3531_v40 = vadd.f32 %v5547_v29, %v3453_v34 }
 0x19f   : > { %vm3600_vm1 = vcmp.ge.f32.partialorder %v3528_v33, 0.0  ;;  %v3672_v39 = vmul.f32 0.2, %v3528_v33  ;;  %vm3602_vm2 = vcmp.ge.f32.partialorder %v3530_v36, 0.0  ;;  %v3674_v41 = vmul.f32 0.2, %v3530_v36 }
 0x1a0   : > { %vm3601_vm3 = vcmp.ge.f32.partialorder %v3529_v37, 0.0  ;;  %v3673_v42 = vmul.f32 0.2, %v3529_v37  ;;  %vm3603_vm4 = vcmp.ge.f32.partialorder %v3531_v40, 0.0  ;;  %v3675_v44 = vmul.f32 0.2, %v3531_v40 }
 0x1a1   : > { %v3744_v43 = vsel %vm3600_vm1, %v3528_v33, %v3672_v39  ;;  %v3746_v45 = vsel %vm3602_vm2, %v3530_v36, %v3674_v41 }
 0x1a2   : > { %v3745_v46 = vsel %vm3601_vm3, %v3529_v37, %v3673_v42  ;;  %v3747_v48 = vsel %vm3603_vm4, %v3531_v40, %v3675_v44 }
 0x1a3   : > { %v4615_v47 = vpack.c.bf16 %v3745_v46, %v3744_v43  ;;  %v4616_v50 = vpack.c.bf16 %v3747_v48, %v3746_v45 }
 0x1a5   : > { %v4020_v51 = vrot.slane %v4615_v47, %v5558_v49  ;;  %v4027_v52 = vrot.slane %v4616_v50, %v5558_v49 }
 0x1a6   : > { %v2396_v53 = vpop.f32.mrb[20].mxu0  ;;  %v2437_v54 = vpop.f32.mrb[20].mxu1 }
 0x1a7   : > { %v3454_v61 = vmul.f32 %v5543_v25, %v2396_v53  ;;  %v2398_v55 = vpop.f32.mrb[21].mxu0  ;;  %v4028_v56 = vcombine.low %v4020_v51, %v4027_v52  ;;  %v3456_v57 = vmul.f32 %v5543_v25, %v2437_v54  ;;  %v2439_v59 = vpop.f32.mrb[21].mxu1 }
 0x1a8   : > { %v3455_v58 = vmul.f32 %v5543_v25, %v2398_v55  ;;  %v2400_v60 = vpop.f32.mrb[22].mxu0  ;;  %v3457_v63 = vmul.f32 %v5543_v25, %v2439_v59  ;;  %v2441_v0 = vpop.f32.mrb[22].mxu1 }
 0x1a9   : > { %v3532_v62 = vadd.f32 %v5547_v29, %v3454_v61  ;;  %v2401_v1 = vpop.f32.mrb[23].mxu0  ;;  %4272 = vst [vmem:[%s5566_s21 + $0x20] sm:$0xff] %v4028_v56  ;;  %v3534_v2 = vadd.f32 %v5547_v29, %v3456_v57  ;;  %v2442_v4 = vpop.f32.mrb[23].mxu1 }
 0x1aa   : > { %v3533_v3 = vadd.f32 %v5547_v29, %v3455_v58  ;;  %v3535_v7 = vadd.f32 %v5547_v29, %v3457_v63 }
 0x1ab   : > { %vm3604_vm5 = vcmp.ge.f32.partialorder %v3532_v62, 0.0  ;;  %v3676_v6 = vmul.f32 0.2, %v3532_v62  ;;  %vm3606_vm6 = vcmp.ge.f32.partialorder %v3534_v2, 0.0  ;;  %v3678_v8 = vmul.f32 0.2, %v3534_v2 }
 0x1ac   : > { %vm3605_vm7 = vcmp.ge.f32.partialorder %v3533_v3, 0.0  ;;  %v3677_v9 = vmul.f32 0.2, %v3533_v3  ;;  %vm3607_vm8 = vcmp.ge.f32.partialorder %v3535_v7, 0.0  ;;  %v3679_v11 = vmul.f32 0.2, %v3535_v7 }
 0x1ad   : > { %v3748_v10 = vsel %vm3604_vm5, %v3532_v62, %v3676_v6  ;;  %v3750_v12 = vsel %vm3606_vm6, %v3534_v2, %v3678_v8 }
 0x1ae   : > { %v3749_v13 = vsel %vm3605_vm7, %v3533_v3, %v3677_v9  ;;  %v3751_v15 = vsel %vm3607_vm8, %v3535_v7, %v3679_v11 }
 0x1af   : > { %v4617_v14 = vpack.c.bf16 %v3749_v13, %v3748_v10  ;;  %v4618_v16 = vpack.c.bf16 %v3751_v15, %v3750_v12 }
 0x1b1   : > { %v4037_v17 = vrot.slane %v4617_v14, %v5558_v49  ;;  %v4044_v18 = vrot.slane %v4618_v16, %v5558_v49 }
 0x1b2   : > { %v2478_v19 = vpop.f32.mrb[24].mxu0  ;;  %v2519_v21 = vpop.f32.mrb[24].mxu1 }
 0x1b3   : > { %v3458_v20 = vmul.f32 %v5543_v25, %v2478_v19  ;;  %v2480_v22 = vpop.f32.mrb[25].mxu0  ;;  %v4045_v23 = vcombine.low %v4037_v17, %v4044_v18  ;;  %v3460_v26 = vmul.f32 %v5543_v25, %v2519_v21  ;;  %v2521_v27 = vpop.f32.mrb[25].mxu1 }
 0x1b4   : > { %v3459_v24 = vmul.f32 %v5543_v25, %v2480_v22  ;;  %v2482_v28 = vpop.f32.mrb[26].mxu0  ;;  %v3461_v31 = vmul.f32 %v5543_v25, %v2521_v27  ;;  %v2523_v32 = vpop.f32.mrb[26].mxu1 }
 0x1b5   : > { %v3536_v30 = vadd.f32 %v5547_v29, %v3458_v20  ;;  %v2483_v33 = vpop.f32.mrb[27].mxu0  ;;  %4273 = vst [vmem:[%s5566_s21 + $0x28] sm:$0xff] %v4045_v23  ;;  %v3538_v34 = vadd.f32 %v5547_v29, %v3460_v26  ;;  %v2524_v35 = vpop.f32.mrb[27].mxu1 }
 0x1b6   : > { %v3537_v5 = vadd.f32 %v5547_v29, %v3459_v24  ;;  %v3539_v37 = vadd.f32 %v5547_v29, %v3461_v31 }
 0x1b7   : > { %vm3608_vm9 = vcmp.ge.f32.partialorder %v3536_v30, 0.0  ;;  %v3680_v36 = vmul.f32 0.2, %v3536_v30  ;;  %vm3610_vm10 = vcmp.ge.f32.partialorder %v3538_v34, 0.0  ;;  %v3682_v38 = vmul.f32 0.2, %v3538_v34 }
 0x1b8   : > { %vm3609_vm11 = vcmp.ge.f32.partialorder %v3537_v5, 0.0  ;;  %v3681_v39 = vmul.f32 0.2, %v3537_v5  ;;  %vm3611_vm12 = vcmp.ge.f32.partialorder %v3539_v37, 0.0  ;;  %v3683_v41 = vmul.f32 0.2, %v3539_v37 }
 0x1b9   : > { %v3752_v40 = vsel %vm3608_vm9, %v3536_v30, %v3680_v36  ;;  %v3754_v42 = vsel %vm3610_vm10, %v3538_v34, %v3682_v38 }
 0x1ba   : > { %v3753_v43 = vsel %vm3609_vm11, %v3537_v5, %v3681_v39  ;;  %v3755_v45 = vsel %vm3611_vm12, %v3539_v37, %v3683_v41 }
 0x1bb   : > { %v4619_v44 = vpack.c.bf16 %v3753_v43, %v3752_v40  ;;  %v4620_v46 = vpack.c.bf16 %v3755_v45, %v3754_v42 }
 0x1bd   : > { %v4054_v47 = vrot.slane %v4619_v44, %v5558_v49  ;;  %v4061_v48 = vrot.slane %v4620_v46, %v5558_v49 }
 0x1be   : > { %v2560_v50 = vpop.f32.mrb[28].mxu0  ;;  %v2601_v52 = vpop.f32.mrb[28].mxu1 }
 0x1bf   : > { %v3462_v51 = vmul.f32 %v5543_v25, %v2560_v50  ;;  %v2562_v53 = vpop.f32.mrb[29].mxu0  ;;  %v4062_v61 = vcombine.low %v4054_v47, %v4061_v48  ;;  %v3464_v54 = vmul.f32 %v5543_v25, %v2601_v52  ;;  %v2603_v56 = vpop.f32.mrb[29].mxu1 }
 0x1c0   : > { %v3463_v55 = vmul.f32 %v5543_v25, %v2562_v53  ;;  %v2564_v57 = vpop.f32.mrb[30].mxu0  ;;  %v3465_v59 = vmul.f32 %v5543_v25, %v2603_v56  ;;  %v2605_v60 = vpop.f32.mrb[30].mxu1 }
 0x1c1   : > { %v3540_v58 = vadd.f32 %v5547_v29, %v3462_v51  ;;  %v2565_v62 = vpop.f32.mrb[31].mxu0  ;;  %4274 = vst [vmem:[%s5566_s21 + $0x30] sm:$0xff] %v4062_v61  ;;  %v3542_v63 = vadd.f32 %v5547_v29, %v3464_v54  ;;  %v2606_v1 = vpop.f32.mrb[31].mxu1 }
 0x1c2   : > { %v3541_v0 = vadd.f32 %v5547_v29, %v3463_v55  ;;  %v3543_v3 = vadd.f32 %v5547_v29, %v3465_v59 }
 0x1c3   : > { %vm3612_vm13 = vcmp.ge.f32.partialorder %v3540_v58, 0.0  ;;  %v3684_v2 = vmul.f32 0.2, %v3540_v58  ;;  %vm3614_vm14 = vcmp.ge.f32.partialorder %v3542_v63, 0.0  ;;  %v3686_v4 = vmul.f32 0.2, %v3542_v63 }
 0x1c4   : > { %vm3613_vm15 = vcmp.ge.f32.partialorder %v3541_v0, 0.0  ;;  %v3685_v6 = vmul.f32 0.2, %v3541_v0  ;;  %vm3615_vm0 = vcmp.ge.f32.partialorder %v3543_v3, 0.0  ;;  %v3687_v8 = vmul.f32 0.2, %v3543_v3 }
 0x1c5   : > { %v3756_v7 = vsel %vm3612_vm13, %v3540_v58, %v3684_v2  ;;  %v3758_v9 = vsel %vm3614_vm14, %v3542_v63, %v3686_v4 }
 0x1c6   : > { %v3757_v10 = vsel %vm3613_vm15, %v3541_v0, %v3685_v6  ;;  %v3759_v12 = vsel %vm3615_vm0, %v3543_v3, %v3687_v8 }
 0x1c7   : > { %v4621_v11 = vpack.c.bf16 %v3757_v10, %v3756_v7  ;;  %v4622_v13 = vpack.c.bf16 %v3759_v12, %v3758_v9 }
 0x1c9   : > { %v4071_v14 = vrot.slane %v4621_v11, %v5558_v49  ;;  %v4078_v15 = vrot.slane %v4622_v13, %v5558_v49 }
 0x1ca   : > { %v2642_v16 = vpop.f32.mrb[32].mxu0  ;;  %v2683_v18 = vpop.f32.mrb[32].mxu1 }
 0x1cb   : > { %v3466_v17 = vmul.f32 %v5543_v25, %v2642_v16  ;;  %v2644_v19 = vpop.f32.mrb[33].mxu0  ;;  %v4079_v20 = vcombine.low %v4071_v14, %v4078_v15  ;;  %v3468_v21 = vmul.f32 %v5543_v25, %v2683_v18  ;;  %v2685_v23 = vpop.f32.mrb[33].mxu1 }
 0x1cc   : > { %v3467_v22 = vmul.f32 %v5543_v25, %v2644_v19  ;;  %v2646_v26 = vpop.f32.mrb[34].mxu0  ;;  %v3469_v27 = vmul.f32 %v5543_v25, %v2685_v23  ;;  %v2687_v28 = vpop.f32.mrb[34].mxu1 }
 0x1cd   : > { %v3544_v24 = vadd.f32 %v5547_v29, %v3466_v17  ;;  %v2647_v30 = vpop.f32.mrb[35].mxu0  ;;  %4275 = vst [vmem:[%s5566_s21 + $0x38] sm:$0xff] %v4079_v20  ;;  %v3546_v31 = vadd.f32 %v5547_v29, %v3468_v21  ;;  %v2688_v33 = vpop.f32.mrb[35].mxu1 }
 0x1ce   : > { %v3545_v32 = vadd.f32 %v5547_v29, %v3467_v22  ;;  %v3547_v5 = vadd.f32 %v5547_v29, %v3469_v27 }
 0x1cf   : > { %vm3616_vm1 = vcmp.ge.f32.partialorder %v3544_v24, 0.0  ;;  %v3688_v34 = vmul.f32 0.2, %v3544_v24  ;;  %vm3618_vm2 = vcmp.ge.f32.partialorder %v3546_v31, 0.0  ;;  %v3690_v35 = vmul.f32 0.2, %v3546_v31 }
 0x1d0   : > { %vm3617_vm3 = vcmp.ge.f32.partialorder %v3545_v32, 0.0  ;;  %v3689_v36 = vmul.f32 0.2, %v3545_v32  ;;  %vm3619_vm4 = vcmp.ge.f32.partialorder %v3547_v5, 0.0  ;;  %v3691_v38 = vmul.f32 0.2, %v3547_v5 }
 0x1d1   : > { %v3760_v37 = vsel %vm3616_vm1, %v3544_v24, %v3688_v34  ;;  %v3762_v39 = vsel %vm3618_vm2, %v3546_v31, %v3690_v35 }
 0x1d2   : > { %v3761_v40 = vsel %vm3617_vm3, %v3545_v32, %v3689_v36  ;;  %v3763_v42 = vsel %vm3619_vm4, %v3547_v5, %v3691_v38 }
 0x1d3   : > { %v4623_v41 = vpack.c.bf16 %v3761_v40, %v3760_v37  ;;  %v4624_v43 = vpack.c.bf16 %v3763_v42, %v3762_v39 }
 0x1d5   : > { %v4088_v44 = vrot.slane %v4623_v41, %v5558_v49  ;;  %v4095_v45 = vrot.slane %v4624_v43, %v5558_v49 }
 0x1d6   : > { %v2724_v46 = vpop.f32.mrb[36].mxu0  ;;  %v2765_v48 = vpop.f32.mrb[36].mxu1 }
 0x1d7   : > { %v3470_v47 = vmul.f32 %v5543_v25, %v2724_v46  ;;  %v2726_v50 = vpop.f32.mrb[37].mxu0  ;;  %v4096_v51 = vcombine.low %v4088_v44, %v4095_v45  ;;  %v3472_v52 = vmul.f32 %v5543_v25, %v2765_v48  ;;  %v2767_v61 = vpop.f32.mrb[37].mxu1 }
 0x1d8   : > { %v3471_v53 = vmul.f32 %v5543_v25, %v2726_v50  ;;  %v2728_v54 = vpop.f32.mrb[38].mxu0  ;;  %v3473_v56 = vmul.f32 %v5543_v25, %v2767_v61  ;;  %v2769_v57 = vpop.f32.mrb[38].mxu1 }
 0x1d9   : > { %v3548_v55 = vadd.f32 %v5547_v29, %v3470_v47  ;;  %v2729_v58 = vpop.f32.mrb[39].mxu0  ;;  %4276 = vst [vmem:[%s5566_s21 + $0x40] sm:$0xff] %v4096_v51  ;;  %v3550_v59 = vadd.f32 %v5547_v29, %v3472_v52  ;;  %v2770_v62 = vpop.f32.mrb[39].mxu1 }
 0x1da   : > { %v3549_v60 = vadd.f32 %v5547_v29, %v3471_v53  ;;  %v3551_v0 = vadd.f32 %v5547_v29, %v3473_v56 }
 0x1db   : > { %vm3620_vm5 = vcmp.ge.f32.partialorder %v3548_v55, 0.0  ;;  %v3692_v63 = vmul.f32 0.2, %v3548_v55  ;;  %vm3622_vm6 = vcmp.ge.f32.partialorder %v3550_v59, 0.0  ;;  %v3694_v1 = vmul.f32 0.2, %v3550_v59 }
 0x1dc   : > { %vm3621_vm7 = vcmp.ge.f32.partialorder %v3549_v60, 0.0  ;;  %v3693_v2 = vmul.f32 0.2, %v3549_v60  ;;  %vm3623_vm8 = vcmp.ge.f32.partialorder %v3551_v0, 0.0  ;;  %v3695_v4 = vmul.f32 0.2, %v3551_v0 }
 0x1dd   : > { %v3764_v3 = vsel %vm3620_vm5, %v3548_v55, %v3692_v63  ;;  %v3766_v6 = vsel %vm3622_vm6, %v3550_v59, %v3694_v1 }
 0x1de   : > { %v3765_v7 = vsel %vm3621_vm7, %v3549_v60, %v3693_v2  ;;  %v3767_v9 = vsel %vm3623_vm8, %v3551_v0, %v3695_v4 }
 0x1df   : > { %v4625_v8 = vpack.c.bf16 %v3765_v7, %v3764_v3  ;;  %v4626_v10 = vpack.c.bf16 %v3767_v9, %v3766_v6 }
 0x1e1   : > { %v4105_v11 = vrot.slane %v4625_v8, %v5558_v49  ;;  %v4112_v12 = vrot.slane %v4626_v10, %v5558_v49 }
 0x1e2   : > { %v2806_v13 = vpop.f32.mrb[40].mxu0  ;;  %v2847_v15 = vpop.f32.mrb[40].mxu1 }
 0x1e3   : > { %v3474_v14 = vmul.f32 %v5543_v25, %v2806_v13  ;;  %v2808_v16 = vpop.f32.mrb[41].mxu0  ;;  %v4113_v17 = vcombine.low %v4105_v11, %v4112_v12  ;;  %v3476_v18 = vmul.f32 %v5543_v25, %v2847_v15  ;;  %v2849_v20 = vpop.f32.mrb[41].mxu1 }
 0x1e4   : > { %v3475_v19 = vmul.f32 %v5543_v25, %v2808_v16  ;;  %v2810_v21 = vpop.f32.mrb[42].mxu0  ;;  %v3477_v23 = vmul.f32 %v5543_v25, %v2849_v20  ;;  %v2851_v26 = vpop.f32.mrb[42].mxu1 }
 0x1e5   : > { %v3552_v22 = vadd.f32 %v5547_v29, %v3474_v14  ;;  %v2811_v24 = vpop.f32.mrb[43].mxu0  ;;  %4277 = vst [vmem:[%s5566_s21 + $0x48] sm:$0xff] %v4113_v17  ;;  %v3554_v27 = vadd.f32 %v5547_v29, %v3476_v18  ;;  %v2852_v30 = vpop.f32.mrb[43].mxu1 }
 0x1e6   : > { %v3553_v28 = vadd.f32 %v5547_v29, %v3475_v19  ;;  %v3555_v32 = vadd.f32 %v5547_v29, %v3477_v23 }
 0x1e7   : > { %vm3624_vm9 = vcmp.ge.f32.partialorder %v3552_v22, 0.0  ;;  %v3696_v31 = vmul.f32 0.2, %v3552_v22  ;;  %vm3626_vm10 = vcmp.ge.f32.partialorder %v3554_v27, 0.0  ;;  %v3698_v33 = vmul.f32 0.2, %v3554_v27 }
 0x1e8   : > { %vm3625_vm11 = vcmp.ge.f32.partialorder %v3553_v28, 0.0  ;;  %v3697_v34 = vmul.f32 0.2, %v3553_v28  ;;  %vm3627_vm12 = vcmp.ge.f32.partialorder %v3555_v32, 0.0  ;;  %v3699_v35 = vmul.f32 0.2, %v3555_v32 }
 0x1e9   : > { %v3768_v5 = vsel %vm3624_vm9, %v3552_v22, %v3696_v31  ;;  %v3770_v36 = vsel %vm3626_vm10, %v3554_v27, %v3698_v33 }
 0x1ea   : > { %v3769_v37 = vsel %vm3625_vm11, %v3553_v28, %v3697_v34  ;;  %v3771_v39 = vsel %vm3627_vm12, %v3555_v32, %v3699_v35 }
 0x1eb   : > { %v4627_v38 = vpack.c.bf16 %v3769_v37, %v3768_v5  ;;  %v4628_v40 = vpack.c.bf16 %v3771_v39, %v3770_v36 }
 0x1ed   : > { %v4122_v41 = vrot.slane %v4627_v38, %v5558_v49  ;;  %v4129_v42 = vrot.slane %v4628_v40, %v5558_v49 }
 0x1ee   : > { %v2888_v43 = vpop.f32.mrb[44].mxu0  ;;  %v2929_v45 = vpop.f32.mrb[44].mxu1 }
 0x1ef   : > { %v3478_v44 = vmul.f32 %v5543_v25, %v2888_v43  ;;  %v2890_v46 = vpop.f32.mrb[45].mxu0  ;;  %v4130_v47 = vcombine.low %v4122_v41, %v4129_v42  ;;  %v3480_v48 = vmul.f32 %v5543_v25, %v2929_v45  ;;  %v2931_v51 = vpop.f32.mrb[45].mxu1 }
 0x1f0   : > { %v3479_v50 = vmul.f32 %v5543_v25, %v2890_v46  ;;  %v2892_v52 = vpop.f32.mrb[46].mxu0  ;;  %v3481_v61 = vmul.f32 %v5543_v25, %v2931_v51  ;;  %v2933_v54 = vpop.f32.mrb[46].mxu1 }
 0x1f1   : > { %v3556_v53 = vadd.f32 %v5547_v29, %v3478_v44  ;;  %v2893_v55 = vpop.f32.mrb[47].mxu0  ;;  %4278 = vst [vmem:[%s5566_s21 + $0x50] sm:$0xff] %v4130_v47  ;;  %v3558_v56 = vadd.f32 %v5547_v29, %v3480_v48  ;;  %v2934_v58 = vpop.f32.mrb[47].mxu1 }
 0x1f2   : > { %v3557_v57 = vadd.f32 %v5547_v29, %v3479_v50  ;;  %v3559_v60 = vadd.f32 %v5547_v29, %v3481_v61 }
 0x1f3   : > { %vm3628_vm13 = vcmp.ge.f32.partialorder %v3556_v53, 0.0  ;;  %v3700_v59 = vmul.f32 0.2, %v3556_v53  ;;  %vm3630_vm14 = vcmp.ge.f32.partialorder %v3558_v56, 0.0  ;;  %v3702_v62 = vmul.f32 0.2, %v3558_v56 }
 0x1f4   : > { %vm3629_vm15 = vcmp.ge.f32.partialorder %v3557_v57, 0.0  ;;  %v3701_v63 = vmul.f32 0.2, %v3557_v57  ;;  %vm3631_vm0 = vcmp.ge.f32.partialorder %v3559_v60, 0.0  ;;  %v3703_v1 = vmul.f32 0.2, %v3559_v60 }
 0x1f5   : > { %v3772_v0 = vsel %vm3628_vm13, %v3556_v53, %v3700_v59  ;;  %v3774_v2 = vsel %vm3630_vm14, %v3558_v56, %v3702_v62 }
 0x1f6   : > { %v3773_v3 = vsel %vm3629_vm15, %v3557_v57, %v3701_v63  ;;  %v3775_v6 = vsel %vm3631_vm0, %v3559_v60, %v3703_v1 }
 0x1f7   : > { %v4629_v4 = vpack.c.bf16 %v3773_v3, %v3772_v0  ;;  %v4630_v7 = vpack.c.bf16 %v3775_v6, %v3774_v2 }
 0x1f9   : > { %v4139_v8 = vrot.slane %v4629_v4, %v5558_v49  ;;  %v4146_v9 = vrot.slane %v4630_v7, %v5558_v49 }
 0x1fa   : > { %v2970_v10 = vpop.f32.mrb[48].mxu0  ;;  %v3011_v12 = vpop.f32.mrb[48].mxu1 }
 0x1fb   : > { %v3482_v11 = vmul.f32 %v5543_v25, %v2970_v10  ;;  %v2972_v13 = vpop.f32.mrb[49].mxu0  ;;  %v4147_v14 = vcombine.low %v4139_v8, %v4146_v9  ;;  %v3484_v15 = vmul.f32 %v5543_v25, %v3011_v12  ;;  %v3013_v17 = vpop.f32.mrb[49].mxu1 }
 0x1fc   : > { %v3483_v16 = vmul.f32 %v5543_v25, %v2972_v13  ;;  %v2974_v18 = vpop.f32.mrb[50].mxu0  ;;  %v3485_v20 = vmul.f32 %v5543_v25, %v3013_v17  ;;  %v3015_v21 = vpop.f32.mrb[50].mxu1 }
 0x1fd   : > { %v3560_v19 = vadd.f32 %v5547_v29, %v3482_v11  ;;  %v2975_v22 = vpop.f32.mrb[51].mxu0  ;;  %4279 = vst [vmem:[%s5566_s21 + $0x58] sm:$0xff] %v4147_v14  ;;  %v3562_v23 = vadd.f32 %v5547_v29, %v3484_v15  ;;  %v3016_v24 = vpop.f32.mrb[51].mxu1 }
 0x1fe   : > { %v3561_v26 = vadd.f32 %v5547_v29, %v3483_v16  ;;  %v3563_v28 = vadd.f32 %v5547_v29, %v3485_v20 }
 0x1ff   : > { %vm3632_vm1 = vcmp.ge.f32.partialorder %v3560_v19, 0.0  ;;  %v3704_v27 = vmul.f32 0.2, %v3560_v19  ;;  %vm3634_vm2 = vcmp.ge.f32.partialorder %v3562_v23, 0.0  ;;  %v3706_v30 = vmul.f32 0.2, %v3562_v23 }
 0x200   : > { %vm3633_vm3 = vcmp.ge.f32.partialorder %v3561_v26, 0.0  ;;  %v3705_v31 = vmul.f32 0.2, %v3561_v26  ;;  %vm3635_vm4 = vcmp.ge.f32.partialorder %v3563_v28, 0.0  ;;  %v3707_v33 = vmul.f32 0.2, %v3563_v28 }
 0x201   : > { %v3776_v32 = vsel %vm3632_vm1, %v3560_v19, %v3704_v27  ;;  %v3778_v34 = vsel %vm3634_vm2, %v3562_v23, %v3706_v30 }
 0x202   : > { %v3777_v5 = vsel %vm3633_vm3, %v3561_v26, %v3705_v31  ;;  %v3779_v36 = vsel %vm3635_vm4, %v3563_v28, %v3707_v33 }
 0x203   : > { %v4631_v35 = vpack.c.bf16 %v3777_v5, %v3776_v32  ;;  %v4632_v37 = vpack.c.bf16 %v3779_v36, %v3778_v34 }
 0x205   : > { %v4156_v38 = vrot.slane %v4631_v35, %v5558_v49  ;;  %v4163_v39 = vrot.slane %v4632_v37, %v5558_v49 }
 0x206   : > { %v3052_v40 = vpop.f32.mrb[52].mxu0  ;;  %v3093_v42 = vpop.f32.mrb[52].mxu1 }
 0x207   : > { %v3486_v41 = vmul.f32 %v5543_v25, %v3052_v40  ;;  %v3054_v43 = vpop.f32.mrb[53].mxu0  ;;  %v4164_v44 = vcombine.low %v4156_v38, %v4163_v39  ;;  %v3488_v45 = vmul.f32 %v5543_v25, %v3093_v42  ;;  %v3095_v47 = vpop.f32.mrb[53].mxu1 }
 0x208   : > { %v3487_v46 = vmul.f32 %v5543_v25, %v3054_v43  ;;  %v3056_v48 = vpop.f32.mrb[54].mxu0  ;;  %v3489_v51 = vmul.f32 %v5543_v25, %v3095_v47  ;;  %v3097_v52 = vpop.f32.mrb[54].mxu1 }
 0x209   : > { %v3564_v50 = vadd.f32 %v5547_v29, %v3486_v41  ;;  %v3057_v53 = vpop.f32.mrb[55].mxu0  ;;  %4280 = vst [vmem:[%s5566_s21 + $0x60] sm:$0xff] %v4164_v44  ;;  %v3566_v61 = vadd.f32 %v5547_v29, %v3488_v45  ;;  %v3098_v55 = vpop.f32.mrb[55].mxu1 }
 0x20a   : > { %v3565_v54 = vadd.f32 %v5547_v29, %v3487_v46  ;;  %v3567_v57 = vadd.f32 %v5547_v29, %v3489_v51 }
 0x20b   : > { %vm3636_vm5 = vcmp.ge.f32.partialorder %v3564_v50, 0.0  ;;  %v3708_v56 = vmul.f32 0.2, %v3564_v50  ;;  %vm3638_vm6 = vcmp.ge.f32.partialorder %v3566_v61, 0.0  ;;  %v3710_v58 = vmul.f32 0.2, %v3566_v61 }
 0x20c   : > { %vm3637_vm7 = vcmp.ge.f32.partialorder %v3565_v54, 0.0  ;;  %v3709_v59 = vmul.f32 0.2, %v3565_v54  ;;  %vm3639_vm8 = vcmp.ge.f32.partialorder %v3567_v57, 0.0  ;;  %v3711_v62 = vmul.f32 0.2, %v3567_v57 }
 0x20d   : > { %v3780_v60 = vsel %vm3636_vm5, %v3564_v50, %v3708_v56  ;;  %v3782_v63 = vsel %vm3638_vm6, %v3566_v61, %v3710_v58 }
 0x20e   : > { %v3781_v0 = vsel %vm3637_vm7, %v3565_v54, %v3709_v59  ;;  %v3783_v2 = vsel %vm3639_vm8, %v3567_v57, %v3711_v62 }
 0x20f   : > { %v4633_v1 = vpack.c.bf16 %v3781_v0, %v3780_v60  ;;  %v4634_v3 = vpack.c.bf16 %v3783_v2, %v3782_v63 }
 0x211   : > { %v4173_v4 = vrot.slane %v4633_v1, %v5558_v49  ;;  %v4180_v6 = vrot.slane %v4634_v3, %v5558_v49 }
 0x212   : > { %v3134_v7 = vpop.f32.mrb[56].mxu0  ;;  %v3175_v9 = vpop.f32.mrb[56].mxu1 }
 0x213   : > { %v3490_v8 = vmul.f32 %v5543_v25, %v3134_v7  ;;  %v3136_v10 = vpop.f32.mrb[57].mxu0  ;;  %v4181_v11 = vcombine.low %v4173_v4, %v4180_v6  ;;  %v3492_v12 = vmul.f32 %v5543_v25, %v3175_v9  ;;  %v3177_v14 = vpop.f32.mrb[57].mxu1 }
 0x214   : > { %v3491_v13 = vmul.f32 %v5543_v25, %v3136_v10  ;;  %v3138_v15 = vpop.f32.mrb[58].mxu0  ;;  %v3493_v17 = vmul.f32 %v5543_v25, %v3177_v14  ;;  %v3179_v18 = vpop.f32.mrb[58].mxu1 }
 0x215   : > { %v3568_v16 = vadd.f32 %v5547_v29, %v3490_v8  ;;  %v3139_v19 = vpop.f32.mrb[59].mxu0  ;;  %4281 = vst [vmem:[%s5566_s21 + $0x68] sm:$0xff] %v4181_v11  ;;  %v3570_v20 = vadd.f32 %v5547_v29, %v3492_v12  ;;  %v3180_v22 = vpop.f32.mrb[59].mxu1 }
 0x216   : > { %v3569_v21 = vadd.f32 %v5547_v29, %v3491_v13  ;;  %v3571_v26 = vadd.f32 %v5547_v29, %v3493_v17 }
 0x217   : > { %vm3640_vm9 = vcmp.ge.f32.partialorder %v3568_v16, 0.0  ;;  %v3712_v23 = vmul.f32 0.2, %v3568_v16  ;;  %vm3642_vm10 = vcmp.ge.f32.partialorder %v3570_v20, 0.0  ;;  %v3714_v24 = vmul.f32 0.2, %v3570_v20 }
 0x218   : > { %vm3641_vm11 = vcmp.ge.f32.partialorder %v3569_v21, 0.0  ;;  %v3713_v27 = vmul.f32 0.2, %v3569_v21  ;;  %vm3643_vm12 = vcmp.ge.f32.partialorder %v3571_v26, 0.0  ;;  %v3715_v30 = vmul.f32 0.2, %v3571_v26 }
 0x219   : > { %v3784_v28 = vsel %vm3640_vm9, %v3568_v16, %v3712_v23  ;;  %v3786_v31 = vsel %vm3642_vm10, %v3570_v20, %v3714_v24 }
 0x21a   : > { %v3785_v32 = vsel %vm3641_vm11, %v3569_v21, %v3713_v27  ;;  %v3787_v34 = vsel %vm3643_vm12, %v3571_v26, %v3715_v30 }
 0x21b   : > { %v4635_v33 = vpack.c.bf16 %v3785_v32, %v3784_v28  ;;  %v4636_v5 = vpack.c.bf16 %v3787_v34, %v3786_v31 }
 0x21d   : > { %v4190_v35 = vrot.slane %v4635_v33, %v5558_v49  ;;  %v4197_v36 = vrot.slane %v4636_v5, %v5558_v49 }
 0x21e   : > { %v3216_v37 = vpop.f32.mrb[60].mxu0  ;;  %v3257_v39 = vpop.f32.mrb[60].mxu1 }
 0x21f   : > { %v3494_v38 = vmul.f32 %v5543_v25, %v3216_v37  ;;  %v3218_v40 = vpop.f32.mrb[61].mxu0  ;;  %v4198_v41 = vcombine.low %v4190_v35, %v4197_v36  ;;  %v3496_v42 = vmul.f32 %v5543_v25, %v3257_v39  ;;  %v3259_v44 = vpop.f32.mrb[61].mxu1 }
 0x220   : > { %v3495_v43 = vmul.f32 %v5543_v25, %v3218_v40  ;;  %v3220_v45 = vpop.f32.mrb[62].mxu0  ;;  %v3497_v47 = vmul.f32 %v5543_v25, %v3259_v44  ;;  %v3261_v48 = vpop.f32.mrb[62].mxu1 }
 0x221   : > { %v3572_v46 = vadd.f32 %v5547_v29, %v3494_v38  ;;  %v3221_v50 = vpop.f32.mrb[63].mxu0  ;;  %4282 = vst [vmem:[%s5566_s21 + $0x70] sm:$0xff] %v4198_v41  ;;  %v3574_v51 = vadd.f32 %v5547_v29, %v3496_v42  ;;  %v3262_v53 = vpop.f32.mrb[63].mxu1 }
 0x222   : > { %v3573_v52 = vadd.f32 %v5547_v29, %v3495_v43  ;;  %v3575_v54 = vadd.f32 %v5547_v29, %v3497_v47 }
 0x223   : > { %vm3644_vm13 = vcmp.ge.f32.partialorder %v3572_v46, 0.0  ;;  %v3716_v61 = vmul.f32 0.2, %v3572_v46  ;;  %vm3646_vm14 = vcmp.ge.f32.partialorder %v3574_v51, 0.0  ;;  %v3718_v55 = vmul.f32 0.2, %v3574_v51 }
 0x224   : > { %vm3645_vm15 = vcmp.ge.f32.partialorder %v3573_v52, 0.0  ;;  %v3717_v56 = vmul.f32 0.2, %v3573_v52  ;;  %vm3647_vm0 = vcmp.ge.f32.partialorder %v3575_v54, 0.0  ;;  %v3719_v58 = vmul.f32 0.2, %v3575_v54 }
 0x225   : > { %v3788_v57 = vsel %vm3644_vm13, %v3572_v46, %v3716_v61  ;;  %v3790_v59 = vsel %vm3646_vm14, %v3574_v51, %v3718_v55 }
 0x226   : > { %v3789_v60 = vsel %vm3645_vm15, %v3573_v52, %v3717_v56  ;;  %v3791_v63 = vsel %vm3647_vm0, %v3575_v54, %v3719_v58 }
 0x227   : > { %v4637_v62 = vpack.c.bf16 %v3789_v60, %v3788_v57  ;;  %v4638_v0 = vpack.c.bf16 %v3791_v63, %v3790_v59 }
 0x229   : > { %v4207_v1 = vrot.slane %v4637_v62, %v5558_v49  ;;  %v4214_v2 = vrot.slane %v4638_v0, %v5558_v49 }
 0x22a   : > { %v3298_v3 = vpop.f32.mrb[64].mxu0  ;;  %v3339_v6 = vpop.f32.mrb[64].mxu1 }
 0x22b   : > { %v3498_v4 = vmul.f32 %v5543_v25, %v3298_v3  ;;  %v3300_v7 = vpop.f32.mrb[65].mxu0  ;;  %v4215_v8 = vcombine.low %v4207_v1, %v4214_v2  ;;  %v3500_v9 = vmul.f32 %v5543_v25, %v3339_v6  ;;  %v3341_v11 = vpop.f32.mrb[65].mxu1 }
 0x22c   : > { %v3499_v10 = vmul.f32 %v5543_v25, %v3300_v7  ;;  %v3302_v12 = vpop.f32.mrb[66].mxu0  ;;  %v3501_v14 = vmul.f32 %v5543_v25, %v3341_v11  ;;  %v3343_v15 = vpop.f32.mrb[66].mxu1 }
 0x22d   : > { %v3576_v13 = vadd.f32 %v5547_v29, %v3498_v4  ;;  %v3303_v16 = vpop.f32.mrb[67].mxu0  ;;  %4283 = vst [vmem:[%s5566_s21 + $0x78] sm:$0xff] %v4215_v8  ;;  %v3578_v17 = vadd.f32 %v5547_v29, %v3500_v9  ;;  %v3344_v19 = vpop.f32.mrb[67].mxu1 }
 0x22e   : > { %v3577_v18 = vadd.f32 %v5547_v29, %v3499_v10  ;;  %v3579_v21 = vadd.f32 %v5547_v29, %v3501_v14 }
 0x22f   : > { %vm3648_vm1 = vcmp.ge.f32.partialorder %v3576_v13, 0.0  ;;  %v3720_v20 = vmul.f32 0.2, %v3576_v13  ;;  %vm3650_vm2 = vcmp.ge.f32.partialorder %v3578_v17, 0.0  ;;  %v3722_v22 = vmul.f32 0.2, %v3578_v17 }
 0x230   : > { %vm3649_vm3 = vcmp.ge.f32.partialorder %v3577_v18, 0.0  ;;  %v3721_v23 = vmul.f32 0.2, %v3577_v18  ;;  %vm3651_vm4 = vcmp.ge.f32.partialorder %v3579_v21, 0.0  ;;  %v3723_v24 = vmul.f32 0.2, %v3579_v21 }
 0x231   : > { %v3792_v26 = vsel %vm3648_vm1, %v3576_v13, %v3720_v20  ;;  %v3794_v27 = vsel %vm3650_vm2, %v3578_v17, %v3722_v22 }
 0x232   : > { %v3793_v28 = vsel %vm3649_vm3, %v3577_v18, %v3721_v23  ;;  %v3795_v31 = vsel %vm3651_vm4, %v3579_v21, %v3723_v24 }
 0x233   : > { %v4639_v30 = vpack.c.bf16 %v3793_v28, %v3792_v26  ;;  %v4640_v32 = vpack.c.bf16 %v3795_v31, %v3794_v27 }
 0x235   : > { %v4224_v33 = vrot.slane %v4639_v30, %v5558_v49  ;;  %v4231_v34 = vrot.slane %v4640_v32, %v5558_v49 }
 0x236   : > { %v3380_v5 = vpop.f32.mrb[68].mxu0  ;;  %v3421_v36 = vpop.f32.mrb[68].mxu1 }
 0x237   : > { %v3502_v35 = vmul.f32 %v5543_v25, %v3380_v5  ;;  %v3382_v37 = vpop.f32.mrb[69].mxu0  ;;  %v4232_v38 = vcombine.low %v4224_v33, %v4231_v34  ;;  %v3504_v39 = vmul.f32 %v5543_v25, %v3421_v36  ;;  %v3423_v41 = vpop.f32.mrb[69].mxu1 }
 0x238   : > { %v3503_v40 = vmul.f32 %v5543_v25, %v3382_v37  ;;  %v3384_v42 = vpop.f32.mrb[70].mxu0  ;;  %v3505_v44 = vmul.f32 %v5543_v25, %v3423_v41  ;;  %v3425_v45 = vpop.f32.mrb[70].mxu1 }
 0x239   : > { %v3580_v43 = vadd.f32 %v5547_v29, %v3502_v35  ;;  %v3385_v46 = vpop.f32.mrb[71].mxu0  ;;  %4284 = vst [vmem:[%s5566_s21 + $0x80] sm:$0xff] %v4232_v38  ;;  %v3582_v47 = vadd.f32 %v5547_v29, %v3504_v39  ;;  %v3426_v50 = vpop.f32.mrb[71].mxu1 }
 0x23a   : > { %v3581_v48 = vadd.f32 %v5547_v29, %v3503_v40  ;;  %v3583_v52 = vadd.f32 %v5547_v29, %v3505_v44 }
 0x23b   : > { %vm3652_vm5 = vcmp.ge.f32.partialorder %v3580_v43, 0.0  ;;  %v3724_v51 = vmul.f32 0.2, %v3580_v43  ;;  %vm3654_vm6 = vcmp.ge.f32.partialorder %v3582_v47, 0.0  ;;  %v3726_v53 = vmul.f32 0.2, %v3582_v47 }
 0x23c   : > { %vm3653_vm7 = vcmp.ge.f32.partialorder %v3581_v48, 0.0  ;;  %v3725_v61 = vmul.f32 0.2, %v3581_v48  ;;  %vm3655_vm8 = vcmp.ge.f32.partialorder %v3583_v52, 0.0  ;;  %v3727_v25 = vmul.f32 0.2, %v3583_v52 }
 0x23d   : > { %v3796_v54 = vsel %vm3652_vm5, %v3580_v43, %v3724_v51  ;;  %v3798_v55 = vsel %vm3654_vm6, %v3582_v47, %v3726_v53 }
 0x23e   : > { %v3797_v56 = vsel %vm3653_vm7, %v3581_v48, %v3725_v61  ;;  %v3799_v58 = vsel %vm3655_vm8, %v3583_v52, %v3727_v25 }
 0x23f   : > { %v4641_v57 = vpack.c.bf16 %v3797_v56, %v3796_v54  ;;  %v4642_v59 = vpack.c.bf16 %v3799_v58, %v3798_v55 }
 0x241   : > { %v4241_v60 = vrot.slane %v4641_v57, %v5558_v49  ;;  %v4248_v62 = vrot.slane %v4642_v59, %v5558_v49 }
 0x243   : > { %v4249_v63 = vcombine.low %v4241_v60, %v4248_v62 }
 0x245   : > { %4285 = vst [vmem:[%s5566_s21 + $0x88] sm:$0xff] %v4249_v63 }
 0x246 PF: > { %p11_p9 = scmp.ge.s32.totalorder %s4744_s19, 4   ;;  %s5770_s15 = smov %s4694_s16 }
 0x247   : > { %s5771_s16 = smov %s4753_s22  ;;  %s5772_s17 = smov %s4744_s19 }
 0x248   :  { %13 = sbr.rel (!%p11_p9) target bundleno = 2 (0x2), region = 94 }

// kernel: discriminator_forward.8
= control target key start
LH: loop header
LB: loop body
LE: loop exit
PB: predicated region body
PF: predicated region fallthrough
CT: control target
= control target key end

     0   :  { %s1709_s15 = smov 0   ;;  %s1711_s16 = smov 0   ;;  %s2073_s0 = inlined_call_operand.vmem [shape: bf16[8,64], index: 0, kind: input, shape index: {}]   ;;  %s2074_s1 = inlined_call_operand.vmem [shape: bf16[64,4608], index: 1, kind: input, shape index: {}]   ;;  %s2075_s2 = inlined_call_operand.vmem [shape: f32[8,1], index: 2, kind: input, shape index: {}]   ;;  %s2076_s3 = inlined_call_operand.vmem [shape: f32[8,1], index: 3, kind: input, shape index: {}]   ;;  %s2077_s4 = inlined_call_operand.vmem [shape: bf16[8,4608], index: 4, kind: output, shape index: {}]  }
   0x1   :  { %s1713_s17 = smov 0  }
   0x2 LB: > { %s1414_s18 = sadd.s32 4294967295, %s1681_s17   ;;  %s1726_s19 = sadd.s32 1, %s1681_s17   ;;  %s1681_s17 = sphi %s1713_s17, %s2080_s17   ;;  %s1677_s16 = sphi %s1711_s16, %s2079_s16   ;;  %s1673_s15 = sphi %s1709_s15, %s2078_s15  }
   0x3   : > { %s39_s20 = ssub.s32 %s1681_s17, %s1726_s19  ;;  %s42_s21 = sadd.s32 1, %s1677_s16 }
   0x4   : > { %p40_p0 = scmp.eq.s32.totalorder %s39_s20, 0  ;;  %p49_p1 = scmp.ne.s32.totalorder %s1677_s16, %s1673_s15 }
   0x5   : > { %p50_p2 = scmp.eq.s32.totalorder %s1681_s17, 0  ;;  %p1417_p4 = scmp.ge.s32.totalorder %s1681_s17, 2 }
   0x6   : > { %s1735_s22 = scalar_select %p40_p0, %s1677_s16, %s42_s21  }
   0x7   : > { %p51_p3 = por %p50_p2, %p49_p1  ;;  %152 = sbr.rel (%p1417_p4) target bundleno = 55 (0x37), region = 28 }
   0xe   : > { %155 = sbr.rel (!%p51_p3) target bundleno = 55 (0x37), region = 32  ;;  %s157_s23 = sand.u32 (%p51_p3), 1, %s1677_s16  }
   0xf   : > { %s1513_s24 = smul.u32 (%p51_p3), 72, %s1681_s17 }
  0x10   : > { %s1523_s25 = smul.u32 (%p51_p3), 576, %s157_s23 }
  0x11   : > { %s1743_s28 = scalar_lea.vmem (%p51_p3), %s2074_s1, %s1513_s24 }
  0x12   : > { %v175_v0 = vld [vmem:[%s1743_s28] sm:$0xff] (%p51_p3)  ;;  %v177_v1 = vld [vmem:[%s1743_s28 + $0x8] sm:$0xff] (%p51_p3)  ;;  %v179_v2 = vld [vmem:[%s1743_s28 + $0x10] sm:$0xff] (%p51_p3)  ;;  %s1748_s29 = scalar_lea.vmem (%p51_p3), [#allocation2], %s1523_s25 }
  0x13   : > { %176 = vst [vmem:[%s1748_s29] sm:$0xff] (%p51_p3), %v175_v0  ;;  %178 = vst [vmem:[%s1748_s29 + $0x8] sm:$0xff] (%p51_p3), %v177_v1  ;;  %v181_v3 = vld [vmem:[%s1743_s28 + $0x18] sm:$0xff] (%p51_p3)  ;;  %v183_v4 = vld [vmem:[%s1743_s28 + $0x20] sm:$0xff] (%p51_p3) }
  0x14   : > { %180 = vst [vmem:[%s1748_s29 + $0x10] sm:$0xff] (%p51_p3), %v179_v2  ;;  %v185_v5 = vld [vmem:[%s1743_s28 + $0x28] sm:$0xff] (%p51_p3)  ;;  %182 = vst [vmem:[%s1748_s29 + $0x18] sm:$0xff] (%p51_p3), %v181_v3  ;;  %v187_v6 = vld [vmem:[%s1743_s28 + $0x30] sm:$0xff] (%p51_p3) }
  0x15   : > { %184 = vst [vmem:[%s1748_s29 + $0x20] sm:$0xff] %v183_v4  ;;  %186 = vst [vmem:[%s1748_s29 + $0x28] sm:$0xff] %v185_v5  ;;  %v189_v7 = vld [vmem:[%s1743_s28 + $0x38] sm:$0xff]  ;;  %v191_v8 = vld [vmem:[%s1743_s28 + $0x40] sm:$0xff] }
  0x16   : > { %188 = vst [vmem:[%s1748_s29 + $0x30] sm:$0xff] %v187_v6  ;;  %190 = vst [vmem:[%s1748_s29 + $0x38] sm:$0xff] %v189_v7  ;;  %v193_v9 = vld [vmem:[%s1743_s28 + $0x90] sm:$0xff]  ;;  %v195_v10 = vld [vmem:[%s1743_s28 + $0x98] sm:$0xff] }
  0x17   : > { %192 = vst [vmem:[%s1748_s29 + $0x40] sm:$0xff] %v191_v8  ;;  %v197_v11 = vld [vmem:[%s1743_s28 + $0xa0] sm:$0xff]  ;;  %194 = vst [vmem:[%s1748_s29 + $0x48] sm:$0xff] %v193_v9  ;;  %v199_v12 = vld [vmem:[%s1743_s28 + $0xa8] sm:$0xff] }
  0x18   : > { %196 = vst [vmem:[%s1748_s29 + $0x50] sm:$0xff] %v195_v10  ;;  %198 = vst [vmem:[%s1748_s29 + $0x58] sm:$0xff] %v197_v11  ;;  %v201_v13 = vld [vmem:[%s1743_s28 + $0xb0] sm:$0xff]  ;;  %v203_v14 = vld [vmem:[%s1743_s28 + $0xb8] sm:$0xff] }
  0x19   : > { %200 = vst [vmem:[%s1748_s29 + $0x60] sm:$0xff] %v199_v12  ;;  %202 = vst [vmem:[%s1748_s29 + $0x68] sm:$0xff] %v201_v13  ;;  %v205_v15 = vld [vmem:[%s1743_s28 + $0xc0] sm:$0xff]  ;;  %v207_v16 = vld [vmem:[%s1743_s28 + $0xc8] sm:$0xff] }
  0x1a   : > { %204 = vst [vmem:[%s1748_s29 + $0x70] sm:$0xff] %v203_v14  ;;  %v209_v17 = vld [vmem:[%s1743_s28 + $0xd0] sm:$0xff]  ;;  %206 = vst [vmem:[%s1748_s29 + $0x78] sm:$0xff] %v205_v15  ;;  %v211_v18 = vld [vmem:[%s1743_s28 + $0x120] sm:$0xff] }
  0x1b   : > { %208 = vst [vmem:[%s1748_s29 + $0x80] sm:$0xff] %v207_v16  ;;  %210 = vst [vmem:[%s1748_s29 + $0x88] sm:$0xff] %v209_v17  ;;  %v213_v19 = vld [vmem:[%s1743_s28 + $0x128] sm:$0xff]  ;;  %v215_v20 = vld [vmem:[%s1743_s28 + $0x130] sm:$0xff] }
  0x1c   : > { %212 = vst [vmem:[%s1748_s29 + $0x90] sm:$0xff] %v211_v18  ;;  %214 = vst [vmem:[%s1748_s29 + $0x98] sm:$0xff] %v213_v19  ;;  %v217_v21 = vld [vmem:[%s1743_s28 + $0x138] sm:$0xff]  ;;  %v219_v22 = vld [vmem:[%s1743_s28 + $0x140] sm:$0xff] }
  0x1d   : > { %216 = vst [vmem:[%s1748_s29 + $0xa0] sm:$0xff] %v215_v20  ;;  %v221_v23 = vld [vmem:[%s1743_s28 + $0x148] sm:$0xff]  ;;  %218 = vst [vmem:[%s1748_s29 + $0xa8] sm:$0xff] %v217_v21  ;;  %v223_v24 = vld [vmem:[%s1743_s28 + $0x150] sm:$0xff] }
  0x1e   : > { %220 = vst [vmem:[%s1748_s29 + $0xb0] sm:$0xff] %v219_v22  ;;  %222 = vst [vmem:[%s1748_s29 + $0xb8] sm:$0xff] %v221_v23  ;;  %v225_v25 = vld [vmem:[%s1743_s28 + $0x158] sm:$0xff]  ;;  %v227_v26 = vld [vmem:[%s1743_s28 + $0x160] sm:$0xff] }
  0x1f   : > { %224 = vst [vmem:[%s1748_s29 + $0xc0] sm:$0xff] %v223_v24  ;;  %226 = vst [vmem:[%s1748_s29 + $0xc8] sm:$0xff] %v225_v25  ;;  %v229_v27 = vld [vmem:[%s1743_s28 + $0x1b0] sm:$0xff]  ;;  %v231_v28 = vld [vmem:[%s1743_s28 + $0x1b8] sm:$0xff] }
  0x20   : > { %228 = vst [vmem:[%s1748_s29 + $0xd0] sm:$0xff] %v227_v26  ;;  %v233_v29 = vld [vmem:[%s1743_s28 + $0x1c0] sm:$0xff]  ;;  %230 = vst [vmem:[%s1748_s29 + $0xd8] sm:$0xff] %v229_v27  ;;  %v235_v30 = vld [vmem:[%s1743_s28 + $0x1c8] sm:$0xff] }
  0x21   : > { %232 = vst [vmem:[%s1748_s29 + $0xe0] sm:$0xff] %v231_v28  ;;  %234 = vst [vmem:[%s1748_s29 + $0xe8] sm:$0xff] %v233_v29  ;;  %v237_v31 = vld [vmem:[%s1743_s28 + $0x1d0] sm:$0xff]  ;;  %v239_v32 = vld [vmem:[%s1743_s28 + $0x1d8] sm:$0xff] }
  0x22   : > { %236 = vst [vmem:[%s1748_s29 + $0xf0] sm:$0xff] %v235_v30  ;;  %238 = vst [vmem:[%s1748_s29 + $0xf8] sm:$0xff] %v237_v31  ;;  %v241_v33 = vld [vmem:[%s1743_s28 + $0x1e0] sm:$0xff]  ;;  %v243_v34 = vld [vmem:[%s1743_s28 + $0x1e8] sm:$0xff] }
  0x23   : > { %240 = vst [vmem:[%s1748_s29 + $0x100] sm:$0xff] %v239_v32  ;;  %v245_v35 = vld [vmem:[%s1743_s28 + $0x1f0] sm:$0xff]  ;;  %242 = vst [vmem:[%s1748_s29 + $0x108] sm:$0xff] %v241_v33  ;;  %v247_v36 = vld [vmem:[%s1743_s28 + $0x240] sm:$0xff] }
  0x24   : > { %244 = vst [vmem:[%s1748_s29 + $0x110] sm:$0xff] %v243_v34  ;;  %246 = vst [vmem:[%s1748_s29 + $0x118] sm:$0xff] %v245_v35  ;;  %v249_v37 = vld [vmem:[%s1743_s28 + $0x248] sm:$0xff]  ;;  %v251_v38 = vld [vmem:[%s1743_s28 + $0x250] sm:$0xff] }
  0x25   : > { %248 = vst [vmem:[%s1748_s29 + $0x120] sm:$0xff] %v247_v36  ;;  %250 = vst [vmem:[%s1748_s29 + $0x128] sm:$0xff] %v249_v37  ;;  %v253_v39 = vld [vmem:[%s1743_s28 + $0x258] sm:$0xff]  ;;  %v255_v40 = vld [vmem:[%s1743_s28 + $0x260] sm:$0xff] }
  0x26   : > { %252 = vst [vmem:[%s1748_s29 + $0x130] sm:$0xff] %v251_v38  ;;  %v257_v41 = vld [vmem:[%s1743_s28 + $0x268] sm:$0xff]  ;;  %254 = vst [vmem:[%s1748_s29 + $0x138] sm:$0xff] %v253_v39  ;;  %v259_v42 = vld [vmem:[%s1743_s28 + $0x270] sm:$0xff] }
  0x27   : > { %256 = vst [vmem:[%s1748_s29 + $0x140] sm:$0xff] %v255_v40  ;;  %258 = vst [vmem:[%s1748_s29 + $0x148] sm:$0xff] %v257_v41  ;;  %v261_v43 = vld [vmem:[%s1743_s28 + $0x278] sm:$0xff]  ;;  %v263_v44 = vld [vmem:[%s1743_s28 + $0x280] sm:$0xff] }
  0x28   : > { %260 = vst [vmem:[%s1748_s29 + $0x150] sm:$0xff] %v259_v42  ;;  %262 = vst [vmem:[%s1748_s29 + $0x158] sm:$0xff] %v261_v43  ;;  %v265_v45 = vld [vmem:[%s1743_s28 + $0x2d0] sm:$0xff]  ;;  %v267_v46 = vld [vmem:[%s1743_s28 + $0x2d8] sm:$0xff] }
  0x29   : > { %264 = vst [vmem:[%s1748_s29 + $0x160] sm:$0xff] %v263_v44  ;;  %v269_v47 = vld [vmem:[%s1743_s28 + $0x2e0] sm:$0xff]  ;;  %266 = vst [vmem:[%s1748_s29 + $0x168] sm:$0xff] %v265_v45  ;;  %v271_v48 = vld [vmem:[%s1743_s28 + $0x2e8] sm:$0xff] }
  0x2a   : > { %268 = vst [vmem:[%s1748_s29 + $0x170] sm:$0xff] %v267_v46  ;;  %270 = vst [vmem:[%s1748_s29 + $0x178] sm:$0xff] %v269_v47  ;;  %v273_v49 = vld [vmem:[%s1743_s28 + $0x2f0] sm:$0xff]  ;;  %v275_v50 = vld [vmem:[%s1743_s28 + $0x2f8] sm:$0xff] }
  0x2b   : > { %272 = vst [vmem:[%s1748_s29 + $0x180] sm:$0xff] %v271_v48  ;;  %274 = vst [vmem:[%s1748_s29 + $0x188] sm:$0xff] %v273_v49  ;;  %v277_v51 = vld [vmem:[%s1743_s28 + $0x300] sm:$0xff]  ;;  %v279_v52 = vld [vmem:[%s1743_s28 + $0x308] sm:$0xff] }
  0x2c   : > { %276 = vst [vmem:[%s1748_s29 + $0x190] sm:$0xff] %v275_v50  ;;  %v281_v53 = vld [vmem:[%s1743_s28 + $0x310] sm:$0xff]  ;;  %278 = vst [vmem:[%s1748_s29 + $0x198] sm:$0xff] %v277_v51  ;;  %v283_v54 = vld [vmem:[%s1743_s28 + $0x360] sm:$0xff] }
  0x2d   : > { %280 = vst [vmem:[%s1748_s29 + $0x1a0] sm:$0xff] %v279_v52  ;;  %282 = vst [vmem:[%s1748_s29 + $0x1a8] sm:$0xff] %v281_v53  ;;  %v285_v55 = vld [vmem:[%s1743_s28 + $0x368] sm:$0xff]  ;;  %v287_v56 = vld [vmem:[%s1743_s28 + $0x370] sm:$0xff] }
  0x2e   : > { %284 = vst [vmem:[%s1748_s29 + $0x1b0] sm:$0xff] %v283_v54  ;;  %286 = vst [vmem:[%s1748_s29 + $0x1b8] sm:$0xff] %v285_v55  ;;  %v289_v57 = vld [vmem:[%s1743_s28 + $0x378] sm:$0xff]  ;;  %v291_v58 = vld [vmem:[%s1743_s28 + $0x380] sm:$0xff] }
  0x2f   : > { %288 = vst [vmem:[%s1748_s29 + $0x1c0] sm:$0xff] %v287_v56  ;;  %v293_v59 = vld [vmem:[%s1743_s28 + $0x388] sm:$0xff]  ;;  %290 = vst [vmem:[%s1748_s29 + $0x1c8] sm:$0xff] %v289_v57  ;;  %v295_v60 = vld [vmem:[%s1743_s28 + $0x390] sm:$0xff] }
  0x30   : > { %292 = vst [vmem:[%s1748_s29 + $0x1d0] sm:$0xff] %v291_v58  ;;  %294 = vst [vmem:[%s1748_s29 + $0x1d8] sm:$0xff] %v293_v59  ;;  %v297_v61 = vld [vmem:[%s1743_s28 + $0x398] sm:$0xff]  ;;  %v299_v62 = vld [vmem:[%s1743_s28 + $0x3a0] sm:$0xff] }
  0x31   : > { %296 = vst [vmem:[%s1748_s29 + $0x1e0] sm:$0xff] %v295_v60  ;;  %298 = vst [vmem:[%s1748_s29 + $0x1e8] sm:$0xff] %v297_v61  ;;  %v301_v63 = vld [vmem:[%s1743_s28 + $0x3f0] sm:$0xff]  ;;  %v303_v0 = vld [vmem:[%s1743_s28 + $0x3f8] sm:$0xff] }
  0x32   : > { %300 = vst [vmem:[%s1748_s29 + $0x1f0] sm:$0xff] %v299_v62  ;;  %v305_v1 = vld [vmem:[%s1743_s28 + $0x400] sm:$0xff]  ;;  %302 = vst [vmem:[%s1748_s29 + $0x1f8] sm:$0xff] %v301_v63  ;;  %v307_v2 = vld [vmem:[%s1743_s28 + $0x408] sm:$0xff] }
  0x33   : > { %304 = vst [vmem:[%s1748_s29 + $0x200] sm:$0xff] %v303_v0  ;;  %306 = vst [vmem:[%s1748_s29 + $0x208] sm:$0xff] %v305_v1  ;;  %v309_v3 = vld [vmem:[%s1743_s28 + $0x410] sm:$0xff]  ;;  %v311_v4 = vld [vmem:[%s1743_s28 + $0x418] sm:$0xff] }
  0x34   : > { %308 = vst [vmem:[%s1748_s29 + $0x210] sm:$0xff] %v307_v2  ;;  %310 = vst [vmem:[%s1748_s29 + $0x218] sm:$0xff] %v309_v3  ;;  %v313_v5 = vld [vmem:[%s1743_s28 + $0x420] sm:$0xff]  ;;  %v315_v6 = vld [vmem:[%s1743_s28 + $0x428] sm:$0xff] }
  0x35   : > { %312 = vst [vmem:[%s1748_s29 + $0x220] sm:$0xff] %v311_v4  ;;  %v317_v7 = vld [vmem:[%s1743_s28 + $0x430] sm:$0xff]  ;;  %314 = vst [vmem:[%s1748_s29 + $0x228] sm:$0xff] %v313_v5 }
  0x36   : > { %316 = vst [vmem:[%s1748_s29 + $0x230] sm:$0xff] %v315_v6  ;;  %318 = vst [vmem:[%s1748_s29 + $0x238] sm:$0xff] %v317_v7 }
  0x37 PF: > { %p1419_p5 = scmp.ge.s32.totalorder %s1681_s17, 1  ;;  %p323_p6 = scmp.lt.s32.totalorder %s1681_s17, 3 }
  0x39   : > { %p324_p7 = pnand %p1419_p5, %p323_p6 }
  0x3a   : > { %s330_s30 = sand.u32 (!%p324_p7), 1, %s1673_s15   ;;  %v1169_v8 = vld [vmem:[%s2075_s2] sm:$0xff] (!%p324_p7)  ;;  %v1683_v9 = vmov (!%p324_p7), 0   ;;  %vm796_vm0 = vcmask (!%p324_p7), 523264   ;;  %s356_s13 = smul.u32 (!%p324_p7), 18, %s1414_s18 }
  0x3b   : > { %327 = sbr.rel (%p324_p7) target bundleno = 367 (0x16f), region = 55  ;;  %832 = vmatprep.mubr.bf16.mxu0 (!%p324_p7), %v1683_v9  ;;  %873 = vmatprep.mubr.bf16.mxu1 (!%p324_p7), %v1683_v9  ;;  %v1193_v10 = vld [vmem:[%s2076_s3] sm:$0xff] (!%p324_p7) }
  0x3c   : > { %s1524_s7 = smul.u32 (!%p324_p7), 576, %s330_s30  ;;  %1550 = vset.pattern.permute.xlu0 (!%p324_p7), %v1683_v9  ;;  %v1924_v27 = vld [vmem:[%s2073_s0] sm:$0xf] (!%p324_p7)  ;;  %p357_p8 = scmp.lt.s32.totalorder (!%p324_p7), %s356_s13, 35 }
  0x3d   : > { %1172 = vperm.xlu0 (!%p324_p7), %1550, %v1169_v8  }
  0x3e   : > { %s1903_s10 = scalar_lea.vmem (!%p324_p7), [#allocation2], %s1524_s7 }
  0x3f   : > { %v1551_v11 = vld [vmem:[%s1903_s10 + $0x4] ss:$72 sps:$4 sm:$0xff] (!%p324_p7)   ;;  %v1553_v12 = vld [vmem:[%s1903_s10] ss:$72 sps:$4 sm:$0xff] (!%p324_p7)   ;;  %v1554_v13 = vld [vmem:[%s1903_s10 + $0x94] ss:$72 sps:$4 sm:$0xff] (!%p324_p7)  }
  0x40   : > { %800 = vmatprep.subr.bf16.mxu0 (!%p324_p7), %v1551_v11  ;;  %v1556_v14 = vld [vmem:[%s1903_s10 + $0x90] ss:$72 sps:$4 sm:$0xff] (!%p324_p7)   ;;  %v1557_v15 = vld [vmem:[%s1903_s10 + $0x124] ss:$72 sps:$4 sm:$0xff] (!%p324_p7)   ;;  %v1559_v18 = vld [vmem:[%s1903_s10 + $0x120] ss:$72 sps:$4 sm:$0xff] (!%p324_p7)  }
  0x41   : > { %801 = vmatpush1.bf16.msra.mxu0 (!%p324_p7), %v1553_v12  ;;  %1196 = vperm.xlu0 (!%p324_p7), %1550, %v1193_v10   ;;  %v1560_v16 = vld [vmem:[%s1903_s10 + $0xc] ss:$72 sps:$4 sm:$0xff] (!%p324_p7)   ;;  %v1562_v17 = vld [vmem:[%s1903_s10 + $0x8] ss:$72 sps:$4 sm:$0xff] (!%p324_p7)   ;;  %v1566_v19 = vld [vmem:[%s1903_s10 + $0x9c] ss:$72 sps:$4 sm:$0xff] (!%p324_p7)  }
  0x42   : > { %802 = vmatprep.subr.bf16.mxu0 %v1554_v13  ;;  %841 = vmatprep.subr.bf16.mxu1 %v1560_v16  ;;  %v1568_v20 = vld [vmem:[%s1903_s10 + $0x98] ss:$72 sps:$4 sm:$0xff]   ;;  %v1563_v21 = vld [vmem:[%s1903_s10 + $0x1b4] ss:$72 sps:$4 sm:$0xff]   ;;  %v1574_v25 = vld [vmem:[%s1903_s10 + $0x128] ss:$72 sps:$4 sm:$0xff]  }
  0x43   : > { %842 = vmatpush1.bf16.msra.mxu1 %v1562_v17  ;;  %v1565_v22 = vld [vmem:[%s1903_s10 + $0x1b0] ss:$72 sps:$4 sm:$0xff]   ;;  %v1572_v23 = vld [vmem:[%s1903_s10 + $0x12c] ss:$72 sps:$4 sm:$0xff]   ;;  %v1578_v26 = vld [vmem:[%s1903_s10 + $0x1bc] ss:$72 sps:$4 sm:$0xff]  }
  0x44   : > { %843 = vmatprep.subr.bf16.mxu1 %v1566_v19  ;;  %v1571_v24 = vld [vmem:[%s1903_s10 + $0x14] ss:$72 sps:$4 sm:$0xff]   ;;  %v1569_v28 = vld [vmem:[%s1903_s10 + $0x10] ss:$72 sps:$4 sm:$0xff]   ;;  %v1577_v29 = vld [vmem:[%s1903_s10 + $0xa4] ss:$72 sps:$4 sm:$0xff]  }
  0x45   : > { %803 = vmatpush1.bf16.msra.mxu0 %v1556_v14  ;;  %v1580_v30 = vld [vmem:[%s1903_s10 + $0x1b8] ss:$72 sps:$4 sm:$0xff]   ;;  %v1586_v31 = vld [vmem:[%s1903_s10 + $0x1c] ss:$72 sps:$4 sm:$0xff]   ;;  %v1592_v35 = vld [vmem:[%s1903_s10 + $0xac] ss:$72 sps:$4 sm:$0xff]  }
  0x46   : > { %804 = vmatprep.subr.bf16.mxu0 %v1557_v15  ;;  %v1575_v32 = vld [vmem:[%s1903_s10 + $0xa0] ss:$72 sps:$4 sm:$0xff]   ;;  %v1583_v33 = vld [vmem:[%s1903_s10 + $0x134] ss:$72 sps:$4 sm:$0xff]   ;;  %v1581_v36 = vld [vmem:[%s1903_s10 + $0x130] ss:$72 sps:$4 sm:$0xff]  }
  0x47   : > { %844 = vmatpush1.bf16.msra.mxu1 %v1568_v20  ;;  %v1584_v34 = vld [vmem:[%s1903_s10 + $0x18] ss:$72 sps:$4 sm:$0xff]   ;;  %v1589_v37 = vld [vmem:[%s1903_s10 + $0x1c4] ss:$72 sps:$4 sm:$0xff]   ;;  %v1590_v38 = vld [vmem:[%s1903_s10 + $0xa8] ss:$72 sps:$4 sm:$0xff]  }
  0x48   : > { %845 = vmatprep.subr.bf16.mxu1 %v1572_v23  ;;  %v1598_v39 = vld [vmem:[%s1903_s10 + $0x13c] ss:$72 sps:$4 sm:$0xff]   ;;  %v1587_v40 = vld [vmem:[%s1903_s10 + $0x1c0] ss:$72 sps:$4 sm:$0xff]   ;;  %v1604_v43 = vld [vmem:[%s1903_s10 + $0x1cc] ss:$72 sps:$4 sm:$0xff]  }
  0x49   : > { %805 = vmatpush1.bf16.msra.mxu0 %v1559_v18  ;;  %v1595_v41 = vld [vmem:[%s1903_s10 + $0x24] ss:$72 sps:$4 sm:$0xff]   ;;  %v1596_v42 = vld [vmem:[%s1903_s10 + $0x138] ss:$72 sps:$4 sm:$0xff]   ;;  %v1601_v45 = vld [vmem:[%s1903_s10 + $0xb4] ss:$72 sps:$4 sm:$0xff]  }
  0x4a   : > { %806 = vmatprep.subr.bf16.mxu0 %v1563_v21  ;;  %v1593_v44 = vld [vmem:[%s1903_s10 + $0x20] ss:$72 sps:$4 sm:$0xff]   ;;  %v1610_v47 = vld [vmem:[%s1903_s10 + $0x2c] ss:$72 sps:$4 sm:$0xff]   ;;  %v1599_v48 = vld [vmem:[%s1903_s10 + $0xb0] ss:$72 sps:$4 sm:$0xff]  }
  0x4b   : > { %846 = vmatpush1.bf16.msra.mxu1 %v1574_v25  ;;  %v1602_v46 = vld [vmem:[%s1903_s10 + $0x1c8] ss:$72 sps:$4 sm:$0xff]   ;;  %v1607_v49 = vld [vmem:[%s1903_s10 + $0x144] ss:$72 sps:$4 sm:$0xff]   ;;  %v1613_v53 = vld [vmem:[%s1903_s10 + $0x1d4] ss:$72 sps:$4 sm:$0xff]  }
  0x4c   : > { %847 = vmatprep.subr.bf16.mxu1 %v1578_v26  ;;  %v1608_v50 = vld [vmem:[%s1903_s10 + $0x28] ss:$72 sps:$4 sm:$0xff]   ;;  %v1616_v51 = vld [vmem:[%s1903_s10 + $0xbc] ss:$72 sps:$4 sm:$0xff]   ;;  %v1614_v54 = vld [vmem:[%s1903_s10 + $0xb8] ss:$72 sps:$4 sm:$0xff]  }
  0x4d   : > { %807 = vmatpush1.bf16.msra.mxu0 %v1565_v22  ;;  %v1605_v52 = vld [vmem:[%s1903_s10 + $0x140] ss:$72 sps:$4 sm:$0xff]   ;;  %v1622_v55 = vld [vmem:[%s1903_s10 + $0x14c] ss:$72 sps:$4 sm:$0xff]   ;;  %v1611_v56 = vld [vmem:[%s1903_s10 + $0x1d0] ss:$72 sps:$4 sm:$0xff]  }
  0x4e   : > { %882 = vmatprep.subr.bf16.mxu0 %v1571_v24  ;;  %v1619_v57 = vld [vmem:[%s1903_s10 + $0x34] ss:$72 sps:$4 sm:$0xff]   ;;  %v1620_v58 = vld [vmem:[%s1903_s10 + $0x148] ss:$72 sps:$4 sm:$0xff]   ;;  %v1626_v61 = vld [vmem:[%s1903_s10 + $0x1d8] ss:$72 sps:$4 sm:$0xff]  }
  0x4f   : > { %848 = vmatpush1.bf16.msra.mxu1 %v1580_v30  ;;  %v1628_v59 = vld [vmem:[%s1903_s10 + $0x1dc] ss:$72 sps:$4 sm:$0xff]   ;;  %v1617_v60 = vld [vmem:[%s1903_s10 + $0x30] ss:$72 sps:$4 sm:$0xff]   ;;  %v1623_v0 = vld [vmem:[%s1903_s10 + $0xc0] ss:$72 sps:$4 sm:$0xff]  }
  0x50   : > { %1493 = vmatmul.mubr.msk.bf16.vlgmr.msra.gmra.mrb[0].mxu0 %vm796_vm0, %v1924_v27  ;;  %923 = vmatprep.subr.bf16.mxu1 %v1586_v31  ;;  %v1625_v62 = vld [vmem:[%s1903_s10 + $0xc4] ss:$72 sps:$4 sm:$0xff]   ;;  %v1632_v1 = vld [vmem:[%s1903_s10 + $0x38] ss:$72 sps:$4 sm:$0xff]   ;;  %v1631_v2 = vld [vmem:[%s1903_s10 + $0x154] ss:$72 sps:$4 sm:$0xff]  }
  0x51   : > { %883 = vmatpush1.bf16.msra.mxu0 %v1569_v28  ;;  %914 = vmatprep.mubr.bf16.mxu0 %v1683_v9  ;;  %v1634_v63 = vld [vmem:[%s1903_s10 + $0x3c] ss:$72 sps:$4 sm:$0xff]   ;;  %v1640_v3 = vld [vmem:[%s1903_s10 + $0xcc] ss:$72 sps:$4 sm:$0xff]   ;;  %v1629_v4 = vld [vmem:[%s1903_s10 + $0x150] ss:$72 sps:$4 sm:$0xff]  }
  0x52   : > { %884 = vmatprep.subr.bf16.mxu0 %v1577_v29  ;;  %1494 = vmatmul.mubr.msk.bf16.vlgmr.msra.gmra.mrb[0].mxu1 %vm796_vm0, %v1924_v27  ;;  %v1638_v5 = vld [vmem:[%s1903_s10 + $0xc8] ss:$72 sps:$4 sm:$0xff]   ;;  %v1637_v6 = vld [vmem:[%s1903_s10 + $0x1e4] ss:$72 sps:$4 sm:$0xff]   ;;  %v1644_v10 = vld [vmem:[%s1903_s10 + $0x158] ss:$72 sps:$4 sm:$0xff]  }
  0x53   : > { %924 = vmatpush1.bf16.msra.mxu1 %v1584_v34  ;;  %955 = vmatprep.mubr.bf16.mxu1 %v1683_v9  ;;  %v1646_v7 = vld [vmem:[%s1903_s10 + $0x15c] ss:$72 sps:$4 sm:$0xff]   ;;  %v1635_v8 = vld [vmem:[%s1903_s10 + $0x1e0] ss:$72 sps:$4 sm:$0xff]   ;;  %v1652_v12 = vld [vmem:[%s1903_s10 + $0x1ec] ss:$72 sps:$4 sm:$0xff]  }
  0x54   : > { %925 = vmatprep.subr.bf16.mxu1 %v1592_v35  ;;  %v1643_v11 = vld [vmem:[%s1903_s10 + $0x44] ss:$72 sps:$4 sm:$0xff]   ;;  %v1641_v13 = vld [vmem:[%s1903_s10 + $0x40] ss:$72 sps:$4 sm:$0xff]   ;;  %v1649_v15 = vld [vmem:[%s1903_s10 + $0xd4] ss:$72 sps:$4 sm:$0xff]  }
  0x55   : > { %885 = vmatpush1.bf16.msra.mxu0 %v1575_v32  ;;  %v1650_v14 = vld [vmem:[%s1903_s10 + $0x1e8] ss:$72 sps:$4 sm:$0xff]   ;;  %v1655_v17 = vld [vmem:[%s1903_s10 + $0x164] ss:$72 sps:$4 sm:$0xff]   ;;  %v1658_v19 = vld [vmem:[%s1903_s10 + $0x1f4] ss:$72 sps:$4 sm:$0xff]  }
  0x56   : > { %886 = vmatprep.subr.bf16.mxu0 %v1583_v33  ;;  %v1647_v16 = vld [vmem:[%s1903_s10 + $0xd0] ss:$72 sps:$4 sm:$0xff]   ;;  %v1653_v18 = vld [vmem:[%s1903_s10 + $0x160] ss:$72 sps:$4 sm:$0xff]   ;;  %s2082_s13 = smov (!%p357_p8, %s356_s13), 35 }
  0x57   : > { %926 = vmatpush1.bf16.msra.mxu1 %v1590_v38  ;;  %v1656_v20 = vld [vmem:[%s1903_s10 + $0x1f0] ss:$72 sps:$4 sm:$0xff]   ;;  %s1420_s14 = sshll.u32 %s2082_s13, 2 }
  0x58   : > { %927 = vmatprep.subr.bf16.mxu1 %v1598_v39  ;;  %s2023_s18 = scalar_lea.vmem %s2077_s4, %s1420_s14 }
  0x59   : > { %887 = vmatpush1.bf16.msra.mxu0 %v1581_v36 }
  0x5a   : > { %888 = vmatprep.subr.bf16.mxu0 %v1589_v37 }
  0x5b   : > { %928 = vmatpush1.bf16.msra.mxu1 %v1596_v42 }
  0x5c   : > { %929 = vmatprep.subr.bf16.mxu1 %v1604_v43 }
  0x5d   : > { %889 = vmatpush1.bf16.msra.mxu0 %v1587_v40 }
  0x5e   : > { %964 = vmatprep.subr.bf16.mxu0 %v1595_v41 }
  0x5f   : > { %930 = vmatpush1.bf16.msra.mxu1 %v1602_v46 }
  0x60   : > { %1495 = vmatmul.mubr.msk.bf16.vlgmr.msra.gmra.mrb[4].mxu0 %vm796_vm0, %v1924_v27  ;;  %1005 = vmatprep.subr.bf16.mxu1 %v1610_v47 }
  0x61   : > { %965 = vmatpush1.bf16.msra.mxu0 %v1593_v44  ;;  %996 = vmatprep.mubr.bf16.mxu0 %v1683_v9 }
  0x62   : > { %966 = vmatprep.subr.bf16.mxu0 %v1601_v45  ;;  %1496 = vmatmul.mubr.msk.bf16.vlgmr.msra.gmra.mrb[4].mxu1 %vm796_vm0, %v1924_v27 }
  0x63   : > { %1006 = vmatpush1.bf16.msra.mxu1 %v1608_v50  ;;  %1037 = vmatprep.mubr.bf16.mxu1 %v1683_v9 }
  0x64   : > { %1007 = vmatprep.subr.bf16.mxu1 %v1616_v51 }
  0x65   : > { %967 = vmatpush1.bf16.msra.mxu0 %v1599_v48 }
  0x66   : > { %968 = vmatprep.subr.bf16.mxu0 %v1607_v49 }
  0x67   : > { %1008 = vmatpush1.bf16.msra.mxu1 %v1614_v54 }
  0x68   : > { %1009 = vmatprep.subr.bf16.mxu1 %v1622_v55 }
  0x69   : > { %969 = vmatpush1.bf16.msra.mxu0 %v1605_v52 }
  0x6a   : > { %970 = vmatprep.subr.bf16.mxu0 %v1613_v53 }
  0x6b   : > { %1010 = vmatpush1.bf16.msra.mxu1 %v1620_v58 }
  0x6c   : > { %1011 = vmatprep.subr.bf16.mxu1 %v1628_v59 }
  0x6d   : > { %971 = vmatpush1.bf16.msra.mxu0 %v1611_v56 }
  0x6e   : > { %1046 = vmatprep.subr.bf16.mxu0 %v1619_v57 }
  0x6f   : > { %1012 = vmatpush1.bf16.msra.mxu1 %v1626_v61 }
  0x70   : > { %1497 = vmatmul.mubr.msk.bf16.vlgmr.msra.gmra.mrb[8].mxu0 %vm796_vm0, %v1924_v27  ;;  %1087 = vmatprep.subr.bf16.mxu1 %v1634_v63 }
  0x71   : > { %1047 = vmatpush1.bf16.msra.mxu0 %v1617_v60  ;;  %1078 = vmatprep.mubr.bf16.mxu0 %v1683_v9 }
  0x72   : > { %1048 = vmatprep.subr.bf16.mxu0 %v1625_v62  ;;  %1498 = vmatmul.mubr.msk.bf16.vlgmr.msra.gmra.mrb[8].mxu1 %vm796_vm0, %v1924_v27 }
  0x73   : > { %1088 = vmatpush1.bf16.msra.mxu1 %v1632_v1  ;;  %1119 = vmatprep.mubr.bf16.mxu1 %v1683_v9 }
  0x74   : > { %1089 = vmatprep.subr.bf16.mxu1 %v1640_v3 }
  0x75   : > { %1049 = vmatpush1.bf16.msra.mxu0 %v1623_v0 }
  0x76   : > { %1050 = vmatprep.subr.bf16.mxu0 %v1631_v2 }
  0x77   : > { %1090 = vmatpush1.bf16.msra.mxu1 %v1638_v5 }
  0x78   : > { %1091 = vmatprep.subr.bf16.mxu1 %v1646_v7 }
  0x79   : > { %1051 = vmatpush1.bf16.msra.mxu0 %v1629_v4 }
  0x7a   : > { %1052 = vmatprep.subr.bf16.mxu0 %v1637_v6 }
  0x7b   : > { %1092 = vmatpush1.bf16.msra.mxu1 %v1644_v10 }
  0x7c   : > { %1093 = vmatprep.subr.bf16.mxu1 %v1652_v12 }
  0x7d   : > { %1053 = vmatpush1.bf16.msra.mxu0 %v1635_v8 }
  0x7e   : > { %1128 = vmatprep.subr.bf16.mxu0 %v1643_v11 }
  0x7f   : > { %1094 = vmatpush1.bf16.msra.mxu1 %v1650_v14 }
  0x80   : > { %1499 = vmatmul.mubr.msk.bf16.vlgmr.msra.gmra.mrb[12].mxu0 %vm796_vm0, %v1924_v27 }
  0x81   : > { %1129 = vmatpush1.bf16.msra.mxu0 %v1641_v13  ;;  %1160 = vmatprep.mubr.bf16.mxu0 %v1683_v9 }
  0x82   : > { %1130 = vmatprep.subr.bf16.mxu0 %v1649_v15  ;;  %1500 = vmatmul.mubr.msk.bf16.vlgmr.msra.gmra.mrb[12].mxu1 %vm796_vm0, %v1924_v27 }
  0x85   : > { %1131 = vmatpush1.bf16.msra.mxu0 %v1647_v16 }
  0x86   : > { %1132 = vmatprep.subr.bf16.mxu0 %v1655_v17 }
  0x89   : > { %1133 = vmatpush1.bf16.msra.mxu0 %v1653_v18 }
  0x8a   : > { %1134 = vmatprep.subr.bf16.mxu0 %v1658_v19 }
  0x8d   : > { %1135 = vmatpush1.bf16.msra.mxu0 %v1656_v20 }
  0x90   : > { %1501 = vmatmul.mubr.msk.bf16.vlgmr.msra.gmra.mrb[16].mxu0 %vm796_vm0, %v1924_v27 }
  0xbc   : > { %v2009_v21 = vpop.permute.xlu0 %1172 }
  0xc0   : > { %v2011_v22 = vpop.permute.xlu0 %1196 }
 0x123   : > { %v834_v9 = vpop.f32.mrb[0].mxu0 }
 0x124   : > { %v1175_v23 = vmul.f32 %v2009_v21, %v834_v9  ;;  %v836_v24 = vpop.f32.mrb[1].mxu0 }
 0x125   : > { %v1176_v25 = vmul.f32 %v2009_v21, %v836_v24  ;;  %v838_v26 = vpop.f32.mrb[2].mxu0  ;;  %v875_v30 = vpop.f32.mrb[0].mxu1 }
 0x126   : > { %v839_v28 = vpop.f32.mrb[3].mxu0  ;;  %v1199_v29 = vadd.f32 %v2011_v22, %v1175_v23  ;;  %v1177_v31 = vmul.f32 %v2009_v21, %v875_v30  ;;  %v877_v32 = vpop.f32.mrb[1].mxu1 }
 0x127   : > { %v1200_v27 = vadd.f32 %v2011_v22, %v1176_v25  ;;  %v1178_v34 = vmul.f32 %v2009_v21, %v877_v32  ;;  %v879_v36 = vpop.f32.mrb[2].mxu1 }
 0x128   : > { %vm1217_vm1 = vcmp.ge.f32.partialorder %v1199_v29, 0.0  ;;  %v1235_v33 = vmul.f32 0.2, %v1199_v29  ;;  %v1201_v37 = vadd.f32 %v2011_v22, %v1177_v31  ;;  %v880_v39 = vpop.f32.mrb[3].mxu1 }
 0x129   : > { %vm1218_vm2 = vcmp.ge.f32.partialorder %v1200_v27, 0.0  ;;  %v1236_v35 = vmul.f32 0.2, %v1200_v27  ;;  %v1202_v40 = vadd.f32 %v2011_v22, %v1178_v34 }
 0x12a   : > { %v1253_v38 = vsel %vm1217_vm1, %v1199_v29, %v1235_v33  ;;  %vm1219_vm3 = vcmp.ge.f32.partialorder %v1201_v37, 0.0  ;;  %v1237_v42 = vmul.f32 0.2, %v1201_v37 }
 0x12b   : > { %v1254_v41 = vsel %vm1218_vm2, %v1200_v27, %v1236_v35  ;;  %vm1220_vm4 = vcmp.ge.f32.partialorder %v1202_v40, 0.0  ;;  %v1238_v44 = vmul.f32 0.2, %v1202_v40 }
 0x12c   : > { %v1514_v43 = vpack.c.bf16 %v1254_v41, %v1253_v38  ;;  %v1255_v45 = vsel %vm1219_vm3, %v1201_v37, %v1237_v42 }
 0x12d   : > { %v1256_v46 = vsel %vm1220_vm4, %v1202_v40, %v1238_v44 }
 0x12e   : > { %1343 = vst [vmem:[%s2023_s18] sm:$0xff] %v1514_v43  ;;  %v1515_v47 = vpack.c.bf16 %v1256_v46, %v1255_v45 }
 0x130   : > { %1344 = vst [vmem:[%s2023_s18 + $0x8] sm:$0xff] %v1515_v47 }
 0x133   : > { %v916_v48 = vpop.f32.mrb[4].mxu0 }
 0x134   : > { %v1179_v49 = vmul.f32 %v2009_v21, %v916_v48  ;;  %v918_v50 = vpop.f32.mrb[5].mxu0 }
 0x135   : > { %v1180_v51 = vmul.f32 %v2009_v21, %v918_v50  ;;  %v920_v52 = vpop.f32.mrb[6].mxu0  ;;  %v957_v56 = vpop.f32.mrb[4].mxu1 }
 0x136   : > { %v1203_v53 = vadd.f32 %v2011_v22, %v1179_v49  ;;  %v921_v54 = vpop.f32.mrb[7].mxu0  ;;  %v1181_v58 = vmul.f32 %v2009_v21, %v957_v56  ;;  %v959_v59 = vpop.f32.mrb[5].mxu1 }
 0x137   : > { %v1204_v55 = vadd.f32 %v2011_v22, %v1180_v51  ;;  %v1182_v61 = vmul.f32 %v2009_v21, %v959_v59  ;;  %v961_v62 = vpop.f32.mrb[6].mxu1 }
 0x138   : > { %vm1221_vm5 = vcmp.ge.f32.partialorder %v1203_v53, 0.0  ;;  %v1239_v57 = vmul.f32 0.2, %v1203_v53  ;;  %v1205_v0 = vadd.f32 %v2011_v22, %v1181_v58  ;;  %v962_v1 = vpop.f32.mrb[7].mxu1 }
 0x139   : > { %vm1222_vm6 = vcmp.ge.f32.partialorder %v1204_v55, 0.0  ;;  %v1240_v60 = vmul.f32 0.2, %v1204_v55  ;;  %v1206_v3 = vadd.f32 %v2011_v22, %v1182_v61 }
 0x13a   : > { %v1257_v63 = vsel %vm1221_vm5, %v1203_v53, %v1239_v57  ;;  %vm1223_vm7 = vcmp.ge.f32.partialorder %v1205_v0, 0.0  ;;  %v1241_v5 = vmul.f32 0.2, %v1205_v0 }
 0x13b   : > { %v1258_v2 = vsel %vm1222_vm6, %v1204_v55, %v1240_v60  ;;  %vm1224_vm8 = vcmp.ge.f32.partialorder %v1206_v3, 0.0  ;;  %v1242_v6 = vmul.f32 0.2, %v1206_v3 }
 0x13c   : > { %v1516_v4 = vpack.c.bf16 %v1258_v2, %v1257_v63  ;;  %v1259_v7 = vsel %vm1223_vm7, %v1205_v0, %v1241_v5 }
 0x13d   : > { %v1260_v8 = vsel %vm1224_vm8, %v1206_v3, %v1242_v6 }
 0x13e   : > { %1345 = vst [vmem:[%s2023_s18 + $0x10] sm:$0xff] %v1516_v4  ;;  %v1517_v10 = vpack.c.bf16 %v1260_v8, %v1259_v7 }
 0x140   : > { %1346 = vst [vmem:[%s2023_s18 + $0x18] sm:$0xff] %v1517_v10 }
 0x143   : > { %v998_v11 = vpop.f32.mrb[8].mxu0 }
 0x144   : > { %v1183_v12 = vmul.f32 %v2009_v21, %v998_v11  ;;  %v1000_v13 = vpop.f32.mrb[9].mxu0 }
 0x145   : > { %v1184_v14 = vmul.f32 %v2009_v21, %v1000_v13  ;;  %v1002_v15 = vpop.f32.mrb[10].mxu0  ;;  %v1039_v19 = vpop.f32.mrb[8].mxu1 }
 0x146   : > { %v1207_v16 = vadd.f32 %v2011_v22, %v1183_v12  ;;  %v1003_v17 = vpop.f32.mrb[11].mxu0  ;;  %v1185_v9 = vmul.f32 %v2009_v21, %v1039_v19  ;;  %v1041_v23 = vpop.f32.mrb[9].mxu1 }
 0x147   : > { %v1208_v18 = vadd.f32 %v2011_v22, %v1184_v14  ;;  %v1186_v25 = vmul.f32 %v2009_v21, %v1041_v23  ;;  %v1043_v26 = vpop.f32.mrb[10].mxu1 }
 0x148   : > { %vm1225_vm9 = vcmp.ge.f32.partialorder %v1207_v16, 0.0  ;;  %v1243_v20 = vmul.f32 0.2, %v1207_v16  ;;  %v1209_v29 = vadd.f32 %v2011_v22, %v1185_v9  ;;  %v1044_v30 = vpop.f32.mrb[11].mxu1 }
 0x149   : > { %vm1226_vm10 = vcmp.ge.f32.partialorder %v1208_v18, 0.0  ;;  %v1244_v24 = vmul.f32 0.2, %v1208_v18  ;;  %v1210_v31 = vadd.f32 %v2011_v22, %v1186_v25 }
 0x14a   : > { %v1261_v28 = vsel %vm1225_vm9, %v1207_v16, %v1243_v20  ;;  %vm1227_vm11 = vcmp.ge.f32.partialorder %v1209_v29, 0.0  ;;  %v1245_v33 = vmul.f32 0.2, %v1209_v29 }
 0x14b   : > { %v1262_v27 = vsel %vm1226_vm10, %v1208_v18, %v1244_v24  ;;  %vm1228_vm12 = vcmp.ge.f32.partialorder %v1210_v31, 0.0  ;;  %v1246_v34 = vmul.f32 0.2, %v1210_v31 }
 0x14c   : > { %v1518_v32 = vpack.c.bf16 %v1262_v27, %v1261_v28  ;;  %v1263_v35 = vsel %vm1227_vm11, %v1209_v29, %v1245_v33 }
 0x14d   : > { %v1264_v36 = vsel %vm1228_vm12, %v1210_v31, %v1246_v34 }
 0x14e   : > { %1347 = vst [vmem:[%s2023_s18 + $0x20] sm:$0xff] %v1518_v32  ;;  %v1519_v37 = vpack.c.bf16 %v1264_v36, %v1263_v35 }
 0x150   : > { %1348 = vst [vmem:[%s2023_s18 + $0x28] sm:$0xff] %v1519_v37 }
 0x153   : > { %v1080_v38 = vpop.f32.mrb[12].mxu0 }
 0x154   : > { %v1187_v39 = vmul.f32 %v2009_v21, %v1080_v38  ;;  %v1082_v40 = vpop.f32.mrb[13].mxu0 }
 0x155   : > { %v1188_v41 = vmul.f32 %v2009_v21, %v1082_v40  ;;  %v1084_v42 = vpop.f32.mrb[14].mxu0  ;;  %v1121_v46 = vpop.f32.mrb[12].mxu1 }
 0x156   : > { %v1211_v43 = vadd.f32 %v2011_v22, %v1187_v39  ;;  %v1085_v44 = vpop.f32.mrb[15].mxu0  ;;  %v1189_v48 = vmul.f32 %v2009_v21, %v1121_v46  ;;  %v1123_v49 = vpop.f32.mrb[13].mxu1 }
 0x157   : > { %v1212_v45 = vadd.f32 %v2011_v22, %v1188_v41  ;;  %v1190_v51 = vmul.f32 %v2009_v21, %v1123_v49  ;;  %v1125_v52 = vpop.f32.mrb[14].mxu1 }
 0x158   : > { %vm1229_vm13 = vcmp.ge.f32.partialorder %v1211_v43, 0.0  ;;  %v1247_v47 = vmul.f32 0.2, %v1211_v43  ;;  %v1213_v54 = vadd.f32 %v2011_v22, %v1189_v48  ;;  %v1126_v55 = vpop.f32.mrb[15].mxu1 }
 0x159   : > { %vm1230_vm14 = vcmp.ge.f32.partialorder %v1212_v45, 0.0  ;;  %v1248_v50 = vmul.f32 0.2, %v1212_v45  ;;  %v1214_v57 = vadd.f32 %v2011_v22, %v1190_v51 }
 0x15a   : > { %v1265_v53 = vsel %vm1229_vm13, %v1211_v43, %v1247_v47  ;;  %vm1231_vm15 = vcmp.ge.f32.partialorder %v1213_v54, 0.0  ;;  %v1249_v59 = vmul.f32 0.2, %v1213_v54 }
 0x15b   : > { %v1266_v56 = vsel %vm1230_vm14, %v1212_v45, %v1248_v50  ;;  %vm1232_vm0 = vcmp.ge.f32.partialorder %v1214_v57, 0.0  ;;  %v1250_v60 = vmul.f32 0.2, %v1214_v57 }
 0x15c   : > { %v1520_v58 = vpack.c.bf16 %v1266_v56, %v1265_v53  ;;  %v1267_v61 = vsel %vm1231_vm15, %v1213_v54, %v1249_v59 }
 0x15d   : > { %v1268_v62 = vsel %vm1232_vm0, %v1214_v57, %v1250_v60 }
 0x15e   : > { %1349 = vst [vmem:[%s2023_s18 + $0x30] sm:$0xff] %v1520_v58  ;;  %v1521_v63 = vpack.c.bf16 %v1268_v62, %v1267_v61 }
 0x160   : > { %1350 = vst [vmem:[%s2023_s18 + $0x38] sm:$0xff] %v1521_v63 }
 0x163   : > { %v1162_v0 = vpop.f32.mrb[16].mxu0 }
 0x164   : > { %v1191_v1 = vmul.f32 %v2009_v21, %v1162_v0  ;;  %v1164_v2 = vpop.f32.mrb[17].mxu0 }
 0x165   : > { %v1192_v3 = vmul.f32 %v2009_v21, %v1164_v2  ;;  %v1166_v4 = vpop.f32.mrb[18].mxu0 }
 0x166   : > { %v1215_v5 = vadd.f32 %v2011_v22, %v1191_v1  ;;  %v1167_v6 = vpop.f32.mrb[19].mxu0 }
 0x167   : > { %v1216_v7 = vadd.f32 %v2011_v22, %v1192_v3 }
 0x168   : > { %vm1233_vm1 = vcmp.ge.f32.partialorder %v1215_v5, 0.0  ;;  %v1251_v8 = vmul.f32 0.2, %v1215_v5 }
 0x169   : > { %vm1234_vm2 = vcmp.ge.f32.partialorder %v1216_v7, 0.0  ;;  %v1252_v10 = vmul.f32 0.2, %v1216_v7 }
 0x16a   : > { %v1269_v11 = vsel %vm1233_vm1, %v1215_v5, %v1251_v8 }
 0x16b   : > { %v1270_v12 = vsel %vm1234_vm2, %v1216_v7, %v1252_v10 }
 0x16c   : > { %v1522_v13 = vpack.c.bf16 %v1270_v12, %v1269_v11 }
 0x16e   : > { %1351 = vst [vmem:[%s2023_s18 + $0x40] sm:$0xff] %v1522_v13 }
 0x16f PF: > { %p11_p9 = scmp.ge.s32.totalorder %s1726_s19, 4   ;;  %s2078_s15 = smov %s1677_s16 }
 0x170   : > { %s2079_s16 = smov %s1735_s22  ;;  %s2080_s17 = smov %s1726_s19 }
 0x171   :  { %13 = sbr.rel (!%p11_p9) target bundleno = 2 (0x2), region = 94 }

// kernel: discriminator_forward.9
= control target key start
LH: loop header
LB: loop body
LE: loop exit
PB: predicated region body
PF: predicated region fallthrough
CT: control target
= control target key end

     0   :  { %s1201_s15 = smov 0   ;;  %s1203_s16 = smov 0   ;;  %s1464_s0 = inlined_call_operand.vmem [shape: bf16[16,128], index: 0, kind: input, shape index: {}]   ;;  %s1465_s1 = inlined_call_operand.vmem [shape: bf16[128,1280], index: 1, kind: input, shape index: {}]   ;;  %s1466_s2 = inlined_call_operand.vmem [shape: f32[16,1], index: 2, kind: input, shape index: {}]   ;;  %s1467_s3 = inlined_call_operand.vmem [shape: f32[16,1], index: 3, kind: input, shape index: {}]   ;;  %s1468_s4 = inlined_call_operand.vmem [shape: bf16[16,1280], index: 4, kind: output, shape index: {}]  }
   0x1   :  { %s1205_s17 = smov 0  }
   0x2 LB: > { %s931_s18 = sadd.s32 4294967295, %s1171_s17   ;;  %s1218_s19 = sadd.s32 1, %s1171_s17   ;;  %s1171_s17 = sphi %s1205_s17, %s1472_s17   ;;  %s1167_s16 = sphi %s1203_s16, %s1471_s16   ;;  %s1163_s15 = sphi %s1201_s15, %s1470_s15  }
   0x3   : > { %s39_s20 = ssub.s32 %s1171_s17, %s1218_s19  ;;  %s42_s21 = sadd.s32 1, %s1167_s16 }
   0x4   : > { %p40_p0 = scmp.eq.s32.totalorder %s39_s20, 0  ;;  %p49_p1 = scmp.ne.s32.totalorder %s1167_s16, %s1163_s15 }
   0x5   : > { %p50_p2 = scmp.eq.s32.totalorder %s1171_s17, 0  ;;  %p121_p3 = scmp.eq.s32.totalorder %s931_s18, 1 }
   0x6   : > { %s1229_s22 = scalar_select %p40_p0, %s1167_s16, %s42_s21  }
   0x7   : > { %p51_p4 = por %p50_p2, %p49_p1  ;;  %p1231_p5 = por %p121_p3, %p49_p1 }
   0x8   : > { %p934_p6 = scmp.ge.s32.totalorder %s1171_s17, 2 }
   0xa   : > { %152 = sbr.rel (%p934_p6) target bundleno = 48 (0x30), region = 28 }
  0x11   : > { %155 = sbr.rel (!%p51_p4) target bundleno = 48 (0x30), region = 32  ;;  %s157_s24 = sand.u32 (%p51_p4), 1, %s1167_s16  }
  0x12   : > { %s1023_s25 = smul.u32 (%p51_p4), 20, %s1171_s17 }
  0x13   : > { %s1060_s26 = smul.u32 (%p51_p4), 320, %s157_s24 }
  0x14   : > { %s1241_s29 = scalar_lea.vmem (%p51_p4), %s1465_s1, %s1023_s25 }
  0x15   : > { %v177_v0 = vld [vmem:[%s1241_s29] sm:$0xff] (%p51_p4)  ;;  %v179_v1 = vld [vmem:[%s1241_s29 + $0x8] sm:$0xff] (%p51_p4)  ;;  %s1246_s30 = scalar_lea.vmem (%p51_p4), [#allocation2], %s1060_s26  ;;  %v183_v3 = vld [vmem:[%s1241_s29 + $0x30] sm:$0xff] (%p51_p4) }
  0x16   : > { %v181_v2 = vld [vmem:[%s1241_s29 + $0x28] sm:$0xff] (%p51_p4)  ;;  %178 = vst [vmem:[%s1246_s30] sm:$0xff] (%p51_p4), %v177_v0  ;;  %180 = vst [vmem:[%s1246_s30 + $0x8] sm:$0xff] (%p51_p4), %v179_v1  ;;  %v185_v4 = vld [vmem:[%s1241_s29 + $0x50] sm:$0xff] (%p51_p4) }
  0x17   : > { %182 = vst [vmem:[%s1246_s30 + $0x14] sm:$0xff] (%p51_p4), %v181_v2  ;;  %v187_v5 = vld [vmem:[%s1241_s29 + $0x58] sm:$0xff] (%p51_p4)  ;;  %184 = vst [vmem:[%s1246_s30 + $0x1c] sm:$0xff] (%p51_p4), %v183_v3  ;;  %v191_v7 = vld [vmem:[%s1241_s29 + $0x80] sm:$0xff] (%p51_p4) }
  0x18   : > { %186 = vst [vmem:[%s1246_s30 + $0x28] sm:$0xff] %v185_v4  ;;  %188 = vst [vmem:[%s1246_s30 + $0x30] sm:$0xff] %v187_v5  ;;  %v189_v6 = vld [vmem:[%s1241_s29 + $0x78] sm:$0xff]  ;;  %v193_v8 = vld [vmem:[%s1241_s29 + $0xa0] sm:$0xff] }
  0x19   : > { %190 = vst [vmem:[%s1246_s30 + $0x3c] sm:$0xff] %v189_v6  ;;  %192 = vst [vmem:[%s1246_s30 + $0x44] sm:$0xff] %v191_v7  ;;  %v195_v9 = vld [vmem:[%s1241_s29 + $0xa8] sm:$0xff]  ;;  %v199_v11 = vld [vmem:[%s1241_s29 + $0xd0] sm:$0xff] }
  0x1a   : > { %194 = vst [vmem:[%s1246_s30 + $0x50] sm:$0xff] %v193_v8  ;;  %v197_v10 = vld [vmem:[%s1241_s29 + $0xc8] sm:$0xff]  ;;  %196 = vst [vmem:[%s1246_s30 + $0x58] sm:$0xff] %v195_v9  ;;  %v201_v12 = vld [vmem:[%s1241_s29 + $0xf0] sm:$0xff] }
  0x1b   : > { %198 = vst [vmem:[%s1246_s30 + $0x64] sm:$0xff] %v197_v10  ;;  %200 = vst [vmem:[%s1246_s30 + $0x6c] sm:$0xff] %v199_v11  ;;  %v203_v13 = vld [vmem:[%s1241_s29 + $0xf8] sm:$0xff]  ;;  %v207_v15 = vld [vmem:[%s1241_s29 + $0x120] sm:$0xff] }
  0x1c   : > { %v205_v14 = vld [vmem:[%s1241_s29 + $0x118] sm:$0xff]  ;;  %202 = vst [vmem:[%s1246_s30 + $0x78] sm:$0xff] %v201_v12  ;;  %204 = vst [vmem:[%s1246_s30 + $0x80] sm:$0xff] %v203_v13  ;;  %v209_v16 = vld [vmem:[%s1241_s29 + $0x140] sm:$0xff] }
  0x1d   : > { %206 = vst [vmem:[%s1246_s30 + $0x8c] sm:$0xff] %v205_v14  ;;  %v211_v17 = vld [vmem:[%s1241_s29 + $0x148] sm:$0xff]  ;;  %208 = vst [vmem:[%s1246_s30 + $0x94] sm:$0xff] %v207_v15  ;;  %v215_v19 = vld [vmem:[%s1241_s29 + $0x170] sm:$0xff] }
  0x1e   : > { %210 = vst [vmem:[%s1246_s30 + $0xa0] sm:$0xff] %v209_v16  ;;  %212 = vst [vmem:[%s1246_s30 + $0xa8] sm:$0xff] %v211_v17  ;;  %v213_v18 = vld [vmem:[%s1241_s29 + $0x168] sm:$0xff]  ;;  %v217_v20 = vld [vmem:[%s1241_s29 + $0x190] sm:$0xff] }
  0x1f   : > { %214 = vst [vmem:[%s1246_s30 + $0xb4] sm:$0xff] %v213_v18  ;;  %216 = vst [vmem:[%s1246_s30 + $0xbc] sm:$0xff] %v215_v19  ;;  %v219_v21 = vld [vmem:[%s1241_s29 + $0x198] sm:$0xff]  ;;  %v223_v23 = vld [vmem:[%s1241_s29 + $0x1c0] sm:$0xff] }
  0x20   : > { %218 = vst [vmem:[%s1246_s30 + $0xc8] sm:$0xff] %v217_v20  ;;  %v221_v22 = vld [vmem:[%s1241_s29 + $0x1b8] sm:$0xff]  ;;  %220 = vst [vmem:[%s1246_s30 + $0xd0] sm:$0xff] %v219_v21  ;;  %v225_v24 = vld [vmem:[%s1241_s29 + $0x1e0] sm:$0xff] }
  0x21   : > { %222 = vst [vmem:[%s1246_s30 + $0xdc] sm:$0xff] %v221_v22  ;;  %224 = vst [vmem:[%s1246_s30 + $0xe4] sm:$0xff] %v223_v23  ;;  %v227_v25 = vld [vmem:[%s1241_s29 + $0x1e8] sm:$0xff]  ;;  %v231_v27 = vld [vmem:[%s1241_s29 + $0x210] sm:$0xff] }
  0x22   : > { %v229_v26 = vld [vmem:[%s1241_s29 + $0x208] sm:$0xff]  ;;  %226 = vst [vmem:[%s1246_s30 + $0xf0] sm:$0xff] %v225_v24  ;;  %228 = vst [vmem:[%s1246_s30 + $0xf8] sm:$0xff] %v227_v25  ;;  %v233_v28 = vld [vmem:[%s1241_s29 + $0x230] sm:$0xff] }
  0x23   : > { %230 = vst [vmem:[%s1246_s30 + $0x104] sm:$0xff] %v229_v26  ;;  %v235_v29 = vld [vmem:[%s1241_s29 + $0x238] sm:$0xff]  ;;  %232 = vst [vmem:[%s1246_s30 + $0x10c] sm:$0xff] %v231_v27  ;;  %v239_v31 = vld [vmem:[%s1241_s29 + $0x260] sm:$0xff] }
  0x24   : > { %234 = vst [vmem:[%s1246_s30 + $0x118] sm:$0xff] %v233_v28  ;;  %236 = vst [vmem:[%s1246_s30 + $0x120] sm:$0xff] %v235_v29  ;;  %v237_v30 = vld [vmem:[%s1241_s29 + $0x258] sm:$0xff]  ;;  %v936_v32 = vld [vmem:[%s1241_s29 + $0x10] sm:$0xf] }
  0x25   : > { %238 = vst [vmem:[%s1246_s30 + $0x12c] sm:$0xff] %v237_v30  ;;  %240 = vst [vmem:[%s1246_s30 + $0x134] sm:$0xff] %v239_v31  ;;  %v938_v33 = vld [vmem:[%s1241_s29 + $0x38] sm:$0xf]  ;;  %v940_v34 = vld [vmem:[%s1241_s29 + $0x60] sm:$0xf] }
  0x26   : > { %937 = vst [vmem:[%s1246_s30 + $0x10] sm:$0xf] %v936_v32  ;;  %v942_v35 = vld [vmem:[%s1241_s29 + $0x88] sm:$0xf]  ;;  %939 = vst [vmem:[%s1246_s30 + $0x24] sm:$0xf] %v938_v33 }
  0x27   : > { %941 = vst [vmem:[%s1246_s30 + $0x38] sm:$0xf] %v940_v34  ;;  %943 = vst [vmem:[%s1246_s30 + $0x4c] sm:$0xf] %v942_v35  ;;  %v944_v36 = vld [vmem:[%s1241_s29 + $0xb0] sm:$0xf] }
  0x28   : > { %v946_v37 = vld [vmem:[%s1241_s29 + $0xd8] sm:$0xf]  ;;  %v948_v38 = vld [vmem:[%s1241_s29 + $0x100] sm:$0xf]  ;;  %945 = vst [vmem:[%s1246_s30 + $0x60] sm:$0xf] %v944_v36 }
  0x29   : > { %947 = vst [vmem:[%s1246_s30 + $0x74] sm:$0xf] %v946_v37  ;;  %949 = vst [vmem:[%s1246_s30 + $0x88] sm:$0xf] %v948_v38  ;;  %v950_v39 = vld [vmem:[%s1241_s29 + $0x128] sm:$0xf] }
  0x2a   : > { %v952_v40 = vld [vmem:[%s1241_s29 + $0x150] sm:$0xf]  ;;  %v954_v41 = vld [vmem:[%s1241_s29 + $0x178] sm:$0xf]  ;;  %951 = vst [vmem:[%s1246_s30 + $0x9c] sm:$0xf] %v950_v39 }
  0x2b   : > { %953 = vst [vmem:[%s1246_s30 + $0xb0] sm:$0xf] %v952_v40  ;;  %955 = vst [vmem:[%s1246_s30 + $0xc4] sm:$0xf] %v954_v41  ;;  %v956_v42 = vld [vmem:[%s1241_s29 + $0x1a0] sm:$0xf] }
  0x2c   : > { %v958_v43 = vld [vmem:[%s1241_s29 + $0x1c8] sm:$0xf]  ;;  %v960_v44 = vld [vmem:[%s1241_s29 + $0x1f0] sm:$0xf]  ;;  %957 = vst [vmem:[%s1246_s30 + $0xd8] sm:$0xf] %v956_v42 }
  0x2d   : > { %959 = vst [vmem:[%s1246_s30 + $0xec] sm:$0xf] %v958_v43  ;;  %961 = vst [vmem:[%s1246_s30 + $0x100] sm:$0xf] %v960_v44  ;;  %v962_v45 = vld [vmem:[%s1241_s29 + $0x218] sm:$0xf] }
  0x2e   : > { %v964_v46 = vld [vmem:[%s1241_s29 + $0x240] sm:$0xf]  ;;  %v966_v47 = vld [vmem:[%s1241_s29 + $0x268] sm:$0xf]  ;;  %963 = vst [vmem:[%s1246_s30 + $0x114] sm:$0xf] %v962_v45 }
  0x2f   : > { %965 = vst [vmem:[%s1246_s30 + $0x128] sm:$0xf] %v964_v46  ;;  %967 = vst [vmem:[%s1246_s30 + $0x13c] sm:$0xf] %v966_v47 }
  0x30 PF: > { %p968_p7 = scmp.ge.s32.totalorder %s1171_s17, 1  ;;  %p284_p8 = scmp.lt.s32.totalorder %s1171_s17, 3 }
  0x32   : > { %p285_p9 = pnand %p968_p7, %p284_p8 }
  0x33   : > { %s291_s5 = sand.u32 (!%p285_p9), 1, %s1163_s15   ;;  %v1173_v48 = vmov (!%p285_p9), 0   ;;  %v709_v49 = vld [vmem:[%s1466_s2] sm:$0xff] (!%p285_p9)  ;;  %v710_v51 = vld [vmem:[%s1466_s2 + $0x8] sm:$0xff] (!%p285_p9)  ;;  %v1174_v20 = vmov (!%p285_p9), 0.0   ;;  %vm1175_vm0 = vmmov (!%p285_p9), 0  }
  0x34   : > { %288 = sbr.rel (%p285_p9) target bundleno = 353 (0x161), region = 58  ;;  %614 = vmatprep.mubr.bf16.mxu0 (!%p285_p9), %v1173_v48  ;;  %657 = vmatprep.mubr.bf16.mxu1 (!%p285_p9), %v1173_v48  ;;  %v731_v50 = vld [vmem:[%s1467_s3] sm:$0xff] (!%p285_p9)  ;;  %v732_v52 = vld [vmem:[%s1467_s3 + $0x8] sm:$0xff] (!%p285_p9) }
  0x35   : > { %s1061_s6 = smul.u32 (!%p285_p9), 320, %s291_s5  ;;  %1090 = vset.pattern.permute.xlu0 (!%p285_p9), %v1173_v48  ;;  %1091 = vset.pattern.permute.xlu1 (!%p285_p9), %v1173_v48  ;;  %v1122_v17 = vld [vmem:[%s1464_s0] sm:$0xff] (!%p285_p9)  }
  0x36   : > { %713 = vperm.xlu0 (!%p285_p9), %1090, %v709_v49   ;;  %735 = vperm.xlu1 (!%p285_p9), %1091, %v731_v50   ;;  %s1062_s25 = smul.u32 (!%p285_p9), 40, %s291_s5 }
  0x37   : > { %s1358_s20 = scalar_lea.vmem (!%p285_p9), [#allocation2], %s1061_s6 }
  0x38   : > { %v1092_v53 = vld [vmem:[%s1358_s20 + $0x4] ss:$20 sps:$4 sm:$0xff] (!%p285_p9)   ;;  %v1094_v54 = vld [vmem:[%s1358_s20] ss:$20 sps:$4 sm:$0xff] (!%p285_p9)   ;;  %v1097_v56 = vld [vmem:[%s1358_s20 + $0x28] ss:$20 sps:$4 sm:$0xff] (!%p285_p9)  }
  0x39   : > { %582 = vmatprep.subr.bf16.mxu0 (!%p285_p9), %v1092_v53  ;;  %v1095_v55 = vld [vmem:[%s1358_s20 + $0x2c] ss:$20 sps:$4 sm:$0xff] (!%p285_p9)   ;;  %v1098_v57 = vld [vmem:[%s1358_s20 + $0x54] ss:$20 sps:$4 sm:$0xff] (!%p285_p9)   ;;  %v1100_v58 = vld [vmem:[%s1358_s20 + $0x50] ss:$20 sps:$4 sm:$0xff] (!%p285_p9)  }
  0x3a   : > { %583 = vmatpush1.bf16.msra.mxu0 (!%p285_p9), %v1094_v54  ;;  %718 = vperm.xlu0 (!%p285_p9), %1090, %v710_v51   ;;  %v1101_v59 = vld [vmem:[%s1358_s20 + $0x7c] ss:$20 sps:$4 sm:$0xff] (!%p285_p9)   ;;  %v1113_v60 = vld [vmem:[%s1358_s20 + $0xc] ss:$20 sps:$4 sm:$0xff] (!%p285_p9)   ;;  %v1104_v63 = vld [vmem:[%s1358_s20 + $0xa4] ss:$20 sps:$4 sm:$0xff] (!%p285_p9)  }
  0x3b   : > { %584 = vmatprep.subr.bf16.mxu0 %v1095_v55  ;;  %740 = vperm.xlu1 %1091, %v732_v52   ;;  %v1115_v61 = vld [vmem:[%s1358_s20 + $0x8] ss:$20 sps:$4 sm:$0xff]   ;;  %v1103_v62 = vld [vmem:[%s1358_s20 + $0x78] ss:$20 sps:$4 sm:$0xff]   ;;  %v1121_v1 = vld [vmem:[%s1358_s20 + $0x30] ss:$20 sps:$4 sm:$0xff]  }
  0x3c   : > { %625 = vmatprep.subr.bf16.mxu1 %v1113_v60  ;;  %v1119_v0 = vld [vmem:[%s1358_s20 + $0x34] ss:$20 sps:$4 sm:$0xff]   ;;  %v1123_v2 = vld [vmem:[%s1358_s20 + $0x5c] ss:$20 sps:$4 sm:$0xff]   ;;  %v1107_v4 = vld [vmem:[%s1358_s20 + $0xcc] ss:$20 sps:$4 sm:$0xff]  }
  0x3d   : > { %626 = vmatpush1.bf16.msra.mxu1 %v1115_v61  ;;  %v1106_v3 = vld [vmem:[%s1358_s20 + $0xa0] ss:$20 sps:$4 sm:$0xff]   ;;  %v1126_v5 = vld [vmem:[%s1358_s20 + $0x58] ss:$20 sps:$4 sm:$0xff]   ;;  %v1109_v7 = vld [vmem:[%s1358_s20 + $0xc8] ss:$20 sps:$4 sm:$0xff]  }
  0x3e   : > { %585 = vmatpush1.bf16.msra.mxu0 %v1097_v56  ;;  %627 = vmatprep.subr.bf16.mxu1 %v1119_v0  ;;  %v1127_v6 = vld [vmem:[%s1358_s20 + $0x84] ss:$20 sps:$4 sm:$0xff]   ;;  %v1110_v8 = vld [vmem:[%s1358_s20 + $0xf4] ss:$20 sps:$4 sm:$0xff]   ;;  %v1131_v10 = vld [vmem:[%s1358_s20 + $0xac] ss:$20 sps:$4 sm:$0xff]  }
  0x3f   : > { %586 = vmatprep.subr.bf16.mxu0 %v1098_v57  ;;  %v1130_v9 = vld [vmem:[%s1358_s20 + $0x80] ss:$20 sps:$4 sm:$0xff]   ;;  %v1112_v11 = vld [vmem:[%s1358_s20 + $0xf0] ss:$20 sps:$4 sm:$0xff]   ;;  %v1134_v13 = vld [vmem:[%s1358_s20 + $0xa8] ss:$20 sps:$4 sm:$0xff]  }
  0x40   : > { %v1116_v12 = vld [vmem:[%s1358_s20 + $0x11c] ss:$20 sps:$4 sm:$0xff]   ;;  %v1135_v14 = vld [vmem:[%s1358_s20 + $0xd4] ss:$20 sps:$4 sm:$0xff]   ;;  %v1118_v15 = vld [vmem:[%s1358_s20 + $0x118] ss:$20 sps:$4 sm:$0xff]  }
  0x41   : > { %628 = vmatpush1.bf16.msra.mxu1 %v1121_v1  ;;  %v1138_v16 = vld [vmem:[%s1358_s20 + $0xd0] ss:$20 sps:$4 sm:$0xff]   ;;  %v1142_v21 = vld [vmem:[%s1358_s20 + $0xf8] ss:$20 sps:$4 sm:$0xff]   ;;  %v1146_v24 = vld [vmem:[%s1358_s20 + $0x120] ss:$20 sps:$4 sm:$0xff]  }
  0x42   : > { %587 = vmatpush1.bf16.msra.mxu0 %v1100_v58  ;;  %629 = vmatprep.subr.bf16.mxu1 %v1123_v2  ;;  %v1139_v18 = vld [vmem:[%s1358_s20 + $0xfc] ss:$20 sps:$4 sm:$0xff]   ;;  %v1143_v22 = vld [vmem:[%s1358_s20 + $0x124] ss:$20 sps:$4 sm:$0xff]   ;;  %v1133_v25 = vld [vmem:[%s1358_s20 + $0x60] ss:$20 sps:$4 sm:$0xff]  }
  0x43   : > { %588 = vmatprep.subr.bf16.mxu0 %v1101_v59  ;;  %v1125_v19 = vld [vmem:[%s1358_s20 + $0x10] ss:$20 sps:$4 sm:$0xff]   ;;  %v1129_v23 = vld [vmem:[%s1358_s20 + $0x38] ss:$20 sps:$4 sm:$0xff]   ;;  %v1137_v26 = vld [vmem:[%s1358_s20 + $0x88] ss:$20 sps:$4 sm:$0xff]  }
  0x44   : > { %v1141_v27 = vld [vmem:[%s1358_s20 + $0xb0] ss:$20 sps:$4 sm:$0xff]   ;;  %v1145_v28 = vld [vmem:[%s1358_s20 + $0xd8] ss:$20 sps:$4 sm:$0xff]   ;;  %v1147_v29 = vld [vmem:[%s1358_s20 + $0x100] ss:$20 sps:$4 sm:$0xff]  }
  0x45   : > { %630 = vmatpush1.bf16.msra.mxu1 %v1126_v5  ;;  %v1148_v30 = vld [vmem:[%s1358_s20 + $0x128] ss:$20 sps:$4 sm:$0xff]   ;;  %s1421_s15 = scalar_lea.vmem [#allocation3], %s1062_s25  ;;  %s1030_s26 = smul.u32 (%p1231_p5), 20, %s931_s18 }
  0x46   : > { %589 = vmatpush1.bf16.msra.mxu0 %v1103_v62  ;;  %631 = vmatprep.subr.bf16.mxu1 %v1127_v6 }
  0x47   : > { %590 = vmatprep.subr.bf16.mxu0 %v1104_v63  ;;  %s830_s23 = scalar_lea.vmem (%p1231_p5), %s1468_s4, %s1030_s26 }
  0x49   : > { %632 = vmatpush1.bf16.msra.mxu1 %v1130_v9 }
  0x4a   : > { %591 = vmatpush1.bf16.msra.mxu0 %v1106_v3  ;;  %633 = vmatprep.subr.bf16.mxu1 %v1131_v10 }
  0x4b   : > { %592 = vmatprep.subr.bf16.mxu0 %v1107_v4 }
  0x4d   : > { %634 = vmatpush1.bf16.msra.mxu1 %v1134_v13 }
  0x4e   : > { %593 = vmatpush1.bf16.msra.mxu0 %v1109_v7  ;;  %635 = vmatprep.subr.bf16.mxu1 %v1135_v14 }
  0x4f   : > { %594 = vmatprep.subr.bf16.mxu0 %v1110_v8 }
  0x51   : > { %636 = vmatpush1.bf16.msra.mxu1 %v1138_v16 }
  0x52   : > { %595 = vmatpush1.bf16.msra.mxu0 %v1112_v11  ;;  %637 = vmatprep.subr.bf16.mxu1 %v1139_v18 }
  0x53   : > { %596 = vmatprep.subr.bf16.mxu0 %v1116_v12 }
  0x55   : > { %638 = vmatpush1.bf16.msra.mxu1 %v1142_v21 }
  0x56   : > { %597 = vmatpush1.bf16.msra.mxu0 %v1118_v15  ;;  %639 = vmatprep.subr.bf16.mxu1 %v1143_v22 }
  0x57   : > { %1040 = vmatprep.subr.bf16.mxu0 %v1174_v20 }
  0x59   : > { %615 = vmatmul.mubr.bf16.vlgmr.msra.gmra.mrb[0].mxu0 %v1122_v17  ;;  %640 = vmatpush1.bf16.msra.mxu1 %v1146_v24 }
  0x5a   : > { %1041 = vmatpush3.bf16.msra.mxu0 %v1125_v19  ;;  %1056 = vmatprep.mubr.msk.bf16.mxu0 %vm1175_vm0, %v1174_v20 }
  0x5b   : > { %1042 = vmatprep.subr.bf16.mxu0 %v1174_v20 }
  0x5c   : > { %658 = vmatmul.mubr.bf16.vlgmr.msra.gmra.mrb[0].mxu1 %v1122_v17 }
  0x5e   : > { %1043 = vmatpush3.bf16.msra.mxu0 %v1129_v23 }
  0x5f   : > { %1044 = vmatprep.subr.bf16.mxu0 %v1174_v20 }
  0x62   : > { %1045 = vmatpush3.bf16.msra.mxu0 %v1133_v25 }
  0x63   : > { %1046 = vmatprep.subr.bf16.mxu0 %v1174_v20 }
  0x66   : > { %1047 = vmatpush3.bf16.msra.mxu0 %v1137_v26 }
  0x67   : > { %1048 = vmatprep.subr.bf16.mxu0 %v1174_v20 }
  0x6a   : > { %1049 = vmatpush3.bf16.msra.mxu0 %v1141_v27 }
  0x6b   : > { %1050 = vmatprep.subr.bf16.mxu0 %v1174_v20 }
  0x6e   : > { %1051 = vmatpush3.bf16.msra.mxu0 %v1145_v28 }
  0x6f   : > { %1052 = vmatprep.subr.bf16.mxu0 %v1174_v20 }
  0x72   : > { %1053 = vmatpush3.bf16.msra.mxu0 %v1147_v29 }
  0x73   : > { %1054 = vmatprep.subr.bf16.mxu0 %v1174_v20 }
  0x76   : > { %1055 = vmatpush3.bf16.msra.mxu0 %v1148_v30 }
  0x79   : > { %1057 = vmatmul.mubr.bf16.vlgmr.msra.gmra.mrb[4].mxu0 %v1122_v17 }
  0xb5   : > { %v1403_v31 = vpop.permute.xlu0 %713  ;;  %v1405_v32 = vpop.permute.xlu1 %735 }
  0xb9   : > { %v1407_v34 = vpop.permute.xlu0 %718 }
  0xba   : > { %v1411_v39 = vpop.permute.xlu1 %740 }
 0x12c   : > { %v616_v33 = vpop.f32.mrb[0].mxu0 }
 0x12d   : > { %v721_v35 = vmul.f32 %v1403_v31, %v616_v33  ;;  %v618_v36 = vpop.f32.mrb[1].mxu0 }
 0x12e   : > { %v722_v37 = vmul.f32 %v1403_v31, %v618_v36  ;;  %v620_v38 = vpop.f32.mrb[2].mxu0 }
 0x12f   : > { %v743_v40 = vadd.f32 %v1405_v32, %v721_v35  ;;  %v726_v41 = vmul.f32 %v1407_v34, %v620_v38  ;;  %v622_v42 = vpop.f32.mrb[3].mxu0  ;;  %v659_v56 = vpop.f32.mrb[0].mxu1 }
 0x130   : > { %v744_v43 = vadd.f32 %v1405_v32, %v722_v37  ;;  %v727_v44 = vmul.f32 %v1407_v34, %v622_v42  ;;  %v723_v58 = vmul.f32 %v1403_v31, %v659_v56  ;;  %v661_v59 = vpop.f32.mrb[1].mxu1 }
 0x131   : > { %vm753_vm1 = vcmp.ge.f32.partialorder %v743_v40, 0.0  ;;  %v763_v45 = vmul.f32 0.2, %v743_v40  ;;  %v748_v46 = vadd.f32 %v1411_v39, %v726_v41  ;;  %v724_v60 = vmul.f32 %v1403_v31, %v661_v59  ;;  %v663_v61 = vpop.f32.mrb[2].mxu1 }
 0x132   : > { %vm754_vm2 = vcmp.ge.f32.partialorder %v744_v43, 0.0  ;;  %v764_v47 = vmul.f32 0.2, %v744_v43  ;;  %v749_v48 = vadd.f32 %v1411_v39, %v727_v44  ;;  %v745_v62 = vadd.f32 %v1405_v32, %v723_v58  ;;  %v665_v0 = vpop.f32.mrb[3].mxu1 }
 0x133   : > { %v773_v49 = vsel %vm753_vm1, %v743_v40, %v763_v45  ;;  %vm758_vm3 = vcmp.ge.f32.partialorder %v748_v46, 0.0  ;;  %v768_v50 = vmul.f32 0.2, %v748_v46  ;;  %v728_v63 = vmul.f32 %v1407_v34, %v663_v61 }
 0x134   : > { %v774_v51 = vsel %vm754_vm2, %v744_v43, %v764_v47  ;;  %vm759_vm4 = vcmp.ge.f32.partialorder %v749_v48, 0.0  ;;  %v769_v52 = vmul.f32 0.2, %v749_v48  ;;  %v746_v1 = vadd.f32 %v1405_v32, %v724_v60 }
 0x135   : > { %v1024_v53 = vpack.c.bf16 %v774_v51, %v773_v49  ;;  %v778_v54 = vsel %vm758_vm3, %v748_v46, %v768_v50  ;;  %v729_v2 = vmul.f32 %v1407_v34, %v665_v0  ;;  %vm755_vm5 = vcmp.ge.f32.partialorder %v745_v62, 0.0 }
 0x136   : > { %v779_v55 = vsel %vm759_vm4, %v749_v48, %v769_v52  ;;  %v765_v3 = vmul.f32 0.2, %v745_v62  ;;  %v750_v4 = vadd.f32 %v1411_v39, %v728_v63  ;;  %vm756_vm6 = vcmp.ge.f32.partialorder %v746_v1, 0.0 }
 0x137   : > { %815 = vst [vmem:[%s1421_s15] sm:$0xff] %v1024_v53  ;;  %v1027_v57 = vpack.c.bf16 %v779_v55, %v778_v54  ;;  %v766_v5 = vmul.f32 0.2, %v746_v1  ;;  %v751_v6 = vadd.f32 %v1411_v39, %v729_v2 }
 0x138   : > { %v775_v7 = vsel %vm755_vm5, %v745_v62, %v765_v3  ;;  %vm760_vm7 = vcmp.ge.f32.partialorder %v750_v4, 0.0  ;;  %v770_v8 = vmul.f32 0.2, %v750_v4 }
 0x139   : > { %818 = vst [vmem:[%s1421_s15 + $0x14] sm:$0xff] %v1027_v57  ;;  %v776_v9 = vsel %vm756_vm6, %v746_v1, %v766_v5  ;;  %vm761_vm8 = vcmp.ge.f32.partialorder %v751_v6, 0.0  ;;  %v771_v10 = vmul.f32 0.2, %v751_v6 }
 0x13a   : > { %v1025_v11 = vpack.c.bf16 %v776_v9, %v775_v7  ;;  %v780_v12 = vsel %vm760_vm7, %v750_v4, %v770_v8 }
 0x13b   : > { %v781_v13 = vsel %vm761_vm8, %v751_v6, %v771_v10 }
 0x13c   : > { %816 = vst [vmem:[%s1421_s15 + $0x8] sm:$0xff] %v1025_v11  ;;  %v1028_v14 = vpack.c.bf16 %v781_v13, %v780_v12 }
 0x13e   : > { %819 = vst [vmem:[%s1421_s15 + $0x1c] sm:$0xff] %v1028_v14  ;;  %v845_v29 = vld [vmem:[%s1421_s15] sm:$0xff] (%p1231_p5) }
 0x13f   : > { %846 = vst [vmem:[%s830_s23] sm:$0xff] (%p1231_p5), %v845_v29 }
 0x143   : > { %v847_v30 = vld [vmem:[%s1421_s15 + $0x8] sm:$0xff] (%p1231_p5) }
 0x144   : > { %848 = vst [vmem:[%s830_s23 + $0x8] sm:$0xff] (%p1231_p5), %v847_v30 }
 0x14c   : > { %v702_v15 = vpop.f32.mrb[4].mxu0 }
 0x14d   : > { %v725_v16 = vmul.f32 %v1403_v31, %v702_v15  ;;  %v1058_v17 = vpop.f32.mrb[5].mxu0  ;;  %v849_v31 = vld [vmem:[%s1421_s15 + $0x14] sm:$0xff] (%p1231_p5) }
 0x14e   : > { %v705_v18 = vpop.f32.mrb[6].mxu0  ;;  %850 = vst [vmem:[%s830_s23 + $0x28] sm:$0xff] (%p1231_p5), %v849_v31 }
 0x14f   : > { %v747_v19 = vadd.f32 %v1405_v32, %v725_v16  ;;  %v730_v20 = vmul.f32 %v1407_v34, %v705_v18  ;;  %v1059_v21 = vpop.f32.mrb[7].mxu0  ;;  %v851_v32 = vld [vmem:[%s1421_s15 + $0x1c] sm:$0xff] (%p1231_p5) }
 0x150   : > { %852 = vst [vmem:[%s830_s23 + $0x30] sm:$0xff] (%p1231_p5), %v851_v32 }
 0x151   : > { %vm757_vm9 = vcmp.ge.f32.partialorder %v747_v19, 0.0  ;;  %v767_v22 = vmul.f32 0.2, %v747_v19  ;;  %v752_v23 = vadd.f32 %v1411_v39, %v730_v20 }
 0x152   : > { %827 = sbr.rel (!%p1231_p5) target bundleno = 353 (0x161), region = 66 }
 0x153   : > { %v777_v24 = vsel %vm757_vm9, %v747_v19, %v767_v22  ;;  %vm762_vm10 = vcmp.ge.f32.partialorder %v752_v23, 0.0  ;;  %v772_v25 = vmul.f32 0.2, %v752_v23 }
 0x154   : > { %v1026_v26 = vpack.c.bf16 %v777_v24, %v777_v24 }
 0x155   : > { %v782_v27 = vsel %vm762_vm10, %v752_v23, %v772_v25 }
 0x156   : > { %817 = vst [vmem:[%s1421_s15 + $0x10] sm:$0xf] %v1026_v26  ;;  %v1029_v28 = vpack.c.bf16 %v782_v27, %v782_v27 }
 0x158   : > { %820 = vst [vmem:[%s1421_s15 + $0x24] sm:$0xf] %v1029_v28 }
 0x15d   : > { %v1017_v33 = vld [vmem:[%s1421_s15 + $0x10] sm:$0xf] }
 0x15e   : > { %1018 = vst [vmem:[%s830_s23 + $0x10] sm:$0xf] %v1017_v33 }
 0x15f   : > { %v1019_v34 = vld [vmem:[%s1421_s15 + $0x24] sm:$0xf] }
 0x160   : > { %1020 = vst [vmem:[%s830_s23 + $0x38] sm:$0xf] %v1019_v34 }
 0x161 PF: > { %p11_p10 = scmp.ge.s32.totalorder %s1218_s19, 4   ;;  %s1470_s15 = smov %s1167_s16 }
 0x162   : > { %s1471_s16 = smov %s1229_s22  ;;  %s1472_s17 = smov %s1218_s19 }
 0x163   :  { %13 = sbr.rel (!%p11_p10) target bundleno = 2 (0x2), region = 135 }

// kernel: discriminator_forward.10
= control target key start
LH: loop header
LB: loop body
LE: loop exit
PB: predicated region body
PF: predicated region fallthrough
CT: control target
= control target key end

     0   :  { %v793_v1 = vmov 0   ;;  %s1033_s1 = inlined_call_operand.vmem [shape: bf16[256,384], index: 1, kind: input, shape index: {}]   ;;  %s1034_s0 = inlined_call_operand.vmem [shape: bf16[32,256], index: 0, kind: input, shape index: {}]   ;;  %s1035_s2 = inlined_call_operand.vmem [shape: f32[32,1], index: 2, kind: input, shape index: {}]   ;;  %s1036_s3 = inlined_call_operand.vmem [shape: f32[32,1], index: 3, kind: input, shape index: {}]   ;;  %s1037_s4 = inlined_call_operand.vmem [shape: bf16[32,384], index: 4, kind: output, shape index: {}]  }
   0x1   :  { %v723_v0 = vld [vmem:[%s1033_s1 + $0x4] ss:$12 sps:$4 sm:$0xff]   ;;  %722 = vset.pattern.permute.xlu1 %v793_v1  ;;  %721 = vset.pattern.permute.xlu0 %v793_v1  ;;  %v725_v2 = vld [vmem:[%s1033_s1] ss:$12 sps:$4 sm:$0xff]   ;;  %v726_v3 = vld [vmem:[%s1033_s1 + $0x1c] ss:$12 sps:$4 sm:$0xff]  }
   0x2   :  { %362 = vmatprep.subr.bf16.mxu0 %v723_v0  ;;  %v728_v4 = vld [vmem:[%s1033_s1 + $0x18] ss:$12 sps:$4 sm:$0xff]   ;;  %v729_v5 = vld [vmem:[%s1033_s1 + $0x34] ss:$12 sps:$4 sm:$0xff]   ;;  %v731_v6 = vld [vmem:[%s1033_s1 + $0x30] ss:$12 sps:$4 sm:$0xff]  }
   0x3   :  { %363 = vmatpush1.bf16.msra.mxu0 %v725_v2  ;;  %v732_v7 = vld [vmem:[%s1033_s1 + $0x4c] ss:$12 sps:$4 sm:$0xff]   ;;  %v737_v8 = vld [vmem:[%s1033_s1 + $0xc8] ss:$12 sps:$4 sm:$0xff]   ;;  %v735_v13 = vld [vmem:[%s1033_s1 + $0x64] ss:$12 sps:$4 sm:$0xff]  }
   0x4   :  { %364 = vmatprep.subr.bf16.mxu0 %v726_v3  ;;  %v739_v9 = vld [vmem:[%s1033_s1 + $0x8] ss:$12 sps:$4 sm:$0xff]   ;;  %692 = vmatprep.subr.bf16.mxu1 %v737_v8  ;;  %v742_v11 = vld [vmem:[%s1033_s1 + $0xe0] ss:$12 sps:$4 sm:$0xff]   ;;  %v747_v14 = vld [vmem:[%s1033_s1 + $0xf8] ss:$12 sps:$4 sm:$0xff]  }
   0x5   :  { %v734_v10 = vld [vmem:[%s1033_s1 + $0x48] ss:$12 sps:$4 sm:$0xff]   ;;  %693 = vmatpush3.bf16.msra.mxu1 %v739_v9  ;;  %v744_v12 = vld [vmem:[%s1033_s1 + $0x20] ss:$12 sps:$4 sm:$0xff]   ;;  %v749_v16 = vld [vmem:[%s1033_s1 + $0x38] ss:$12 sps:$4 sm:$0xff]  }
   0x6   :  { %694 = vmatprep.subr.bf16.mxu1 %v742_v11  ;;  %v738_v15 = vld [vmem:[%s1033_s1 + $0x60] ss:$12 sps:$4 sm:$0xff]   ;;  %v740_v17 = vld [vmem:[%s1033_s1 + $0x7c] ss:$12 sps:$4 sm:$0xff]   ;;  %v743_v20 = vld [vmem:[%s1033_s1 + $0x78] ss:$12 sps:$4 sm:$0xff]  }
   0x7   :  { %365 = vmatpush1.bf16.msra.mxu0 %v728_v4  ;;  %v752_v18 = vld [vmem:[%s1033_s1 + $0x110] ss:$12 sps:$4 sm:$0xff]   ;;  %v745_v21 = vld [vmem:[%s1033_s1 + $0x94] ss:$12 sps:$4 sm:$0xff]   ;;  %v750_v26 = vld [vmem:[%s1033_s1 + $0xac] ss:$12 sps:$4 sm:$0xff]  }
   0x8   :  { %366 = vmatprep.subr.bf16.mxu0 %v729_v5  ;;  %v754_v19 = vld [vmem:[%s1033_s1 + $0x50] ss:$12 sps:$4 sm:$0xff]   ;;  %v757_v22 = vld [vmem:[%s1033_s1 + $0x128] ss:$12 sps:$4 sm:$0xff]   ;;  %v762_v25 = vld [vmem:[%s1033_s1 + $0x140] ss:$12 sps:$4 sm:$0xff]  }
   0x9   :  { %695 = vmatpush3.bf16.msra.mxu1 %v744_v12  ;;  %v748_v23 = vld [vmem:[%s1033_s1 + $0x90] ss:$12 sps:$4 sm:$0xff]   ;;  %v759_v24 = vld [vmem:[%s1033_s1 + $0x68] ss:$12 sps:$4 sm:$0xff]   ;;  %v764_v27 = vld [vmem:[%s1033_s1 + $0x80] ss:$12 sps:$4 sm:$0xff]  }
   0xa   :  { %696 = vmatprep.subr.bf16.mxu1 %v747_v14  ;;  %v753_v28 = vld [vmem:[%s1033_s1 + $0xa8] ss:$12 sps:$4 sm:$0xff]   ;;  %v767_v29 = vld [vmem:[%s1033_s1 + $0x158] ss:$12 sps:$4 sm:$0xff]   ;;  %v758_v31 = vld [vmem:[%s1033_s1 + $0xc0] ss:$12 sps:$4 sm:$0xff]  }
   0xb   :  { %367 = vmatpush1.bf16.msra.mxu0 %v731_v6  ;;  %v755_v30 = vld [vmem:[%s1033_s1 + $0xc4] ss:$12 sps:$4 sm:$0xff]   ;;  %v760_v34 = vld [vmem:[%s1033_s1 + $0xdc] ss:$12 sps:$4 sm:$0xff]   ;;  %v765_v38 = vld [vmem:[%s1033_s1 + $0xf4] ss:$12 sps:$4 sm:$0xff]  }
   0xc   :  { %368 = vmatprep.subr.bf16.mxu0 %v732_v7  ;;  %v769_v32 = vld [vmem:[%s1033_s1 + $0x98] ss:$12 sps:$4 sm:$0xff]   ;;  %v772_v33 = vld [vmem:[%s1033_s1 + $0x170] ss:$12 sps:$4 sm:$0xff]   ;;  %v775_v39 = vld [vmem:[%s1034_s0] ss:$8 sps:$4 sm:$0xff]  }
   0xd   :  { %697 = vmatpush3.bf16.msra.mxu1 %v749_v16  ;;  %v777_v35 = vld [vmem:[%s1034_s0 + $0x4] ss:$8 sps:$4 sm:$0xff]   ;;  %v774_v36 = vld [vmem:[%s1033_s1 + $0xb0] ss:$12 sps:$4 sm:$0xff]   ;;  %v773_v46 = vld [vmem:[%s1033_s1 + $0x108] ss:$12 sps:$4 sm:$0xff]  }
   0xe   :  { %698 = vmatprep.subr.bf16.mxu1 %v752_v18  ;;  %v763_v37 = vld [vmem:[%s1033_s1 + $0xd8] ss:$12 sps:$4 sm:$0xff]   ;;  %447 = vmatprep.mubr.bf16.mxu1 %v777_v35  ;;  %v784_v40 = vld [vmem:[%s1034_s0 + $0x14] ss:$8 sps:$4 sm:$0xff]   ;;  %v465_v47 = vld [vmem:[%s1035_s2 + $0x8] sm:$0xff] }
   0xf   :  { %369 = vmatpush1.bf16.msra.mxu0 %v734_v10  ;;  %394 = vmatprep.mubr.bf16.mxu0 %v777_v35  ;;  %v768_v41 = vld [vmem:[%s1033_s1 + $0xf0] ss:$12 sps:$4 sm:$0xff]   ;;  %v770_v42 = vld [vmem:[%s1033_s1 + $0x10c] ss:$12 sps:$4 sm:$0xff]   ;;  %v464_v44 = vld [vmem:[%s1035_s2] sm:$0xff] }
  0x10   :  { %370 = vmatprep.subr.bf16.mxu0 %v735_v13  ;;  %v466_v43 = vld [vmem:[%s1035_s2 + $0x10] sm:$0xff]  ;;  %470 = vperm.xlu0 %721, %v464_v44   ;;  %v467_v45 = vld [vmem:[%s1035_s2 + $0x18] sm:$0xff]  ;;  %v501_v50 = vld [vmem:[%s1036_s3 + $0x8] sm:$0xff] }
  0x11   :  { %699 = vmatpush3.bf16.msra.mxu1 %v754_v19  ;;  %480 = vperm.xlu1 %722, %v466_v43   ;;  %v778_v48 = vld [vmem:[%s1033_s1 + $0x124] ss:$12 sps:$4 sm:$0xff]   ;;  %v780_v51 = vld [vmem:[%s1033_s1 + $0x120] ss:$12 sps:$4 sm:$0xff]   ;;  %v781_v53 = vld [vmem:[%s1033_s1 + $0x13c] ss:$12 sps:$4 sm:$0xff]  }
  0x12   :  { %700 = vmatprep.subr.bf16.mxu1 %v757_v22  ;;  %v788_v49 = vld [vmem:[%s1034_s0 + $0x10] ss:$8 sps:$4 sm:$0xff]   ;;  %v500_v52 = vld [vmem:[%s1036_s3] sm:$0xff]  ;;  %v792_v60 = vld [vmem:[%s1033_s1 + $0x168] ss:$12 sps:$4 sm:$0xff]  }
  0x13   :  { %371 = vmatpush1.bf16.msra.mxu0 %v738_v15  ;;  %v503_v54 = vld [vmem:[%s1036_s3 + $0x18] sm:$0xff]  ;;  %v502_v56 = vld [vmem:[%s1036_s3 + $0x10] sm:$0xff] }
  0x14   :  { %372 = vmatprep.subr.bf16.mxu0 %v740_v17  ;;  %475 = vperm.xlu0 %721, %v465_v47   ;;  %v783_v55 = vld [vmem:[%s1033_s1 + $0x138] ss:$12 sps:$4 sm:$0xff]   ;;  %v786_v57 = vld [vmem:[%s1033_s1 + $0x154] ss:$12 sps:$4 sm:$0xff]   ;;  %v789_v58 = vld [vmem:[%s1033_s1 + $0x150] ss:$12 sps:$4 sm:$0xff]  }
  0x15   :  { %701 = vmatpush3.bf16.msra.mxu1 %v759_v24  ;;  %485 = vperm.xlu1 %722, %v467_v45   ;;  %v790_v59 = vld [vmem:[%s1033_s1 + $0x16c] ss:$12 sps:$4 sm:$0xff]  }
  0x16   :  { %702 = vmatprep.subr.bf16.mxu1 %v762_v25 }
  0x17   :  { %373 = vmatpush1.bf16.msra.mxu0 %v743_v20 }
  0x18   :  { %374 = vmatprep.subr.bf16.mxu0 %v745_v21  ;;  %506 = vperm.xlu0 %721, %v500_v52  }
  0x19   :  { %703 = vmatpush3.bf16.msra.mxu1 %v764_v27  ;;  %511 = vperm.xlu1 %722, %v501_v50  }
  0x1a   :  { %704 = vmatprep.subr.bf16.mxu1 %v767_v29 }
  0x1b   :  { %375 = vmatpush1.bf16.msra.mxu0 %v748_v23 }
  0x1c   :  { %376 = vmatprep.subr.bf16.mxu0 %v750_v26  ;;  %516 = vperm.xlu0 %721, %v502_v56  }
  0x1d   :  { %705 = vmatpush3.bf16.msra.mxu1 %v769_v32  ;;  %521 = vperm.xlu1 %722, %v503_v54  }
  0x1e   :  { %706 = vmatprep.subr.bf16.mxu1 %v772_v33 }
  0x1f   :  { %377 = vmatpush1.bf16.msra.mxu0 %v753_v28 }
  0x20   :  { %378 = vmatprep.subr.bf16.mxu0 %v755_v30 }
  0x21   :  { %707 = vmatpush3.bf16.msra.mxu1 %v774_v36 }
  0x23   :  { %379 = vmatpush1.bf16.msra.mxu0 %v758_v31 }
  0x24   :  { %380 = vmatprep.subr.bf16.mxu0 %v760_v34  ;;  %448 = vmatmul.mubr.bf16.vlgmr.msra.gmra.mrb[0].mxu1 %v775_v39 }
  0x25   :  { %455 = vmatprep.mubr.bf16.mxu1 %v784_v40 }
  0x27   :  { %381 = vmatpush1.bf16.msra.mxu0 %v763_v37 }
  0x28   :  { %382 = vmatprep.subr.bf16.mxu0 %v765_v38 }
  0x2b   :  { %383 = vmatpush1.bf16.msra.mxu0 %v768_v41 }
  0x2c   :  { %384 = vmatprep.subr.bf16.mxu0 %v770_v42  ;;  %456 = vmatmul.mubr.bf16.gmra.mrb[4].mxu1 %v788_v49 }
  0x2f   :  { %385 = vmatpush1.bf16.msra.mxu0 %v773_v46 }
  0x30   :  { %386 = vmatprep.subr.bf16.mxu0 %v778_v48 }
  0x33   :  { %387 = vmatpush1.bf16.msra.mxu0 %v780_v51 }
  0x34   :  { %388 = vmatprep.subr.bf16.mxu0 %v781_v53 }
  0x37   :  { %389 = vmatpush1.bf16.msra.mxu0 %v783_v55 }
  0x38   :  { %390 = vmatprep.subr.bf16.mxu0 %v786_v57 }
  0x3b   :  { %391 = vmatpush1.bf16.msra.mxu0 %v789_v58 }
  0x3c   :  { %392 = vmatprep.subr.bf16.mxu0 %v790_v59 }
  0x3f   :  { %393 = vmatpush1.bf16.msra.mxu0 %v792_v60 }
  0x42   :  { %395 = vmatmul.mubr.bf16.vlgmr.msra.gmra.mrb[0].mxu0 %v775_v39 }
  0x43   :  { %404 = vmatprep.mubr.bf16.mxu0 %v784_v40 }
  0x4a   :  { %405 = vmatmul.mubr.bf16.gmra.mrb[4].mxu0 %v788_v49 }
  0x8f   :  { %v471_v61 = vpop.permute.xlu0 %470 }
  0x90   :  { %v999_v62 = vpop.permute.xlu1 %480 }
  0x93   :  { %v476_v63 = vpop.permute.xlu0 %475 }
  0x94   :  { %v1001_v2 = vpop.permute.xlu1 %485 }
  0x97   :  { %v507_v8 = vpop.permute.xlu0 %506 }
  0x98   :  { %v512_v11 = vpop.permute.xlu1 %511 }
  0x9b   :  { %v517_v22 = vpop.permute.xlu0 %516 }
  0x9c   :  { %v522_v27 = vpop.permute.xlu1 %521 }
  0xf7   :  { %v708_v0 = vpop.f32.mrb[0].mxu1 }
  0xf8   :  { %v709_v1 = vpop.f32.mrb[1].mxu1 }
  0xf9   :  { %v710_v3 = vadd.f32 %v709_v1, %v708_v0  ;;  %v711_v4 = vpop.f32.mrb[2].mxu1 }
  0xfa   :  { %v712_v5 = vpop.f32.mrb[3].mxu1 }
  0xfb   :  { %v490_v6 = vmul.f32 %v710_v3, %v471_v61  ;;  %v713_v7 = vadd.f32 %v712_v5, %v711_v4 }
  0xfd   :  { %v493_v9 = vmul.f32 %v713_v7, %v476_v63  ;;  %v526_v10 = vadd.f32 %v507_v8, %v490_v6 }
  0xff   :  { %v714_v12 = vpop.f32.mrb[4].mxu1  ;;  %v529_v13 = vadd.f32 %v512_v11, %v493_v9  ;;  %vm538_vm0 = vcmp.ge.f32.partialorder %v526_v10, 0.0  ;;  %v550_v14 = vmul.f32 0.2, %v526_v10 }
 0x100   :  { %v715_v15 = vpop.f32.mrb[5].mxu1 }
 0x101   :  { %v716_v16 = vadd.f32 %v715_v15, %v714_v12  ;;  %v717_v17 = vpop.f32.mrb[6].mxu1  ;;  %vm541_vm1 = vcmp.ge.f32.partialorder %v529_v13, 0.0  ;;  %v553_v18 = vmul.f32 0.2, %v529_v13  ;;  %v562_v19 = vsel %vm538_vm0, %v526_v10, %v550_v14 }
 0x102   :  { %v685_v20 = vpack.c.bf16 %v562_v19, %v562_v19  ;;  %v718_v21 = vpop.f32.mrb[7].mxu1 }
 0x103   :  { %v496_v23 = vmul.f32 %v716_v16, %v999_v62  ;;  %v565_v24 = vsel %vm541_vm1, %v529_v13, %v553_v18  ;;  %v719_v25 = vadd.f32 %v718_v21, %v717_v17 }
 0x104   :  { %v687_v26 = vpack.c.bf16 %v565_v24, %v565_v24  ;;  %613 = vst [vmem:[%s1037_s4 + $0x8] sm:$0xf] %v685_v20 }
 0x105   :  { %v499_v28 = vmul.f32 %v719_v25, %v1001_v2  ;;  %v532_v29 = vadd.f32 %v517_v22, %v496_v23 }
 0x106   :  { %615 = vst [vmem:[%s1037_s4 + $0x14] sm:$0xf] %v687_v26 }
 0x107   :  { %v535_v30 = vadd.f32 %v522_v27, %v499_v28  ;;  %vm544_vm2 = vcmp.ge.f32.partialorder %v532_v29, 0.0  ;;  %v556_v31 = vmul.f32 0.2, %v532_v29 }
 0x109   :  { %vm547_vm3 = vcmp.ge.f32.partialorder %v535_v30, 0.0  ;;  %v559_v32 = vmul.f32 0.2, %v535_v30  ;;  %v568_v33 = vsel %vm544_vm2, %v532_v29, %v556_v31 }
 0x10a   :  { %v689_v34 = vpack.c.bf16 %v568_v33, %v568_v33 }
 0x10b   :  { %v571_v35 = vsel %vm547_vm3, %v535_v30, %v559_v32 }
 0x10c   :  { %v691_v36 = vpack.c.bf16 %v571_v35, %v571_v35  ;;  %617 = vst [vmem:[%s1037_s4 + $0x20] sm:$0xf] %v689_v34 }
 0x10e   :  { %619 = vst [vmem:[%s1037_s4 + $0x2c] sm:$0xf] %v691_v36 }
 0x115   :  { %v396_v37 = vpop.f32.mrb[0].mxu0 }
 0x116   :  { %v488_v38 = vmul.f32 %v471_v61, %v396_v37  ;;  %v398_v39 = vpop.f32.mrb[1].mxu0 }
 0x117   :  { %v489_v40 = vmul.f32 %v471_v61, %v398_v39  ;;  %v400_v41 = vpop.f32.mrb[2].mxu0 }
 0x118   :  { %v524_v42 = vadd.f32 %v507_v8, %v488_v38  ;;  %v491_v43 = vmul.f32 %v476_v63, %v400_v41  ;;  %v402_v44 = vpop.f32.mrb[3].mxu0 }
 0x119   :  { %v525_v45 = vadd.f32 %v507_v8, %v489_v40  ;;  %v492_v46 = vmul.f32 %v476_v63, %v402_v44 }
 0x11a   :  { %vm536_vm4 = vcmp.ge.f32.partialorder %v524_v42, 0.0  ;;  %v548_v47 = vmul.f32 0.2, %v524_v42  ;;  %v527_v48 = vadd.f32 %v512_v11, %v491_v43 }
 0x11b   :  { %vm537_vm5 = vcmp.ge.f32.partialorder %v525_v45, 0.0  ;;  %v549_v49 = vmul.f32 0.2, %v525_v45  ;;  %v528_v50 = vadd.f32 %v512_v11, %v492_v46 }
 0x11c   :  { %v560_v51 = vsel %vm536_vm4, %v524_v42, %v548_v47  ;;  %vm539_vm6 = vcmp.ge.f32.partialorder %v527_v48, 0.0  ;;  %v551_v52 = vmul.f32 0.2, %v527_v48 }
 0x11d   :  { %v561_v53 = vsel %vm537_vm5, %v525_v45, %v549_v49  ;;  %vm540_vm7 = vcmp.ge.f32.partialorder %v528_v50, 0.0  ;;  %v552_v54 = vmul.f32 0.2, %v528_v50  ;;  %v406_v55 = vpop.f32.mrb[4].mxu0 }
 0x11e   :  { %v684_v56 = vpack.c.bf16 %v561_v53, %v560_v51  ;;  %v563_v57 = vsel %vm539_vm6, %v527_v48, %v551_v52  ;;  %v494_v58 = vmul.f32 %v999_v62, %v406_v55  ;;  %v408_v59 = vpop.f32.mrb[5].mxu0 }
 0x11f   :  { %v564_v60 = vsel %vm540_vm7, %v528_v50, %v552_v54  ;;  %v495_v61 = vmul.f32 %v999_v62, %v408_v59  ;;  %v410_v63 = vpop.f32.mrb[6].mxu0 }
 0x120   :  { %612 = vst [vmem:[%s1037_s4] sm:$0xff] %v684_v56  ;;  %v686_v0 = vpack.c.bf16 %v564_v60, %v563_v57  ;;  %v530_v1 = vadd.f32 %v517_v22, %v494_v58  ;;  %v497_v3 = vmul.f32 %v1001_v2, %v410_v63  ;;  %v412_v4 = vpop.f32.mrb[7].mxu0 }
 0x121   :  { %v531_v5 = vadd.f32 %v517_v22, %v495_v61  ;;  %v498_v6 = vmul.f32 %v1001_v2, %v412_v4 }
 0x122   :  { %614 = vst [vmem:[%s1037_s4 + $0xc] sm:$0xff] %v686_v0  ;;  %vm542_vm8 = vcmp.ge.f32.partialorder %v530_v1, 0.0  ;;  %v554_v7 = vmul.f32 0.2, %v530_v1  ;;  %v533_v62 = vadd.f32 %v522_v27, %v497_v3 }
 0x123   :  { %vm543_vm9 = vcmp.ge.f32.partialorder %v531_v5, 0.0  ;;  %v555_v8 = vmul.f32 0.2, %v531_v5  ;;  %v534_v9 = vadd.f32 %v522_v27, %v498_v6 }
 0x124   :  { %v566_v10 = vsel %vm542_vm8, %v530_v1, %v554_v7  ;;  %vm545_vm10 = vcmp.ge.f32.partialorder %v533_v62, 0.0  ;;  %v557_v11 = vmul.f32 0.2, %v533_v62 }
 0x125   :  { %v567_v12 = vsel %vm543_vm9, %v531_v5, %v555_v8  ;;  %vm546_vm11 = vcmp.ge.f32.partialorder %v534_v9, 0.0  ;;  %v558_v13 = vmul.f32 0.2, %v534_v9 }
 0x126   :  { %v688_v14 = vpack.c.bf16 %v567_v12, %v566_v10  ;;  %v569_v15 = vsel %vm545_vm10, %v533_v62, %v557_v11 }
 0x127   :  { %v570_v16 = vsel %vm546_vm11, %v534_v9, %v558_v13 }
 0x128   :  { %616 = vst [vmem:[%s1037_s4 + $0x18] sm:$0xff] %v688_v14  ;;  %v690_v2 = vpack.c.bf16 %v570_v16, %v569_v15 }
 0x12a   :  { %618 = vst [vmem:[%s1037_s4 + $0x24] sm:$0xff] %v690_v2 }

// kernel: discriminator_forward.11
= control target key start
LH: loop header
LB: loop body
LE: loop exit
PB: predicated region body
PF: predicated region fallthrough
CT: control target
= control target key end

     0   :  { %v906_v1 = vmov 0   ;;  %s1148_s1 = inlined_call_operand.vmem [shape: bf16[512,128], index: 1, kind: input, shape index: {}]   ;;  %s1149_s0 = inlined_call_operand.vmem [shape: bf16[64,512], index: 0, kind: input, shape index: {}]   ;;  %s1150_s2 = inlined_call_operand.vmem [shape: f32[64,1], index: 2, kind: input, shape index: {}]   ;;  %s1151_s3 = inlined_call_operand.vmem [shape: f32[64,1], index: 3, kind: input, shape index: {}]   ;;  %s1152_s4 = inlined_call_operand.vmem [shape: bf16[64,128], index: 4, kind: output, shape index: {}]  }
   0x1   :  { %v850_v0 = vld [vmem:[%s1148_s1 + $0x40] sm:$0xff]   ;;  %849 = vset.pattern.permute.xlu1 %v906_v1  ;;  %848 = vset.pattern.permute.xlu0 %v906_v1  ;;  %v854_v5 = vld [vmem:[%s1148_s1 + $0x48] sm:$0xff]   ;;  %v858_v9 = vld [vmem:[%s1148_s1 + $0x50] sm:$0xff]  }
   0x2   :  { %v851_v2 = vld [vmem:[%s1148_s1 + $0xc0] sm:$0xff]   ;;  %767 = vmatprep.subr.bf16.mxu0 %v850_v0  ;;  %v855_v6 = vld [vmem:[%s1148_s1 + $0xc8] sm:$0xff]   ;;  %v859_v10 = vld [vmem:[%s1148_s1 + $0xd0] sm:$0xff]  }
   0x3   :  { %v852_v3 = vld [vmem:[%s1148_s1] sm:$0xff]   ;;  %807 = vmatprep.subr.bf16.mxu1 %v851_v2  ;;  %v856_v7 = vld [vmem:[%s1148_s1 + $0x8] sm:$0xff]   ;;  %v860_v11 = vld [vmem:[%s1148_s1 + $0x10] sm:$0xff]  }
   0x4   :  { %v853_v4 = vld [vmem:[%s1148_s1 + $0x80] sm:$0xff]   ;;  %768 = vmatpush3.bf16.msra.mxu0 %v852_v3  ;;  %v857_v8 = vld [vmem:[%s1148_s1 + $0x88] sm:$0xff]   ;;  %v861_v12 = vld [vmem:[%s1148_s1 + $0x90] sm:$0xff]  }
   0x5   :  { %808 = vmatpush3.bf16.msra.mxu1 %v853_v4  ;;  %769 = vmatprep.subr.bf16.mxu0 %v854_v5  ;;  %v862_v13 = vld [vmem:[%s1148_s1 + $0x58] sm:$0xff]   ;;  %v866_v17 = vld [vmem:[%s1148_s1 + $0x60] sm:$0xff]   ;;  %v870_v21 = vld [vmem:[%s1148_s1 + $0x68] sm:$0xff]  }
   0x6   :  { %809 = vmatprep.subr.bf16.mxu1 %v855_v6  ;;  %v863_v14 = vld [vmem:[%s1148_s1 + $0xd8] sm:$0xff]   ;;  %v867_v18 = vld [vmem:[%s1148_s1 + $0xe0] sm:$0xff]   ;;  %v871_v22 = vld [vmem:[%s1148_s1 + $0xe8] sm:$0xff]  }
   0x7   :  { %v864_v15 = vld [vmem:[%s1148_s1 + $0x18] sm:$0xff]   ;;  %v868_v19 = vld [vmem:[%s1148_s1 + $0x20] sm:$0xff]   ;;  %v872_v23 = vld [vmem:[%s1148_s1 + $0x28] sm:$0xff]  }
   0x8   :  { %770 = vmatpush3.bf16.msra.mxu0 %v856_v7  ;;  %v865_v16 = vld [vmem:[%s1148_s1 + $0x98] sm:$0xff]   ;;  %v869_v20 = vld [vmem:[%s1148_s1 + $0xa0] sm:$0xff]   ;;  %v873_v24 = vld [vmem:[%s1148_s1 + $0xa8] sm:$0xff]  }
   0x9   :  { %810 = vmatpush3.bf16.msra.mxu1 %v857_v8  ;;  %771 = vmatprep.subr.bf16.mxu0 %v858_v9  ;;  %v874_v25 = vld [vmem:[%s1148_s1 + $0x70] sm:$0xff]   ;;  %v878_v29 = vld [vmem:[%s1148_s1 + $0x78] sm:$0xff]   ;;  %v500_v44 = vld [vmem:[%s1150_s2] sm:$0xff] }
   0xa   :  { %811 = vmatprep.subr.bf16.mxu1 %v859_v10  ;;  %v875_v26 = vld [vmem:[%s1148_s1 + $0xf0] sm:$0xff]   ;;  %v879_v30 = vld [vmem:[%s1148_s1 + $0xf8] sm:$0xff]   ;;  %510 = vperm.xlu0 %848, %v500_v44   ;;  %v501_v46 = vld [vmem:[%s1150_s2 + $0x8] sm:$0xff] }
   0xb   :  { %v876_v27 = vld [vmem:[%s1148_s1 + $0x30] sm:$0xff]   ;;  %v880_v31 = vld [vmem:[%s1148_s1 + $0x38] sm:$0xff]   ;;  %v505_v48 = vld [vmem:[%s1150_s2 + $0x28] sm:$0xff] }
   0xc   :  { %772 = vmatpush3.bf16.msra.mxu0 %v860_v11  ;;  %v877_v28 = vld [vmem:[%s1148_s1 + $0xb0] sm:$0xff]   ;;  %v881_v32 = vld [vmem:[%s1148_s1 + $0xb8] sm:$0xff]   ;;  %v504_v51 = vld [vmem:[%s1150_s2 + $0x20] sm:$0xff] }
   0xd   :  { %812 = vmatpush3.bf16.msra.mxu1 %v861_v12  ;;  %773 = vmatprep.subr.bf16.mxu0 %v862_v13  ;;  %v882_v33 = vld [vmem:[%s1149_s0] ss:$16 sps:$4 sm:$0xff]   ;;  %v884_v34 = vld [vmem:[%s1149_s0 + $0x4] ss:$16 sps:$4 sm:$0xff]   ;;  %v885_v35 = vld [vmem:[%s1149_s0 + $0x8] ss:$16 sps:$4 sm:$0xff]  }
   0xe   :  { %813 = vmatprep.subr.bf16.mxu1 %v863_v14  ;;  %v887_v36 = vld [vmem:[%s1149_s0 + $0xc] ss:$16 sps:$4 sm:$0xff]   ;;  %402 = vmatprep.mubr.bf16.mxu0 %v884_v34  ;;  %v888_v37 = vld [vmem:[%s1149_s0 + $0x24] ss:$16 sps:$4 sm:$0xff]   ;;  %v892_v39 = vld [vmem:[%s1149_s0 + $0x20] ss:$16 sps:$4 sm:$0xff]  }
   0xf   :  { %467 = vmatprep.mubr.bf16.mxu1 %v887_v36  ;;  %v890_v38 = vld [vmem:[%s1149_s0 + $0x2c] ss:$16 sps:$4 sm:$0xff]   ;;  %v893_v40 = vld [vmem:[%s1149_s0 + $0x28] ss:$16 sps:$4 sm:$0xff]   ;;  %v894_v41 = vld [vmem:[%s1149_s0 + $0x44] ss:$16 sps:$4 sm:$0xff]   ;;  %515 = vperm.xlu0 %848, %v501_v46  }
  0x10   :  { %774 = vmatpush3.bf16.msra.mxu0 %v864_v15  ;;  %v896_v42 = vld [vmem:[%s1149_s0 + $0x4c] ss:$16 sps:$4 sm:$0xff]   ;;  %v502_v43 = vld [vmem:[%s1150_s2 + $0x10] sm:$0xff]  ;;  %v899_v49 = vld [vmem:[%s1149_s0 + $0x48] ss:$16 sps:$4 sm:$0xff]  }
  0x11   :  { %814 = vmatpush3.bf16.msra.mxu1 %v865_v16  ;;  %775 = vmatprep.subr.bf16.mxu0 %v866_v17  ;;  %v503_v45 = vld [vmem:[%s1150_s2 + $0x18] sm:$0xff]  ;;  %v898_v47 = vld [vmem:[%s1149_s0 + $0x40] ss:$16 sps:$4 sm:$0xff]   ;;  %v900_v50 = vld [vmem:[%s1149_s0 + $0x64] ss:$16 sps:$4 sm:$0xff]  }
  0x12   :  { %815 = vmatprep.subr.bf16.mxu1 %v867_v18  ;;  %520 = vperm.xlu1 %849, %v502_v43   ;;  %v902_v52 = vld [vmem:[%s1149_s0 + $0x6c] ss:$16 sps:$4 sm:$0xff]   ;;  %v506_v54 = vld [vmem:[%s1150_s2 + $0x30] sm:$0xff]  ;;  %v905_v57 = vld [vmem:[%s1149_s0 + $0x68] ss:$16 sps:$4 sm:$0xff]  }
  0x13   :  { %530 = vperm.xlu0 %848, %v504_v51   ;;  %v507_v53 = vld [vmem:[%s1150_s2 + $0x38] sm:$0xff]  ;;  %v904_v55 = vld [vmem:[%s1149_s0 + $0x60] ss:$16 sps:$4 sm:$0xff]   ;;  %v557_v56 = vld [vmem:[%s1151_s3 + $0x8] sm:$0xff] }
  0x14   :  { %776 = vmatpush3.bf16.msra.mxu0 %v868_v19  ;;  %v556_v58 = vld [vmem:[%s1151_s3] sm:$0xff]  ;;  %v559_v59 = vld [vmem:[%s1151_s3 + $0x18] sm:$0xff]  ;;  %v558_v60 = vld [vmem:[%s1151_s3 + $0x10] sm:$0xff] }
  0x15   :  { %816 = vmatpush3.bf16.msra.mxu1 %v869_v20  ;;  %777 = vmatprep.subr.bf16.mxu0 %v870_v21  ;;  %v561_v61 = vld [vmem:[%s1151_s3 + $0x28] sm:$0xff]  ;;  %v560_v62 = vld [vmem:[%s1151_s3 + $0x20] sm:$0xff]  ;;  %v563_v63 = vld [vmem:[%s1151_s3 + $0x38] sm:$0xff] }
  0x16   :  { %817 = vmatprep.subr.bf16.mxu1 %v871_v22  ;;  %525 = vperm.xlu1 %849, %v503_v45   ;;  %v562_v0 = vld [vmem:[%s1151_s3 + $0x30] sm:$0xff] }
  0x17   :  { %540 = vperm.xlu0 %848, %v506_v54  }
  0x18   :  { %778 = vmatpush3.bf16.msra.mxu0 %v872_v23 }
  0x19   :  { %818 = vmatpush3.bf16.msra.mxu1 %v873_v24  ;;  %779 = vmatprep.subr.bf16.mxu0 %v874_v25 }
  0x1a   :  { %819 = vmatprep.subr.bf16.mxu1 %v875_v26  ;;  %535 = vperm.xlu1 %849, %v505_v48  }
  0x1b   :  { %566 = vperm.xlu0 %848, %v556_v58  }
  0x1c   :  { %780 = vmatpush3.bf16.msra.mxu0 %v876_v27 }
  0x1d   :  { %820 = vmatpush3.bf16.msra.mxu1 %v877_v28  ;;  %781 = vmatprep.subr.bf16.mxu0 %v878_v29 }
  0x1e   :  { %821 = vmatprep.subr.bf16.mxu1 %v879_v30  ;;  %545 = vperm.xlu1 %849, %v507_v53  }
  0x1f   :  { %576 = vperm.xlu0 %848, %v558_v60  }
  0x20   :  { %782 = vmatpush3.bf16.msra.mxu0 %v880_v31 }
  0x21   :  { %822 = vmatpush3.bf16.msra.mxu1 %v881_v32 }
  0x22   :  { %571 = vperm.xlu1 %849, %v557_v56  }
  0x23   :  { %403 = vmatmul.mubr.bf16.vlgmr.msra.gmra.mrb[0].mxu0 %v882_v33  ;;  %586 = vperm.xlu0 %848, %v560_v62  }
  0x24   :  { %468 = vmatmul.mubr.bf16.vlgmr.msra.gmra.mrb[0].mxu1 %v885_v35  ;;  %410 = vmatprep.mubr.bf16.mxu0 %v888_v37 }
  0x25   :  { %475 = vmatprep.mubr.bf16.mxu1 %v890_v38 }
  0x26   :  { %581 = vperm.xlu1 %849, %v559_v59  }
  0x27   :  { %596 = vperm.xlu0 %848, %v562_v0  }
  0x2a   :  { %591 = vperm.xlu1 %849, %v561_v61  }
  0x2b   :  { %411 = vmatmul.mubr.bf16.gmra.mrb[4].mxu0 %v892_v39 }
  0x2c   :  { %476 = vmatmul.mubr.bf16.gmra.mrb[4].mxu1 %v893_v40  ;;  %418 = vmatprep.mubr.bf16.mxu0 %v894_v41 }
  0x2d   :  { %483 = vmatprep.mubr.bf16.mxu1 %v896_v42 }
  0x2e   :  { %601 = vperm.xlu1 %849, %v563_v63  }
  0x33   :  { %419 = vmatmul.mubr.bf16.gmra.mrb[8].mxu0 %v898_v47 }
  0x34   :  { %484 = vmatmul.mubr.bf16.gmra.mrb[8].mxu1 %v899_v49  ;;  %426 = vmatprep.mubr.bf16.mxu0 %v900_v50 }
  0x35   :  { %491 = vmatprep.mubr.bf16.mxu1 %v902_v52 }
  0x3b   :  { %427 = vmatmul.mubr.bf16.gmra.mrb[12].mxu0 %v904_v55 }
  0x3c   :  { %492 = vmatmul.mubr.bf16.gmra.mrb[12].mxu1 %v905_v57 }
  0x89   :  { %v511_v2 = vpop.permute.xlu0 %510 }
  0x8e   :  { %v516_v4 = vpop.permute.xlu0 %515 }
  0x91   :  { %v521_v1 = vpop.permute.xlu1 %520 }
  0x92   :  { %v1126_v6 = vpop.permute.xlu0 %530 }
  0x95   :  { %v526_v3 = vpop.permute.xlu1 %525 }
  0x96   :  { %v1130_v8 = vpop.permute.xlu0 %540 }
  0x99   :  { %v1124_v5 = vpop.permute.xlu1 %535 }
  0x9a   :  { %v567_v25 = vpop.permute.xlu0 %566 }
  0x9d   :  { %v1128_v7 = vpop.permute.xlu1 %545 }
  0x9e   :  { %v577_v48 = vpop.permute.xlu0 %576 }
  0xa1   :  { %v572_v22 = vpop.permute.xlu1 %571 }
  0xa5   :  { %v582_v44 = vpop.permute.xlu1 %581 }
  0xf6   :  { %v783_v9 = vpop.f32.mrb[0].mxu0 }
  0xf7   :  { %v823_v10 = vpop.f32.mrb[0].mxu1  ;;  %v784_v11 = vpop.f32.mrb[1].mxu0 }
  0xf8   :  { %v785_v12 = vadd.f32 %v784_v11, %v783_v9  ;;  %v824_v13 = vpop.f32.mrb[1].mxu1  ;;  %v786_v14 = vpop.f32.mrb[2].mxu0 }
  0xf9   :  { %v825_v15 = vadd.f32 %v824_v13, %v823_v10  ;;  %v826_v16 = vpop.f32.mrb[2].mxu1  ;;  %v787_v17 = vpop.f32.mrb[3].mxu0 }
  0xfa   :  { %v788_v18 = vadd.f32 %v787_v17, %v786_v14  ;;  %v827_v19 = vpop.f32.mrb[3].mxu1  ;;  %v592_v10 = vpop.permute.xlu1 %591 }
  0xfb   :  { %v470_v20 = vadd.f32 %v825_v15, %v785_v12  ;;  %v828_v21 = vadd.f32 %v827_v19, %v826_v16 }
  0xfd   :  { %v548_v23 = vmul.f32 %v511_v2, %v470_v20  ;;  %v473_v24 = vadd.f32 %v828_v21, %v788_v18 }
  0xfe   :  { %v789_v26 = vpop.f32.mrb[4].mxu0 }
  0xff   :  { %v604_v27 = vadd.f32 %v567_v25, %v548_v23  ;;  %v549_v28 = vmul.f32 %v516_v4, %v473_v24  ;;  %v829_v29 = vpop.f32.mrb[4].mxu1  ;;  %v790_v30 = vpop.f32.mrb[5].mxu0 }
 0x100   :  { %v791_v31 = vadd.f32 %v790_v30, %v789_v26  ;;  %v830_v32 = vpop.f32.mrb[5].mxu1  ;;  %v792_v33 = vpop.f32.mrb[6].mxu0 }
 0x101   :  { %v620_v34 = vmul.f32 0.2, %v604_v27  ;;  %v605_v35 = vadd.f32 %v572_v22, %v549_v28  ;;  %v831_v36 = vadd.f32 %v830_v32, %v829_v29  ;;  %v832_v37 = vpop.f32.mrb[6].mxu1  ;;  %v793_v38 = vpop.f32.mrb[7].mxu0  ;;  %vm612_vm0 = vcmp.ge.f32.partialorder %v604_v27, 0.0 }
 0x102   :  { %v794_v39 = vadd.f32 %v793_v38, %v792_v33  ;;  %v833_v40 = vpop.f32.mrb[7].mxu1 }
 0x103   :  { %vm613_vm1 = vcmp.ge.f32.partialorder %v605_v35, 0.0  ;;  %v621_v41 = vmul.f32 0.2, %v605_v35  ;;  %v478_v42 = vadd.f32 %v831_v36, %v791_v31  ;;  %v834_v43 = vadd.f32 %v833_v40, %v832_v37  ;;  %v602_v40 = vpop.permute.xlu1 %601 }
 0x104   :  { %v628_v45 = vsel %vm612_vm0, %v604_v27, %v620_v34 }
 0x105   :  { %v629_v46 = vsel %vm613_vm1, %v605_v35, %v621_v41  ;;  %v550_v47 = vmul.f32 %v521_v1, %v478_v42  ;;  %v481_v50 = vadd.f32 %v834_v43, %v794_v39 }
 0x106   :  { %v747_v49 = vpack.c.bf16 %v629_v46, %v628_v45  ;;  %v795_v51 = vpop.f32.mrb[8].mxu0 }
 0x107   :  { %v606_v52 = vadd.f32 %v577_v48, %v550_v47  ;;  %v835_v53 = vpop.f32.mrb[8].mxu1  ;;  %v796_v54 = vpop.f32.mrb[9].mxu0  ;;  %v551_v55 = vmul.f32 %v526_v3, %v481_v50 }
 0x108   :  { %748 = vst [vmem:[%s1152_s4] sm:$0xff] %v747_v49   ;;  %v797_v56 = vadd.f32 %v796_v54, %v795_v51  ;;  %v836_v57 = vpop.f32.mrb[9].mxu1  ;;  %v798_v58 = vpop.f32.mrb[10].mxu0 }
 0x109   :  { %v837_v59 = vadd.f32 %v836_v57, %v835_v53  ;;  %v838_v60 = vpop.f32.mrb[10].mxu1  ;;  %v799_v61 = vpop.f32.mrb[11].mxu0  ;;  %v622_v62 = vmul.f32 0.2, %v606_v52  ;;  %v607_v63 = vadd.f32 %v582_v44, %v551_v55  ;;  %vm614_vm2 = vcmp.ge.f32.partialorder %v606_v52, 0.0 }
 0x10a   :  { %v800_v0 = vadd.f32 %v799_v61, %v798_v58  ;;  %v839_v1 = vpop.f32.mrb[11].mxu1  ;;  %v587_v3 = vpop.permute.xlu0 %586 }
 0x10b   :  { %v486_v2 = vadd.f32 %v837_v59, %v797_v56  ;;  %v840_v4 = vadd.f32 %v839_v1, %v838_v60  ;;  %vm615_vm3 = vcmp.ge.f32.partialorder %v607_v63, 0.0  ;;  %v623_v9 = vmul.f32 0.2, %v607_v63 }
 0x10c   :  { %v630_v13 = vsel %vm614_vm2, %v606_v52, %v622_v62 }
 0x10d   :  { %v552_v11 = vmul.f32 %v1126_v6, %v486_v2  ;;  %v489_v12 = vadd.f32 %v840_v4, %v800_v0  ;;  %v631_v14 = vsel %vm615_vm3, %v607_v63, %v623_v9 }
 0x10e   :  { %v801_v15 = vpop.f32.mrb[12].mxu0  ;;  %v752_v16 = vpack.c.bf16 %v631_v14, %v630_v13  ;;  %v597_v35 = vpop.permute.xlu0 %596 }
 0x10f   :  { %v608_v17 = vadd.f32 %v587_v3, %v552_v11  ;;  %v553_v18 = vmul.f32 %v1124_v5, %v489_v12  ;;  %v841_v19 = vpop.f32.mrb[12].mxu1  ;;  %v802_v20 = vpop.f32.mrb[13].mxu0 }
 0x110   :  { %v803_v21 = vadd.f32 %v802_v20, %v801_v15  ;;  %v842_v22 = vpop.f32.mrb[13].mxu1  ;;  %v804_v23 = vpop.f32.mrb[14].mxu0  ;;  %764 = vst [vmem:[%s1152_s4 + $0x8] sm:$0xff] %v752_v16  }
 0x111   :  { %v624_v24 = vmul.f32 0.2, %v608_v17  ;;  %v609_v6 = vadd.f32 %v592_v10, %v553_v18  ;;  %v843_v25 = vadd.f32 %v842_v22, %v841_v19  ;;  %v844_v26 = vpop.f32.mrb[14].mxu1  ;;  %v805_v27 = vpop.f32.mrb[15].mxu0  ;;  %vm616_vm4 = vcmp.ge.f32.partialorder %v608_v17, 0.0 }
 0x112   :  { %v806_v28 = vadd.f32 %v805_v27, %v804_v23  ;;  %v845_v29 = vpop.f32.mrb[15].mxu1 }
 0x113   :  { %vm617_vm5 = vcmp.ge.f32.partialorder %v609_v6, 0.0  ;;  %v625_v30 = vmul.f32 0.2, %v609_v6  ;;  %v494_v5 = vadd.f32 %v843_v25, %v803_v21  ;;  %v846_v31 = vadd.f32 %v845_v29, %v844_v26 }
 0x114   :  { %v632_v32 = vsel %vm616_vm4, %v608_v17, %v624_v24 }
 0x115   :  { %v633_v33 = vsel %vm617_vm5, %v609_v6, %v625_v30  ;;  %v554_v34 = vmul.f32 %v1130_v8, %v494_v5  ;;  %v497_v37 = vadd.f32 %v846_v31, %v806_v28 }
 0x116   :  { %v757_v36 = vpack.c.bf16 %v633_v33, %v632_v32 }
 0x117   :  { %v610_v38 = vadd.f32 %v597_v35, %v554_v34  ;;  %v555_v39 = vmul.f32 %v1128_v7, %v497_v37 }
 0x118   :  { %765 = vst [vmem:[%s1152_s4 + $0x10] sm:$0xff] %v757_v36  }
 0x119   :  { %v626_v41 = vmul.f32 0.2, %v610_v38  ;;  %v611_v42 = vadd.f32 %v602_v40, %v555_v39  ;;  %vm618_vm6 = vcmp.ge.f32.partialorder %v610_v38, 0.0 }
 0x11b   :  { %vm619_vm7 = vcmp.ge.f32.partialorder %v611_v42, 0.0  ;;  %v627_v43 = vmul.f32 0.2, %v611_v42  ;;  %v634_v44 = vsel %vm618_vm6, %v610_v38, %v626_v41 }
 0x11d   :  { %v635_v45 = vsel %vm619_vm7, %v611_v42, %v627_v43 }
 0x11e   :  { %v762_v46 = vpack.c.bf16 %v635_v45, %v634_v44 }
 0x120   :  { %766 = vst [vmem:[%s1152_s4 + $0x18] sm:$0xff] %v762_v46  }

// kernel: discriminator_forward.12
= control target key start
LH: loop header
LB: loop body
LE: loop exit
PB: predicated region body
PF: predicated region fallthrough
CT: control target
= control target key end

     0   :  { %v1524_v1 = vmov 0   ;;  %s1940_s1 = inlined_call_operand.vmem [shape: bf16[1024,128], index: 1, kind: input, shape index: {}]   ;;  %s1941_s0 = inlined_call_operand.vmem [shape: bf16[64,1024], index: 0, kind: input, shape index: {}]   ;;  %s1942_s2 = inlined_call_operand.vmem [shape: f32[64,1], index: 2, kind: input, shape index: {}]   ;;  %s1943_s3 = inlined_call_operand.vmem [shape: f32[64,1], index: 3, kind: input, shape index: {}]   ;;  %s1944_s4 = inlined_call_operand.vmem [shape: bf16[64,128], index: 4, kind: output, shape index: {}]  }
   0x1   :  { %v1460_v0 = vld [vmem:[%s1940_s1 + $0x40] sm:$0xff]   ;;  %1459 = vset.pattern.permute.xlu1 %v1524_v1  ;;  %1458 = vset.pattern.permute.xlu0 %v1524_v1  ;;  %v1464_v5 = vld [vmem:[%s1940_s1 + $0x48] sm:$0xff]   ;;  %v1468_v9 = vld [vmem:[%s1940_s1 + $0x50] sm:$0xff]  }
   0x2   :  { %v1461_v2 = vld [vmem:[%s1940_s1 + $0xc0] sm:$0xff]   ;;  %1297 = vmatprep.subr.bf16.mxu0 %v1460_v0  ;;  %v1465_v6 = vld [vmem:[%s1940_s1 + $0xc8] sm:$0xff]   ;;  %v1469_v10 = vld [vmem:[%s1940_s1 + $0xd0] sm:$0xff]  }
   0x3   :  { %v1462_v3 = vld [vmem:[%s1940_s1] sm:$0xff]   ;;  %1337 = vmatprep.subr.bf16.mxu1 %v1461_v2  ;;  %v1466_v7 = vld [vmem:[%s1940_s1 + $0x8] sm:$0xff]   ;;  %v1470_v11 = vld [vmem:[%s1940_s1 + $0x10] sm:$0xff]  }
   0x4   :  { %v1463_v4 = vld [vmem:[%s1940_s1 + $0x80] sm:$0xff]   ;;  %1298 = vmatpush3.bf16.msra.mxu0 %v1462_v3  ;;  %v1467_v8 = vld [vmem:[%s1940_s1 + $0x88] sm:$0xff]   ;;  %v1471_v12 = vld [vmem:[%s1940_s1 + $0x90] sm:$0xff]  }
   0x5   :  { %1338 = vmatpush3.bf16.msra.mxu1 %v1463_v4  ;;  %1299 = vmatprep.subr.bf16.mxu0 %v1464_v5  ;;  %v1472_v13 = vld [vmem:[%s1940_s1 + $0x58] sm:$0xff]   ;;  %v1476_v17 = vld [vmem:[%s1940_s1 + $0x60] sm:$0xff]   ;;  %v1480_v21 = vld [vmem:[%s1940_s1 + $0x68] sm:$0xff]  }
   0x6   :  { %1339 = vmatprep.subr.bf16.mxu1 %v1465_v6  ;;  %v1473_v14 = vld [vmem:[%s1940_s1 + $0xd8] sm:$0xff]   ;;  %v1477_v18 = vld [vmem:[%s1940_s1 + $0xe0] sm:$0xff]   ;;  %v1481_v22 = vld [vmem:[%s1940_s1 + $0xe8] sm:$0xff]  }
   0x7   :  { %v1474_v15 = vld [vmem:[%s1940_s1 + $0x18] sm:$0xff]   ;;  %v1478_v19 = vld [vmem:[%s1940_s1 + $0x20] sm:$0xff]   ;;  %v1482_v23 = vld [vmem:[%s1940_s1 + $0x28] sm:$0xff]  }
   0x8   :  { %1300 = vmatpush3.bf16.msra.mxu0 %v1466_v7  ;;  %v1475_v16 = vld [vmem:[%s1940_s1 + $0x98] sm:$0xff]   ;;  %v1479_v20 = vld [vmem:[%s1940_s1 + $0xa0] sm:$0xff]   ;;  %v1483_v24 = vld [vmem:[%s1940_s1 + $0xa8] sm:$0xff]  }
   0x9   :  { %1340 = vmatpush3.bf16.msra.mxu1 %v1467_v8  ;;  %1301 = vmatprep.subr.bf16.mxu0 %v1468_v9  ;;  %v1484_v25 = vld [vmem:[%s1940_s1 + $0x70] sm:$0xff]   ;;  %v1488_v29 = vld [vmem:[%s1940_s1 + $0x78] sm:$0xff]   ;;  %v18_v33 = vld [vmem:[%s1941_s0] sm:$0xff] }
   0xa   :  { %1341 = vmatprep.subr.bf16.mxu1 %v1469_v10  ;;  %v1485_v26 = vld [vmem:[%s1940_s1 + $0xf0] sm:$0xff]   ;;  %v1489_v30 = vld [vmem:[%s1940_s1 + $0xf8] sm:$0xff]   ;;  %v22_v34 = vld [vmem:[%s1941_s0 + $0x20] sm:$0xff] }
   0xb   :  { %v1486_v27 = vld [vmem:[%s1940_s1 + $0x30] sm:$0xff]   ;;  %v1490_v31 = vld [vmem:[%s1940_s1 + $0x38] sm:$0xff]   ;;  %v19_v35 = vld [vmem:[%s1941_s0 + $0x8] sm:$0xff]  ;;  %v1162_v36 = vcombine.low %v18_v33, %v22_v34  ;;  %v1163_v37 = vcombine.high %v18_v33, %v22_v34 }
   0xc   :  { %1302 = vmatpush3.bf16.msra.mxu0 %v1470_v11  ;;  %v1487_v28 = vld [vmem:[%s1940_s1 + $0xb0] sm:$0xff]   ;;  %v1491_v32 = vld [vmem:[%s1940_s1 + $0xb8] sm:$0xff]   ;;  %v23_v38 = vld [vmem:[%s1941_s0 + $0x28] sm:$0xff] }
   0xd   :  { %1342 = vmatpush3.bf16.msra.mxu1 %v1471_v12  ;;  %1303 = vmatprep.subr.bf16.mxu0 %v1472_v13  ;;  %v1164_v39 = vcombine.low %v19_v35, %v23_v38  ;;  %v1165_v40 = vcombine.high %v19_v35, %v23_v38  ;;  %v1492_v41 = vld [vmem:[%s1940_s1 + $0x140] sm:$0xff]   ;;  %v1496_v45 = vld [vmem:[%s1940_s1 + $0x148] sm:$0xff]   ;;  %v1500_v57 = vld [vmem:[%s1940_s1 + $0x150] sm:$0xff]  }
   0xe   :  { %1343 = vmatprep.subr.bf16.mxu1 %v1473_v14  ;;  %754 = vmatprep.mubr.bf16.mxu0 %v1163_v37  ;;  %v1493_v42 = vld [vmem:[%s1940_s1 + $0x1c0] sm:$0xff]   ;;  %v1497_v46 = vld [vmem:[%s1940_s1 + $0x1c8] sm:$0xff]   ;;  %v1501_v58 = vld [vmem:[%s1940_s1 + $0x1d0] sm:$0xff]  }
   0xf   :  { %819 = vmatprep.mubr.bf16.mxu1 %v1165_v40  ;;  %v1494_v43 = vld [vmem:[%s1940_s1 + $0x100] sm:$0xff]   ;;  %v1498_v47 = vld [vmem:[%s1940_s1 + $0x108] sm:$0xff]   ;;  %v1502_v59 = vld [vmem:[%s1940_s1 + $0x110] sm:$0xff]  }
  0x10   :  { %1304 = vmatpush3.bf16.msra.mxu0 %v1474_v15  ;;  %v1495_v44 = vld [vmem:[%s1940_s1 + $0x180] sm:$0xff]   ;;  %v1499_v48 = vld [vmem:[%s1940_s1 + $0x188] sm:$0xff]   ;;  %v1503_v60 = vld [vmem:[%s1940_s1 + $0x190] sm:$0xff]  }
  0x11   :  { %1344 = vmatpush3.bf16.msra.mxu1 %v1475_v16  ;;  %1305 = vmatprep.subr.bf16.mxu0 %v1476_v17  ;;  %v26_v49 = vld [vmem:[%s1941_s0 + $0x40] sm:$0xff]  ;;  %v27_v52 = vld [vmem:[%s1941_s0 + $0x48] sm:$0xff]  ;;  %v1504_v61 = vld [vmem:[%s1940_s1 + $0x158] sm:$0xff]  }
  0x12   :  { %1345 = vmatprep.subr.bf16.mxu1 %v1477_v18  ;;  %v30_v50 = vld [vmem:[%s1941_s0 + $0x60] sm:$0xff]  ;;  %v31_v53 = vld [vmem:[%s1941_s0 + $0x68] sm:$0xff]  ;;  %v1505_v62 = vld [vmem:[%s1940_s1 + $0x1d8] sm:$0xff]  }
  0x13   :  { %v1171_v51 = vcombine.high %v26_v49, %v30_v50  ;;  %v1170_v54 = vcombine.low %v26_v49, %v30_v50  ;;  %v1173_v55 = vcombine.high %v27_v52, %v31_v53  ;;  %v1172_v56 = vcombine.low %v27_v52, %v31_v53  ;;  %v1506_v63 = vld [vmem:[%s1940_s1 + $0x118] sm:$0xff]   ;;  %v34_v1 = vld [vmem:[%s1941_s0 + $0x80] sm:$0xff]  ;;  %v35_v3 = vld [vmem:[%s1941_s0 + $0x88] sm:$0xff] }
  0x14   :  { %1306 = vmatpush3.bf16.msra.mxu0 %v1478_v19  ;;  %v1507_v0 = vld [vmem:[%s1940_s1 + $0x198] sm:$0xff]   ;;  %v38_v2 = vld [vmem:[%s1941_s0 + $0xa0] sm:$0xff]  ;;  %v39_v4 = vld [vmem:[%s1941_s0 + $0xa8] sm:$0xff] }
  0x15   :  { %1346 = vmatpush3.bf16.msra.mxu1 %v1479_v20  ;;  %1307 = vmatprep.subr.bf16.mxu0 %v1480_v21  ;;  %v1179_v5 = vcombine.high %v34_v1, %v38_v2  ;;  %v1181_v6 = vcombine.high %v35_v3, %v39_v4  ;;  %v1178_v7 = vcombine.low %v34_v1, %v38_v2  ;;  %v1508_v9 = vld [vmem:[%s1940_s1 + $0x160] sm:$0xff]   ;;  %v1512_v13 = vld [vmem:[%s1940_s1 + $0x168] sm:$0xff]   ;;  %v20_v33 = vld [vmem:[%s1941_s0 + $0x10] sm:$0xff] }
  0x16   :  { %1347 = vmatprep.subr.bf16.mxu1 %v1481_v22  ;;  %v1180_v8 = vcombine.low %v35_v3, %v39_v4  ;;  %v1509_v10 = vld [vmem:[%s1940_s1 + $0x1e0] sm:$0xff]   ;;  %v1513_v14 = vld [vmem:[%s1940_s1 + $0x1e8] sm:$0xff]   ;;  %v24_v34 = vld [vmem:[%s1941_s0 + $0x30] sm:$0xff] }
  0x17   :  { %v1510_v11 = vld [vmem:[%s1940_s1 + $0x120] sm:$0xff]   ;;  %v1514_v15 = vld [vmem:[%s1940_s1 + $0x128] sm:$0xff]   ;;  %v1166_v35 = vcombine.low %v20_v33, %v24_v34  ;;  %v21_v37 = vld [vmem:[%s1941_s0 + $0x18] sm:$0xff] }
  0x18   :  { %1308 = vmatpush3.bf16.msra.mxu0 %v1482_v23  ;;  %v1511_v12 = vld [vmem:[%s1940_s1 + $0x1a0] sm:$0xff]   ;;  %v1515_v16 = vld [vmem:[%s1940_s1 + $0x1a8] sm:$0xff]   ;;  %v25_v38 = vld [vmem:[%s1941_s0 + $0x38] sm:$0xff] }
  0x19   :  { %1348 = vmatpush3.bf16.msra.mxu1 %v1483_v24  ;;  %1309 = vmatprep.subr.bf16.mxu0 %v1484_v25  ;;  %v42_v17 = vld [vmem:[%s1941_s0 + $0xc0] sm:$0xff]  ;;  %v43_v19 = vld [vmem:[%s1941_s0 + $0xc8] sm:$0xff]  ;;  %v1516_v25 = vld [vmem:[%s1940_s1 + $0x170] sm:$0xff]   ;;  %v1168_v40 = vcombine.low %v21_v37, %v25_v38 }
  0x1a   :  { %1349 = vmatprep.subr.bf16.mxu1 %v1485_v26  ;;  %v46_v18 = vld [vmem:[%s1941_s0 + $0xe0] sm:$0xff]  ;;  %v47_v21 = vld [vmem:[%s1941_s0 + $0xe8] sm:$0xff]  ;;  %v1517_v26 = vld [vmem:[%s1940_s1 + $0x1f0] sm:$0xff]  }
  0x1b   :  { %v1187_v20 = vcombine.high %v42_v17, %v46_v18  ;;  %v1186_v22 = vcombine.low %v42_v17, %v46_v18  ;;  %v1189_v23 = vcombine.high %v43_v19, %v47_v21  ;;  %v1188_v24 = vcombine.low %v43_v19, %v47_v21  ;;  %v40_v49 = vld [vmem:[%s1941_s0 + $0xb0] sm:$0xff]  ;;  %v982_v50 = vld [vmem:[%s1942_s2] sm:$0xff]  ;;  %v41_v52 = vld [vmem:[%s1941_s0 + $0xb8] sm:$0xff] }
  0x1c   :  { %1310 = vmatpush3.bf16.msra.mxu0 %v1486_v27  ;;  %v1518_v27 = vld [vmem:[%s1940_s1 + $0x130] sm:$0xff]   ;;  %992 = vperm.xlu0 %1458, %v982_v50   ;;  %v985_v53 = vld [vmem:[%s1942_s2 + $0x18] sm:$0xff] }
  0x1d   :  { %1350 = vmatpush3.bf16.msra.mxu1 %v1487_v28  ;;  %1311 = vmatprep.subr.bf16.mxu0 %v1488_v29  ;;  %v1519_v28 = vld [vmem:[%s1940_s1 + $0x1b0] sm:$0xff]   ;;  %v1520_v29 = vld [vmem:[%s1940_s1 + $0x178] sm:$0xff]  }
  0x1e   :  { %1351 = vmatprep.subr.bf16.mxu1 %v1489_v30  ;;  %v1521_v30 = vld [vmem:[%s1940_s1 + $0x1f8] sm:$0xff]   ;;  %v988_v3 = vld [vmem:[%s1942_s2 + $0x30] sm:$0xff] }
  0x1f   :  { %v989_v1 = vld [vmem:[%s1942_s2 + $0x38] sm:$0xff] }
  0x20   :  { %1312 = vmatpush3.bf16.msra.mxu0 %v1490_v31  ;;  %v1522_v31 = vld [vmem:[%s1940_s1 + $0x138] sm:$0xff]  }
  0x21   :  { %1352 = vmatpush3.bf16.msra.mxu1 %v1491_v32  ;;  %1377 = vmatprep.subr.bf16.mxu0 %v1492_v41  ;;  %v1523_v32 = vld [vmem:[%s1940_s1 + $0x1b8] sm:$0xff]   ;;  %v1169_v41 = vcombine.high %v21_v37, %v25_v38 }
  0x22   :  { %1417 = vmatprep.subr.bf16.mxu1 %v1493_v42  ;;  %v32_v42 = vld [vmem:[%s1941_s0 + $0x70] sm:$0xff] }
  0x23   :  { %755 = vmatmul.mubr.bf16.vlgmr.msra.gmra.mrb[0].mxu0 %v1162_v36  ;;  %v1167_v36 = vcombine.high %v20_v33, %v24_v34 }
  0x24   :  { %820 = vmatmul.mubr.bf16.vlgmr.msra.gmra.mrb[0].mxu1 %v1164_v39  ;;  %1378 = vmatpush3.bf16.msra.mxu0 %v1494_v43  ;;  %v28_v39 = vld [vmem:[%s1941_s0 + $0x50] sm:$0xff]  ;;  %v29_v43 = vld [vmem:[%s1941_s0 + $0x58] sm:$0xff] }
  0x25   :  { %1418 = vmatpush3.bf16.msra.mxu1 %v1495_v44  ;;  %1379 = vmatprep.subr.bf16.mxu0 %v1496_v45  ;;  %v33_v44 = vld [vmem:[%s1941_s0 + $0x78] sm:$0xff]  ;;  %v1175_v45 = vcombine.high %v28_v39, %v32_v42 }
  0x26   :  { %1419 = vmatprep.subr.bf16.mxu1 %v1497_v46  ;;  %762 = vmatprep.mubr.bf16.mxu0 %v1171_v51  ;;  %v1177_v46 = vcombine.high %v29_v43, %v33_v44  ;;  %v37_v51 = vld [vmem:[%s1941_s0 + $0x98] sm:$0xff] }
  0x27   :  { %827 = vmatprep.mubr.bf16.mxu1 %v1173_v55  ;;  %v983_v55 = vld [vmem:[%s1942_s2 + $0x8] sm:$0xff]  ;;  %v1184_v4 = vcombine.low %v37_v51, %v41_v52 }
  0x28   :  { %1380 = vmatpush3.bf16.msra.mxu0 %v1498_v47  ;;  %v984_v47 = vld [vmem:[%s1942_s2 + $0x10] sm:$0xff]  ;;  %997 = vperm.xlu0 %1458, %v983_v55  }
  0x29   :  { %1420 = vmatpush3.bf16.msra.mxu1 %v1499_v48  ;;  %1381 = vmatprep.subr.bf16.mxu0 %v1500_v57  ;;  %v36_v48 = vld [vmem:[%s1941_s0 + $0x90] sm:$0xff] }
  0x2a   :  { %1421 = vmatprep.subr.bf16.mxu1 %v1501_v58  ;;  %1002 = vperm.xlu1 %1459, %v984_v47   ;;  %v1183_v57 = vcombine.high %v36_v48, %v40_v49  ;;  %v1185_v58 = vcombine.high %v37_v51, %v41_v52  ;;  %v1182_v2 = vcombine.low %v36_v48, %v40_v49 }
  0x2b   :  { %763 = vmatmul.mubr.bf16.gmra.mrb[4].mxu0 %v1170_v54  ;;  %v1174_v54 = vcombine.low %v28_v39, %v32_v42 }
  0x2c   :  { %828 = vmatmul.mubr.bf16.gmra.mrb[4].mxu1 %v1172_v56  ;;  %1382 = vmatpush3.bf16.msra.mxu0 %v1502_v59  ;;  %v1176_v56 = vcombine.low %v29_v43, %v33_v44  ;;  %v987_v59 = vld [vmem:[%s1942_s2 + $0x28] sm:$0xff] }
  0x2d   :  { %1422 = vmatpush3.bf16.msra.mxu1 %v1503_v60  ;;  %1383 = vmatprep.subr.bf16.mxu0 %v1504_v61  ;;  %v986_v60 = vld [vmem:[%s1942_s2 + $0x20] sm:$0xff]  ;;  %v44_v61 = vld [vmem:[%s1941_s0 + $0xd0] sm:$0xff] }
  0x2e   :  { %1423 = vmatprep.subr.bf16.mxu1 %v1505_v62  ;;  %770 = vmatprep.mubr.bf16.mxu0 %v1179_v5  ;;  %v48_v62 = vld [vmem:[%s1941_s0 + $0xf0] sm:$0xff] }
  0x2f   :  { %835 = vmatprep.mubr.bf16.mxu1 %v1181_v6  ;;  %1007 = vperm.xlu1 %1459, %v985_v53   ;;  %v1191_v5 = vcombine.high %v44_v61, %v48_v62 }
  0x30   :  { %1384 = vmatpush3.bf16.msra.mxu0 %v1506_v63  ;;  %v45_v63 = vld [vmem:[%s1941_s0 + $0xd8] sm:$0xff]  ;;  %1012 = vperm.xlu0 %1458, %v986_v60  }
  0x31   :  { %1424 = vmatpush3.bf16.msra.mxu1 %v1507_v0  ;;  %1385 = vmatprep.subr.bf16.mxu0 %v1508_v9  ;;  %v49_v0 = vld [vmem:[%s1941_s0 + $0xf8] sm:$0xff] }
  0x32   :  { %1425 = vmatprep.subr.bf16.mxu1 %v1509_v10  ;;  %v1193_v6 = vcombine.high %v45_v63, %v49_v0  ;;  %v1041_v9 = vld [vmem:[%s1943_s3 + $0x18] sm:$0xff]  ;;  %v1190_v10 = vcombine.low %v44_v61, %v48_v62 }
  0x33   :  { %771 = vmatmul.mubr.bf16.gmra.mrb[8].mxu0 %v1178_v7  ;;  %1017 = vperm.xlu1 %1459, %v987_v59   ;;  %v1039_v7 = vld [vmem:[%s1943_s3 + $0x8] sm:$0xff] }
  0x34   :  { %836 = vmatmul.mubr.bf16.gmra.mrb[8].mxu1 %v1180_v8  ;;  %1386 = vmatpush3.bf16.msra.mxu0 %v1510_v11  ;;  %v1038_v8 = vld [vmem:[%s1943_s3] sm:$0xff]  ;;  %v1040_v11 = vld [vmem:[%s1943_s3 + $0x10] sm:$0xff] }
  0x35   :  { %1426 = vmatpush3.bf16.msra.mxu1 %v1511_v12  ;;  %1387 = vmatprep.subr.bf16.mxu0 %v1512_v13  ;;  %v1192_v12 = vcombine.low %v45_v63, %v49_v0  ;;  %v1043_v13 = vld [vmem:[%s1943_s3 + $0x28] sm:$0xff] }
  0x36   :  { %1427 = vmatprep.subr.bf16.mxu1 %v1513_v14  ;;  %778 = vmatprep.mubr.bf16.mxu0 %v1187_v20  ;;  %v1042_v14 = vld [vmem:[%s1943_s3 + $0x20] sm:$0xff] }
  0x37   :  { %843 = vmatprep.mubr.bf16.mxu1 %v1189_v23  ;;  %1027 = vperm.xlu1 %1459, %v989_v1  }
  0x38   :  { %1388 = vmatpush3.bf16.msra.mxu0 %v1514_v15  ;;  %1022 = vperm.xlu0 %1458, %v988_v3   ;;  %v1045_v15 = vld [vmem:[%s1943_s3 + $0x38] sm:$0xff] }
  0x39   :  { %1428 = vmatpush3.bf16.msra.mxu1 %v1515_v16  ;;  %1389 = vmatprep.subr.bf16.mxu0 %v1516_v25  ;;  %v1044_v16 = vld [vmem:[%s1943_s3 + $0x30] sm:$0xff] }
  0x3a   :  { %1429 = vmatprep.subr.bf16.mxu1 %v1517_v26 }
  0x3b   :  { %779 = vmatmul.mubr.bf16.gmra.mrb[12].mxu0 %v1186_v22  ;;  %1053 = vperm.xlu1 %1459, %v1039_v7  }
  0x3c   :  { %844 = vmatmul.mubr.bf16.gmra.mrb[12].mxu1 %v1188_v24  ;;  %1390 = vmatpush3.bf16.msra.mxu0 %v1518_v27 }
  0x3d   :  { %1430 = vmatpush3.bf16.msra.mxu1 %v1519_v28  ;;  %1391 = vmatprep.subr.bf16.mxu0 %v1520_v29 }
  0x3e   :  { %1431 = vmatprep.subr.bf16.mxu1 %v1521_v30  ;;  %884 = vmatprep.mubr.bf16.mxu0 %v1167_v36 }
  0x3f   :  { %949 = vmatprep.mubr.bf16.mxu1 %v1169_v41  ;;  %1048 = vperm.xlu0 %1458, %v1038_v8  }
  0x40   :  { %1392 = vmatpush3.bf16.msra.mxu0 %v1522_v31  ;;  %1063 = vperm.xlu1 %1459, %v1041_v9  }
  0x41   :  { %1432 = vmatpush3.bf16.msra.mxu1 %v1523_v32 }
  0x43   :  { %885 = vmatmul.mubr.bf16.vlgmr.msra.gmra.mrb[16].mxu0 %v1166_v35  ;;  %1058 = vperm.xlu0 %1458, %v1040_v11  }
  0x44   :  { %950 = vmatmul.mubr.bf16.vlgmr.msra.gmra.mrb[16].mxu1 %v1168_v40  ;;  %892 = vmatprep.mubr.bf16.mxu0 %v1175_v45 }
  0x45   :  { %957 = vmatprep.mubr.bf16.mxu1 %v1177_v46  ;;  %1073 = vperm.xlu1 %1459, %v1043_v13  }
  0x47   :  { %1068 = vperm.xlu0 %1458, %v1042_v14  }
  0x49   :  { %1083 = vperm.xlu1 %1459, %v1045_v15  }
  0x4b   :  { %893 = vmatmul.mubr.bf16.gmra.mrb[20].mxu0 %v1174_v54  ;;  %1078 = vperm.xlu0 %1458, %v1044_v16  }
  0x4c   :  { %958 = vmatmul.mubr.bf16.gmra.mrb[20].mxu1 %v1176_v56  ;;  %900 = vmatprep.mubr.bf16.mxu0 %v1183_v57 }
  0x4d   :  { %965 = vmatprep.mubr.bf16.mxu1 %v1185_v58 }
  0x53   :  { %901 = vmatmul.mubr.bf16.gmra.mrb[24].mxu0 %v1182_v2 }
  0x54   :  { %966 = vmatmul.mubr.bf16.gmra.mrb[24].mxu1 %v1184_v4  ;;  %908 = vmatprep.mubr.bf16.mxu0 %v1191_v5 }
  0x55   :  { %973 = vmatprep.mubr.bf16.mxu1 %v1193_v6 }
  0x5b   :  { %909 = vmatmul.mubr.bf16.gmra.mrb[28].mxu0 %v1190_v10 }
  0x5c   :  { %974 = vmatmul.mubr.bf16.gmra.mrb[28].mxu1 %v1192_v12 }
  0x9b   :  { %v1890_v33 = vpop.permute.xlu0 %992 }
  0xa7   :  { %v998_v48 = vpop.permute.xlu0 %997 }
  0xa9   :  { %v1888_v31 = vpop.permute.xlu1 %1002 }
  0xae   :  { %v1896_v47 = vpop.permute.xlu1 %1007 }
  0xaf   :  { %v1904_v0 = vpop.permute.xlu0 %1012 }
  0xb2   :  { %v1902_v63 = vpop.permute.xlu1 %1017 }
  0xb6   :  { %v1910_v15 = vpop.permute.xlu1 %1027 }
  0xb7   :  { %v1912_v16 = vpop.permute.xlu0 %1022 }
  0xf6   :  { %v1313_v17 = vpop.f32.mrb[0].mxu0 }
  0xf7   :  { %v1353_v18 = vpop.f32.mrb[0].mxu1  ;;  %v1314_v19 = vpop.f32.mrb[1].mxu0 }
  0xf8   :  { %v1315_v20 = vadd.f32 %v1314_v19, %v1313_v17  ;;  %v1354_v21 = vpop.f32.mrb[1].mxu1  ;;  %v1316_v22 = vpop.f32.mrb[2].mxu0 }
  0xf9   :  { %v1355_v23 = vadd.f32 %v1354_v21, %v1353_v18  ;;  %v1356_v24 = vpop.f32.mrb[2].mxu1  ;;  %v1317_v25 = vpop.f32.mrb[3].mxu0 }
  0xfa   :  { %v1318_v26 = vadd.f32 %v1317_v25, %v1316_v22  ;;  %v1357_v27 = vpop.f32.mrb[3].mxu1 }
  0xfb   :  { %v822_v28 = vadd.f32 %v1355_v23, %v1315_v20  ;;  %v1358_v29 = vadd.f32 %v1357_v27, %v1356_v24 }
  0xfd   :  { %v1886_v30 = vadd.f32 %v1358_v29, %v1318_v26 }
  0xfe   :  { %v1319_v32 = vpop.f32.mrb[4].mxu0 }
  0xff   :  { %v1359_v34 = vpop.f32.mrb[4].mxu1  ;;  %v1320_v35 = vpop.f32.mrb[5].mxu0 }
 0x100   :  { %v1321_v36 = vadd.f32 %v1320_v35, %v1319_v32  ;;  %v1360_v37 = vpop.f32.mrb[5].mxu1  ;;  %v1322_v38 = vpop.f32.mrb[6].mxu0 }
 0x101   :  { %v1361_v39 = vadd.f32 %v1360_v37, %v1359_v34  ;;  %v1362_v40 = vpop.f32.mrb[6].mxu1  ;;  %v1323_v41 = vpop.f32.mrb[7].mxu0 }
 0x102   :  { %v1324_v42 = vadd.f32 %v1323_v41, %v1322_v38  ;;  %v1363_v43 = vpop.f32.mrb[7].mxu1  ;;  %v1049_v37 = vpop.permute.xlu0 %1048 }
 0x103   :  { %v1892_v44 = vadd.f32 %v1361_v39, %v1321_v36  ;;  %v1364_v45 = vadd.f32 %v1363_v43, %v1362_v40  ;;  %v1054_v36 = vpop.permute.xlu1 %1053 }
 0x105   :  { %v1894_v46 = vadd.f32 %v1364_v45, %v1324_v42 }
 0x106   :  { %v1325_v49 = vpop.f32.mrb[8].mxu0 }
 0x107   :  { %v1365_v50 = vpop.f32.mrb[8].mxu1  ;;  %v1326_v51 = vpop.f32.mrb[9].mxu0 }
 0x108   :  { %v1366_v52 = vpop.f32.mrb[9].mxu1  ;;  %v1327_v53 = vadd.f32 %v1326_v51, %v1325_v49  ;;  %v1328_v55 = vpop.f32.mrb[10].mxu0 }
 0x109   :  { %v1367_v54 = vadd.f32 %v1366_v52, %v1365_v50  ;;  %v1368_v56 = vpop.f32.mrb[10].mxu1  ;;  %v1329_v57 = vpop.f32.mrb[11].mxu0 }
 0x10a   :  { %v1369_v58 = vpop.f32.mrb[11].mxu1  ;;  %v1330_v60 = vadd.f32 %v1329_v57, %v1328_v55 }
 0x10b   :  { %v1898_v59 = vadd.f32 %v1367_v54, %v1327_v53  ;;  %v1370_v61 = vadd.f32 %v1369_v58, %v1368_v56 }
 0x10d   :  { %v1900_v62 = vadd.f32 %v1370_v61, %v1330_v60  ;;  %v1064_v61 = vpop.permute.xlu1 %1063 }
 0x10e   :  { %v1331_v1 = vpop.f32.mrb[12].mxu0 }
 0x10f   :  { %v1371_v2 = vpop.f32.mrb[12].mxu1  ;;  %v1332_v3 = vpop.f32.mrb[13].mxu0 }
 0x110   :  { %v1333_v4 = vadd.f32 %v1332_v3, %v1331_v1  ;;  %v1372_v5 = vpop.f32.mrb[13].mxu1  ;;  %v1334_v6 = vpop.f32.mrb[14].mxu0 }
 0x111   :  { %v1373_v7 = vadd.f32 %v1372_v5, %v1371_v2  ;;  %v1374_v8 = vpop.f32.mrb[14].mxu1  ;;  %v1335_v9 = vpop.f32.mrb[15].mxu0 }
 0x112   :  { %v1336_v10 = vadd.f32 %v1335_v9, %v1334_v6  ;;  %v1375_v11 = vpop.f32.mrb[15].mxu1  ;;  %v1059_v1 = vpop.permute.xlu0 %1058 }
 0x113   :  { %v1906_v12 = vadd.f32 %v1373_v7, %v1333_v4  ;;  %v1376_v13 = vadd.f32 %v1375_v11, %v1374_v8 }
 0x115   :  { %v1908_v14 = vadd.f32 %v1376_v13, %v1336_v10 }
 0x116   :  { %v1393_v17 = vpop.f32.mrb[16].mxu0 }
 0x117   :  { %v1433_v18 = vpop.f32.mrb[16].mxu1  ;;  %v1394_v19 = vpop.f32.mrb[17].mxu0 }
 0x118   :  { %v1395_v20 = vadd.f32 %v1394_v19, %v1393_v17  ;;  %v1434_v21 = vpop.f32.mrb[17].mxu1  ;;  %v1396_v22 = vpop.f32.mrb[18].mxu0 }
 0x119   :  { %v1435_v23 = vadd.f32 %v1434_v21, %v1433_v18  ;;  %v1436_v24 = vpop.f32.mrb[18].mxu1  ;;  %v1397_v25 = vpop.f32.mrb[19].mxu0 }
 0x11a   :  { %v887_v26 = vadd.f32 %v1395_v20, %v822_v28  ;;  %v1398_v27 = vadd.f32 %v1397_v25, %v1396_v22  ;;  %v1437_v29 = vpop.f32.mrb[19].mxu1 }
 0x11b   :  { %v1438_v32 = vadd.f32 %v1437_v29, %v1436_v24 }
 0x11c   :  { %v952_v34 = vadd.f32 %v1435_v23, %v887_v26  ;;  %v890_v35 = vadd.f32 %v1398_v27, %v1886_v30  ;;  %v1074_v27 = vpop.permute.xlu1 %1073 }
 0x11e   :  { %v1030_v38 = vmul.f32 %v1890_v33, %v952_v34  ;;  %v955_v39 = vadd.f32 %v1438_v32, %v890_v35  ;;  %v1399_v40 = vpop.f32.mrb[20].mxu0  ;;  %v1069_v32 = vpop.permute.xlu0 %1068 }
 0x11f   :  { %v1439_v41 = vpop.f32.mrb[20].mxu1  ;;  %v1400_v42 = vpop.f32.mrb[21].mxu0 }
 0x120   :  { %v1086_v43 = vadd.f32 %v1049_v37, %v1030_v38  ;;  %v1031_v45 = vmul.f32 %v998_v48, %v955_v39  ;;  %v1401_v49 = vadd.f32 %v1400_v42, %v1399_v40  ;;  %v1440_v50 = vpop.f32.mrb[21].mxu1  ;;  %v1402_v51 = vpop.f32.mrb[22].mxu0 }
 0x121   :  { %v1441_v28 = vadd.f32 %v1440_v50, %v1439_v41  ;;  %v1442_v52 = vpop.f32.mrb[22].mxu1  ;;  %v1403_v53 = vpop.f32.mrb[23].mxu0 }
 0x122   :  { %v1102_v54 = vmul.f32 0.2, %v1086_v43  ;;  %v1087_v55 = vadd.f32 %v1054_v36, %v1031_v45  ;;  %v895_v30 = vadd.f32 %v1401_v49, %v1892_v44  ;;  %v1443_v56 = vpop.f32.mrb[23].mxu1  ;;  %vm1094_vm0 = vcmp.ge.f32.partialorder %v1086_v43, 0.0 }
 0x123   :  { %v1404_v57 = vadd.f32 %v1403_v53, %v1402_v51  ;;  %v1444_v33 = vadd.f32 %v1443_v56, %v1442_v52 }
 0x124   :  { %vm1095_vm1 = vcmp.ge.f32.partialorder %v1087_v55, 0.0  ;;  %v1103_v58 = vmul.f32 0.2, %v1087_v55  ;;  %v960_v60 = vadd.f32 %v1441_v28, %v895_v30  ;;  %v1110_v2 = vsel %vm1094_vm0, %v1086_v43, %v1102_v54 }
 0x125   :  { %v898_v48 = vadd.f32 %v1404_v57, %v1894_v46 }
 0x126   :  { %v1111_v3 = vsel %vm1095_vm1, %v1087_v55, %v1103_v58  ;;  %v1032_v4 = vmul.f32 %v1888_v31, %v960_v60  ;;  %v1405_v5 = vpop.f32.mrb[24].mxu0  ;;  %v1079_v58 = vpop.permute.xlu0 %1078 }
 0x127   :  { %v1277_v6 = vpack.c.bf16 %v1111_v3, %v1110_v2  ;;  %v963_v7 = vadd.f32 %v1444_v33, %v898_v48  ;;  %v1445_v8 = vpop.f32.mrb[24].mxu1  ;;  %v1406_v44 = vpop.f32.mrb[25].mxu0 }
 0x128   :  { %v1088_v9 = vadd.f32 %v1059_v1, %v1032_v4  ;;  %v1407_v10 = vadd.f32 %v1406_v44, %v1405_v5  ;;  %v1446_v11 = vpop.f32.mrb[25].mxu1  ;;  %v1408_v13 = vpop.f32.mrb[26].mxu0 }
 0x129   :  { %1278 = vst [vmem:[%s1944_s4] sm:$0xff] %v1277_v6   ;;  %v1033_v46 = vmul.f32 %v1896_v47, %v963_v7  ;;  %v1447_v17 = vadd.f32 %v1446_v11, %v1445_v8  ;;  %v1448_v18 = vpop.f32.mrb[26].mxu1  ;;  %v1409_v19 = vpop.f32.mrb[27].mxu0 }
 0x12a   :  { %v903_v31 = vadd.f32 %v1407_v10, %v1898_v59  ;;  %v1410_v20 = vadd.f32 %v1409_v19, %v1408_v13  ;;  %v1449_v21 = vpop.f32.mrb[27].mxu1  ;;  %v1104_v22 = vmul.f32 0.2, %v1088_v9  ;;  %vm1096_vm2 = vcmp.ge.f32.partialorder %v1088_v9, 0.0  ;;  %v1084_v1 = vpop.permute.xlu1 %1083 }
 0x12b   :  { %v1089_v23 = vadd.f32 %v1064_v61, %v1033_v46  ;;  %v1450_v24 = vadd.f32 %v1449_v21, %v1448_v18 }
 0x12c   :  { %v968_v25 = vadd.f32 %v1447_v17, %v903_v31  ;;  %v906_v26 = vadd.f32 %v1410_v20, %v1900_v62  ;;  %v1112_v36 = vsel %vm1096_vm2, %v1088_v9, %v1104_v22 }
 0x12d   :  { %vm1097_vm3 = vcmp.ge.f32.partialorder %v1089_v23, 0.0  ;;  %v1105_v29 = vmul.f32 0.2, %v1089_v23 }
 0x12e   :  { %v1034_v47 = vmul.f32 %v1904_v0, %v968_v25  ;;  %v971_v34 = vadd.f32 %v1450_v24, %v906_v26  ;;  %v1411_v35 = vpop.f32.mrb[28].mxu0 }
 0x12f   :  { %v1113_v37 = vsel %vm1097_vm3, %v1089_v23, %v1105_v29  ;;  %v1451_v59 = vpop.f32.mrb[28].mxu1  ;;  %v1412_v38 = vpop.f32.mrb[29].mxu0 }
 0x130   :  { %v1282_v39 = vpack.c.bf16 %v1113_v37, %v1112_v36  ;;  %v1090_v40 = vadd.f32 %v1069_v32, %v1034_v47  ;;  %v1035_v41 = vmul.f32 %v1902_v63, %v971_v34  ;;  %v1413_v42 = vadd.f32 %v1412_v38, %v1411_v35  ;;  %v1452_v43 = vpop.f32.mrb[29].mxu1  ;;  %v1414_v45 = vpop.f32.mrb[30].mxu0 }
 0x131   :  { %v1453_v62 = vadd.f32 %v1452_v43, %v1451_v59  ;;  %v1454_v49 = vpop.f32.mrb[30].mxu1  ;;  %v1415_v50 = vpop.f32.mrb[31].mxu0 }
 0x132   :  { %1294 = vst [vmem:[%s1944_s4 + $0x8] sm:$0xff] %v1282_v39   ;;  %v1106_v0 = vmul.f32 0.2, %v1090_v40  ;;  %v1091_v51 = vadd.f32 %v1074_v27, %v1035_v41  ;;  %v911_v28 = vadd.f32 %v1413_v42, %v1906_v12  ;;  %v1455_v52 = vpop.f32.mrb[31].mxu1  ;;  %vm1098_vm4 = vcmp.ge.f32.partialorder %v1090_v40, 0.0 }
 0x133   :  { %v1416_v53 = vadd.f32 %v1415_v50, %v1414_v45  ;;  %v1456_v54 = vadd.f32 %v1455_v52, %v1454_v49 }
 0x134   :  { %vm1099_vm5 = vcmp.ge.f32.partialorder %v1091_v51, 0.0  ;;  %v1107_v63 = vmul.f32 0.2, %v1091_v51  ;;  %v976_v55 = vadd.f32 %v1453_v62, %v911_v28  ;;  %v1114_v56 = vsel %vm1098_vm4, %v1090_v40, %v1106_v0 }
 0x135   :  { %v914_v30 = vadd.f32 %v1416_v53, %v1908_v14 }
 0x136   :  { %v1115_v57 = vsel %vm1099_vm5, %v1091_v51, %v1107_v63  ;;  %v1036_v33 = vmul.f32 %v1912_v16, %v976_v55 }
 0x137   :  { %v1287_v60 = vpack.c.bf16 %v1115_v57, %v1114_v56  ;;  %v979_v61 = vadd.f32 %v1456_v54, %v914_v30 }
 0x138   :  { %v1092_v48 = vadd.f32 %v1079_v58, %v1036_v33 }
 0x139   :  { %1295 = vst [vmem:[%s1944_s4 + $0x10] sm:$0xff] %v1287_v60   ;;  %v1037_v12 = vmul.f32 %v1910_v15, %v979_v61 }
 0x13a   :  { %v1108_v2 = vmul.f32 0.2, %v1092_v48  ;;  %vm1100_vm6 = vcmp.ge.f32.partialorder %v1092_v48, 0.0 }
 0x13b   :  { %v1093_v3 = vadd.f32 %v1084_v1, %v1037_v12 }
 0x13c   :  { %v1116_v4 = vsel %vm1100_vm6, %v1092_v48, %v1108_v2 }
 0x13d   :  { %vm1101_vm7 = vcmp.ge.f32.partialorder %v1093_v3, 0.0  ;;  %v1109_v14 = vmul.f32 0.2, %v1093_v3 }
 0x13f   :  { %v1117_v5 = vsel %vm1101_vm7, %v1093_v3, %v1109_v14 }
 0x140   :  { %v1292_v6 = vpack.c.bf16 %v1117_v5, %v1116_v4 }
 0x142   :  { %1296 = vst [vmem:[%s1944_s4 + $0x18] sm:$0xff] %v1292_v6  }

// kernel: discriminator_forward.13
= control target key start
LH: loop header
LB: loop body
LE: loop exit
PB: predicated region body
PF: predicated region fallthrough
CT: control target
= control target key end

     0   :  { %s8099_s1 = inlined_call_operand.vmem [shape: bf16[512,1152], index: 1, kind: input, shape index: {}]   ;;  %s8100_s0 = inlined_call_operand.vmem [shape: bf16[8,512], index: 0, kind: input, shape index: {}]   ;;  %s8101_s4 = inlined_call_operand.vmem [shape: bf16[1024,512], index: 4, kind: input, shape index: {}]   ;;  %s8102_s2 = inlined_call_operand.vmem [shape: f32[1,1152], index: 2, kind: input, shape index: {}]   ;;  %s8103_s3 = inlined_call_operand.vmem [shape: f32[1,1152], index: 3, kind: input, shape index: {}]   ;;  %s8104_s6 = inlined_call_operand.vmem [shape: bf16[512,128], index: 6, kind: input, shape index: {}]   ;;  %s8105_s8 = inlined_call_operand.vmem [shape: f32[8,128], index: 8, kind: output, shape index: {0}]   ;;  %s8106_s5 = inlined_call_operand.vmem [shape: f32[1,512], index: 5, kind: input, shape index: {}]   ;;  %s8107_s7 = inlined_call_operand.vmem [shape: f32[1,128], index: 7, kind: input, shape index: {}]   ;;  %s8108_s9 = inlined_call_operand.vmem [shape: f32[8,128], index: 9, kind: output, shape index: {1}]  }
   0x1   :  { %v5359_v0 = vld [vmem:[%s8099_s1 + $0x4] ss:$36 sps:$4 sm:$0xff]   ;;  %v5361_v1 = vld [vmem:[%s8099_s1 + $0xc] ss:$36 sps:$4 sm:$0xff]   ;;  %v5367_v5 = vld [vmem:[%s8099_s1 + $0x54] ss:$36 sps:$4 sm:$0xff]  }
   0x2   :  { %1889 = vmatprep.subr.bf16.mxu0 %v5359_v0  ;;  %v5363_v2 = vld [vmem:[%s8099_s1] ss:$36 sps:$4 sm:$0xff]   ;;  %v5364_v3 = vld [vmem:[%s8099_s1 + $0x8] ss:$36 sps:$4 sm:$0xff]   ;;  %1971 = vmatprep.subr.bf16.mxu1 %v5361_v1  ;;  %v5370_v7 = vld [vmem:[%s8099_s1 + $0x50] ss:$36 sps:$4 sm:$0xff]  }
   0x3   :  { %v5365_v4 = vld [vmem:[%s8099_s1 + $0x4c] ss:$36 sps:$4 sm:$0xff]   ;;  %1890 = vmatpush1.bf16.msra.mxu0 %v5363_v2  ;;  %1972 = vmatpush1.bf16.msra.mxu1 %v5364_v3  ;;  %v5371_v8 = vld [vmem:[%s8099_s1 + $0x94] ss:$36 sps:$4 sm:$0xff]   ;;  %v5373_v9 = vld [vmem:[%s8099_s1 + $0x9c] ss:$36 sps:$4 sm:$0xff]  }
   0x4   :  { %v5369_v6 = vld [vmem:[%s8099_s1 + $0x48] ss:$36 sps:$4 sm:$0xff]   ;;  %1891 = vmatprep.subr.bf16.mxu0 %v5365_v4  ;;  %1973 = vmatprep.subr.bf16.mxu1 %v5367_v5  ;;  %v5375_v10 = vld [vmem:[%s8099_s1 + $0x90] ss:$36 sps:$4 sm:$0xff]   ;;  %v5376_v11 = vld [vmem:[%s8099_s1 + $0x98] ss:$36 sps:$4 sm:$0xff]  }
   0x5   :  { %v5377_v12 = vld [vmem:[%s8099_s1 + $0xdc] ss:$36 sps:$4 sm:$0xff]   ;;  %v5379_v13 = vld [vmem:[%s8099_s1 + $0xe4] ss:$36 sps:$4 sm:$0xff]   ;;  %v5385_v17 = vld [vmem:[%s8099_s1 + $0x12c] ss:$36 sps:$4 sm:$0xff]  }
   0x6   :  { %v5381_v14 = vld [vmem:[%s8099_s1 + $0xd8] ss:$36 sps:$4 sm:$0xff]   ;;  %v5382_v15 = vld [vmem:[%s8099_s1 + $0xe0] ss:$36 sps:$4 sm:$0xff]   ;;  %v5388_v19 = vld [vmem:[%s8099_s1 + $0x128] ss:$36 sps:$4 sm:$0xff]  }
   0x7   :  { %1892 = vmatpush1.bf16.msra.mxu0 %v5369_v6  ;;  %1974 = vmatpush1.bf16.msra.mxu1 %v5370_v7  ;;  %v5383_v16 = vld [vmem:[%s8099_s1 + $0x124] ss:$36 sps:$4 sm:$0xff]   ;;  %v5389_v20 = vld [vmem:[%s8099_s1 + $0x16c] ss:$36 sps:$4 sm:$0xff]   ;;  %v5391_v21 = vld [vmem:[%s8099_s1 + $0x174] ss:$36 sps:$4 sm:$0xff]  }
   0x8   :  { %1893 = vmatprep.subr.bf16.mxu0 %v5371_v8  ;;  %1975 = vmatprep.subr.bf16.mxu1 %v5373_v9  ;;  %v5387_v18 = vld [vmem:[%s8099_s1 + $0x120] ss:$36 sps:$4 sm:$0xff]   ;;  %v5393_v22 = vld [vmem:[%s8099_s1 + $0x168] ss:$36 sps:$4 sm:$0xff]   ;;  %v5394_v23 = vld [vmem:[%s8099_s1 + $0x170] ss:$36 sps:$4 sm:$0xff]  }
   0x9   :  { %v5395_v24 = vld [vmem:[%s8099_s1 + $0x1b4] ss:$36 sps:$4 sm:$0xff]   ;;  %v5397_v25 = vld [vmem:[%s8099_s1 + $0x1bc] ss:$36 sps:$4 sm:$0xff]   ;;  %v5403_v29 = vld [vmem:[%s8099_s1 + $0x204] ss:$36 sps:$4 sm:$0xff]  }
   0xa   :  { %v5399_v26 = vld [vmem:[%s8099_s1 + $0x1b0] ss:$36 sps:$4 sm:$0xff]   ;;  %v5400_v27 = vld [vmem:[%s8099_s1 + $0x1b8] ss:$36 sps:$4 sm:$0xff]   ;;  %v5406_v31 = vld [vmem:[%s8099_s1 + $0x200] ss:$36 sps:$4 sm:$0xff]  }
   0xb   :  { %1894 = vmatpush1.bf16.msra.mxu0 %v5375_v10  ;;  %1976 = vmatpush1.bf16.msra.mxu1 %v5376_v11  ;;  %v5401_v28 = vld [vmem:[%s8099_s1 + $0x1fc] ss:$36 sps:$4 sm:$0xff]   ;;  %v5407_v32 = vld [vmem:[%s8099_s1 + $0x244] ss:$36 sps:$4 sm:$0xff]   ;;  %v5409_v33 = vld [vmem:[%s8099_s1 + $0x24c] ss:$36 sps:$4 sm:$0xff]  }
   0xc   :  { %1895 = vmatprep.subr.bf16.mxu0 %v5377_v12  ;;  %1977 = vmatprep.subr.bf16.mxu1 %v5379_v13  ;;  %v5405_v30 = vld [vmem:[%s8099_s1 + $0x1f8] ss:$36 sps:$4 sm:$0xff]   ;;  %v5411_v34 = vld [vmem:[%s8099_s1 + $0x240] ss:$36 sps:$4 sm:$0xff]   ;;  %v5412_v35 = vld [vmem:[%s8099_s1 + $0x248] ss:$36 sps:$4 sm:$0xff]  }
   0xd   :  { %v5413_v36 = vld [vmem:[%s8099_s1 + $0x28c] ss:$36 sps:$4 sm:$0xff]   ;;  %v5415_v37 = vld [vmem:[%s8099_s1 + $0x294] ss:$36 sps:$4 sm:$0xff]   ;;  %v5421_v41 = vld [vmem:[%s8099_s1 + $0x2dc] ss:$36 sps:$4 sm:$0xff]  }
   0xe   :  { %v5417_v38 = vld [vmem:[%s8099_s1 + $0x288] ss:$36 sps:$4 sm:$0xff]   ;;  %v5418_v39 = vld [vmem:[%s8099_s1 + $0x290] ss:$36 sps:$4 sm:$0xff]   ;;  %v5424_v43 = vld [vmem:[%s8099_s1 + $0x2d8] ss:$36 sps:$4 sm:$0xff]  }
   0xf   :  { %1896 = vmatpush1.bf16.msra.mxu0 %v5381_v14  ;;  %1978 = vmatpush1.bf16.msra.mxu1 %v5382_v15  ;;  %v5419_v40 = vld [vmem:[%s8099_s1 + $0x2d4] ss:$36 sps:$4 sm:$0xff]   ;;  %v5425_v44 = vld [vmem:[%s8099_s1 + $0x31c] ss:$36 sps:$4 sm:$0xff]   ;;  %v5427_v45 = vld [vmem:[%s8099_s1 + $0x324] ss:$36 sps:$4 sm:$0xff]  }
  0x10   :  { %1897 = vmatprep.subr.bf16.mxu0 %v5383_v16  ;;  %1979 = vmatprep.subr.bf16.mxu1 %v5385_v17  ;;  %v5423_v42 = vld [vmem:[%s8099_s1 + $0x2d0] ss:$36 sps:$4 sm:$0xff]   ;;  %v32_v46 = vld [vmem:[%s8100_s0] sm:$0xff]  ;;  %v5429_v47 = vld [vmem:[%s8099_s1 + $0x318] ss:$36 sps:$4 sm:$0xff]  }
  0x11   :  { %v6391_v48 = vcombine.high %v32_v46, %v32_v46  ;;  %v5430_v49 = vld [vmem:[%s8099_s1 + $0x320] ss:$36 sps:$4 sm:$0xff]   ;;  %v5433_v51 = vld [vmem:[%s8099_s1 + $0x36c] ss:$36 sps:$4 sm:$0xff]   ;;  %v5439_v55 = vld [vmem:[%s8099_s1 + $0x3b4] ss:$36 sps:$4 sm:$0xff]   ;;  %v6455_v5 = vcombine.low %v32_v46, %v32_v46 }
  0x12   :  { %v5431_v50 = vld [vmem:[%s8099_s1 + $0x364] ss:$36 sps:$4 sm:$0xff]   ;;  %v5437_v54 = vld [vmem:[%s8099_s1 + $0x3ac] ss:$36 sps:$4 sm:$0xff]   ;;  %v5443_v58 = vld [vmem:[%s8099_s1 + $0x3f4] ss:$36 sps:$4 sm:$0xff]  }
  0x13   :  { %1898 = vmatpush1.bf16.msra.mxu0 %v5387_v18  ;;  %1980 = vmatpush1.bf16.msra.mxu1 %v5388_v19  ;;  %v5435_v52 = vld [vmem:[%s8099_s1 + $0x360] ss:$36 sps:$4 sm:$0xff]   ;;  %v5436_v53 = vld [vmem:[%s8099_s1 + $0x368] ss:$36 sps:$4 sm:$0xff]   ;;  %v5442_v57 = vld [vmem:[%s8099_s1 + $0x3b0] ss:$36 sps:$4 sm:$0xff]  }
  0x14   :  { %1899 = vmatprep.subr.bf16.mxu0 %v5389_v20  ;;  %1981 = vmatprep.subr.bf16.mxu1 %v5391_v21  ;;  %v5441_v56 = vld [vmem:[%s8099_s1 + $0x3a8] ss:$36 sps:$4 sm:$0xff]   ;;  %v5445_v59 = vld [vmem:[%s8099_s1 + $0x3fc] ss:$36 sps:$4 sm:$0xff]   ;;  %v5447_v60 = vld [vmem:[%s8099_s1 + $0x3f0] ss:$36 sps:$4 sm:$0xff]  }
  0x15   :  { %1921 = vmatprep.mubr.bf16.mxu0 %v6391_v48  ;;  %2003 = vmatprep.mubr.bf16.mxu1 %v6391_v48  ;;  %v5448_v61 = vld [vmem:[%s8099_s1 + $0x3f8] ss:$36 sps:$4 sm:$0xff]   ;;  %v5451_v63 = vld [vmem:[%s8099_s1 + $0x444] ss:$36 sps:$4 sm:$0xff]   ;;  %v5461_v3 = vld [vmem:[%s8099_s1 + $0x48c] ss:$36 sps:$4 sm:$0xff]  }
  0x16   :  { %v5449_v62 = vld [vmem:[%s8099_s1 + $0x43c] ss:$36 sps:$4 sm:$0xff]   ;;  %v5458_v2 = vld [vmem:[%s8099_s1 + $0x484] ss:$36 sps:$4 sm:$0xff]   ;;  %v5465_v7 = vld [vmem:[%s8099_s1 + $0x4cc] ss:$36 sps:$4 sm:$0xff]  }
  0x17   :  { %1900 = vmatpush1.bf16.msra.mxu0 %v5393_v22  ;;  %1982 = vmatpush1.bf16.msra.mxu1 %v5394_v23  ;;  %v5453_v0 = vld [vmem:[%s8099_s1 + $0x438] ss:$36 sps:$4 sm:$0xff]   ;;  %v5454_v1 = vld [vmem:[%s8099_s1 + $0x440] ss:$36 sps:$4 sm:$0xff]   ;;  %v5459_v6 = vld [vmem:[%s8099_s1 + $0x488] ss:$36 sps:$4 sm:$0xff]  }
  0x18   :  { %1901 = vmatprep.subr.bf16.mxu0 %v5395_v24  ;;  %1983 = vmatprep.subr.bf16.mxu1 %v5397_v25  ;;  %v5456_v4 = vld [vmem:[%s8099_s1 + $0x480] ss:$36 sps:$4 sm:$0xff]   ;;  %v5468_v8 = vld [vmem:[%s8099_s1 + $0x4d4] ss:$36 sps:$4 sm:$0xff]   ;;  %v5463_v9 = vld [vmem:[%s8099_s1 + $0x4c8] ss:$36 sps:$4 sm:$0xff]  }
  0x19   :  { %v5466_v10 = vld [vmem:[%s8099_s1 + $0x4d0] ss:$36 sps:$4 sm:$0xff]   ;;  %v5474_v12 = vld [vmem:[%s8099_s1 + $0x51c] ss:$36 sps:$4 sm:$0xff]   ;;  %v5480_v16 = vld [vmem:[%s8099_s1 + $0x564] ss:$36 sps:$4 sm:$0xff]  }
  0x1a   :  { %v5471_v11 = vld [vmem:[%s8099_s1 + $0x514] ss:$36 sps:$4 sm:$0xff]   ;;  %v5477_v15 = vld [vmem:[%s8099_s1 + $0x55c] ss:$36 sps:$4 sm:$0xff]   ;;  %v5483_v19 = vld [vmem:[%s8099_s1 + $0x5a4] ss:$36 sps:$4 sm:$0xff]  }
  0x1b   :  { %1902 = vmatpush1.bf16.msra.mxu0 %v5399_v26  ;;  %1984 = vmatpush1.bf16.msra.mxu1 %v5400_v27  ;;  %v5469_v13 = vld [vmem:[%s8099_s1 + $0x510] ss:$36 sps:$4 sm:$0xff]   ;;  %v5472_v14 = vld [vmem:[%s8099_s1 + $0x518] ss:$36 sps:$4 sm:$0xff]   ;;  %v5478_v18 = vld [vmem:[%s8099_s1 + $0x560] ss:$36 sps:$4 sm:$0xff]  }
  0x1c   :  { %1903 = vmatprep.subr.bf16.mxu0 %v5401_v28  ;;  %1985 = vmatprep.subr.bf16.mxu1 %v5403_v29  ;;  %v5475_v17 = vld [vmem:[%s8099_s1 + $0x558] ss:$36 sps:$4 sm:$0xff]   ;;  %v5486_v20 = vld [vmem:[%s8099_s1 + $0x5ac] ss:$36 sps:$4 sm:$0xff]   ;;  %v5481_v21 = vld [vmem:[%s8099_s1 + $0x5a0] ss:$36 sps:$4 sm:$0xff]  }
  0x1d   :  { %v5484_v22 = vld [vmem:[%s8099_s1 + $0x5a8] ss:$36 sps:$4 sm:$0xff]   ;;  %v5492_v24 = vld [vmem:[%s8099_s1 + $0x5f4] ss:$36 sps:$4 sm:$0xff]   ;;  %v5498_v28 = vld [vmem:[%s8099_s1 + $0x63c] ss:$36 sps:$4 sm:$0xff]  }
  0x1e   :  { %v5489_v23 = vld [vmem:[%s8099_s1 + $0x5ec] ss:$36 sps:$4 sm:$0xff]   ;;  %v5495_v27 = vld [vmem:[%s8099_s1 + $0x634] ss:$36 sps:$4 sm:$0xff]   ;;  %v5522_v46 = vld [vmem:[%s8099_s1 + $0x75c] ss:$36 sps:$4 sm:$0xff]  }
  0x1f   :  { %1904 = vmatpush1.bf16.msra.mxu0 %v5405_v30  ;;  %1986 = vmatpush1.bf16.msra.mxu1 %v5406_v31  ;;  %v5487_v25 = vld [vmem:[%s8099_s1 + $0x5e8] ss:$36 sps:$4 sm:$0xff]   ;;  %v5490_v26 = vld [vmem:[%s8099_s1 + $0x5f0] ss:$36 sps:$4 sm:$0xff]  }
  0x20   :  { %1905 = vmatprep.subr.bf16.mxu0 %v5407_v32  ;;  %1987 = vmatprep.subr.bf16.mxu1 %v5409_v33  ;;  %v6531_v29 = vld [vmem:[%s8100_s0 + $0x8] sm:$0xff]  ;;  %v5493_v31 = vld [vmem:[%s8099_s1 + $0x630] ss:$36 sps:$4 sm:$0xff]   ;;  %v5496_v32 = vld [vmem:[%s8099_s1 + $0x638] ss:$36 sps:$4 sm:$0xff]  }
  0x21   :  { %v6535_v30 = vcombine.high %v6531_v29, %v6531_v29  ;;  %v5501_v33 = vld [vmem:[%s8099_s1 + $0x67c] ss:$36 sps:$4 sm:$0xff]  }
  0x23   :  { %1906 = vmatpush1.bf16.msra.mxu0 %v5411_v34  ;;  %1988 = vmatpush1.bf16.msra.mxu1 %v5412_v35  ;;  %v5504_v34 = vld [vmem:[%s8099_s1 + $0x684] ss:$36 sps:$4 sm:$0xff]   ;;  %v5499_v35 = vld [vmem:[%s8099_s1 + $0x678] ss:$36 sps:$4 sm:$0xff]  }
  0x24   :  { %1907 = vmatprep.subr.bf16.mxu0 %v5413_v36  ;;  %1989 = vmatprep.subr.bf16.mxu1 %v5415_v37  ;;  %v5502_v36 = vld [vmem:[%s8099_s1 + $0x680] ss:$36 sps:$4 sm:$0xff]  }
  0x25   :  { %v5507_v37 = vld [vmem:[%s8099_s1 + $0x6c4] ss:$36 sps:$4 sm:$0xff]  }
  0x27   :  { %1908 = vmatpush1.bf16.msra.mxu0 %v5417_v38  ;;  %1990 = vmatpush1.bf16.msra.mxu1 %v5418_v39  ;;  %v5510_v38 = vld [vmem:[%s8099_s1 + $0x6cc] ss:$36 sps:$4 sm:$0xff]   ;;  %v5505_v39 = vld [vmem:[%s8099_s1 + $0x6c0] ss:$36 sps:$4 sm:$0xff]  }
  0x28   :  { %1909 = vmatprep.subr.bf16.mxu0 %v5419_v40  ;;  %1991 = vmatprep.subr.bf16.mxu1 %v5421_v41  ;;  %v5508_v40 = vld [vmem:[%s8099_s1 + $0x6c8] ss:$36 sps:$4 sm:$0xff]  }
  0x29   :  { %v5513_v41 = vld [vmem:[%s8099_s1 + $0x70c] ss:$36 sps:$4 sm:$0xff]  }
  0x2b   :  { %1910 = vmatpush1.bf16.msra.mxu0 %v5423_v42  ;;  %1992 = vmatpush1.bf16.msra.mxu1 %v5424_v43  ;;  %v5516_v42 = vld [vmem:[%s8099_s1 + $0x714] ss:$36 sps:$4 sm:$0xff]   ;;  %v5511_v43 = vld [vmem:[%s8099_s1 + $0x708] ss:$36 sps:$4 sm:$0xff]  }
  0x2c   :  { %1911 = vmatprep.subr.bf16.mxu0 %v5425_v44  ;;  %1993 = vmatprep.subr.bf16.mxu1 %v5427_v45  ;;  %v5514_v44 = vld [vmem:[%s8099_s1 + $0x710] ss:$36 sps:$4 sm:$0xff]  }
  0x2d   :  { %v5519_v45 = vld [vmem:[%s8099_s1 + $0x754] ss:$36 sps:$4 sm:$0xff]  }
  0x2f   :  { %1912 = vmatpush1.bf16.msra.mxu0 %v5429_v47  ;;  %1994 = vmatpush1.bf16.msra.mxu1 %v5430_v49  ;;  %v5517_v47 = vld [vmem:[%s8099_s1 + $0x750] ss:$36 sps:$4 sm:$0xff]   ;;  %v5520_v49 = vld [vmem:[%s8099_s1 + $0x758] ss:$36 sps:$4 sm:$0xff]  }
  0x30   :  { %1913 = vmatprep.subr.bf16.mxu0 %v5431_v50  ;;  %1995 = vmatprep.subr.bf16.mxu1 %v5433_v51  ;;  %v5525_v50 = vld [vmem:[%s8099_s1 + $0x79c] ss:$36 sps:$4 sm:$0xff]   ;;  %v5528_v51 = vld [vmem:[%s8099_s1 + $0x7a4] ss:$36 sps:$4 sm:$0xff]  }
  0x33   :  { %1914 = vmatpush1.bf16.msra.mxu0 %v5435_v52  ;;  %1996 = vmatpush1.bf16.msra.mxu1 %v5436_v53  ;;  %v5523_v52 = vld [vmem:[%s8099_s1 + $0x798] ss:$36 sps:$4 sm:$0xff]   ;;  %v5526_v53 = vld [vmem:[%s8099_s1 + $0x7a0] ss:$36 sps:$4 sm:$0xff]  }
  0x34   :  { %1915 = vmatprep.subr.bf16.mxu0 %v5437_v54  ;;  %1997 = vmatprep.subr.bf16.mxu1 %v5439_v55  ;;  %v5531_v54 = vld [vmem:[%s8099_s1 + $0x7e4] ss:$36 sps:$4 sm:$0xff]   ;;  %v5534_v55 = vld [vmem:[%s8099_s1 + $0x7ec] ss:$36 sps:$4 sm:$0xff]  }
  0x37   :  { %1916 = vmatpush1.bf16.msra.mxu0 %v5441_v56  ;;  %1998 = vmatpush1.bf16.msra.mxu1 %v5442_v57  ;;  %v5529_v56 = vld [vmem:[%s8099_s1 + $0x7e0] ss:$36 sps:$4 sm:$0xff]   ;;  %v5532_v57 = vld [vmem:[%s8099_s1 + $0x7e8] ss:$36 sps:$4 sm:$0xff]  }
  0x38   :  { %1917 = vmatprep.subr.bf16.mxu0 %v5443_v58  ;;  %1999 = vmatprep.subr.bf16.mxu1 %v5445_v59  ;;  %v5537_v58 = vld [vmem:[%s8099_s1 + $0x82c] ss:$36 sps:$4 sm:$0xff]   ;;  %v5540_v59 = vld [vmem:[%s8099_s1 + $0x834] ss:$36 sps:$4 sm:$0xff]  }
  0x3b   :  { %1918 = vmatpush1.bf16.msra.mxu0 %v5447_v60  ;;  %2000 = vmatpush1.bf16.msra.mxu1 %v5448_v61  ;;  %v5535_v60 = vld [vmem:[%s8099_s1 + $0x828] ss:$36 sps:$4 sm:$0xff]   ;;  %v5538_v61 = vld [vmem:[%s8099_s1 + $0x830] ss:$36 sps:$4 sm:$0xff]  }
  0x3c   :  { %1919 = vmatprep.subr.bf16.mxu0 %v5449_v62  ;;  %2001 = vmatprep.subr.bf16.mxu1 %v5451_v63  ;;  %v5543_v62 = vld [vmem:[%s8099_s1 + $0x874] ss:$36 sps:$4 sm:$0xff]   ;;  %v5546_v63 = vld [vmem:[%s8099_s1 + $0x87c] ss:$36 sps:$4 sm:$0xff]  }
  0x3f   :  { %1920 = vmatpush1.bf16.msra.mxu0 %v5453_v0  ;;  %2002 = vmatpush1.bf16.msra.mxu1 %v5454_v1  ;;  %v5541_v0 = vld [vmem:[%s8099_s1 + $0x870] ss:$36 sps:$4 sm:$0xff]   ;;  %v5544_v1 = vld [vmem:[%s8099_s1 + $0x878] ss:$36 sps:$4 sm:$0xff]  }
  0x40   :  { %1930 = vmatprep.subr.bf16.mxu0 %v5458_v2  ;;  %2012 = vmatprep.subr.bf16.mxu1 %v5461_v3  ;;  %v5549_v2 = vld [vmem:[%s8099_s1 + $0x8bc] ss:$36 sps:$4 sm:$0xff]   ;;  %v5552_v3 = vld [vmem:[%s8099_s1 + $0x8c4] ss:$36 sps:$4 sm:$0xff]  }
  0x42   :  { %1922 = vmatmul.mubr.bf16.vlgmr.msra.gmra.mrb[0].mxu0 %v6455_v5  ;;  %2004 = vmatmul.mubr.bf16.vlgmr.msra.gmra.mrb[0].mxu1 %v6455_v5 }
  0x43   :  { %1931 = vmatpush1.bf16.msra.mxu0 %v5456_v4  ;;  %2013 = vmatpush1.bf16.msra.mxu1 %v5459_v6  ;;  %v5547_v4 = vld [vmem:[%s8099_s1 + $0x8b8] ss:$36 sps:$4 sm:$0xff]   ;;  %v5550_v6 = vld [vmem:[%s8099_s1 + $0x8c0] ss:$36 sps:$4 sm:$0xff]  }
  0x44   :  { %1932 = vmatprep.subr.bf16.mxu0 %v5465_v7  ;;  %2014 = vmatprep.subr.bf16.mxu1 %v5468_v8  ;;  %v5557_v7 = vld [vmem:[%s8099_s1 + $0x14] ss:$36 sps:$4 sm:$0xff]   ;;  %v5560_v8 = vld [vmem:[%s8099_s1 + $0x1c] ss:$36 sps:$4 sm:$0xff]  }
  0x45   :  { %1962 = vmatprep.mubr.bf16.mxu0 %v6535_v30  ;;  %2044 = vmatprep.mubr.bf16.mxu1 %v6535_v30 }
  0x47   :  { %1933 = vmatpush1.bf16.msra.mxu0 %v5463_v9  ;;  %2015 = vmatpush1.bf16.msra.mxu1 %v5466_v10  ;;  %v6661_v9 = vcombine.low %v6531_v29, %v6531_v29  ;;  %v5555_v10 = vld [vmem:[%s8099_s1 + $0x10] ss:$36 sps:$4 sm:$0xff]   ;;  %v5590_v29 = vld [vmem:[%s8099_s1 + $0x184] ss:$36 sps:$4 sm:$0xff]  }
  0x48   :  { %1934 = vmatprep.subr.bf16.mxu0 %v5471_v11  ;;  %2016 = vmatprep.subr.bf16.mxu1 %v5474_v12  ;;  %v5558_v11 = vld [vmem:[%s8099_s1 + $0x18] ss:$36 sps:$4 sm:$0xff]  }
  0x49   :  { %v5563_v12 = vld [vmem:[%s8099_s1 + $0x5c] ss:$36 sps:$4 sm:$0xff]  }
  0x4b   :  { %1935 = vmatpush1.bf16.msra.mxu0 %v5469_v13  ;;  %2017 = vmatpush1.bf16.msra.mxu1 %v5472_v14  ;;  %v5566_v13 = vld [vmem:[%s8099_s1 + $0x64] ss:$36 sps:$4 sm:$0xff]   ;;  %v5561_v14 = vld [vmem:[%s8099_s1 + $0x58] ss:$36 sps:$4 sm:$0xff]  }
  0x4c   :  { %1936 = vmatprep.subr.bf16.mxu0 %v5477_v15  ;;  %2018 = vmatprep.subr.bf16.mxu1 %v5480_v16  ;;  %v5564_v15 = vld [vmem:[%s8099_s1 + $0x60] ss:$36 sps:$4 sm:$0xff]  }
  0x4d   :  { %v5569_v16 = vld [vmem:[%s8099_s1 + $0xa4] ss:$36 sps:$4 sm:$0xff]  }
  0x4f   :  { %1937 = vmatpush1.bf16.msra.mxu0 %v5475_v17  ;;  %2019 = vmatpush1.bf16.msra.mxu1 %v5478_v18  ;;  %v5572_v17 = vld [vmem:[%s8099_s1 + $0xac] ss:$36 sps:$4 sm:$0xff]   ;;  %v5567_v18 = vld [vmem:[%s8099_s1 + $0xa0] ss:$36 sps:$4 sm:$0xff]  }
  0x50   :  { %1938 = vmatprep.subr.bf16.mxu0 %v5483_v19  ;;  %2020 = vmatprep.subr.bf16.mxu1 %v5486_v20  ;;  %v5570_v19 = vld [vmem:[%s8099_s1 + $0xa8] ss:$36 sps:$4 sm:$0xff]  }
  0x51   :  { %v5575_v20 = vld [vmem:[%s8099_s1 + $0xec] ss:$36 sps:$4 sm:$0xff]  }
  0x53   :  { %1939 = vmatpush1.bf16.msra.mxu0 %v5481_v21  ;;  %2021 = vmatpush1.bf16.msra.mxu1 %v5484_v22  ;;  %v5578_v21 = vld [vmem:[%s8099_s1 + $0xf4] ss:$36 sps:$4 sm:$0xff]   ;;  %v5573_v22 = vld [vmem:[%s8099_s1 + $0xe8] ss:$36 sps:$4 sm:$0xff]  }
  0x54   :  { %1940 = vmatprep.subr.bf16.mxu0 %v5489_v23  ;;  %2022 = vmatprep.subr.bf16.mxu1 %v5492_v24  ;;  %v5576_v23 = vld [vmem:[%s8099_s1 + $0xf0] ss:$36 sps:$4 sm:$0xff]  }
  0x55   :  { %v5581_v24 = vld [vmem:[%s8099_s1 + $0x134] ss:$36 sps:$4 sm:$0xff]  }
  0x57   :  { %1941 = vmatpush1.bf16.msra.mxu0 %v5487_v25  ;;  %2023 = vmatpush1.bf16.msra.mxu1 %v5490_v26  ;;  %v5584_v25 = vld [vmem:[%s8099_s1 + $0x13c] ss:$36 sps:$4 sm:$0xff]   ;;  %v5579_v26 = vld [vmem:[%s8099_s1 + $0x130] ss:$36 sps:$4 sm:$0xff]  }
  0x58   :  { %1942 = vmatprep.subr.bf16.mxu0 %v5495_v27  ;;  %2024 = vmatprep.subr.bf16.mxu1 %v5498_v28  ;;  %v5582_v27 = vld [vmem:[%s8099_s1 + $0x138] ss:$36 sps:$4 sm:$0xff]  }
  0x59   :  { %v5587_v28 = vld [vmem:[%s8099_s1 + $0x17c] ss:$36 sps:$4 sm:$0xff]  }
  0x5b   :  { %1943 = vmatpush1.bf16.msra.mxu0 %v5493_v31  ;;  %2025 = vmatpush1.bf16.msra.mxu1 %v5496_v32  ;;  %v5585_v31 = vld [vmem:[%s8099_s1 + $0x178] ss:$36 sps:$4 sm:$0xff]   ;;  %v5588_v32 = vld [vmem:[%s8099_s1 + $0x180] ss:$36 sps:$4 sm:$0xff]  }
  0x5c   :  { %1944 = vmatprep.subr.bf16.mxu0 %v5501_v33  ;;  %2026 = vmatprep.subr.bf16.mxu1 %v5504_v34  ;;  %v5593_v33 = vld [vmem:[%s8099_s1 + $0x1c4] ss:$36 sps:$4 sm:$0xff]   ;;  %v5596_v34 = vld [vmem:[%s8099_s1 + $0x1cc] ss:$36 sps:$4 sm:$0xff]  }
  0x5f   :  { %1945 = vmatpush1.bf16.msra.mxu0 %v5499_v35  ;;  %2027 = vmatpush1.bf16.msra.mxu1 %v5502_v36  ;;  %v5591_v35 = vld [vmem:[%s8099_s1 + $0x1c0] ss:$36 sps:$4 sm:$0xff]   ;;  %v5594_v36 = vld [vmem:[%s8099_s1 + $0x1c8] ss:$36 sps:$4 sm:$0xff]  }
  0x60   :  { %1946 = vmatprep.subr.bf16.mxu0 %v5507_v37  ;;  %2028 = vmatprep.subr.bf16.mxu1 %v5510_v38  ;;  %v5599_v37 = vld [vmem:[%s8099_s1 + $0x20c] ss:$36 sps:$4 sm:$0xff]   ;;  %v5602_v38 = vld [vmem:[%s8099_s1 + $0x214] ss:$36 sps:$4 sm:$0xff]  }
  0x63   :  { %1947 = vmatpush1.bf16.msra.mxu0 %v5505_v39  ;;  %2029 = vmatpush1.bf16.msra.mxu1 %v5508_v40  ;;  %v5597_v39 = vld [vmem:[%s8099_s1 + $0x208] ss:$36 sps:$4 sm:$0xff]   ;;  %v5600_v40 = vld [vmem:[%s8099_s1 + $0x210] ss:$36 sps:$4 sm:$0xff]  }
  0x64   :  { %1948 = vmatprep.subr.bf16.mxu0 %v5513_v41  ;;  %2030 = vmatprep.subr.bf16.mxu1 %v5516_v42  ;;  %v5605_v41 = vld [vmem:[%s8099_s1 + $0x254] ss:$36 sps:$4 sm:$0xff]   ;;  %v5608_v42 = vld [vmem:[%s8099_s1 + $0x25c] ss:$36 sps:$4 sm:$0xff]  }
  0x67   :  { %1949 = vmatpush1.bf16.msra.mxu0 %v5511_v43  ;;  %2031 = vmatpush1.bf16.msra.mxu1 %v5514_v44  ;;  %v5603_v43 = vld [vmem:[%s8099_s1 + $0x250] ss:$36 sps:$4 sm:$0xff]   ;;  %v5606_v44 = vld [vmem:[%s8099_s1 + $0x258] ss:$36 sps:$4 sm:$0xff]  }
  0x68   :  { %1950 = vmatprep.subr.bf16.mxu0 %v5519_v45  ;;  %2032 = vmatprep.subr.bf16.mxu1 %v5522_v46  ;;  %v5611_v45 = vld [vmem:[%s8099_s1 + $0x29c] ss:$36 sps:$4 sm:$0xff]   ;;  %v5614_v46 = vld [vmem:[%s8099_s1 + $0x2a4] ss:$36 sps:$4 sm:$0xff]  }
  0x6b   :  { %1951 = vmatpush1.bf16.msra.mxu0 %v5517_v47  ;;  %2033 = vmatpush1.bf16.msra.mxu1 %v5520_v49  ;;  %v5609_v47 = vld [vmem:[%s8099_s1 + $0x298] ss:$36 sps:$4 sm:$0xff]   ;;  %v5612_v49 = vld [vmem:[%s8099_s1 + $0x2a0] ss:$36 sps:$4 sm:$0xff]  }
  0x6c   :  { %1952 = vmatprep.subr.bf16.mxu0 %v5525_v50  ;;  %2034 = vmatprep.subr.bf16.mxu1 %v5528_v51  ;;  %v5617_v50 = vld [vmem:[%s8099_s1 + $0x2e4] ss:$36 sps:$4 sm:$0xff]   ;;  %v5620_v51 = vld [vmem:[%s8099_s1 + $0x2ec] ss:$36 sps:$4 sm:$0xff]  }
  0x6f   :  { %1953 = vmatpush1.bf16.msra.mxu0 %v5523_v52  ;;  %2035 = vmatpush1.bf16.msra.mxu1 %v5526_v53  ;;  %v5615_v52 = vld [vmem:[%s8099_s1 + $0x2e0] ss:$36 sps:$4 sm:$0xff]   ;;  %v5618_v53 = vld [vmem:[%s8099_s1 + $0x2e8] ss:$36 sps:$4 sm:$0xff]  }
  0x70   :  { %1954 = vmatprep.subr.bf16.mxu0 %v5531_v54  ;;  %2036 = vmatprep.subr.bf16.mxu1 %v5534_v55  ;;  %v5623_v54 = vld [vmem:[%s8099_s1 + $0x32c] ss:$36 sps:$4 sm:$0xff]   ;;  %v5626_v55 = vld [vmem:[%s8099_s1 + $0x334] ss:$36 sps:$4 sm:$0xff]  }
  0x73   :  { %1955 = vmatpush1.bf16.msra.mxu0 %v5529_v56  ;;  %2037 = vmatpush1.bf16.msra.mxu1 %v5532_v57  ;;  %v5621_v56 = vld [vmem:[%s8099_s1 + $0x328] ss:$36 sps:$4 sm:$0xff]   ;;  %v5624_v57 = vld [vmem:[%s8099_s1 + $0x330] ss:$36 sps:$4 sm:$0xff]  }
  0x74   :  { %1956 = vmatprep.subr.bf16.mxu0 %v5537_v58  ;;  %2038 = vmatprep.subr.bf16.mxu1 %v5540_v59  ;;  %v5629_v58 = vld [vmem:[%s8099_s1 + $0x374] ss:$36 sps:$4 sm:$0xff]   ;;  %v5632_v59 = vld [vmem:[%s8099_s1 + $0x37c] ss:$36 sps:$4 sm:$0xff]  }
  0x77   :  { %1957 = vmatpush1.bf16.msra.mxu0 %v5535_v60  ;;  %2039 = vmatpush1.bf16.msra.mxu1 %v5538_v61  ;;  %v5627_v60 = vld [vmem:[%s8099_s1 + $0x370] ss:$36 sps:$4 sm:$0xff]   ;;  %v5630_v61 = vld [vmem:[%s8099_s1 + $0x378] ss:$36 sps:$4 sm:$0xff]  }
  0x78   :  { %1958 = vmatprep.subr.bf16.mxu0 %v5543_v62  ;;  %2040 = vmatprep.subr.bf16.mxu1 %v5546_v63  ;;  %v5635_v62 = vld [vmem:[%s8099_s1 + $0x3bc] ss:$36 sps:$4 sm:$0xff]   ;;  %v5638_v63 = vld [vmem:[%s8099_s1 + $0x3c4] ss:$36 sps:$4 sm:$0xff]  }
  0x7b   :  { %1959 = vmatpush1.bf16.msra.mxu0 %v5541_v0  ;;  %2041 = vmatpush1.bf16.msra.mxu1 %v5544_v1  ;;  %v5633_v0 = vld [vmem:[%s8099_s1 + $0x3b8] ss:$36 sps:$4 sm:$0xff]   ;;  %v5636_v1 = vld [vmem:[%s8099_s1 + $0x3c0] ss:$36 sps:$4 sm:$0xff]  }
  0x7c   :  { %1960 = vmatprep.subr.bf16.mxu0 %v5549_v2  ;;  %2042 = vmatprep.subr.bf16.mxu1 %v5552_v3  ;;  %v5641_v2 = vld [vmem:[%s8099_s1 + $0x404] ss:$36 sps:$4 sm:$0xff]   ;;  %v5644_v3 = vld [vmem:[%s8099_s1 + $0x40c] ss:$36 sps:$4 sm:$0xff]  }
  0x7f   :  { %1961 = vmatpush1.bf16.msra.mxu0 %v5547_v4  ;;  %2043 = vmatpush1.bf16.msra.mxu1 %v5550_v6  ;;  %v5639_v4 = vld [vmem:[%s8099_s1 + $0x400] ss:$36 sps:$4 sm:$0xff]   ;;  %v5642_v6 = vld [vmem:[%s8099_s1 + $0x408] ss:$36 sps:$4 sm:$0xff]  }
  0x80   :  { %2053 = vmatprep.subr.bf16.mxu0 %v5557_v7  ;;  %2135 = vmatprep.subr.bf16.mxu1 %v5560_v8  ;;  %v5647_v7 = vld [vmem:[%s8099_s1 + $0x44c] ss:$36 sps:$4 sm:$0xff]   ;;  %v5650_v8 = vld [vmem:[%s8099_s1 + $0x454] ss:$36 sps:$4 sm:$0xff]  }
  0x82   :  { %1963 = vmatmul.mubr.bf16.vlgmr.msra.gmra.mrb[0].mxu0 %v6661_v9  ;;  %2045 = vmatmul.mubr.bf16.vlgmr.msra.gmra.mrb[0].mxu1 %v6661_v9 }
  0x83   :  { %2054 = vmatpush1.bf16.msra.mxu0 %v5555_v10  ;;  %2136 = vmatpush1.bf16.msra.mxu1 %v5558_v11  ;;  %v5645_v10 = vld [vmem:[%s8099_s1 + $0x448] ss:$36 sps:$4 sm:$0xff]   ;;  %v5648_v11 = vld [vmem:[%s8099_s1 + $0x450] ss:$36 sps:$4 sm:$0xff]  }
  0x84   :  { %2055 = vmatprep.subr.bf16.mxu0 %v5563_v12  ;;  %2137 = vmatprep.subr.bf16.mxu1 %v5566_v13  ;;  %v5653_v12 = vld [vmem:[%s8099_s1 + $0x494] ss:$36 sps:$4 sm:$0xff]   ;;  %v5656_v13 = vld [vmem:[%s8099_s1 + $0x49c] ss:$36 sps:$4 sm:$0xff]  }
  0x85   :  { %2085 = vmatprep.mubr.bf16.mxu0 %v6391_v48  ;;  %2167 = vmatprep.mubr.bf16.mxu1 %v6391_v48 }
  0x87   :  { %2056 = vmatpush1.bf16.msra.mxu0 %v5561_v14  ;;  %2138 = vmatpush1.bf16.msra.mxu1 %v5564_v15  ;;  %v5651_v14 = vld [vmem:[%s8099_s1 + $0x490] ss:$36 sps:$4 sm:$0xff]   ;;  %v5654_v15 = vld [vmem:[%s8099_s1 + $0x498] ss:$36 sps:$4 sm:$0xff]  }
  0x88   :  { %2057 = vmatprep.subr.bf16.mxu0 %v5569_v16  ;;  %2139 = vmatprep.subr.bf16.mxu1 %v5572_v17  ;;  %v5659_v16 = vld [vmem:[%s8099_s1 + $0x4dc] ss:$36 sps:$4 sm:$0xff]   ;;  %v5662_v17 = vld [vmem:[%s8099_s1 + $0x4e4] ss:$36 sps:$4 sm:$0xff]  }
  0x8b   :  { %2058 = vmatpush1.bf16.msra.mxu0 %v5567_v18  ;;  %2140 = vmatpush1.bf16.msra.mxu1 %v5570_v19  ;;  %v5657_v18 = vld [vmem:[%s8099_s1 + $0x4d8] ss:$36 sps:$4 sm:$0xff]   ;;  %v5660_v19 = vld [vmem:[%s8099_s1 + $0x4e0] ss:$36 sps:$4 sm:$0xff]  }
  0x8c   :  { %2059 = vmatprep.subr.bf16.mxu0 %v5575_v20  ;;  %2141 = vmatprep.subr.bf16.mxu1 %v5578_v21  ;;  %v5665_v20 = vld [vmem:[%s8099_s1 + $0x524] ss:$36 sps:$4 sm:$0xff]   ;;  %v5668_v21 = vld [vmem:[%s8099_s1 + $0x52c] ss:$36 sps:$4 sm:$0xff]  }
  0x8f   :  { %2060 = vmatpush1.bf16.msra.mxu0 %v5573_v22  ;;  %2142 = vmatpush1.bf16.msra.mxu1 %v5576_v23  ;;  %v5663_v22 = vld [vmem:[%s8099_s1 + $0x520] ss:$36 sps:$4 sm:$0xff]   ;;  %v5666_v23 = vld [vmem:[%s8099_s1 + $0x528] ss:$36 sps:$4 sm:$0xff]  }
  0x90   :  { %2061 = vmatprep.subr.bf16.mxu0 %v5581_v24  ;;  %2143 = vmatprep.subr.bf16.mxu1 %v5584_v25  ;;  %v5671_v24 = vld [vmem:[%s8099_s1 + $0x56c] ss:$36 sps:$4 sm:$0xff]   ;;  %v5674_v25 = vld [vmem:[%s8099_s1 + $0x574] ss:$36 sps:$4 sm:$0xff]  }
  0x93   :  { %2062 = vmatpush1.bf16.msra.mxu0 %v5579_v26  ;;  %2144 = vmatpush1.bf16.msra.mxu1 %v5582_v27  ;;  %v5669_v26 = vld [vmem:[%s8099_s1 + $0x568] ss:$36 sps:$4 sm:$0xff]   ;;  %v5672_v27 = vld [vmem:[%s8099_s1 + $0x570] ss:$36 sps:$4 sm:$0xff]  }
  0x94   :  { %2063 = vmatprep.subr.bf16.mxu0 %v5587_v28  ;;  %2145 = vmatprep.subr.bf16.mxu1 %v5590_v29  ;;  %v5677_v28 = vld [vmem:[%s8099_s1 + $0x5b4] ss:$36 sps:$4 sm:$0xff]   ;;  %v5680_v29 = vld [vmem:[%s8099_s1 + $0x5bc] ss:$36 sps:$4 sm:$0xff]  }
  0x97   :  { %2064 = vmatpush1.bf16.msra.mxu0 %v5585_v31  ;;  %2146 = vmatpush1.bf16.msra.mxu1 %v5588_v32  ;;  %v5675_v31 = vld [vmem:[%s8099_s1 + $0x5b0] ss:$36 sps:$4 sm:$0xff]   ;;  %v5678_v32 = vld [vmem:[%s8099_s1 + $0x5b8] ss:$36 sps:$4 sm:$0xff]  }
  0x98   :  { %2065 = vmatprep.subr.bf16.mxu0 %v5593_v33  ;;  %2147 = vmatprep.subr.bf16.mxu1 %v5596_v34  ;;  %v5683_v33 = vld [vmem:[%s8099_s1 + $0x5fc] ss:$36 sps:$4 sm:$0xff]   ;;  %v5686_v34 = vld [vmem:[%s8099_s1 + $0x604] ss:$36 sps:$4 sm:$0xff]  }
  0x9b   :  { %2066 = vmatpush1.bf16.msra.mxu0 %v5591_v35  ;;  %2148 = vmatpush1.bf16.msra.mxu1 %v5594_v36  ;;  %v5681_v35 = vld [vmem:[%s8099_s1 + $0x5f8] ss:$36 sps:$4 sm:$0xff]   ;;  %v5684_v36 = vld [vmem:[%s8099_s1 + $0x600] ss:$36 sps:$4 sm:$0xff]  }
  0x9c   :  { %2067 = vmatprep.subr.bf16.mxu0 %v5599_v37  ;;  %2149 = vmatprep.subr.bf16.mxu1 %v5602_v38  ;;  %v5689_v37 = vld [vmem:[%s8099_s1 + $0x644] ss:$36 sps:$4 sm:$0xff]   ;;  %v5692_v38 = vld [vmem:[%s8099_s1 + $0x64c] ss:$36 sps:$4 sm:$0xff]  }
  0x9f   :  { %2068 = vmatpush1.bf16.msra.mxu0 %v5597_v39  ;;  %2150 = vmatpush1.bf16.msra.mxu1 %v5600_v40  ;;  %v5687_v39 = vld [vmem:[%s8099_s1 + $0x640] ss:$36 sps:$4 sm:$0xff]   ;;  %v5690_v40 = vld [vmem:[%s8099_s1 + $0x648] ss:$36 sps:$4 sm:$0xff]  }
  0xa0   :  { %2069 = vmatprep.subr.bf16.mxu0 %v5605_v41  ;;  %2151 = vmatprep.subr.bf16.mxu1 %v5608_v42  ;;  %v5695_v41 = vld [vmem:[%s8099_s1 + $0x68c] ss:$36 sps:$4 sm:$0xff]   ;;  %v5698_v42 = vld [vmem:[%s8099_s1 + $0x694] ss:$36 sps:$4 sm:$0xff]  }
  0xa3   :  { %2070 = vmatpush1.bf16.msra.mxu0 %v5603_v43  ;;  %2152 = vmatpush1.bf16.msra.mxu1 %v5606_v44  ;;  %v5693_v43 = vld [vmem:[%s8099_s1 + $0x688] ss:$36 sps:$4 sm:$0xff]   ;;  %v5696_v44 = vld [vmem:[%s8099_s1 + $0x690] ss:$36 sps:$4 sm:$0xff]  }
  0xa4   :  { %2071 = vmatprep.subr.bf16.mxu0 %v5611_v45  ;;  %2153 = vmatprep.subr.bf16.mxu1 %v5614_v46  ;;  %v5701_v45 = vld [vmem:[%s8099_s1 + $0x6d4] ss:$36 sps:$4 sm:$0xff]   ;;  %v5704_v46 = vld [vmem:[%s8099_s1 + $0x6dc] ss:$36 sps:$4 sm:$0xff]  }
  0xa7   :  { %2072 = vmatpush1.bf16.msra.mxu0 %v5609_v47  ;;  %2154 = vmatpush1.bf16.msra.mxu1 %v5612_v49  ;;  %v5699_v47 = vld [vmem:[%s8099_s1 + $0x6d0] ss:$36 sps:$4 sm:$0xff]   ;;  %v5702_v49 = vld [vmem:[%s8099_s1 + $0x6d8] ss:$36 sps:$4 sm:$0xff]  }
  0xa8   :  { %2073 = vmatprep.subr.bf16.mxu0 %v5617_v50  ;;  %2155 = vmatprep.subr.bf16.mxu1 %v5620_v51  ;;  %v5707_v50 = vld [vmem:[%s8099_s1 + $0x71c] ss:$36 sps:$4 sm:$0xff]   ;;  %v5710_v51 = vld [vmem:[%s8099_s1 + $0x724] ss:$36 sps:$4 sm:$0xff]  }
  0xab   :  { %2074 = vmatpush1.bf16.msra.mxu0 %v5615_v52  ;;  %2156 = vmatpush1.bf16.msra.mxu1 %v5618_v53  ;;  %v5705_v52 = vld [vmem:[%s8099_s1 + $0x718] ss:$36 sps:$4 sm:$0xff]   ;;  %v5708_v53 = vld [vmem:[%s8099_s1 + $0x720] ss:$36 sps:$4 sm:$0xff]  }
  0xac   :  { %2075 = vmatprep.subr.bf16.mxu0 %v5623_v54  ;;  %2157 = vmatprep.subr.bf16.mxu1 %v5626_v55  ;;  %v5713_v54 = vld [vmem:[%s8099_s1 + $0x764] ss:$36 sps:$4 sm:$0xff]   ;;  %v5716_v55 = vld [vmem:[%s8099_s1 + $0x76c] ss:$36 sps:$4 sm:$0xff]  }
  0xaf   :  { %2076 = vmatpush1.bf16.msra.mxu0 %v5621_v56  ;;  %2158 = vmatpush1.bf16.msra.mxu1 %v5624_v57  ;;  %v5711_v56 = vld [vmem:[%s8099_s1 + $0x760] ss:$36 sps:$4 sm:$0xff]   ;;  %v5714_v57 = vld [vmem:[%s8099_s1 + $0x768] ss:$36 sps:$4 sm:$0xff]  }
  0xb0   :  { %2077 = vmatprep.subr.bf16.mxu0 %v5629_v58  ;;  %2159 = vmatprep.subr.bf16.mxu1 %v5632_v59  ;;  %v5719_v58 = vld [vmem:[%s8099_s1 + $0x7ac] ss:$36 sps:$4 sm:$0xff]   ;;  %v5722_v59 = vld [vmem:[%s8099_s1 + $0x7b4] ss:$36 sps:$4 sm:$0xff]  }
  0xb3   :  { %2078 = vmatpush1.bf16.msra.mxu0 %v5627_v60  ;;  %2160 = vmatpush1.bf16.msra.mxu1 %v5630_v61  ;;  %v5717_v60 = vld [vmem:[%s8099_s1 + $0x7a8] ss:$36 sps:$4 sm:$0xff]   ;;  %v5720_v61 = vld [vmem:[%s8099_s1 + $0x7b0] ss:$36 sps:$4 sm:$0xff]  }
  0xb4   :  { %2079 = vmatprep.subr.bf16.mxu0 %v5635_v62  ;;  %2161 = vmatprep.subr.bf16.mxu1 %v5638_v63  ;;  %v5725_v62 = vld [vmem:[%s8099_s1 + $0x7f4] ss:$36 sps:$4 sm:$0xff]   ;;  %v5728_v63 = vld [vmem:[%s8099_s1 + $0x7fc] ss:$36 sps:$4 sm:$0xff]  }
  0xb7   :  { %2080 = vmatpush1.bf16.msra.mxu0 %v5633_v0  ;;  %2162 = vmatpush1.bf16.msra.mxu1 %v5636_v1  ;;  %v5723_v0 = vld [vmem:[%s8099_s1 + $0x7f0] ss:$36 sps:$4 sm:$0xff]   ;;  %v5726_v1 = vld [vmem:[%s8099_s1 + $0x7f8] ss:$36 sps:$4 sm:$0xff]  }
  0xb8   :  { %2081 = vmatprep.subr.bf16.mxu0 %v5641_v2  ;;  %2163 = vmatprep.subr.bf16.mxu1 %v5644_v3  ;;  %v5731_v2 = vld [vmem:[%s8099_s1 + $0x83c] ss:$36 sps:$4 sm:$0xff]   ;;  %v5734_v3 = vld [vmem:[%s8099_s1 + $0x844] ss:$36 sps:$4 sm:$0xff]  }
  0xbb   :  { %2082 = vmatpush1.bf16.msra.mxu0 %v5639_v4  ;;  %2164 = vmatpush1.bf16.msra.mxu1 %v5642_v6  ;;  %v5729_v4 = vld [vmem:[%s8099_s1 + $0x838] ss:$36 sps:$4 sm:$0xff]   ;;  %v5732_v6 = vld [vmem:[%s8099_s1 + $0x840] ss:$36 sps:$4 sm:$0xff]  }
  0xbc   :  { %2083 = vmatprep.subr.bf16.mxu0 %v5647_v7  ;;  %2165 = vmatprep.subr.bf16.mxu1 %v5650_v8  ;;  %v5737_v7 = vld [vmem:[%s8099_s1 + $0x884] ss:$36 sps:$4 sm:$0xff]   ;;  %v5740_v8 = vld [vmem:[%s8099_s1 + $0x88c] ss:$36 sps:$4 sm:$0xff]  }
  0xbf   :  { %2084 = vmatpush1.bf16.msra.mxu0 %v5645_v10  ;;  %2166 = vmatpush1.bf16.msra.mxu1 %v5648_v11  ;;  %v5735_v10 = vld [vmem:[%s8099_s1 + $0x880] ss:$36 sps:$4 sm:$0xff]   ;;  %v5738_v11 = vld [vmem:[%s8099_s1 + $0x888] ss:$36 sps:$4 sm:$0xff]  }
  0xc0   :  { %2094 = vmatprep.subr.bf16.mxu0 %v5653_v12  ;;  %2176 = vmatprep.subr.bf16.mxu1 %v5656_v13  ;;  %v5743_v12 = vld [vmem:[%s8099_s1 + $0x8cc] ss:$36 sps:$4 sm:$0xff]   ;;  %v5746_v13 = vld [vmem:[%s8099_s1 + $0x8d4] ss:$36 sps:$4 sm:$0xff]  }
  0xc2   :  { %2086 = vmatmul.mubr.bf16.vlgmr.msra.gmra.mrb[4].mxu0 %v6455_v5  ;;  %2168 = vmatmul.mubr.bf16.vlgmr.msra.gmra.mrb[4].mxu1 %v6455_v5 }
  0xc3   :  { %2095 = vmatpush1.bf16.msra.mxu0 %v5651_v14  ;;  %2177 = vmatpush1.bf16.msra.mxu1 %v5654_v15  ;;  %v5741_v14 = vld [vmem:[%s8099_s1 + $0x8c8] ss:$36 sps:$4 sm:$0xff]   ;;  %v5744_v15 = vld [vmem:[%s8099_s1 + $0x8d0] ss:$36 sps:$4 sm:$0xff]  }
  0xc4   :  { %2096 = vmatprep.subr.bf16.mxu0 %v5659_v16  ;;  %2178 = vmatprep.subr.bf16.mxu1 %v5662_v17  ;;  %v5747_v16 = vld [vmem:[%s8099_s1 + $0x260] ss:$36 sps:$4 sm:$0xff]  }
  0xc5   :  { %2126 = vmatprep.mubr.bf16.mxu0 %v6535_v30  ;;  %2208 = vmatprep.mubr.bf16.mxu1 %v6535_v30  ;;  %v5748_v17 = vld [vmem:[%s8099_s1 + $0x6e0] ss:$36 sps:$4 sm:$0xff]  }
  0xc7   :  { %2097 = vmatpush1.bf16.msra.mxu0 %v5657_v18  ;;  %2179 = vmatpush1.bf16.msra.mxu1 %v5660_v19  ;;  %v5749_v18 = vld [vmem:[%s8099_s1 + $0x20] ss:$36 sps:$4 sm:$0xff]  }
  0xc8   :  { %2098 = vmatprep.subr.bf16.mxu0 %v5665_v20  ;;  %2180 = vmatprep.subr.bf16.mxu1 %v5668_v21  ;;  %v5750_v19 = vld [vmem:[%s8099_s1 + $0x4a0] ss:$36 sps:$4 sm:$0xff]   ;;  %v5751_v20 = vld [vmem:[%s8099_s1 + $0x2a8] ss:$36 sps:$4 sm:$0xff]  }
  0xc9   :  { %v5752_v21 = vld [vmem:[%s8099_s1 + $0x728] ss:$36 sps:$4 sm:$0xff]  }
  0xcb   :  { %2099 = vmatpush1.bf16.msra.mxu0 %v5663_v22  ;;  %2181 = vmatpush1.bf16.msra.mxu1 %v5666_v23  ;;  %v5753_v22 = vld [vmem:[%s8099_s1 + $0x68] ss:$36 sps:$4 sm:$0xff]  }
  0xcc   :  { %2100 = vmatprep.subr.bf16.mxu0 %v5671_v24  ;;  %2182 = vmatprep.subr.bf16.mxu1 %v5674_v25  ;;  %v5754_v23 = vld [vmem:[%s8099_s1 + $0x4e8] ss:$36 sps:$4 sm:$0xff]   ;;  %v5755_v24 = vld [vmem:[%s8099_s1 + $0x2f0] ss:$36 sps:$4 sm:$0xff]  }
  0xcd   :  { %v5756_v25 = vld [vmem:[%s8099_s1 + $0x770] ss:$36 sps:$4 sm:$0xff]  }
  0xcf   :  { %2101 = vmatpush1.bf16.msra.mxu0 %v5669_v26  ;;  %2183 = vmatpush1.bf16.msra.mxu1 %v5672_v27  ;;  %v5757_v26 = vld [vmem:[%s8099_s1 + $0xb0] ss:$36 sps:$4 sm:$0xff]  }
  0xd0   :  { %2102 = vmatprep.subr.bf16.mxu0 %v5677_v28  ;;  %2184 = vmatprep.subr.bf16.mxu1 %v5680_v29  ;;  %v5758_v27 = vld [vmem:[%s8099_s1 + $0x530] ss:$36 sps:$4 sm:$0xff]   ;;  %v5759_v28 = vld [vmem:[%s8099_s1 + $0x338] ss:$36 sps:$4 sm:$0xff]  }
  0xd1   :  { %v5762_v29 = vld [vmem:[%s8099_s1 + $0x578] ss:$36 sps:$4 sm:$0xff]  }
  0xd3   :  { %2103 = vmatpush1.bf16.msra.mxu0 %v5675_v31  ;;  %2185 = vmatpush1.bf16.msra.mxu1 %v5678_v32  ;;  %v5763_v31 = vld [vmem:[%s8099_s1 + $0x380] ss:$36 sps:$4 sm:$0xff]  }
  0xd4   :  { %2104 = vmatprep.subr.bf16.mxu0 %v5683_v33  ;;  %2186 = vmatprep.subr.bf16.mxu1 %v5686_v34  ;;  %v5764_v32 = vld [vmem:[%s8099_s1 + $0x800] ss:$36 sps:$4 sm:$0xff]  }
  0xd5   :  { %v5765_v33 = vld [vmem:[%s8099_s1 + $0x140] ss:$36 sps:$4 sm:$0xff]  }
  0xd6   :  { %v5766_v34 = vld [vmem:[%s8099_s1 + $0x5c0] ss:$36 sps:$4 sm:$0xff]  }
  0xd7   :  { %2105 = vmatpush1.bf16.msra.mxu0 %v5681_v35  ;;  %2187 = vmatpush1.bf16.msra.mxu1 %v5684_v36  ;;  %v5767_v35 = vld [vmem:[%s8099_s1 + $0x3c8] ss:$36 sps:$4 sm:$0xff]  }
  0xd8   :  { %2106 = vmatprep.subr.bf16.mxu0 %v5689_v37  ;;  %2188 = vmatprep.subr.bf16.mxu1 %v5692_v38  ;;  %v5768_v36 = vld [vmem:[%s8099_s1 + $0x848] ss:$36 sps:$4 sm:$0xff]  }
  0xd9   :  { %v5769_v37 = vld [vmem:[%s8099_s1 + $0x188] ss:$36 sps:$4 sm:$0xff]  }
  0xda   :  { %v5770_v38 = vld [vmem:[%s8099_s1 + $0x608] ss:$36 sps:$4 sm:$0xff]  }
  0xdb   :  { %2107 = vmatpush1.bf16.msra.mxu0 %v5687_v39  ;;  %2189 = vmatpush1.bf16.msra.mxu1 %v5690_v40  ;;  %v5771_v39 = vld [vmem:[%s8099_s1 + $0x410] ss:$36 sps:$4 sm:$0xff]  }
  0xdc   :  { %2108 = vmatprep.subr.bf16.mxu0 %v5695_v41  ;;  %2190 = vmatprep.subr.bf16.mxu1 %v5698_v42  ;;  %v5772_v40 = vld [vmem:[%s8099_s1 + $0x890] ss:$36 sps:$4 sm:$0xff]  }
  0xdd   :  { %v5773_v41 = vld [vmem:[%s8099_s1 + $0x1d0] ss:$36 sps:$4 sm:$0xff]  }
  0xde   :  { %v5774_v42 = vld [vmem:[%s8099_s1 + $0x650] ss:$36 sps:$4 sm:$0xff]  }
  0xdf   :  { %2109 = vmatpush1.bf16.msra.mxu0 %v5693_v43  ;;  %2191 = vmatpush1.bf16.msra.mxu1 %v5696_v44  ;;  %v5775_v43 = vld [vmem:[%s8099_s1 + $0x458] ss:$36 sps:$4 sm:$0xff]  }
  0xe0   :  { %2110 = vmatprep.subr.bf16.mxu0 %v5701_v45  ;;  %2192 = vmatprep.subr.bf16.mxu1 %v5704_v46  ;;  %v5776_v44 = vld [vmem:[%s8099_s1 + $0x8d8] ss:$36 sps:$4 sm:$0xff]  }
  0xe1   :  { %v5777_v45 = vld [vmem:[%s8099_s1 + $0x218] ss:$36 sps:$4 sm:$0xff]  }
  0xe2   :  { %v5778_v46 = vld [vmem:[%s8099_s1 + $0x698] ss:$36 sps:$4 sm:$0xff]  }
  0xe3   :  { %2111 = vmatpush1.bf16.msra.mxu0 %v5699_v47  ;;  %2193 = vmatpush1.bf16.msra.mxu1 %v5702_v49  ;;  %v5781_v47 = vld [vmem:[%s8101_s4 + $0x4] ss:$16 sps:$4 sm:$0xff]   ;;  %v5784_v49 = vld [vmem:[%s8101_s4 + $0xc] ss:$16 sps:$4 sm:$0xff]  }
  0xe4   :  { %2112 = vmatprep.subr.bf16.mxu0 %v5707_v50  ;;  %2194 = vmatprep.subr.bf16.mxu1 %v5710_v51  ;;  %v5779_v50 = vld [vmem:[%s8101_s4] ss:$16 sps:$4 sm:$0xff]   ;;  %v5782_v51 = vld [vmem:[%s8101_s4 + $0x8] ss:$16 sps:$4 sm:$0xff]  }
  0xe7   :  { %2113 = vmatpush1.bf16.msra.mxu0 %v5705_v52  ;;  %2195 = vmatpush1.bf16.msra.mxu1 %v5708_v53  ;;  %v5787_v52 = vld [vmem:[%s8101_s4 + $0x24] ss:$16 sps:$4 sm:$0xff]   ;;  %v5790_v53 = vld [vmem:[%s8101_s4 + $0x2c] ss:$16 sps:$4 sm:$0xff]  }
  0xe8   :  { %2114 = vmatprep.subr.bf16.mxu0 %v5713_v54  ;;  %2196 = vmatprep.subr.bf16.mxu1 %v5716_v55  ;;  %v5785_v54 = vld [vmem:[%s8101_s4 + $0x20] ss:$16 sps:$4 sm:$0xff]   ;;  %v5788_v55 = vld [vmem:[%s8101_s4 + $0x28] ss:$16 sps:$4 sm:$0xff]  }
  0xeb   :  { %2115 = vmatpush1.bf16.msra.mxu0 %v5711_v56  ;;  %2197 = vmatpush1.bf16.msra.mxu1 %v5714_v57  ;;  %v5793_v56 = vld [vmem:[%s8101_s4 + $0x44] ss:$16 sps:$4 sm:$0xff]   ;;  %v5794_v57 = vld [vmem:[%s8101_s4 + $0x48] ss:$16 sps:$4 sm:$0xff]  }
  0xec   :  { %2116 = vmatprep.subr.bf16.mxu0 %v5719_v58  ;;  %2198 = vmatprep.subr.bf16.mxu1 %v5722_v59  ;;  %v5799_v58 = vld [vmem:[%s8101_s4 + $0x64] ss:$16 sps:$4 sm:$0xff]   ;;  %v5802_v59 = vld [vmem:[%s8101_s4 + $0x6c] ss:$16 sps:$4 sm:$0xff]  }
  0xef   :  { %2117 = vmatpush1.bf16.msra.mxu0 %v5717_v60  ;;  %2199 = vmatpush1.bf16.msra.mxu1 %v5720_v61  ;;  %v5797_v60 = vld [vmem:[%s8101_s4 + $0x60] ss:$16 sps:$4 sm:$0xff]   ;;  %v5800_v61 = vld [vmem:[%s8101_s4 + $0x68] ss:$16 sps:$4 sm:$0xff]  }
  0xf0   :  { %2118 = vmatprep.subr.bf16.mxu0 %v5725_v62  ;;  %2200 = vmatprep.subr.bf16.mxu1 %v5728_v63  ;;  %v5805_v62 = vld [vmem:[%s8101_s4 + $0x84] ss:$16 sps:$4 sm:$0xff]   ;;  %v5808_v63 = vld [vmem:[%s8101_s4 + $0x8c] ss:$16 sps:$4 sm:$0xff]  }
  0xf3   :  { %2119 = vmatpush1.bf16.msra.mxu0 %v5723_v0  ;;  %2201 = vmatpush1.bf16.msra.mxu1 %v5726_v1  ;;  %v5803_v0 = vld [vmem:[%s8101_s4 + $0x80] ss:$16 sps:$4 sm:$0xff]   ;;  %v5806_v1 = vld [vmem:[%s8101_s4 + $0x88] ss:$16 sps:$4 sm:$0xff]  }
  0xf4   :  { %2120 = vmatprep.subr.bf16.mxu0 %v5731_v2  ;;  %2202 = vmatprep.subr.bf16.mxu1 %v5734_v3  ;;  %v5811_v2 = vld [vmem:[%s8101_s4 + $0xa4] ss:$16 sps:$4 sm:$0xff]   ;;  %v5814_v3 = vld [vmem:[%s8101_s4 + $0xac] ss:$16 sps:$4 sm:$0xff]  }
  0xf7   :  { %2121 = vmatpush1.bf16.msra.mxu0 %v5729_v4  ;;  %2203 = vmatpush1.bf16.msra.mxu1 %v5732_v6  ;;  %v5809_v4 = vld [vmem:[%s8101_s4 + $0xa0] ss:$16 sps:$4 sm:$0xff]   ;;  %v5812_v6 = vld [vmem:[%s8101_s4 + $0xa8] ss:$16 sps:$4 sm:$0xff]  }
  0xf8   :  { %2122 = vmatprep.subr.bf16.mxu0 %v5737_v7  ;;  %2204 = vmatprep.subr.bf16.mxu1 %v5740_v8  ;;  %v5817_v7 = vld [vmem:[%s8101_s4 + $0xc4] ss:$16 sps:$4 sm:$0xff]   ;;  %v5820_v8 = vld [vmem:[%s8101_s4 + $0xcc] ss:$16 sps:$4 sm:$0xff]  }
  0xfb   :  { %2123 = vmatpush1.bf16.msra.mxu0 %v5735_v10  ;;  %2205 = vmatpush1.bf16.msra.mxu1 %v5738_v11  ;;  %v5815_v10 = vld [vmem:[%s8101_s4 + $0xc0] ss:$16 sps:$4 sm:$0xff]   ;;  %v5818_v11 = vld [vmem:[%s8101_s4 + $0xc8] ss:$16 sps:$4 sm:$0xff]  }
  0xfc   :  { %2124 = vmatprep.subr.bf16.mxu0 %v5743_v12  ;;  %2206 = vmatprep.subr.bf16.mxu1 %v5746_v13  ;;  %v5823_v12 = vld [vmem:[%s8101_s4 + $0xe4] ss:$16 sps:$4 sm:$0xff]   ;;  %v5826_v13 = vld [vmem:[%s8101_s4 + $0xec] ss:$16 sps:$4 sm:$0xff]  }
  0xff   :  { %2125 = vmatpush1.bf16.msra.mxu0 %v5741_v14  ;;  %2207 = vmatpush1.bf16.msra.mxu1 %v5744_v15  ;;  %v5821_v14 = vld [vmem:[%s8101_s4 + $0xe0] ss:$16 sps:$4 sm:$0xff]   ;;  %v5824_v15 = vld [vmem:[%s8101_s4 + $0xe8] ss:$16 sps:$4 sm:$0xff]  }
 0x100   :  { %5219 = vmatprep.subr.bf16.mxu0 %v5747_v16  ;;  %5241 = vmatprep.subr.bf16.mxu1 %v5748_v17  ;;  %v5829_v16 = vld [vmem:[%s8101_s4 + $0x104] ss:$16 sps:$4 sm:$0xff]   ;;  %v5832_v17 = vld [vmem:[%s8101_s4 + $0x10c] ss:$16 sps:$4 sm:$0xff]  }
 0x102   :  { %2127 = vmatmul.mubr.bf16.vlgmr.msra.gmra.mrb[4].mxu0 %v6661_v9  ;;  %2209 = vmatmul.mubr.bf16.vlgmr.msra.gmra.mrb[4].mxu1 %v6661_v9 }
 0x103   :  { %5220 = vmatpush3.bf16.msra.mxu0 %v5749_v18  ;;  %5242 = vmatpush3.bf16.msra.mxu1 %v5750_v19  ;;  %v5827_v18 = vld [vmem:[%s8101_s4 + $0x100] ss:$16 sps:$4 sm:$0xff]   ;;  %v5830_v19 = vld [vmem:[%s8101_s4 + $0x108] ss:$16 sps:$4 sm:$0xff]  }
 0x104   :  { %5221 = vmatprep.subr.bf16.mxu0 %v5751_v20  ;;  %5243 = vmatprep.subr.bf16.mxu1 %v5752_v21  ;;  %v5835_v20 = vld [vmem:[%s8101_s4 + $0x124] ss:$16 sps:$4 sm:$0xff]   ;;  %v5838_v21 = vld [vmem:[%s8101_s4 + $0x12c] ss:$16 sps:$4 sm:$0xff]  }
 0x105   :  { %2249 = vmatprep.mubr.bf16.mxu0 %v6391_v48  ;;  %2289 = vmatprep.mubr.bf16.mxu1 %v6535_v30  ;;  %v5760_v48 = vld [vmem:[%s8099_s1 + $0x7b8] ss:$36 sps:$4 sm:$0xff]  }
 0x106   :  { %v5761_v30 = vld [vmem:[%s8099_s1 + $0xf8] ss:$36 sps:$4 sm:$0xff]  }
 0x107   :  { %5222 = vmatpush3.bf16.msra.mxu0 %v5753_v22  ;;  %5244 = vmatpush3.bf16.msra.mxu1 %v5754_v23  ;;  %v5833_v22 = vld [vmem:[%s8101_s4 + $0x120] ss:$16 sps:$4 sm:$0xff]   ;;  %v5836_v23 = vld [vmem:[%s8101_s4 + $0x128] ss:$16 sps:$4 sm:$0xff]  }
 0x108   :  { %5223 = vmatprep.subr.bf16.mxu0 %v5755_v24  ;;  %5245 = vmatprep.subr.bf16.mxu1 %v5756_v25  ;;  %v5841_v24 = vld [vmem:[%s8101_s4 + $0x144] ss:$16 sps:$4 sm:$0xff]   ;;  %v5844_v25 = vld [vmem:[%s8101_s4 + $0x14c] ss:$16 sps:$4 sm:$0xff]  }
 0x10b   :  { %5224 = vmatpush3.bf16.msra.mxu0 %v5757_v26  ;;  %5246 = vmatpush3.bf16.msra.mxu1 %v5758_v27  ;;  %v5839_v26 = vld [vmem:[%s8101_s4 + $0x140] ss:$16 sps:$4 sm:$0xff]   ;;  %v5842_v27 = vld [vmem:[%s8101_s4 + $0x148] ss:$16 sps:$4 sm:$0xff]  }
 0x10c   :  { %5225 = vmatprep.subr.bf16.mxu0 %v5759_v28  ;;  %5247 = vmatprep.subr.bf16.mxu1 %v5760_v48  ;;  %v358_v28 = vlaneseq  ;;  %v5847_v48 = vld [vmem:[%s8101_s4 + $0x164] ss:$16 sps:$4 sm:$0xff]  }
 0x10f   :  { %5226 = vmatpush3.bf16.msra.mxu0 %v5761_v30  ;;  %5248 = vmatpush3.bf16.msra.mxu1 %v5762_v29  ;;  %v5850_v30 = vld [vmem:[%s8101_s4 + $0x16c] ss:$16 sps:$4 sm:$0xff]   ;;  %v5845_v29 = vld [vmem:[%s8101_s4 + $0x160] ss:$16 sps:$4 sm:$0xff]  }
 0x110   :  { %5227 = vmatprep.subr.bf16.mxu0 %v5763_v31  ;;  %5249 = vmatprep.subr.bf16.mxu1 %v5764_v32  ;;  %v5848_v31 = vld [vmem:[%s8101_s4 + $0x168] ss:$16 sps:$4 sm:$0xff]   ;;  %v7295_v32 = vshrl.u32 %v358_v28, 7 }
 0x111   :  { %v5890_v28 = vld [vmem:[%s8101_s4 + $0x248] ss:$16 sps:$4 sm:$0xff]  }
 0x113   :  { %5228 = vmatpush3.bf16.msra.mxu0 %v5765_v33  ;;  %5250 = vmatpush3.bf16.msra.mxu1 %v5766_v34  ;;  %v5853_v33 = vld [vmem:[%s8101_s4 + $0x184] ss:$16 sps:$4 sm:$0xff]   ;;  %v5856_v34 = vld [vmem:[%s8101_s4 + $0x18c] ss:$16 sps:$4 sm:$0xff]  }
 0x114   :  { %5229 = vmatprep.subr.bf16.mxu0 %v5767_v35  ;;  %5251 = vmatprep.subr.bf16.mxu1 %v5768_v36  ;;  %v5851_v35 = vld [vmem:[%s8101_s4 + $0x180] ss:$16 sps:$4 sm:$0xff]   ;;  %v5854_v36 = vld [vmem:[%s8101_s4 + $0x188] ss:$16 sps:$4 sm:$0xff]  }
 0x117   :  { %5230 = vmatpush3.bf16.msra.mxu0 %v5769_v37  ;;  %5252 = vmatpush3.bf16.msra.mxu1 %v5770_v38  ;;  %v7312_v37 = vld [vmem:[%s8102_s2] sm:$0xff]  ;;  %v7315_v38 = vsub.s32 0, %v7295_v32 }
 0x118   :  { %5231 = vmatprep.subr.bf16.mxu0 %v5771_v39  ;;  %5253 = vmatprep.subr.bf16.mxu1 %v5772_v40  ;;  %v7318_v39 = vsub.s32 1, %v7295_v32  ;;  %v7321_v40 = vsub.s32 3, %v7295_v32 }
 0x11b   :  { %5232 = vmatpush3.bf16.msra.mxu0 %v5773_v41  ;;  %5254 = vmatpush3.bf16.msra.mxu1 %v5774_v42  ;;  %v7326_v41 = vld [vmem:[%s8103_s3] sm:$0xff] }
 0x11c   :  { %5233 = vmatprep.subr.bf16.mxu0 %v5775_v43  ;;  %5255 = vmatprep.subr.bf16.mxu1 %v5776_v44  ;;  %v5859_v42 = vld [vmem:[%s8101_s4 + $0x1a4] ss:$16 sps:$4 sm:$0xff]   ;;  %v5862_v43 = vld [vmem:[%s8101_s4 + $0x1ac] ss:$16 sps:$4 sm:$0xff]   ;;  %v5857_v44 = vld [vmem:[%s8101_s4 + $0x1a0] ss:$16 sps:$4 sm:$0xff]  }
 0x11f   :  { %5234 = vmatpush3.bf16.msra.mxu0 %v5777_v45  ;;  %5256 = vmatpush3.bf16.msra.mxu1 %v5778_v46  ;;  %v5860_v45 = vld [vmem:[%s8101_s4 + $0x1a8] ss:$16 sps:$4 sm:$0xff]   ;;  %v361_v46 = vrot.slane %v7312_v37, %v7315_v38 }
 0x120   :  { %3940 = vmatprep.subr.bf16.mxu0 %v5781_v47  ;;  %4104 = vmatprep.subr.bf16.mxu1 %v5784_v49  ;;  %v5865_v47 = vld [vmem:[%s8101_s4 + $0x1c4] ss:$16 sps:$4 sm:$0xff]   ;;  %v5868_v49 = vld [vmem:[%s8101_s4 + $0x1cc] ss:$16 sps:$4 sm:$0xff]  }
 0x122   :  { %2250 = vmatmul.mubr.bf16.vlgmr.msra.gmra.mrb[8].mxu0 %v6455_v5  ;;  %2290 = vmatmul.mubr.bf16.vlgmr.msra.gmra.mrb[8].mxu1 %v6661_v9  ;;  %v5796_v5 = vld [vmem:[%s8101_s4 + $0x4c] ss:$16 sps:$4 sm:$0xff]   ;;  %v5791_v9 = vld [vmem:[%s8101_s4 + $0x40] ss:$16 sps:$4 sm:$0xff]  }
 0x123   :  { %3941 = vmatpush1.bf16.msra.mxu0 %v5779_v50  ;;  %4105 = vmatpush1.bf16.msra.mxu1 %v5782_v51  ;;  %v365_v50 = vrot.slane %v7312_v37, %v7318_v39  ;;  %v373_v51 = vrot.slane %v7312_v37, %v7321_v40 }
 0x124   :  { %3942 = vmatprep.subr.bf16.mxu0 %v5787_v52  ;;  %4106 = vmatprep.subr.bf16.mxu1 %v5790_v53  ;;  %v2313_v53 = vrot.slane %v7326_v41, %v7315_v38 }
 0x127   :  { %3943 = vmatpush1.bf16.msra.mxu0 %v5785_v54  ;;  %4107 = vmatpush1.bf16.msra.mxu1 %v5788_v55  ;;  %v2317_v55 = vrot.slane %v7326_v41, %v7318_v39 }
 0x128   :  { %3944 = vmatprep.subr.bf16.mxu0 %v5793_v56  ;;  %4108 = vmatprep.subr.bf16.mxu1 %v5796_v5  ;;  %v5863_v56 = vld [vmem:[%s8101_s4 + $0x1c0] ss:$16 sps:$4 sm:$0xff]  }
 0x12b   :  { %3945 = vmatpush1.bf16.msra.mxu0 %v5791_v9  ;;  %4109 = vmatpush1.bf16.msra.mxu1 %v5794_v57 }
 0x12c   :  { %3946 = vmatprep.subr.bf16.mxu0 %v5799_v58  ;;  %4110 = vmatprep.subr.bf16.mxu1 %v5802_v59  ;;  %v2325_v58 = vrot.slane %v7326_v41, %v7321_v40  ;;  %v5866_v59 = vld [vmem:[%s8101_s4 + $0x1c8] ss:$16 sps:$4 sm:$0xff]  }
 0x12f   :  { %3947 = vmatpush1.bf16.msra.mxu0 %v5797_v60  ;;  %4111 = vmatpush1.bf16.msra.mxu1 %v5800_v61  ;;  %v5871_v60 = vld [vmem:[%s8101_s4 + $0x1e4] ss:$16 sps:$4 sm:$0xff]  }
 0x130   :  { %3948 = vmatprep.subr.bf16.mxu0 %v5805_v62  ;;  %4112 = vmatprep.subr.bf16.mxu1 %v5808_v63 }
 0x133   :  { %3949 = vmatpush1.bf16.msra.mxu0 %v5803_v0  ;;  %4113 = vmatpush1.bf16.msra.mxu1 %v5806_v1 }
 0x134   :  { %3950 = vmatprep.subr.bf16.mxu0 %v5811_v2  ;;  %4114 = vmatprep.subr.bf16.mxu1 %v5814_v3  ;;  %v5874_v3 = vld [vmem:[%s8101_s4 + $0x1ec] ss:$16 sps:$4 sm:$0xff]  }
 0x137   :  { %3951 = vmatpush1.bf16.msra.mxu0 %v5809_v4  ;;  %4115 = vmatpush1.bf16.msra.mxu1 %v5812_v6 }
 0x138   :  { %3952 = vmatprep.subr.bf16.mxu0 %v5817_v7  ;;  %4116 = vmatprep.subr.bf16.mxu1 %v5820_v8  ;;  %v5869_v8 = vld [vmem:[%s8101_s4 + $0x1e0] ss:$16 sps:$4 sm:$0xff]  }
 0x13b   :  { %3953 = vmatpush1.bf16.msra.mxu0 %v5815_v10  ;;  %4117 = vmatpush1.bf16.msra.mxu1 %v5818_v11  ;;  %v5872_v10 = vld [vmem:[%s8101_s4 + $0x1e8] ss:$16 sps:$4 sm:$0xff]  }
 0x13c   :  { %3954 = vmatprep.subr.bf16.mxu0 %v5823_v12  ;;  %4118 = vmatprep.subr.bf16.mxu1 %v5826_v13  ;;  %v5877_v13 = vld [vmem:[%s8101_s4 + $0x204] ss:$16 sps:$4 sm:$0xff]  }
 0x13f   :  { %3955 = vmatpush1.bf16.msra.mxu0 %v5821_v14  ;;  %4119 = vmatpush1.bf16.msra.mxu1 %v5824_v15  ;;  %v5880_v14 = vld [vmem:[%s8101_s4 + $0x20c] ss:$16 sps:$4 sm:$0xff]  }
 0x140   :  { %3956 = vmatprep.subr.bf16.mxu0 %v5829_v16  ;;  %4120 = vmatprep.subr.bf16.mxu1 %v5832_v17  ;;  %v5875_v16 = vld [vmem:[%s8101_s4 + $0x200] ss:$16 sps:$4 sm:$0xff]   ;;  %v5878_v17 = vld [vmem:[%s8101_s4 + $0x208] ss:$16 sps:$4 sm:$0xff]  }
 0x143   :  { %3957 = vmatpush1.bf16.msra.mxu0 %v5827_v18  ;;  %4121 = vmatpush1.bf16.msra.mxu1 %v5830_v19 }
 0x144   :  { %3958 = vmatprep.subr.bf16.mxu0 %v5835_v20  ;;  %4122 = vmatprep.subr.bf16.mxu1 %v5838_v21  ;;  %v5883_v21 = vld [vmem:[%s8101_s4 + $0x224] ss:$16 sps:$4 sm:$0xff]  }
 0x147   :  { %3959 = vmatpush1.bf16.msra.mxu0 %v5833_v22  ;;  %4123 = vmatpush1.bf16.msra.mxu1 %v5836_v23  ;;  %v5886_v22 = vld [vmem:[%s8101_s4 + $0x22c] ss:$16 sps:$4 sm:$0xff]   ;;  %v5881_v23 = vld [vmem:[%s8101_s4 + $0x220] ss:$16 sps:$4 sm:$0xff]  }
 0x148   :  { %3960 = vmatprep.subr.bf16.mxu0 %v5841_v24  ;;  %4124 = vmatprep.subr.bf16.mxu1 %v5844_v25  ;;  %v5884_v24 = vld [vmem:[%s8101_s4 + $0x228] ss:$16 sps:$4 sm:$0xff]   ;;  %v5889_v25 = vld [vmem:[%s8101_s4 + $0x244] ss:$16 sps:$4 sm:$0xff]  }
 0x14b   :  { %3961 = vmatpush1.bf16.msra.mxu0 %v5839_v26  ;;  %4125 = vmatpush1.bf16.msra.mxu1 %v5842_v27  ;;  %v5892_v26 = vld [vmem:[%s8101_s4 + $0x24c] ss:$16 sps:$4 sm:$0xff]   ;;  %v5887_v27 = vld [vmem:[%s8101_s4 + $0x240] ss:$16 sps:$4 sm:$0xff]  }
 0x14c   :  { %3962 = vmatprep.subr.bf16.mxu0 %v5847_v48  ;;  %4126 = vmatprep.subr.bf16.mxu1 %v5850_v30  ;;  %v5895_v48 = vld [vmem:[%s8101_s4 + $0x264] ss:$16 sps:$4 sm:$0xff]   ;;  %v5898_v30 = vld [vmem:[%s8101_s4 + $0x26c] ss:$16 sps:$4 sm:$0xff]  }
 0x14f   :  { %3963 = vmatpush1.bf16.msra.mxu0 %v5845_v29  ;;  %4127 = vmatpush1.bf16.msra.mxu1 %v5848_v31  ;;  %v5893_v29 = vld [vmem:[%s8101_s4 + $0x260] ss:$16 sps:$4 sm:$0xff]   ;;  %v5896_v31 = vld [vmem:[%s8101_s4 + $0x268] ss:$16 sps:$4 sm:$0xff]  }
 0x150   :  { %3964 = vmatprep.subr.bf16.mxu0 %v5853_v33  ;;  %4128 = vmatprep.subr.bf16.mxu1 %v5856_v34  ;;  %v5901_v33 = vld [vmem:[%s8101_s4 + $0x284] ss:$16 sps:$4 sm:$0xff]   ;;  %v5904_v34 = vld [vmem:[%s8101_s4 + $0x28c] ss:$16 sps:$4 sm:$0xff]  }
 0x153   :  { %3965 = vmatpush1.bf16.msra.mxu0 %v5851_v35  ;;  %4129 = vmatpush1.bf16.msra.mxu1 %v5854_v36  ;;  %v5899_v35 = vld [vmem:[%s8101_s4 + $0x280] ss:$16 sps:$4 sm:$0xff]   ;;  %v5902_v36 = vld [vmem:[%s8101_s4 + $0x288] ss:$16 sps:$4 sm:$0xff]  }
 0x154   :  { %3966 = vmatprep.subr.bf16.mxu0 %v5859_v42  ;;  %4130 = vmatprep.subr.bf16.mxu1 %v5862_v43  ;;  %v5907_v42 = vld [vmem:[%s8101_s4 + $0x2a4] ss:$16 sps:$4 sm:$0xff]   ;;  %v5910_v43 = vld [vmem:[%s8101_s4 + $0x2ac] ss:$16 sps:$4 sm:$0xff]  }
 0x155   :  { %v1964_v52 = vpop.f32.mrb[0].mxu0  ;;  %v7354_v54 = vpop.f32.mrb[0].mxu1 }
 0x156   :  { %v5307_v5 = vadd.f32 %v1964_v52, %v361_v46  ;;  %v1966_v9 = vpop.f32.mrb[1].mxu0  ;;  %v2048_v57 = vpop.f32.mrb[1].mxu1  ;;  %v5913_v46 = vld [vmem:[%s8101_s4 + $0x2c4] ss:$16 sps:$4 sm:$0xff]   ;;  %v5922_v52 = vld [vmem:[%s8101_s4 + $0x2ec] ss:$16 sps:$4 sm:$0xff]  }
 0x157   :  { %v5308_v61 = vadd.f32 %v1966_v9, %v365_v50  ;;  %v5310_v62 = vadd.f32 %v2048_v57, %v373_v51  ;;  %v1968_v63 = vpop.f32.mrb[2].mxu0  ;;  %v2050_v0 = vpop.f32.mrb[2].mxu1  ;;  %3967 = vmatpush1.bf16.msra.mxu0 %v5857_v44  ;;  %4131 = vmatpush1.bf16.msra.mxu1 %v5860_v45  ;;  %v5905_v44 = vld [vmem:[%s8101_s4 + $0x2a0] ss:$16 sps:$4 sm:$0xff]   ;;  %v5908_v45 = vld [vmem:[%s8101_s4 + $0x2a8] ss:$16 sps:$4 sm:$0xff]  }
 0x158   :  { %v1969_v1 = vpop.f32.mrb[3].mxu0  ;;  %v2051_v2 = vpop.f32.mrb[3].mxu1  ;;  %3968 = vmatprep.subr.bf16.mxu0 %v5865_v47  ;;  %4132 = vmatprep.subr.bf16.mxu1 %v5868_v49  ;;  %v2355_v4 = vmul.f32 %v5307_v5, %v2313_v53  ;;  %vm2297_vm1 = vcmp.ge.f32.partialorder %v5307_v5, 0.0  ;;  %v5916_v47 = vld [vmem:[%s8101_s4 + $0x2cc] ss:$16 sps:$4 sm:$0xff]  }
 0x159   :  { %vm2298_vm0 = vcmp.ge.f32.partialorder %v5308_v61, 0.0  ;;  %v2356_v6 = vmul.f32 %v5308_v61, %v2317_v55  ;;  %v2358_v7 = vmul.f32 %v5310_v62, %v2325_v58  ;;  %vm2300_vm2 = vcmp.ge.f32.partialorder %v5310_v62, 0.0  ;;  %v5911_v49 = vld [vmem:[%s8101_s4 + $0x2c0] ss:$16 sps:$4 sm:$0xff]   ;;  %v5914_v50 = vld [vmem:[%s8101_s4 + $0x2c8] ss:$16 sps:$4 sm:$0xff]  }
 0x15a   :  { %v2364_v15 = vsel %vm2297_vm1, %v5307_v5, %v2355_v4  ;;  %v5919_v51 = vld [vmem:[%s8101_s4 + $0x2e4] ss:$16 sps:$4 sm:$0xff]   ;;  %v5917_v53 = vld [vmem:[%s8101_s4 + $0x2e0] ss:$16 sps:$4 sm:$0xff]   ;;  %v5920_v55 = vld [vmem:[%s8101_s4 + $0x2e8] ss:$16 sps:$4 sm:$0xff]  }
 0x15b   :  { %3969 = vmatpush1.bf16.msra.mxu0 %v5863_v56  ;;  %4133 = vmatpush1.bf16.msra.mxu1 %v5866_v59  ;;  %v2365_v11 = vsel %vm2298_vm0, %v5308_v61, %v2356_v6  ;;  %v2367_v18 = vsel %vm2300_vm2, %v5310_v62, %v2358_v7  ;;  %v2374_v19 = vpack.c.bf16 %v2364_v15, %v2364_v15  ;;  %v5925_v56 = vld [vmem:[%s8101_s4 + $0x304] ss:$16 sps:$4 sm:$0xff]   ;;  %v5928_v5 = vld [vmem:[%s8101_s4 + $0x30c] ss:$16 sps:$4 sm:$0xff]   ;;  %v5923_v9 = vld [vmem:[%s8101_s4 + $0x300] ss:$16 sps:$4 sm:$0xff]  }
 0x15c   :  { %3970 = vmatprep.subr.bf16.mxu0 %v5871_v60  ;;  %v2375_v12 = vpack.c.bf16 %v2365_v11, %v2365_v11  ;;  %4134 = vmatprep.subr.bf16.mxu1 %v5874_v3  ;;  %v2377_v20 = vpack.c.bf16 %v2367_v18, %v2367_v18  ;;  %v5926_v57 = vld [vmem:[%s8101_s4 + $0x308] ss:$16 sps:$4 sm:$0xff]   ;;  %v5931_v58 = vld [vmem:[%s8101_s4 + $0x324] ss:$16 sps:$4 sm:$0xff]   ;;  %v5934_v59 = vld [vmem:[%s8101_s4 + $0x32c] ss:$16 sps:$4 sm:$0xff]  }
 0x15d   :  { %v5929_v60 = vld [vmem:[%s8101_s4 + $0x320] ss:$16 sps:$4 sm:$0xff]   ;;  %v5932_v61 = vld [vmem:[%s8101_s4 + $0x328] ss:$16 sps:$4 sm:$0xff]   ;;  %v5937_v62 = vld [vmem:[%s8101_s4 + $0x344] ss:$16 sps:$4 sm:$0xff]  }
 0x15e   :  { %3972 = vmatprep.mubr.bf16.mxu0 %v2375_v12  ;;  %4136 = vmatprep.mubr.bf16.mxu1 %v2375_v12  ;;  %v5940_v63 = vld [vmem:[%s8101_s4 + $0x34c] ss:$16 sps:$4 sm:$0xff]   ;;  %v5935_v0 = vld [vmem:[%s8101_s4 + $0x340] ss:$16 sps:$4 sm:$0xff]   ;;  %v5938_v1 = vld [vmem:[%s8101_s4 + $0x348] ss:$16 sps:$4 sm:$0xff]  }
 0x15f   :  { %3971 = vmatpush1.bf16.msra.mxu0 %v5869_v8  ;;  %4135 = vmatpush1.bf16.msra.mxu1 %v5872_v10  ;;  %v5943_v2 = vld [vmem:[%s8101_s4 + $0x364] ss:$16 sps:$4 sm:$0xff]   ;;  %v5946_v3 = vld [vmem:[%s8101_s4 + $0x36c] ss:$16 sps:$4 sm:$0xff]   ;;  %v5941_v4 = vld [vmem:[%s8101_s4 + $0x360] ss:$16 sps:$4 sm:$0xff]  }
 0x160   :  { %3981 = vmatprep.subr.bf16.mxu0 %v5877_v13  ;;  %4145 = vmatprep.subr.bf16.mxu1 %v5880_v14  ;;  %v5944_v6 = vld [vmem:[%s8101_s4 + $0x368] ss:$16 sps:$4 sm:$0xff]   ;;  %v5949_v7 = vld [vmem:[%s8101_s4 + $0x384] ss:$16 sps:$4 sm:$0xff]   ;;  %v7526_v8 = vsub.s32 2, %v7295_v32 }
 0x161   :  { %v5952_v10 = vld [vmem:[%s8101_s4 + $0x38c] ss:$16 sps:$4 sm:$0xff]   ;;  %v5947_v11 = vld [vmem:[%s8101_s4 + $0x380] ss:$16 sps:$4 sm:$0xff]   ;;  %v5950_v12 = vld [vmem:[%s8101_s4 + $0x388] ss:$16 sps:$4 sm:$0xff]  }
 0x162   :  { %3973 = vmatmul.mubr.bf16.vlgmr.msra.gmra.mrb[12].mxu0 %v2374_v19  ;;  %4137 = vmatmul.mubr.bf16.vlgmr.msra.gmra.mrb[12].mxu1 %v2374_v19  ;;  %v5955_v13 = vld [vmem:[%s8101_s4 + $0x3a4] ss:$16 sps:$4 sm:$0xff]   ;;  %v369_v14 = vrot.slane %v7312_v37, %v7526_v8  ;;  %v5958_v15 = vld [vmem:[%s8101_s4 + $0x3ac] ss:$16 sps:$4 sm:$0xff]  }
 0x163   :  { %3982 = vmatpush1.bf16.msra.mxu0 %v5875_v16  ;;  %4013 = vmatprep.mubr.bf16.mxu0 %v2377_v20  ;;  %v5953_v16 = vld [vmem:[%s8101_s4 + $0x3a0] ss:$16 sps:$4 sm:$0xff]   ;;  %v5961_v18 = vld [vmem:[%s8101_s4 + $0x3c4] ss:$16 sps:$4 sm:$0xff]  }
 0x164   :  { %4146 = vmatpush1.bf16.msra.mxu1 %v5878_v17  ;;  %4177 = vmatprep.mubr.bf16.mxu1 %v2377_v20  ;;  %v5956_v17 = vld [vmem:[%s8101_s4 + $0x3a8] ss:$16 sps:$4 sm:$0xff]   ;;  %v5309_v19 = vadd.f32 %v7354_v54, %v369_v14  ;;  %v2321_v20 = vrot.slane %v7326_v41, %v7526_v8  ;;  %v5967_v54 = vld [vmem:[%s8101_s4 + $0x3e4] ss:$16 sps:$4 sm:$0xff]  }
 0x165   :  { %3983 = vmatprep.subr.bf16.mxu0 %v5883_v21  ;;  %4147 = vmatprep.subr.bf16.mxu1 %v5886_v22  ;;  %v5964_v21 = vld [vmem:[%s8101_s4 + $0x3cc] ss:$16 sps:$4 sm:$0xff]   ;;  %v5959_v22 = vld [vmem:[%s8101_s4 + $0x3c0] ss:$16 sps:$4 sm:$0xff]   ;;  %v6033_v14 = vld [vmem:[%s8101_s4 + $0x544] ss:$16 sps:$4 sm:$0xff]  }
 0x166   :  { %vm2299_vm3 = vcmp.ge.f32.partialorder %v5309_v19, 0.0 }
 0x167   :  { %3984 = vmatpush1.bf16.msra.mxu0 %v5881_v23  ;;  %v5962_v23 = vld [vmem:[%s8101_s4 + $0x3c8] ss:$16 sps:$4 sm:$0xff]  }
 0x168   :  { %4148 = vmatpush1.bf16.msra.mxu1 %v5884_v24  ;;  %3985 = vmatprep.subr.bf16.mxu0 %v5889_v25  ;;  %v2357_v24 = vmul.f32 %v5309_v19, %v2321_v20  ;;  %v5970_v25 = vld [vmem:[%s8101_s4 + $0x3ec] ss:$16 sps:$4 sm:$0xff]   ;;  %v6037_v20 = vld [vmem:[%s8101_s4 + $0x560] ss:$16 sps:$4 sm:$0xff]  }
 0x169   :  { %4149 = vmatprep.subr.bf16.mxu1 %v5892_v26  ;;  %v5965_v26 = vld [vmem:[%s8101_s4 + $0x3e0] ss:$16 sps:$4 sm:$0xff]  }
 0x16b   :  { %3986 = vmatpush1.bf16.msra.mxu0 %v5887_v27  ;;  %v5968_v27 = vld [vmem:[%s8101_s4 + $0x3e8] ss:$16 sps:$4 sm:$0xff]  }
 0x16c   :  { %4150 = vmatpush1.bf16.msra.mxu1 %v5890_v28  ;;  %3987 = vmatprep.subr.bf16.mxu0 %v5895_v48  ;;  %v5973_v28 = vld [vmem:[%s8101_s4 + $0x404] ss:$16 sps:$4 sm:$0xff]   ;;  %v2366_v48 = vsel %vm2299_vm3, %v5309_v19, %v2357_v24  ;;  %v6042_v19 = vld [vmem:[%s8101_s4 + $0x56c] ss:$16 sps:$4 sm:$0xff]   ;;  %v6043_v24 = vld [vmem:[%s8101_s4 + $0x580] ss:$16 sps:$4 sm:$0xff]  }
 0x16d   :  { %4151 = vmatprep.subr.bf16.mxu1 %v5898_v30  ;;  %v5976_v30 = vld [vmem:[%s8101_s4 + $0x40c] ss:$16 sps:$4 sm:$0xff]  }
 0x16f   :  { %3988 = vmatpush1.bf16.msra.mxu0 %v5893_v29  ;;  %v5971_v29 = vld [vmem:[%s8101_s4 + $0x400] ss:$16 sps:$4 sm:$0xff]  }
 0x170   :  { %4152 = vmatpush1.bf16.msra.mxu1 %v5896_v31  ;;  %3989 = vmatprep.subr.bf16.mxu0 %v5901_v33  ;;  %v2376_v31 = vpack.c.bf16 %v2366_v48, %v2366_v48  ;;  %v5974_v33 = vld [vmem:[%s8101_s4 + $0x408] ss:$16 sps:$4 sm:$0xff]   ;;  %v6054_v48 = vld [vmem:[%s8101_s4 + $0x5ac] ss:$16 sps:$4 sm:$0xff]  }
 0x171   :  { %4153 = vmatprep.subr.bf16.mxu1 %v5904_v34  ;;  %v5979_v34 = vld [vmem:[%s8101_s4 + $0x424] ss:$16 sps:$4 sm:$0xff]  }
 0x173   :  { %3990 = vmatpush1.bf16.msra.mxu0 %v5899_v35  ;;  %v5982_v35 = vld [vmem:[%s8101_s4 + $0x42c] ss:$16 sps:$4 sm:$0xff]  }
 0x174   :  { %4154 = vmatpush1.bf16.msra.mxu1 %v5902_v36  ;;  %3991 = vmatprep.subr.bf16.mxu0 %v5907_v42  ;;  %v5977_v36 = vld [vmem:[%s8101_s4 + $0x420] ss:$16 sps:$4 sm:$0xff]   ;;  %v5980_v42 = vld [vmem:[%s8101_s4 + $0x428] ss:$16 sps:$4 sm:$0xff]  }
 0x175   :  { %4155 = vmatprep.subr.bf16.mxu1 %v5910_v43  ;;  %v5985_v43 = vld [vmem:[%s8101_s4 + $0x444] ss:$16 sps:$4 sm:$0xff]  }
 0x177   :  { %3992 = vmatpush1.bf16.msra.mxu0 %v5905_v44  ;;  %v5988_v44 = vld [vmem:[%s8101_s4 + $0x44c] ss:$16 sps:$4 sm:$0xff]  }
 0x178   :  { %4156 = vmatpush1.bf16.msra.mxu1 %v5908_v45  ;;  %3993 = vmatprep.subr.bf16.mxu0 %v5913_v46  ;;  %v5983_v45 = vld [vmem:[%s8101_s4 + $0x440] ss:$16 sps:$4 sm:$0xff]   ;;  %v5986_v46 = vld [vmem:[%s8101_s4 + $0x448] ss:$16 sps:$4 sm:$0xff]  }
 0x179   :  { %4157 = vmatprep.subr.bf16.mxu1 %v5916_v47  ;;  %v5991_v47 = vld [vmem:[%s8101_s4 + $0x464] ss:$16 sps:$4 sm:$0xff]  }
 0x17b   :  { %3994 = vmatpush1.bf16.msra.mxu0 %v5911_v49  ;;  %v5994_v49 = vld [vmem:[%s8101_s4 + $0x46c] ss:$16 sps:$4 sm:$0xff]  }
 0x17c   :  { %4158 = vmatpush1.bf16.msra.mxu1 %v5914_v50  ;;  %3995 = vmatprep.subr.bf16.mxu0 %v5919_v51  ;;  %v5989_v50 = vld [vmem:[%s8101_s4 + $0x460] ss:$16 sps:$4 sm:$0xff]   ;;  %v5992_v51 = vld [vmem:[%s8101_s4 + $0x468] ss:$16 sps:$4 sm:$0xff]  }
 0x17d   :  { %4159 = vmatprep.subr.bf16.mxu1 %v5922_v52  ;;  %v5997_v52 = vld [vmem:[%s8101_s4 + $0x484] ss:$16 sps:$4 sm:$0xff]  }
 0x17f   :  { %3996 = vmatpush1.bf16.msra.mxu0 %v5917_v53  ;;  %v6000_v53 = vld [vmem:[%s8101_s4 + $0x48c] ss:$16 sps:$4 sm:$0xff]  }
 0x180   :  { %4160 = vmatpush1.bf16.msra.mxu1 %v5920_v55  ;;  %3997 = vmatprep.subr.bf16.mxu0 %v5925_v56  ;;  %v5995_v55 = vld [vmem:[%s8101_s4 + $0x480] ss:$16 sps:$4 sm:$0xff]   ;;  %v5998_v56 = vld [vmem:[%s8101_s4 + $0x488] ss:$16 sps:$4 sm:$0xff]  }
 0x181   :  { %4161 = vmatprep.subr.bf16.mxu1 %v5928_v5  ;;  %v6003_v5 = vld [vmem:[%s8101_s4 + $0x4a4] ss:$16 sps:$4 sm:$0xff]  }
 0x183   :  { %3998 = vmatpush1.bf16.msra.mxu0 %v5923_v9  ;;  %v6006_v9 = vld [vmem:[%s8101_s4 + $0x4ac] ss:$16 sps:$4 sm:$0xff]  }
 0x184   :  { %4162 = vmatpush1.bf16.msra.mxu1 %v5926_v57  ;;  %3999 = vmatprep.subr.bf16.mxu0 %v5931_v58  ;;  %v6001_v57 = vld [vmem:[%s8101_s4 + $0x4a0] ss:$16 sps:$4 sm:$0xff]   ;;  %v6004_v58 = vld [vmem:[%s8101_s4 + $0x4a8] ss:$16 sps:$4 sm:$0xff]  }
 0x185   :  { %4163 = vmatprep.subr.bf16.mxu1 %v5934_v59  ;;  %v6009_v59 = vld [vmem:[%s8101_s4 + $0x4c4] ss:$16 sps:$4 sm:$0xff]  }
 0x187   :  { %4000 = vmatpush1.bf16.msra.mxu0 %v5929_v60  ;;  %v6012_v60 = vld [vmem:[%s8101_s4 + $0x4cc] ss:$16 sps:$4 sm:$0xff]  }
 0x188   :  { %4164 = vmatpush1.bf16.msra.mxu1 %v5932_v61  ;;  %4001 = vmatprep.subr.bf16.mxu0 %v5937_v62  ;;  %v6007_v61 = vld [vmem:[%s8101_s4 + $0x4c0] ss:$16 sps:$4 sm:$0xff]   ;;  %v6010_v62 = vld [vmem:[%s8101_s4 + $0x4c8] ss:$16 sps:$4 sm:$0xff]  }
 0x189   :  { %4165 = vmatprep.subr.bf16.mxu1 %v5940_v63  ;;  %v6015_v63 = vld [vmem:[%s8101_s4 + $0x4e4] ss:$16 sps:$4 sm:$0xff]  }
 0x18b   :  { %4002 = vmatpush1.bf16.msra.mxu0 %v5935_v0  ;;  %v6013_v0 = vld [vmem:[%s8101_s4 + $0x4e0] ss:$16 sps:$4 sm:$0xff]  }
 0x18c   :  { %4166 = vmatpush1.bf16.msra.mxu1 %v5938_v1  ;;  %4003 = vmatprep.subr.bf16.mxu0 %v5943_v2  ;;  %v6018_v1 = vld [vmem:[%s8101_s4 + $0x4ec] ss:$16 sps:$4 sm:$0xff]   ;;  %v6016_v2 = vld [vmem:[%s8101_s4 + $0x4e8] ss:$16 sps:$4 sm:$0xff]  }
 0x18d   :  { %4167 = vmatprep.subr.bf16.mxu1 %v5946_v3  ;;  %v6021_v3 = vld [vmem:[%s8101_s4 + $0x504] ss:$16 sps:$4 sm:$0xff]  }
 0x18f   :  { %4004 = vmatpush1.bf16.msra.mxu0 %v5941_v4  ;;  %v6024_v4 = vld [vmem:[%s8101_s4 + $0x50c] ss:$16 sps:$4 sm:$0xff]  }
 0x190   :  { %4168 = vmatpush1.bf16.msra.mxu1 %v5944_v6  ;;  %4005 = vmatprep.subr.bf16.mxu0 %v5949_v7  ;;  %v6019_v6 = vld [vmem:[%s8101_s4 + $0x500] ss:$16 sps:$4 sm:$0xff]   ;;  %v6022_v7 = vld [vmem:[%s8101_s4 + $0x508] ss:$16 sps:$4 sm:$0xff]  }
 0x191   :  { %4169 = vmatprep.subr.bf16.mxu1 %v5952_v10  ;;  %v6027_v10 = vld [vmem:[%s8101_s4 + $0x524] ss:$16 sps:$4 sm:$0xff]  }
 0x193   :  { %4006 = vmatpush1.bf16.msra.mxu0 %v5947_v11  ;;  %v6030_v11 = vld [vmem:[%s8101_s4 + $0x52c] ss:$16 sps:$4 sm:$0xff]  }
 0x194   :  { %4170 = vmatpush1.bf16.msra.mxu1 %v5950_v12  ;;  %4007 = vmatprep.subr.bf16.mxu0 %v5955_v13  ;;  %v6025_v12 = vld [vmem:[%s8101_s4 + $0x520] ss:$16 sps:$4 sm:$0xff]   ;;  %v6028_v13 = vld [vmem:[%s8101_s4 + $0x528] ss:$16 sps:$4 sm:$0xff]  }
 0x195   :  { %4171 = vmatprep.subr.bf16.mxu1 %v5958_v15  ;;  %v6036_v15 = vld [vmem:[%s8101_s4 + $0x54c] ss:$16 sps:$4 sm:$0xff]  }
 0x197   :  { %4008 = vmatpush1.bf16.msra.mxu0 %v5953_v16  ;;  %v6031_v16 = vld [vmem:[%s8101_s4 + $0x540] ss:$16 sps:$4 sm:$0xff]  }
 0x198   :  { %4172 = vmatpush1.bf16.msra.mxu1 %v5956_v17  ;;  %4009 = vmatprep.subr.bf16.mxu0 %v5961_v18  ;;  %v6034_v17 = vld [vmem:[%s8101_s4 + $0x548] ss:$16 sps:$4 sm:$0xff]   ;;  %v6039_v18 = vld [vmem:[%s8101_s4 + $0x564] ss:$16 sps:$4 sm:$0xff]  }
 0x199   :  { %4173 = vmatprep.subr.bf16.mxu1 %v5964_v21  ;;  %v6040_v21 = vld [vmem:[%s8101_s4 + $0x568] ss:$16 sps:$4 sm:$0xff]  }
 0x19b   :  { %4010 = vmatpush1.bf16.msra.mxu0 %v5959_v22  ;;  %v6045_v22 = vld [vmem:[%s8101_s4 + $0x584] ss:$16 sps:$4 sm:$0xff]  }
 0x19c   :  { %4174 = vmatpush1.bf16.msra.mxu1 %v5962_v23  ;;  %4011 = vmatprep.subr.bf16.mxu0 %v5967_v54  ;;  %v6048_v23 = vld [vmem:[%s8101_s4 + $0x58c] ss:$16 sps:$4 sm:$0xff]   ;;  %v376_v54 = vsub.s32 4, %v7295_v32 }
 0x19d   :  { %4175 = vmatprep.subr.bf16.mxu1 %v5970_v25  ;;  %v380_v25 = vsub.s32 5, %v7295_v32 }
 0x19f   :  { %4012 = vmatpush1.bf16.msra.mxu0 %v5965_v26  ;;  %v388_v26 = vsub.s32 7, %v7295_v32 }
 0x1a0   :  { %4176 = vmatpush1.bf16.msra.mxu1 %v5968_v27  ;;  %4022 = vmatprep.subr.bf16.mxu0 %v5973_v28  ;;  %v6046_v27 = vld [vmem:[%s8101_s4 + $0x588] ss:$16 sps:$4 sm:$0xff]   ;;  %v6051_v28 = vld [vmem:[%s8101_s4 + $0x5a4] ss:$16 sps:$4 sm:$0xff]  }
 0x1a1   :  { %4186 = vmatprep.subr.bf16.mxu1 %v5976_v30  ;;  %v377_v30 = vrot.slane %v7312_v37, %v376_v54 }
 0x1a2   :  { %4014 = vmatmul.mubr.bf16.vlgmr.msra.gmra.mrb[12].mxu0 %v2376_v31 }
 0x1a3   :  { %4178 = vmatmul.mubr.bf16.vlgmr.msra.gmra.mrb[12].mxu1 %v2376_v31  ;;  %4023 = vmatpush1.bf16.msra.mxu0 %v5971_v29  ;;  %v381_v29 = vrot.slane %v7312_v37, %v380_v25  ;;  %v389_v31 = vrot.slane %v7312_v37, %v388_v26  ;;  %v2333_v37 = vrot.slane %v7326_v41, %v380_v25  ;;  %v6091_v25 = vld [vmem:[%s8101_s4 + $0x680] ss:$16 sps:$4 sm:$0xff]  }
 0x1a4   :  { %4187 = vmatpush1.bf16.msra.mxu1 %v5974_v33  ;;  %4024 = vmatprep.subr.bf16.mxu0 %v5979_v34  ;;  %v6049_v33 = vld [vmem:[%s8101_s4 + $0x5a0] ss:$16 sps:$4 sm:$0xff]   ;;  %v6052_v34 = vld [vmem:[%s8101_s4 + $0x5a8] ss:$16 sps:$4 sm:$0xff]  }
 0x1a5   :  { %4188 = vmatprep.subr.bf16.mxu1 %v5982_v35  ;;  %v6057_v35 = vld [vmem:[%s8101_s4 + $0x5c4] ss:$16 sps:$4 sm:$0xff]  }
 0x1a7   :  { %4025 = vmatpush1.bf16.msra.mxu0 %v5977_v36 }
 0x1a8   :  { %4189 = vmatpush1.bf16.msra.mxu1 %v5980_v42  ;;  %4026 = vmatprep.subr.bf16.mxu0 %v5985_v43  ;;  %v2329_v42 = vrot.slane %v7326_v41, %v376_v54  ;;  %v6093_v54 = vld [vmem:[%s8101_s4 + $0x684] ss:$16 sps:$4 sm:$0xff]  }
 0x1a9   :  { %4190 = vmatprep.subr.bf16.mxu1 %v5988_v44  ;;  %v6060_v44 = vld [vmem:[%s8101_s4 + $0x5cc] ss:$16 sps:$4 sm:$0xff]  }
 0x1ab   :  { %4027 = vmatpush1.bf16.msra.mxu0 %v5983_v45 }
 0x1ac   :  { %4191 = vmatpush1.bf16.msra.mxu1 %v5986_v46  ;;  %4028 = vmatprep.subr.bf16.mxu0 %v5991_v47 }
 0x1ad   :  { %4192 = vmatprep.subr.bf16.mxu1 %v5994_v49 }
 0x1af   :  { %4029 = vmatpush1.bf16.msra.mxu0 %v5989_v50 }
 0x1b0   :  { %4193 = vmatpush1.bf16.msra.mxu1 %v5992_v51  ;;  %4030 = vmatprep.subr.bf16.mxu0 %v5997_v52  ;;  %v2341_v51 = vrot.slane %v7326_v41, %v388_v26  ;;  %v6094_v26 = vld [vmem:[%s8101_s4 + $0x688] ss:$16 sps:$4 sm:$0xff]  }
 0x1b1   :  { %4194 = vmatprep.subr.bf16.mxu1 %v6000_v53 }
 0x1b3   :  { %4031 = vmatpush1.bf16.msra.mxu0 %v5995_v55  ;;  %v6055_v55 = vld [vmem:[%s8101_s4 + $0x5c0] ss:$16 sps:$4 sm:$0xff]  }
 0x1b4   :  { %4195 = vmatpush1.bf16.msra.mxu1 %v5998_v56  ;;  %4032 = vmatprep.subr.bf16.mxu0 %v6003_v5 }
 0x1b5   :  { %4196 = vmatprep.subr.bf16.mxu1 %v6006_v9  ;;  %v6058_v9 = vld [vmem:[%s8101_s4 + $0x5c8] ss:$16 sps:$4 sm:$0xff]  }
 0x1b7   :  { %4033 = vmatpush1.bf16.msra.mxu0 %v6001_v57  ;;  %v6063_v57 = vld [vmem:[%s8101_s4 + $0x5e4] ss:$16 sps:$4 sm:$0xff]  }
 0x1b8   :  { %4197 = vmatpush1.bf16.msra.mxu1 %v6004_v58  ;;  %4034 = vmatprep.subr.bf16.mxu0 %v6009_v59  ;;  %v6066_v59 = vld [vmem:[%s8101_s4 + $0x5ec] ss:$16 sps:$4 sm:$0xff]  }
 0x1b9   :  { %4198 = vmatprep.subr.bf16.mxu1 %v6012_v60 }
 0x1bb   :  { %4035 = vmatpush1.bf16.msra.mxu0 %v6007_v61  ;;  %v6061_v61 = vld [vmem:[%s8101_s4 + $0x5e0] ss:$16 sps:$4 sm:$0xff]  }
 0x1bc   :  { %4199 = vmatpush1.bf16.msra.mxu1 %v6010_v62  ;;  %4036 = vmatprep.subr.bf16.mxu0 %v6015_v63 }
 0x1bd   :  { %4200 = vmatprep.subr.bf16.mxu1 %v6018_v1  ;;  %v6069_v1 = vld [vmem:[%s8101_s4 + $0x604] ss:$16 sps:$4 sm:$0xff]  }
 0x1bf   :  { %4037 = vmatpush1.bf16.msra.mxu0 %v6013_v0  ;;  %v6064_v0 = vld [vmem:[%s8101_s4 + $0x5e8] ss:$16 sps:$4 sm:$0xff]  }
 0x1c0   :  { %4201 = vmatpush1.bf16.msra.mxu1 %v6016_v2  ;;  %4038 = vmatprep.subr.bf16.mxu0 %v6021_v3  ;;  %v6072_v3 = vld [vmem:[%s8101_s4 + $0x60c] ss:$16 sps:$4 sm:$0xff]  }
 0x1c1   :  { %4202 = vmatprep.subr.bf16.mxu1 %v6024_v4  ;;  %v6067_v4 = vld [vmem:[%s8101_s4 + $0x600] ss:$16 sps:$4 sm:$0xff]  }
 0x1c3   :  { %4039 = vmatpush1.bf16.msra.mxu0 %v6019_v6 }
 0x1c4   :  { %4203 = vmatpush1.bf16.msra.mxu1 %v6022_v7  ;;  %4040 = vmatprep.subr.bf16.mxu0 %v6027_v10  ;;  %v6070_v10 = vld [vmem:[%s8101_s4 + $0x608] ss:$16 sps:$4 sm:$0xff]  }
 0x1c5   :  { %4204 = vmatprep.subr.bf16.mxu1 %v6030_v11  ;;  %v6075_v11 = vld [vmem:[%s8101_s4 + $0x624] ss:$16 sps:$4 sm:$0xff]  }
 0x1c7   :  { %4041 = vmatpush1.bf16.msra.mxu0 %v6025_v12 }
 0x1c8   :  { %4205 = vmatpush1.bf16.msra.mxu1 %v6028_v13  ;;  %4042 = vmatprep.subr.bf16.mxu0 %v6033_v14  ;;  %v6078_v13 = vld [vmem:[%s8101_s4 + $0x62c] ss:$16 sps:$4 sm:$0xff]   ;;  %v6073_v14 = vld [vmem:[%s8101_s4 + $0x620] ss:$16 sps:$4 sm:$0xff]  }
 0x1c9   :  { %4206 = vmatprep.subr.bf16.mxu1 %v6036_v15  ;;  %v6076_v15 = vld [vmem:[%s8101_s4 + $0x628] ss:$16 sps:$4 sm:$0xff]  }
 0x1cb   :  { %4043 = vmatpush1.bf16.msra.mxu0 %v6031_v16  ;;  %v6081_v16 = vld [vmem:[%s8101_s4 + $0x644] ss:$16 sps:$4 sm:$0xff]  }
 0x1cc   :  { %4207 = vmatpush1.bf16.msra.mxu1 %v6034_v17  ;;  %4044 = vmatprep.subr.bf16.mxu0 %v6039_v18  ;;  %v6084_v17 = vld [vmem:[%s8101_s4 + $0x64c] ss:$16 sps:$4 sm:$0xff]   ;;  %v6079_v18 = vld [vmem:[%s8101_s4 + $0x640] ss:$16 sps:$4 sm:$0xff]  }
 0x1cd   :  { %4208 = vmatprep.subr.bf16.mxu1 %v6042_v19  ;;  %v6082_v19 = vld [vmem:[%s8101_s4 + $0x648] ss:$16 sps:$4 sm:$0xff]  }
 0x1cf   :  { %4045 = vmatpush1.bf16.msra.mxu0 %v6037_v20  ;;  %v6087_v20 = vld [vmem:[%s8101_s4 + $0x664] ss:$16 sps:$4 sm:$0xff]  }
 0x1d0   :  { %4209 = vmatpush1.bf16.msra.mxu1 %v6040_v21  ;;  %4046 = vmatprep.subr.bf16.mxu0 %v6045_v22  ;;  %v6090_v21 = vld [vmem:[%s8101_s4 + $0x66c] ss:$16 sps:$4 sm:$0xff]   ;;  %v6085_v22 = vld [vmem:[%s8101_s4 + $0x660] ss:$16 sps:$4 sm:$0xff]  }
 0x1d1   :  { %4210 = vmatprep.subr.bf16.mxu1 %v6048_v23  ;;  %v6088_v23 = vld [vmem:[%s8101_s4 + $0x668] ss:$16 sps:$4 sm:$0xff]  }
 0x1d3   :  { %4047 = vmatpush1.bf16.msra.mxu0 %v6043_v24  ;;  %v6096_v24 = vld [vmem:[%s8101_s4 + $0x68c] ss:$16 sps:$4 sm:$0xff]  }
 0x1d4   :  { %4211 = vmatpush1.bf16.msra.mxu1 %v6046_v27  ;;  %4048 = vmatprep.subr.bf16.mxu0 %v6051_v28  ;;  %v6099_v27 = vld [vmem:[%s8101_s4 + $0x6a4] ss:$16 sps:$4 sm:$0xff]   ;;  %v6102_v28 = vld [vmem:[%s8101_s4 + $0x6ac] ss:$16 sps:$4 sm:$0xff]  }
 0x1d5   :  { %v2128_v36 = vpop.f32.mrb[4].mxu0  ;;  %v7756_v43 = vpop.f32.mrb[4].mxu1  ;;  %4212 = vmatprep.subr.bf16.mxu1 %v6054_v48  ;;  %v6097_v48 = vld [vmem:[%s8101_s4 + $0x6a0] ss:$16 sps:$4 sm:$0xff]  }
 0x1d6   :  { %v5311_v45 = vadd.f32 %v2128_v36, %v377_v30  ;;  %v2130_v46 = vpop.f32.mrb[5].mxu0  ;;  %v2212_v47 = vpop.f32.mrb[5].mxu1  ;;  %v6100_v30 = vld [vmem:[%s8101_s4 + $0x6a8] ss:$16 sps:$4 sm:$0xff]  }
 0x1d7   :  { %v5312_v49 = vadd.f32 %v2130_v46, %v381_v29  ;;  %v5314_v50 = vadd.f32 %v2212_v47, %v389_v31  ;;  %v2132_v52 = vpop.f32.mrb[6].mxu0  ;;  %v2214_v53 = vpop.f32.mrb[6].mxu1  ;;  %4049 = vmatpush1.bf16.msra.mxu0 %v6049_v33  ;;  %v6105_v29 = vld [vmem:[%s8101_s4 + $0x6c4] ss:$16 sps:$4 sm:$0xff]   ;;  %v6103_v47 = vld [vmem:[%s8101_s4 + $0x6c0] ss:$16 sps:$4 sm:$0xff]  }
 0x1d8   :  { %4213 = vmatpush1.bf16.msra.mxu1 %v6052_v34  ;;  %v2133_v56 = vpop.f32.mrb[7].mxu0  ;;  %v2215_v5 = vpop.f32.mrb[7].mxu1  ;;  %4050 = vmatprep.subr.bf16.mxu0 %v6057_v35  ;;  %v2359_v41 = vmul.f32 %v5311_v45, %v2329_v42  ;;  %vm2301_vm5 = vcmp.ge.f32.partialorder %v5311_v45, 0.0  ;;  %v6108_v34 = vld [vmem:[%s8101_s4 + $0x6cc] ss:$16 sps:$4 sm:$0xff]  }
 0x1d9   :  { %vm2302_vm4 = vcmp.ge.f32.partialorder %v5312_v49, 0.0  ;;  %v2360_v58 = vmul.f32 %v5312_v49, %v2333_v37  ;;  %4214 = vmatprep.subr.bf16.mxu1 %v6060_v44  ;;  %v2362_v60 = vmul.f32 %v5314_v50, %v2341_v51  ;;  %vm2304_vm6 = vcmp.ge.f32.partialorder %v5314_v50, 0.0  ;;  %v4636_v35 = vld [vmem:[%s8102_s2 + $0x8] ss:$0 sm:$0xff]  ;;  %v6111_v52 = vld [vmem:[%s8101_s4 + $0x6e4] ss:$16 sps:$4 sm:$0xff]  }
 0x1da   :  { %v2368_v2 = vsel %vm2301_vm5, %v5311_v45, %v2359_v41  ;;  %v6106_v51 = vld [vmem:[%s8101_s4 + $0x6c8] ss:$16 sps:$4 sm:$0xff]   ;;  %v6117_v41 = vld [vmem:[%s8101_s4 + $0x704] ss:$16 sps:$4 sm:$0xff]  }
 0x1db   :  { %4051 = vmatpush1.bf16.msra.mxu0 %v6055_v55  ;;  %v2369_v62 = vsel %vm2302_vm4, %v5312_v49, %v2360_v58  ;;  %v2371_v6 = vsel %vm2304_vm6, %v5314_v50, %v2362_v60  ;;  %v2378_v7 = vpack.c.bf16 %v2368_v2, %v2368_v2  ;;  %v6114_v55 = vld [vmem:[%s8101_s4 + $0x6ec] ss:$16 sps:$4 sm:$0xff]   ;;  %v4929_v56 = vld [vmem:[%s8103_s3 + $0x8] ss:$0 sm:$0xff] }
 0x1dc   :  { %4215 = vmatpush1.bf16.msra.mxu1 %v6058_v9  ;;  %4052 = vmatprep.subr.bf16.mxu0 %v6063_v57  ;;  %v2379_v63 = vpack.c.bf16 %v2369_v62, %v2369_v62  ;;  %v2381_v12 = vpack.c.bf16 %v2371_v6, %v2371_v6  ;;  %v6109_v9 = vld [vmem:[%s8101_s4 + $0x6e0] ss:$16 sps:$4 sm:$0xff]   ;;  %v6112_v57 = vld [vmem:[%s8101_s4 + $0x6e8] ss:$16 sps:$4 sm:$0xff]  }
 0x1dd   :  { %4216 = vmatprep.subr.bf16.mxu1 %v6066_v59  ;;  %v6120_v59 = vld [vmem:[%s8101_s4 + $0x70c] ss:$16 sps:$4 sm:$0xff]   ;;  %v6118_v62 = vld [vmem:[%s8101_s4 + $0x708] ss:$16 sps:$4 sm:$0xff]   ;;  %v6127_v6 = vld [vmem:[%s8101_s4 + $0x740] ss:$16 sps:$4 sm:$0xff]  }
 0x1de   :  { %4054 = vmatprep.mubr.bf16.mxu0 %v2379_v63  ;;  %4218 = vmatprep.mubr.bf16.mxu1 %v2379_v63  ;;  %v6123_v63 = vld [vmem:[%s8101_s4 + $0x724] ss:$16 sps:$4 sm:$0xff]   ;;  %v6124_v2 = vld [vmem:[%s8101_s4 + $0x728] ss:$16 sps:$4 sm:$0xff]  }
 0x1df   :  { %4053 = vmatpush1.bf16.msra.mxu0 %v6061_v61  ;;  %v6115_v61 = vld [vmem:[%s8101_s4 + $0x700] ss:$16 sps:$4 sm:$0xff]  }
 0x1e0   :  { %4217 = vmatpush1.bf16.msra.mxu1 %v6064_v0  ;;  %4063 = vmatprep.subr.bf16.mxu0 %v6069_v1  ;;  %v6126_v0 = vld [vmem:[%s8101_s4 + $0x72c] ss:$16 sps:$4 sm:$0xff]   ;;  %v6121_v1 = vld [vmem:[%s8101_s4 + $0x720] ss:$16 sps:$4 sm:$0xff]  }
 0x1e1   :  { %4227 = vmatprep.subr.bf16.mxu1 %v6072_v3  ;;  %v6129_v3 = vld [vmem:[%s8101_s4 + $0x744] ss:$16 sps:$4 sm:$0xff]  }
 0x1e2   :  { %4055 = vmatmul.mubr.bf16.vlgmr.msra.gmra.mrb[12].mxu0 %v2378_v7 }
 0x1e3   :  { %4219 = vmatmul.mubr.bf16.vlgmr.msra.gmra.mrb[12].mxu1 %v2378_v7  ;;  %4064 = vmatpush1.bf16.msra.mxu0 %v6067_v4  ;;  %v6132_v4 = vld [vmem:[%s8101_s4 + $0x74c] ss:$16 sps:$4 sm:$0xff]   ;;  %v6130_v7 = vld [vmem:[%s8101_s4 + $0x748] ss:$16 sps:$4 sm:$0xff]  }
 0x1e4   :  { %4095 = vmatprep.mubr.bf16.mxu0 %v2381_v12  ;;  %4228 = vmatpush1.bf16.msra.mxu1 %v6070_v10  ;;  %v6135_v10 = vld [vmem:[%s8101_s4 + $0x764] ss:$16 sps:$4 sm:$0xff]  }
 0x1e5   :  { %4259 = vmatprep.mubr.bf16.mxu1 %v2381_v12  ;;  %4065 = vmatprep.subr.bf16.mxu0 %v6075_v11  ;;  %v6138_v11 = vld [vmem:[%s8101_s4 + $0x76c] ss:$16 sps:$4 sm:$0xff]   ;;  %v6133_v12 = vld [vmem:[%s8101_s4 + $0x760] ss:$16 sps:$4 sm:$0xff]  }
 0x1e6   :  { %4229 = vmatprep.subr.bf16.mxu1 %v6078_v13  ;;  %v6136_v13 = vld [vmem:[%s8101_s4 + $0x768] ss:$16 sps:$4 sm:$0xff]  }
 0x1e7   :  { %4066 = vmatpush1.bf16.msra.mxu0 %v6073_v14  ;;  %v6141_v14 = vld [vmem:[%s8101_s4 + $0x784] ss:$16 sps:$4 sm:$0xff]  }
 0x1e8   :  { %4230 = vmatpush1.bf16.msra.mxu1 %v6076_v15  ;;  %4067 = vmatprep.subr.bf16.mxu0 %v6081_v16  ;;  %v384_v15 = vsub.s32 6, %v7295_v32  ;;  %v6144_v16 = vld [vmem:[%s8101_s4 + $0x78c] ss:$16 sps:$4 sm:$0xff]   ;;  %v6147_v32 = vld [vmem:[%s8101_s4 + $0x7a4] ss:$16 sps:$4 sm:$0xff]  }
 0x1e9   :  { %4231 = vmatprep.subr.bf16.mxu1 %v6084_v17  ;;  %v6139_v17 = vld [vmem:[%s8101_s4 + $0x780] ss:$16 sps:$4 sm:$0xff]  }
 0x1eb   :  { %4068 = vmatpush1.bf16.msra.mxu0 %v6079_v18  ;;  %v6142_v18 = vld [vmem:[%s8101_s4 + $0x788] ss:$16 sps:$4 sm:$0xff]  }
 0x1ec   :  { %4232 = vmatpush1.bf16.msra.mxu1 %v6082_v19  ;;  %4069 = vmatprep.subr.bf16.mxu0 %v6087_v20  ;;  %v6195_v19 = vld [vmem:[%s8102_s2] sm:$0xff] }
 0x1ed   :  { %4233 = vmatprep.subr.bf16.mxu1 %v6090_v21  ;;  %v385_v20 = vrot.slane %v6195_v19, %v384_v15  ;;  %v6150_v21 = vld [vmem:[%s8101_s4 + $0x7ac] ss:$16 sps:$4 sm:$0xff]  }
 0x1ef   :  { %4070 = vmatpush1.bf16.msra.mxu0 %v6085_v22  ;;  %v6145_v22 = vld [vmem:[%s8101_s4 + $0x7a0] ss:$16 sps:$4 sm:$0xff]  }
 0x1f0   :  { %4234 = vmatpush1.bf16.msra.mxu1 %v6088_v23  ;;  %4071 = vmatprep.subr.bf16.mxu0 %v6093_v54  ;;  %v6148_v23 = vld [vmem:[%s8101_s4 + $0x7a8] ss:$16 sps:$4 sm:$0xff]   ;;  %v6153_v54 = vld [vmem:[%s8101_s4 + $0x7c4] ss:$16 sps:$4 sm:$0xff]  }
 0x1f1   :  { %4235 = vmatprep.subr.bf16.mxu1 %v6096_v24  ;;  %v5313_v24 = vadd.f32 %v7756_v43, %v385_v20  ;;  %v6154_v43 = vld [vmem:[%s8101_s4 + $0x7c8] ss:$16 sps:$4 sm:$0xff]  }
 0x1f3   :  { %4072 = vmatpush1.bf16.msra.mxu0 %v6091_v25  ;;  %v6196_v25 = vld [vmem:[%s8103_s3] sm:$0xff]  ;;  %vm2303_vm8 = vcmp.ge.f32.partialorder %v5313_v24, 0.0 }
 0x1f4   :  { %4236 = vmatpush1.bf16.msra.mxu1 %v6094_v26  ;;  %4073 = vmatprep.subr.bf16.mxu0 %v6099_v27  ;;  %v2337_v26 = vrot.slane %v6196_v25, %v384_v15  ;;  %v6156_v27 = vld [vmem:[%s8101_s4 + $0x7cc] ss:$16 sps:$4 sm:$0xff]  }
 0x1f5   :  { %v5235_v31 = vpop.f32.mrb[8].mxu0  ;;  %v5257_v33 = vpop.f32.mrb[8].mxu1  ;;  %4237 = vmatprep.subr.bf16.mxu1 %v6102_v28  ;;  %v6151_v28 = vld [vmem:[%s8101_s4 + $0x7c0] ss:$16 sps:$4 sm:$0xff]  }
 0x1f6   :  { %v5236_v36 = vpop.f32.mrb[9].mxu0  ;;  %v5258_v42 = vpop.f32.mrb[9].mxu1 }
 0x1f7   :  { %v5237_v37 = vadd.f32 %v5236_v36, %v5235_v31  ;;  %v5259_v44 = vadd.f32 %v5258_v42, %v5257_v33  ;;  %v5238_v45 = vpop.f32.mrb[10].mxu0  ;;  %v5260_v46 = vpop.f32.mrb[10].mxu1  ;;  %4074 = vmatpush1.bf16.msra.mxu0 %v6097_v48  ;;  %v6159_v48 = vld [vmem:[%s8101_s4 + $0x7e4] ss:$16 sps:$4 sm:$0xff]   ;;  %v6157_v31 = vld [vmem:[%s8101_s4 + $0x7e0] ss:$16 sps:$4 sm:$0xff]  }
 0x1f8   :  { %4238 = vmatpush1.bf16.msra.mxu1 %v6100_v30  ;;  %v5239_v49 = vpop.f32.mrb[11].mxu0  ;;  %v5261_v50 = vpop.f32.mrb[11].mxu1  ;;  %4075 = vmatprep.subr.bf16.mxu0 %v6105_v29  ;;  %v2361_v30 = vmul.f32 %v5313_v24, %v2337_v26  ;;  %v6162_v29 = vld [vmem:[%s8101_s4 + $0x7ec] ss:$16 sps:$4 sm:$0xff]   ;;  %v6160_v33 = vld [vmem:[%s8101_s4 + $0x7e8] ss:$16 sps:$4 sm:$0xff]  }
 0x1f9   :  { %v2252_v53 = vadd.f32 %v5237_v37, %v4636_v35  ;;  %4239 = vmatprep.subr.bf16.mxu1 %v6108_v34  ;;  %v6163_v34 = vld [vmem:[%s8104_s6 + $0x40] sm:$0xff]   ;;  %v6167_v45 = vld [vmem:[%s8104_s6 + $0x48] sm:$0xff]   ;;  %v6171_v50 = vld [vmem:[%s8104_s6 + $0x50] sm:$0xff]  }
 0x1fa   :  { %v2370_v35 = vsel %vm2303_vm8, %v5313_v24, %v2361_v30  ;;  %v6164_v36 = vld [vmem:[%s8104_s6 + $0xc0] sm:$0xff]   ;;  %v6168_v46 = vld [vmem:[%s8104_s6 + $0xc8] sm:$0xff]  }
 0x1fb   :  { %v2292_v5 = vadd.f32 %v5259_v44, %v2252_v53  ;;  %4076 = vmatpush1.bf16.msra.mxu0 %v6103_v47  ;;  %v6165_v42 = vld [vmem:[%s8104_s6] sm:$0xff]   ;;  %v2380_v37 = vpack.c.bf16 %v2370_v35, %v2370_v35  ;;  %v6169_v47 = vld [vmem:[%s8104_s6 + $0x8] sm:$0xff]   ;;  %v6174_v53 = vld [vmem:[%s8104_s6 + $0x90] sm:$0xff]  }
 0x1fc   :  { %4240 = vmatpush1.bf16.msra.mxu1 %v6106_v51  ;;  %4077 = vmatprep.subr.bf16.mxu0 %v6111_v52  ;;  %v6166_v44 = vld [vmem:[%s8104_s6 + $0x80] sm:$0xff]   ;;  %v6170_v49 = vld [vmem:[%s8104_s6 + $0x88] sm:$0xff]   ;;  %v6172_v51 = vld [vmem:[%s8104_s6 + $0xd0] sm:$0xff]  }
 0x1fd   :  { %vm2305_vm7 = vcmp.ge.f32.partialorder %v2292_v5, 0.0  ;;  %v2363_v58 = vmul.f32 %v4929_v56, %v2292_v5  ;;  %4241 = vmatprep.subr.bf16.mxu1 %v6114_v55  ;;  %v6173_v52 = vld [vmem:[%s8104_s6 + $0x10] sm:$0xff]   ;;  %v6175_v55 = vld [vmem:[%s8104_s6 + $0x58] sm:$0xff]   ;;  %v5186_v35 = vld [vmem:[%s8107_s7] ss:$0 sm:$0xff] }
 0x1fe   :  { %v6176_v56 = vld [vmem:[%s8104_s6 + $0xd8] sm:$0xff]  }
 0x1ff   :  { %v2372_v60 = vsel %vm2305_vm7, %v2292_v5, %v2363_v58  ;;  %4078 = vmatpush1.bf16.msra.mxu0 %v6109_v9  ;;  %v6177_v5 = vld [vmem:[%s8104_s6 + $0x18] sm:$0xff]   ;;  %v6181_v58 = vld [vmem:[%s8104_s6 + $0x20] sm:$0xff]  }
 0x200   :  { %2373 = vst [vmem:[%s8105_s8] sm:$0xff] %v2372_v60  ;;  %4242 = vmatpush1.bf16.msra.mxu1 %v6112_v57  ;;  %4079 = vmatprep.subr.bf16.mxu0 %v6117_v41  ;;  %v6178_v9 = vld [vmem:[%s8104_s6 + $0x98] sm:$0xff]   ;;  %v6179_v57 = vld [vmem:[%s8104_s6 + $0x60] sm:$0xff]   ;;  %v6183_v60 = vld [vmem:[%s8104_s6 + $0x68] sm:$0xff]  }
 0x201   :  { %4243 = vmatprep.subr.bf16.mxu1 %v6120_v59  ;;  %v6180_v41 = vld [vmem:[%s8104_s6 + $0xe0] sm:$0xff]  }
 0x202   :  { %v6182_v59 = vld [vmem:[%s8104_s6 + $0xa0] sm:$0xff]  }
 0x203   :  { %4080 = vmatpush1.bf16.msra.mxu0 %v6115_v61  ;;  %v6184_v61 = vld [vmem:[%s8104_s6 + $0xe8] sm:$0xff]  }
 0x204   :  { %4244 = vmatpush1.bf16.msra.mxu1 %v6118_v62  ;;  %4081 = vmatprep.subr.bf16.mxu0 %v6123_v63  ;;  %v6185_v62 = vld [vmem:[%s8104_s6 + $0x28] sm:$0xff]  }
 0x205   :  { %4245 = vmatprep.subr.bf16.mxu1 %v6126_v0  ;;  %v6186_v63 = vld [vmem:[%s8104_s6 + $0xa8] sm:$0xff]   ;;  %v6187_v0 = vld [vmem:[%s8104_s6 + $0x70] sm:$0xff]  }
 0x207   :  { %4082 = vmatpush1.bf16.msra.mxu0 %v6121_v1  ;;  %v6188_v1 = vld [vmem:[%s8104_s6 + $0xf0] sm:$0xff]  }
 0x208   :  { %4246 = vmatpush1.bf16.msra.mxu1 %v6124_v2  ;;  %4083 = vmatprep.subr.bf16.mxu0 %v6129_v3  ;;  %v6189_v2 = vld [vmem:[%s8104_s6 + $0x30] sm:$0xff]  }
 0x209   :  { %4247 = vmatprep.subr.bf16.mxu1 %v6132_v4  ;;  %v6190_v3 = vld [vmem:[%s8104_s6 + $0xb0] sm:$0xff]   ;;  %v6191_v4 = vld [vmem:[%s8104_s6 + $0x78] sm:$0xff]  }
 0x20b   :  { %4084 = vmatpush1.bf16.msra.mxu0 %v6127_v6  ;;  %v6192_v6 = vld [vmem:[%s8104_s6 + $0xf8] sm:$0xff]  }
 0x20c   :  { %4248 = vmatpush1.bf16.msra.mxu1 %v6130_v7  ;;  %4085 = vmatprep.subr.bf16.mxu0 %v6135_v10  ;;  %v6193_v7 = vld [vmem:[%s8104_s6 + $0x38] sm:$0xff]  }
 0x20d   :  { %4249 = vmatprep.subr.bf16.mxu1 %v6138_v11  ;;  %v6194_v10 = vld [vmem:[%s8104_s6 + $0xb8] sm:$0xff]   ;;  %v2638_v11 = vld [vmem:[%s8106_s5] sm:$0xf] }
 0x20e   :  { %v2655_v15 = vrot.slane %v2638_v11, %v7321_v40 }
 0x20f   :  { %4086 = vmatpush1.bf16.msra.mxu0 %v6133_v12  ;;  %v2643_v12 = vrot.slane %v2638_v11, %v7315_v38 }
 0x210   :  { %4250 = vmatpush1.bf16.msra.mxu1 %v6136_v13  ;;  %4087 = vmatprep.subr.bf16.mxu0 %v6141_v14  ;;  %v2651_v13 = vrot.slane %v2638_v11, %v7526_v8  ;;  %v2647_v14 = vrot.slane %v2638_v11, %v7318_v39 }
 0x211   :  { %4251 = vmatprep.subr.bf16.mxu1 %v6144_v16 }
 0x213   :  { %4088 = vmatpush1.bf16.msra.mxu0 %v6139_v17 }
 0x214   :  { %4252 = vmatpush1.bf16.msra.mxu1 %v6142_v18  ;;  %4089 = vmatprep.subr.bf16.mxu0 %v6147_v32 }
 0x215   :  { %4253 = vmatprep.subr.bf16.mxu1 %v6150_v21 }
 0x217   :  { %4090 = vmatpush1.bf16.msra.mxu0 %v6145_v22 }
 0x218   :  { %4254 = vmatpush1.bf16.msra.mxu1 %v6148_v23  ;;  %4091 = vmatprep.subr.bf16.mxu0 %v6153_v54 }
 0x219   :  { %4255 = vmatprep.subr.bf16.mxu1 %v6156_v27 }
 0x21b   :  { %4092 = vmatpush1.bf16.msra.mxu0 %v6151_v28 }
 0x21c   :  { %4256 = vmatpush1.bf16.msra.mxu1 %v6154_v43  ;;  %4093 = vmatprep.subr.bf16.mxu0 %v6159_v48 }
 0x21d   :  { %4257 = vmatprep.subr.bf16.mxu1 %v6162_v29 }
 0x21f   :  { %4094 = vmatpush1.bf16.msra.mxu0 %v6157_v31 }
 0x220   :  { %4258 = vmatpush1.bf16.msra.mxu1 %v6160_v33  ;;  %5263 = vmatprep.subr.bf16.mxu0 %v6163_v34 }
 0x221   :  { %5285 = vmatprep.subr.bf16.mxu1 %v6164_v36 }
 0x222   :  { %4096 = vmatmul.mubr.bf16.vlgmr.msra.gmra.mrb[12].mxu0 %v2380_v37 }
 0x223   :  { %4260 = vmatmul.mubr.bf16.vlgmr.msra.gmra.mrb[12].mxu1 %v2380_v37  ;;  %5264 = vmatpush3.bf16.msra.mxu0 %v6165_v42 }
 0x224   :  { %5286 = vmatpush3.bf16.msra.mxu1 %v6166_v44  ;;  %5265 = vmatprep.subr.bf16.mxu0 %v6167_v45 }
 0x225   :  { %5287 = vmatprep.subr.bf16.mxu1 %v6168_v46 }
 0x227   :  { %5266 = vmatpush3.bf16.msra.mxu0 %v6169_v47 }
 0x228   :  { %5288 = vmatpush3.bf16.msra.mxu1 %v6170_v49  ;;  %5267 = vmatprep.subr.bf16.mxu0 %v6171_v50 }
 0x229   :  { %5289 = vmatprep.subr.bf16.mxu1 %v6172_v51 }
 0x22b   :  { %5268 = vmatpush3.bf16.msra.mxu0 %v6173_v52 }
 0x22c   :  { %5290 = vmatpush3.bf16.msra.mxu1 %v6174_v53  ;;  %5269 = vmatprep.subr.bf16.mxu0 %v6175_v55 }
 0x22d   :  { %5291 = vmatprep.subr.bf16.mxu1 %v6176_v56 }
 0x22f   :  { %5270 = vmatpush3.bf16.msra.mxu0 %v6177_v5 }
 0x230   :  { %5292 = vmatpush3.bf16.msra.mxu1 %v6178_v9  ;;  %5271 = vmatprep.subr.bf16.mxu0 %v6179_v57 }
 0x231   :  { %5293 = vmatprep.subr.bf16.mxu1 %v6180_v41 }
 0x233   :  { %5272 = vmatpush3.bf16.msra.mxu0 %v6181_v58 }
 0x234   :  { %5294 = vmatpush3.bf16.msra.mxu1 %v6182_v59  ;;  %5273 = vmatprep.subr.bf16.mxu0 %v6183_v60 }
 0x235   :  { %5295 = vmatprep.subr.bf16.mxu1 %v6184_v61 }
 0x237   :  { %5274 = vmatpush3.bf16.msra.mxu0 %v6185_v62 }
 0x238   :  { %5296 = vmatpush3.bf16.msra.mxu1 %v6186_v63  ;;  %5275 = vmatprep.subr.bf16.mxu0 %v6187_v0 }
 0x239   :  { %5297 = vmatprep.subr.bf16.mxu1 %v6188_v1 }
 0x23b   :  { %5276 = vmatpush3.bf16.msra.mxu0 %v6189_v2 }
 0x23c   :  { %5298 = vmatpush3.bf16.msra.mxu1 %v6190_v3  ;;  %5277 = vmatprep.subr.bf16.mxu0 %v6191_v4 }
 0x23d   :  { %5299 = vmatprep.subr.bf16.mxu1 %v6192_v6 }
 0x23f   :  { %5278 = vmatpush3.bf16.msra.mxu0 %v6193_v7 }
 0x240   :  { %5300 = vmatpush3.bf16.msra.mxu1 %v6194_v10 }
 0x2f5   :  { %v4097_v16 = vpop.f32.mrb[12].mxu0 }
 0x2f6   :  { %v5315_v17 = vadd.f32 %v4097_v16, %v2643_v12  ;;  %v4261_v18 = vpop.f32.mrb[12].mxu1  ;;  %v4099_v32 = vpop.f32.mrb[13].mxu0 }
 0x2f7   :  { %v5317_v19 = vadd.f32 %v4261_v18, %v2651_v13  ;;  %v5316_v20 = vadd.f32 %v4099_v32, %v2647_v14  ;;  %v4263_v21 = vpop.f32.mrb[13].mxu1  ;;  %v4101_v22 = vpop.f32.mrb[14].mxu0 }
 0x2f8   :  { %vm4268_vm9 = vcmp.ge.f32.partialorder %v5315_v17, 0.0  ;;  %v4272_v23 = vmul.f32 0.2, %v5315_v17  ;;  %v5318_v54 = vadd.f32 %v4263_v21, %v2655_v15  ;;  %v4265_v24 = vpop.f32.mrb[14].mxu1  ;;  %v4102_v25 = vpop.f32.mrb[15].mxu0 }
 0x2f9   :  { %vm4270_vm10 = vcmp.ge.f32.partialorder %v5317_v19, 0.0  ;;  %v4274_v38 = vmul.f32 0.2, %v5317_v19  ;;  %vm4269_vm11 = vcmp.ge.f32.partialorder %v5316_v20, 0.0  ;;  %v4273_v8 = vmul.f32 0.2, %v5316_v20 }
 0x2fa   :  { %v4276_v39 = vsel %vm4268_vm9, %v5315_v17, %v4272_v23  ;;  %vm4271_vm12 = vcmp.ge.f32.partialorder %v5318_v54, 0.0  ;;  %v4275_v40 = vmul.f32 0.2, %v5318_v54  ;;  %v4266_v26 = vpop.f32.mrb[15].mxu1 }
 0x2fb   :  { %v4278_v27 = vsel %vm4270_vm10, %v5317_v19, %v4274_v38  ;;  %v4277_v28 = vsel %vm4269_vm11, %v5316_v20, %v4273_v8  ;;  %v4280_v30 = vpack.c.bf16 %v4276_v39, %v4276_v39 }
 0x2fc   :  { %v4281_v43 = vpack.c.bf16 %v4277_v28, %v4277_v28  ;;  %v4279_v48 = vsel %vm4271_vm12, %v5318_v54, %v4275_v40  ;;  %v4282_v31 = vpack.c.bf16 %v4278_v27, %v4278_v27 }
 0x2fd   :  { %v4283_v29 = vpack.c.bf16 %v4279_v48, %v4279_v48 }
 0x2fe   :  { %4579 = vmatprep.mubr.bf16.mxu0 %v4281_v43 }
 0x2ff   :  { %4619 = vmatprep.mubr.bf16.mxu1 %v4283_v29  ;;  %4580 = vmatmul.mubr.bf16.vlgmr.msra.gmra.mrb[16].mxu0 %v4280_v30 }
 0x300   :  { %4620 = vmatmul.mubr.bf16.vlgmr.msra.gmra.mrb[16].mxu1 %v4282_v31 }
 0x3d2   :  { %v5279_v33 = vpop.f32.mrb[16].mxu0 }
 0x3d3   :  { %v5301_v34 = vpop.f32.mrb[16].mxu1  ;;  %v5280_v36 = vpop.f32.mrb[17].mxu0 }
 0x3d4   :  { %v5281_v42 = vadd.f32 %v5280_v36, %v5279_v33  ;;  %v5302_v37 = vpop.f32.mrb[17].mxu1  ;;  %v5282_v44 = vpop.f32.mrb[18].mxu0 }
 0x3d5   :  { %v5303_v45 = vadd.f32 %v5302_v37, %v5301_v34  ;;  %v5304_v46 = vpop.f32.mrb[18].mxu1  ;;  %v5283_v47 = vpop.f32.mrb[19].mxu0 }
 0x3d6   :  { %v4582_v49 = vadd.f32 %v5281_v42, %v5186_v35  ;;  %v5305_v50 = vpop.f32.mrb[19].mxu1 }
 0x3d8   :  { %v4622_v51 = vadd.f32 %v5303_v45, %v4582_v49 }
 0x3da   :  { %4627 = vst [vmem:[%s8108_s9] sm:$0xff] %v4622_v51 }

</bundles_post_ra>
